<compile_context>
chip_gen: v5e
topology: v5e:2x2
jax: 0.10.0
libtpu: 0.0.40
codegen_flags: <defaults>
</compile_context>

<pallas_src>
import functools

import jax
import jax.numpy as jnp
from jax.experimental import pallas as pl
from jax.experimental.pallas import tpu as pltpu


def _round_up(x, m):
    return (x + m - 1) // m * m


# ----------------------------------------------------------------------------
# Fused Pallas kernel
# ----------------------------------------------------------------------------
def _center_block_kernel(x_ref, mask_ref, w1_ref, wr_ref, shift_ref,
                         o_ref, pad_ref, patch_ref, *,
                         dilations, H, W, P, S0, cin, cout):
    """Fused 6x (dilated 3x3 conv + folded BN + ReLU) + sum, one batch image.

    x_ref    : (1, cin, H*Wp)  input rows in strided-flat form (W real cols,
                               then Wp-W zeros), f32
    mask_ref : (1, H*Wp)       1.0 on real columns, 0.0 on stride padding
    w1_ref   : (cout, 9*cin)   stage-1 im2col weights, BN scale folded, bf16
    wr_ref   : (5, cout, 9*cout) stage-2..6 im2col weights (bf16)
    shift_ref: (6, cout, 1)    folded conv-bias + BN shift (f32)
    o_ref    : (1, cout, H*Wp) sum of the six branch activations (f32)
    pad_ref  : VMEM bf16 (max_c, flat)  zero-haloed flat scratch
    patch_ref: VMEM bf16 (>=9*max_c, H*Wp) im2col staging scratch
    """
    Wp = W + 2 * P
    HWp = H * Wp
    n_stages = len(dilations)

    # One-time zero: the halo (everything outside [S0, S0+HWp)) is never
    # written afterwards, and the interior is fully overwritten by every
    # stage before it is read.  Scratch persists across grid steps; the grid
    # axis is "arbitrary" (sequential), so program_id==0 runs first.
    @pl.when(pl.program_id(0) == 0)
    def _():
        pad_ref[...] = jnp.zeros_like(pad_ref)

    # Hoist the stride-padding mask broadcast out of the (unrolled) loop.
    mask = jnp.broadcast_to(mask_ref[...], (cout, HWp))

    act = x_ref[0].astype(jnp.bfloat16)        # (cin, HWp); stride cols are 0
    c = cin
    total = None
    for s, d in enumerate(dilations):
        # Place the (zero stride-padded) activation in the interior of the
        # flat zero-haloed scratch.  S0 and HWp are multiples of 128.
        pad_ref[0:c, S0:S0 + HWp] = act

        # im2col into the persistent bf16 patches scratch: each 3x3 tap of a
        # dilated conv is a single contiguous flat slice (row stride Wp).
        t = 0
        for ky in (-1, 0, 1):
            for kx in (-1, 0, 1):
                start = S0 + ky * d * Wp + kx * d
                patch_ref[t * c:(t + 1) * c, :] = pad_ref[0:c, start:start + HWp]
                t += 1

        w = w1_ref[...] if s == 0 else wr_ref[s - 1]        # (cout, 9*c)
        conv = jnp.dot(w, patch_ref[0:9 * c, :],
                       preferred_element_type=jnp.float32)  # (cout, HWp) f32
        y = jnp.maximum(conv + shift_ref[s], 0.0)           # folded BN + ReLU
        total = y if total is None else total + y

        if s + 1 < n_stages:
            # Zero the stride-padding columns so they act as left/right zero
            # padding for the next stage.  The last stage's stride columns
            # are garbage but are sliced off by the wrapper.
            act = (y * mask).astype(jnp.bfloat16)
            c = cout

    o_ref[0] = total


# ----------------------------------------------------------------------------
# Wrapper
# ----------------------------------------------------------------------------
def center_block_forward(x_nchw, params):
    """x_nchw: (N, Cin, H, W) float32 — matches the PyTorch call convention."""
    N, cin, H, W = x_nchw.shape
    cout = params[0]["w"].shape[-1]
    dilations = tuple(int(p["dilation"]) for p in params)
    n_stages = len(params)
    P = max(dilations)
    Wp = W + 2 * P
    HWp = H * Wp
    cin_p = _round_up(cin, 8)                    # sublane-align stage-1 channels
    max_c = max(cin_p, cout)
    S0 = _round_up(P * Wp + P, 128)              # lane-aligned interior start
    flat = _round_up(S0 + HWp + P * Wp + P, 128)  # flat padded-buffer length
    k_rows = _round_up(9 * max_c, 16)            # bf16 sublane-packed rows

    # One small pad/reshape replaces six per-stage padded HBM copies:
    # channel-pad to cin_p, stride-pad each row from W to Wp, flatten rows.
    x = jnp.pad(x_nchw, ((0, 0), (0, cin_p - cin), (0, 0), (0, Wp - W)))
    x_flat = x.reshape(N, cin_p, HWp)

    # 1.0 on real columns of each strided-flat row, 0.0 on the stride padding.
    col = jnp.arange(HWp, dtype=jnp.int32) % Wp
    mask = (col < W).astype(jnp.float32).reshape(1, HWp)

    def im2col_weights(w, scale, c_pad):
        # Fold inference-BN scale into the weights (exact), pad input
        # channels, lay out as (cout, 9*c_pad) with K index = tap*c_pad + ci.
        c = w.shape[2]
        w = w * scale.reshape(1, 1, 1, -1)
        w = jnp.pad(w, ((0, 0), (0, 0), (0, c_pad - c), (0, 0)))
        return w.reshape(9 * c_pad, -1).T.astype(jnp.bfloat16)

    w1 = im2col_weights(params[0]["w"], params[0]["scale"], cin_p)
    w_rest = jnp.stack(
        [im2col_weights(p["w"], p["scale"], cout) for p in params[1:]])
    shift_all = jnp.stack([p["shift"] for p in params]).reshape(n_stages, cout, 1)

    kernel = functools.partial(
        _center_block_kernel,
        dilations=dilations, H=H, W=W, P=P, S0=S0, cin=cin_p, cout=cout)

    # Explicit VMEM budget: scratch + double-buffered blocks, with headroom.
    bytes_est = (
        max_c * flat * 2                    # pad scratch (bf16)
        + k_rows * HWp * 2                  # im2col patches scratch (bf16)
        + 2 * cin_p * HWp * 4               # input block (double buffered)
        + 2 * cout * HWp * 4                # output block (double buffered)
        + 2 * HWp * 4                       # mask
        + 2 * (w1.size + w_rest.size) * 2   # bf16 weights
        + 2 * shift_all.size * 4)
    vmem_limit = int(min(64 << 20, max(16 << 20, 2 * bytes_est + (2 << 20))))

    out_flat = pl.pallas_call(
        kernel,
        out_shape=jax.ShapeDtypeStruct((N, cout, HWp), jnp.float32),
        grid=(N,),
        in_specs=[
            pl.BlockSpec((1, cin_p, HWp), lambda n: (n, 0, 0)),
            pl.BlockSpec((1, HWp), lambda n: (0, 0)),
            pl.BlockSpec((cout, 9 * cin_p), lambda n: (0, 0)),
            pl.BlockSpec((n_stages - 1, cout, 9 * cout), lambda n: (0, 0, 0)),
            pl.BlockSpec((n_stages, cout, 1), lambda n: (0, 0, 0)),
        ],
        out_specs=pl.BlockSpec((1, cout, HWp), lambda n: (n, 0, 0)),
        scratch_shapes=[
            pltpu.VMEM((max_c, flat), jnp.bfloat16),    # zero-haloed flat pad
            pltpu.VMEM((k_rows, HWp), jnp.bfloat16),    # im2col patches
        ],
        # "arbitrary": sequential grid, required for the once-only scratch
        # zeroing (a "parallel" axis sharded across v7x's 2 TCs would skip
        # program_id==0 on the second core).
        compiler_params=pltpu.CompilerParams(
            dimension_semantics=("arbitrary",),
            vmem_limit_bytes=vmem_limit),
    )(x_flat, mask, w1, w_rest, shift_all)

    # Strided-flat (N, cout, H*Wp) -> dense NCHW (N, cout, H, W).
    return out_flat.reshape(N, cout, H, Wp)[:, :, :, :W]


# ----------------------------------------------------------------------------
# Parameters (deterministic synthetic, conv-bias + BN folded to scale/shift)
# ----------------------------------------------------------------------------
def make_params(key, in_channels, out_channels):
    dilations = (1, 2, 4, 8, 16, 32)
    params = []
    cin = in_channels
    for i, d in enumerate(dilations):
        k = jax.random.fold_in(key, i)
        kw, kb, kg, kbeta, km, kv = jax.random.split(k, 6)
        w = 0.1 * jax.random.normal(kw, (3, 3, cin, out_channels), jnp.float32)
        conv_b = 0.05 * jax.random.normal(kb, (out_channels,), jnp.float32)
        gamma = 1.0 + 0.1 * jax.random.normal(kg, (out_channels,), jnp.float32)
        beta = 0.05 * jax.random.normal(kbeta, (out_channels,), jnp.float32)
        r_mean = 0.05 * jax.random.normal(km, (out_channels,), jnp.float32)
        r_var = 1.0 + 0.1 * jax.random.uniform(kv, (out_channels,), jnp.float32)
        eps = 1e-5
        bn_scale = gamma / jnp.sqrt(r_var + eps)
        scale = bn_scale
        shift = (conv_b - r_mean) * bn_scale + beta
        params.append(dict(w=w, scale=scale, shift=shift, dilation=d))
        cin = out_channels
    return params


# ----------------------------------------------------------------------------
# Pure-JAX reference (lax conv) for validation
# ----------------------------------------------------------------------------
def center_block_reference(x_nchw, params):
    x = jnp.transpose(x_nchw, (0, 2, 3, 1))
    outs = []
    cur = x
    for p in params:
        d = p["dilation"]
        conv = jax.lax.conv_general_dilated(
            cur, p["w"],
            window_strides=(1, 1),
            padding=((d, d), (d, d)),
            rhs_dilation=(d, d),
            dimension_numbers=("NHWC", "HWIO", "NHWC"),
        )
        cur = jnp.maximum(conv * p["scale"] + p["shift"], 0.0)
        outs.append(cur)
    y = outs[0] + outs[1] + outs[2] + outs[3] + outs[4] + outs[5]
    return jnp.transpose(y, (0, 3, 1, 2))


if __name__ == "__main__":
    key = jax.random.PRNGKey(0)
    kx, kp = jax.random.split(key)

    N, Cin, Cout, H, W = 2, 4, 8, 16, 16
    x = jax.random.normal(kx, (N, Cin, H, W), jnp.float32)
    params = make_params(kp, Cin, Cout)

    out = jax.block_until_ready(center_block_forward(x, params))
    ref = jax.block_until_ready(center_block_reference(x, params))

    assert out.shape == (N, Cout, H, W), out.shape
    assert bool(jnp.all(jnp.isfinite(out)))
    assert bool(jnp.allclose(out, ref, rtol=5e-2, atol=5e-2)), (
        float(jnp.max(jnp.abs(out - ref))))

    print("KERNEL_OK")
</pallas_src>

<mosaic_0001>
module attributes {stable_mosaic.version = 11 : i64} {
  func.func @_center_block_kernel(%arg0: i32, %arg1: memref<1x8x1280xf32, #tpu.memory_space<vmem>>, %arg2: memref<1x1280xf32, #tpu.memory_space<vmem>>, %arg3: memref<8x72xbf16, #tpu.memory_space<vmem>>, %arg4: memref<5x8x72xbf16, #tpu.memory_space<vmem>>, %arg5: memref<6x8x1xf32, #tpu.memory_space<vmem>>, %arg6: memref<1x8x1280xf32, #tpu.memory_space<vmem>>, %arg7: memref<8x6656xbf16, #tpu.memory_space<vmem>>, %arg8: memref<80x1280xbf16, #tpu.memory_space<vmem>>) attributes {dimension_semantics = [#tpu.dimension_semantics<arbitrary>], iteration_bounds = array<i64: 2>, scalar_prefetch = 0 : i64, scratch_operands = 2 : i64, tpu.core_type = #tpu.core_type<tc>, window_params = [{transform_indices = @transform_0, window_bounds = array<i64: 1, 8, 1280>}, {pipeline_mode = #tpu.pipeline_mode<synchronous>, transform_indices = @transform_1, window_bounds = array<i64: 1, 1280>}, {pipeline_mode = #tpu.pipeline_mode<synchronous>, transform_indices = @transform_2, window_bounds = array<i64: 8, 72>}, {pipeline_mode = #tpu.pipeline_mode<synchronous>, transform_indices = @transform_3, window_bounds = array<i64: 5, 8, 72>}, {pipeline_mode = #tpu.pipeline_mode<synchronous>, transform_indices = @transform_4, window_bounds = array<i64: 6, 8, 1>}, {transform_indices = @transform_5, window_bounds = array<i64: 1, 8, 1280>}]} {
    %c0_i32 = arith.constant 0 : i32
    %0 = arith.cmpi eq, %arg0, %c0_i32 : i32
    %1 = arith.extui %0 : i1 to i32
    %c0_i32_0 = arith.constant 0 : i32
    %2 = arith.cmpi ne, %1, %c0_i32_0 : i32
    scf.if %2 {
      %cst_232 = arith.constant 0.000000e+00 : bf16
      %200 = vector.broadcast %cst_232 : bf16 to vector<8x6656xbf16>
      %c0_233 = arith.constant 0 : index
      %c0_234 = arith.constant 0 : index
      %201 = vector.load %arg7[%c0_233, %c0_234] : memref<8x6656xbf16, #tpu.memory_space<vmem>>, vector<8x6656xbf16>
      tpu.vector_store %arg7[%c0_233, %c0_234], %200 {strides = array<i32>} : memref<8x6656xbf16, #tpu.memory_space<vmem>>, vector<8x6656xbf16>,
    } else {
    }
    %c0 = arith.constant 0 : index
    %c0_1 = arith.constant 0 : index
    %3 = vector.load %arg2[%c0, %c0_1] : memref<1x1280xf32, #tpu.memory_space<vmem>>, vector<1x1280xf32>
    %4 = vector.shape_cast %3 : vector<1x1280xf32> to vector<1x1280xf32>
    %5 = vector.broadcast %4 : vector<1x1280xf32> to vector<8x1280xf32>
    %c0_2 = arith.constant 0 : index
    %c0_3 = arith.constant 0 : index
    %c0_4 = arith.constant 0 : index
    %6 = vector.load %arg1[%c0_2, %c0_3, %c0_4] : memref<1x8x1280xf32, #tpu.memory_space<vmem>>, vector<1x8x1280xf32>
    %7 = vector.shape_cast %6 : vector<1x8x1280xf32> to vector<8x1280xf32>
    %8 = arith.truncf %7 : vector<8x1280xf32> to vector<8x1280xbf16>
    %c0_5 = arith.constant 0 : index
    %c2688 = arith.constant 2688 : index
    %9 = vector.load %arg7[%c0_5, %c2688] : memref<8x6656xbf16, #tpu.memory_space<vmem>>, vector<8x1280xbf16>
    tpu.vector_store %arg7[%c0_5, %c2688], %8 {strides = array<i32>} : memref<8x6656xbf16, #tpu.memory_space<vmem>>, vector<8x1280xbf16>,
    %c0_6 = arith.constant 0 : index
    %c2607 = arith.constant 2607 : index
    %10 = vector.load %arg7[%c0_6, %c2607] : memref<8x6656xbf16, #tpu.memory_space<vmem>>, vector<8x1280xbf16>
    %c0_7 = arith.constant 0 : index
    %c0_8 = arith.constant 0 : index
    %11 = vector.load %arg8[%c0_7, %c0_8] : memref<80x1280xbf16, #tpu.memory_space<vmem>>, vector<8x1280xbf16>
    tpu.vector_store %arg8[%c0_7, %c0_8], %10 {strides = array<i32>} : memref<80x1280xbf16, #tpu.memory_space<vmem>>, vector<8x1280xbf16>,
    %c0_9 = arith.constant 0 : index
    %c2608 = arith.constant 2608 : index
    %12 = vector.load %arg7[%c0_9, %c2608] : memref<8x6656xbf16, #tpu.memory_space<vmem>>, vector<8x1280xbf16>
    %c8 = arith.constant 8 : index
    %c0_10 = arith.constant 0 : index
    %13 = vector.load %arg8[%c8, %c0_10] : memref<80x1280xbf16, #tpu.memory_space<vmem>>, vector<8x1280xbf16>
    tpu.vector_store %arg8[%c8, %c0_10], %12 {strides = array<i32>} : memref<80x1280xbf16, #tpu.memory_space<vmem>>, vector<8x1280xbf16>,
    %c0_11 = arith.constant 0 : index
    %c2609 = arith.constant 2609 : index
    %14 = vector.load %arg7[%c0_11, %c2609] : memref<8x6656xbf16, #tpu.memory_space<vmem>>, vector<8x1280xbf16>
    %c16 = arith.constant 16 : index
    %c0_12 = arith.constant 0 : index
    %15 = vector.load %arg8[%c16, %c0_12] : memref<80x1280xbf16, #tpu.memory_space<vmem>>, vector<8x1280xbf16>
    tpu.vector_store %arg8[%c16, %c0_12], %14 {strides = array<i32>} : memref<80x1280xbf16, #tpu.memory_space<vmem>>, vector<8x1280xbf16>,
    %c0_13 = arith.constant 0 : index
    %c2687 = arith.constant 2687 : index
    %16 = vector.load %arg7[%c0_13, %c2687] : memref<8x6656xbf16, #tpu.memory_space<vmem>>, vector<8x1280xbf16>
    %c24 = arith.constant 24 : index
    %c0_14 = arith.constant 0 : index
    %17 = vector.load %arg8[%c24, %c0_14] : memref<80x1280xbf16, #tpu.memory_space<vmem>>, vector<8x1280xbf16>
    tpu.vector_store %arg8[%c24, %c0_14], %16 {strides = array<i32>} : memref<80x1280xbf16, #tpu.memory_space<vmem>>, vector<8x1280xbf16>,
    %c0_15 = arith.constant 0 : index
    %c2688_16 = arith.constant 2688 : index
    %18 = vector.load %arg7[%c0_15, %c2688_16] : memref<8x6656xbf16, #tpu.memory_space<vmem>>, vector<8x1280xbf16>
    %c32 = arith.constant 32 : index
    %c0_17 = arith.constant 0 : index
    %19 = vector.load %arg8[%c32, %c0_17] : memref<80x1280xbf16, #tpu.memory_space<vmem>>, vector<8x1280xbf16>
    tpu.vector_store %arg8[%c32, %c0_17], %18 {strides = array<i32>} : memref<80x1280xbf16, #tpu.memory_space<vmem>>, vector<8x1280xbf16>,
    %c0_18 = arith.constant 0 : index
    %c2689 = arith.constant 2689 : index
    %20 = vector.load %arg7[%c0_18, %c2689] : memref<8x6656xbf16, #tpu.memory_space<vmem>>, vector<8x1280xbf16>
    %c40 = arith.constant 40 : index
    %c0_19 = arith.constant 0 : index
    %21 = vector.load %arg8[%c40, %c0_19] : memref<80x1280xbf16, #tpu.memory_space<vmem>>, vector<8x1280xbf16>
    tpu.vector_store %arg8[%c40, %c0_19], %20 {strides = array<i32>} : memref<80x1280xbf16, #tpu.memory_space<vmem>>, vector<8x1280xbf16>,
    %c0_20 = arith.constant 0 : index
    %c2767 = arith.constant 2767 : index
    %22 = vector.load %arg7[%c0_20, %c2767] : memref<8x6656xbf16, #tpu.memory_space<vmem>>, vector<8x1280xbf16>
    %c48 = arith.constant 48 : index
    %c0_21 = arith.constant 0 : index
    %23 = vector.load %arg8[%c48, %c0_21] : memref<80x1280xbf16, #tpu.memory_space<vmem>>, vector<8x1280xbf16>
    tpu.vector_store %arg8[%c48, %c0_21], %22 {strides = array<i32>} : memref<80x1280xbf16, #tpu.memory_space<vmem>>, vector<8x1280xbf16>,
    %c0_22 = arith.constant 0 : index
    %c2768 = arith.constant 2768 : index
    %24 = vector.load %arg7[%c0_22, %c2768] : memref<8x6656xbf16, #tpu.memory_space<vmem>>, vector<8x1280xbf16>
    %c56 = arith.constant 56 : index
    %c0_23 = arith.constant 0 : index
    %25 = vector.load %arg8[%c56, %c0_23] : memref<80x1280xbf16, #tpu.memory_space<vmem>>, vector<8x1280xbf16>
    tpu.vector_store %arg8[%c56, %c0_23], %24 {strides = array<i32>} : memref<80x1280xbf16, #tpu.memory_space<vmem>>, vector<8x1280xbf16>,
    %c0_24 = arith.constant 0 : index
    %c2769 = arith.constant 2769 : index
    %26 = vector.load %arg7[%c0_24, %c2769] : memref<8x6656xbf16, #tpu.memory_space<vmem>>, vector<8x1280xbf16>
    %c64 = arith.constant 64 : index
    %c0_25 = arith.constant 0 : index
    %27 = vector.load %arg8[%c64, %c0_25] : memref<80x1280xbf16, #tpu.memory_space<vmem>>, vector<8x1280xbf16>
    tpu.vector_store %arg8[%c64, %c0_25], %26 {strides = array<i32>} : memref<80x1280xbf16, #tpu.memory_space<vmem>>, vector<8x1280xbf16>,
    %c0_26 = arith.constant 0 : index
    %c0_27 = arith.constant 0 : index
    %28 = vector.load %arg3[%c0_26, %c0_27] : memref<8x72xbf16, #tpu.memory_space<vmem>>, vector<8x72xbf16>
    %c0_28 = arith.constant 0 : index
    %c0_29 = arith.constant 0 : index
    %29 = vector.load %arg8[%c0_28, %c0_29] : memref<80x1280xbf16, #tpu.memory_space<vmem>>, vector<72x1280xbf16>
    %cst = arith.constant dense<0.000000e+00> : vector<8x1280xf32>
    %30 = tpu.matmul %28, %29, %cst {dimension_numbers = #tpu.dot_dimension_numbers<[1], [0], [0], [1], [0, 0, 1, 1], [], []>} : vector<8x72xbf16>, vector<72x1280xbf16>, vector<8x1280xf32> -> vector<8x1280xf32>
    %c0_30 = arith.constant 0 : index
    %c0_31 = arith.constant 0 : index
    %c0_32 = arith.constant 0 : index
    %31 = vector.load %arg5[%c0_30, %c0_31, %c0_32] : memref<6x8x1xf32, #tpu.memory_space<vmem>>, vector<1x8x1xf32>
    %32 = vector.shape_cast %31 : vector<1x8x1xf32> to vector<8x1xf32>
    %33 = vector.broadcast %32 : vector<8x1xf32> to vector<8x1280xf32>
    %34 = arith.addf %30, %33 : vector<8x1280xf32>
    %cst_33 = arith.constant 0.000000e+00 : f32
    %35 = vector.broadcast %cst_33 : f32 to vector<8x1280xf32>
    %36 = arith.maximumf %34, %35 : vector<8x1280xf32>
    %37 = arith.mulf %36, %5 : vector<8x1280xf32>
    %38 = arith.truncf %37 : vector<8x1280xf32> to vector<8x1280xbf16>
    %c0_34 = arith.constant 0 : index
    %c2688_35 = arith.constant 2688 : index
    %39 = vector.load %arg7[%c0_34, %c2688_35] : memref<8x6656xbf16, #tpu.memory_space<vmem>>, vector<8x1280xbf16>
    tpu.vector_store %arg7[%c0_34, %c2688_35], %38 {strides = array<i32>} : memref<8x6656xbf16, #tpu.memory_space<vmem>>, vector<8x1280xbf16>,
    %c0_36 = arith.constant 0 : index
    %c2526 = arith.constant 2526 : index
    %40 = vector.load %arg7[%c0_36, %c2526] : memref<8x6656xbf16, #tpu.memory_space<vmem>>, vector<8x1280xbf16>
    %c0_37 = arith.constant 0 : index
    %c0_38 = arith.constant 0 : index
    %41 = vector.load %arg8[%c0_37, %c0_38] : memref<80x1280xbf16, #tpu.memory_space<vmem>>, vector<8x1280xbf16>
    tpu.vector_store %arg8[%c0_37, %c0_38], %40 {strides = array<i32>} : memref<80x1280xbf16, #tpu.memory_space<vmem>>, vector<8x1280xbf16>,
    %c0_39 = arith.constant 0 : index
    %c2528 = arith.constant 2528 : index
    %42 = vector.load %arg7[%c0_39, %c2528] : memref<8x6656xbf16, #tpu.memory_space<vmem>>, vector<8x1280xbf16>
    %c8_40 = arith.constant 8 : index
    %c0_41 = arith.constant 0 : index
    %43 = vector.load %arg8[%c8_40, %c0_41] : memref<80x1280xbf16, #tpu.memory_space<vmem>>, vector<8x1280xbf16>
    tpu.vector_store %arg8[%c8_40, %c0_41], %42 {strides = array<i32>} : memref<80x1280xbf16, #tpu.memory_space<vmem>>, vector<8x1280xbf16>,
    %c0_42 = arith.constant 0 : index
    %c2530 = arith.constant 2530 : index
    %44 = vector.load %arg7[%c0_42, %c2530] : memref<8x6656xbf16, #tpu.memory_space<vmem>>, vector<8x1280xbf16>
    %c16_43 = arith.constant 16 : index
    %c0_44 = arith.constant 0 : index
    %45 = vector.load %arg8[%c16_43, %c0_44] : memref<80x1280xbf16, #tpu.memory_space<vmem>>, vector<8x1280xbf16>
    tpu.vector_store %arg8[%c16_43, %c0_44], %44 {strides = array<i32>} : memref<80x1280xbf16, #tpu.memory_space<vmem>>, vector<8x1280xbf16>,
    %c0_45 = arith.constant 0 : index
    %c2686 = arith.constant 2686 : index
    %46 = vector.load %arg7[%c0_45, %c2686] : memref<8x6656xbf16, #tpu.memory_space<vmem>>, vector<8x1280xbf16>
    %c24_46 = arith.constant 24 : index
    %c0_47 = arith.constant 0 : index
    %47 = vector.load %arg8[%c24_46, %c0_47] : memref<80x1280xbf16, #tpu.memory_space<vmem>>, vector<8x1280xbf16>
    tpu.vector_store %arg8[%c24_46, %c0_47], %46 {strides = array<i32>} : memref<80x1280xbf16, #tpu.memory_space<vmem>>, vector<8x1280xbf16>,
    %c0_48 = arith.constant 0 : index
    %c2688_49 = arith.constant 2688 : index
    %48 = vector.load %arg7[%c0_48, %c2688_49] : memref<8x6656xbf16, #tpu.memory_space<vmem>>, vector<8x1280xbf16>
    %c32_50 = arith.constant 32 : index
    %c0_51 = arith.constant 0 : index
    %49 = vector.load %arg8[%c32_50, %c0_51] : memref<80x1280xbf16, #tpu.memory_space<vmem>>, vector<8x1280xbf16>
    tpu.vector_store %arg8[%c32_50, %c0_51], %48 {strides = array<i32>} : memref<80x1280xbf16, #tpu.memory_space<vmem>>, vector<8x1280xbf16>,
    %c0_52 = arith.constant 0 : index
    %c2690 = arith.constant 2690 : index
    %50 = vector.load %arg7[%c0_52, %c2690] : memref<8x6656xbf16, #tpu.memory_space<vmem>>, vector<8x1280xbf16>
    %c40_53 = arith.constant 40 : index
    %c0_54 = arith.constant 0 : index
    %51 = vector.load %arg8[%c40_53, %c0_54] : memref<80x1280xbf16, #tpu.memory_space<vmem>>, vector<8x1280xbf16>
    tpu.vector_store %arg8[%c40_53, %c0_54], %50 {strides = array<i32>} : memref<80x1280xbf16, #tpu.memory_space<vmem>>, vector<8x1280xbf16>,
    %c0_55 = arith.constant 0 : index
    %c2846 = arith.constant 2846 : index
    %52 = vector.load %arg7[%c0_55, %c2846] : memref<8x6656xbf16, #tpu.memory_space<vmem>>, vector<8x1280xbf16>
    %c48_56 = arith.constant 48 : index
    %c0_57 = arith.constant 0 : index
    %53 = vector.load %arg8[%c48_56, %c0_57] : memref<80x1280xbf16, #tpu.memory_space<vmem>>, vector<8x1280xbf16>
    tpu.vector_store %arg8[%c48_56, %c0_57], %52 {strides = array<i32>} : memref<80x1280xbf16, #tpu.memory_space<vmem>>, vector<8x1280xbf16>,
    %c0_58 = arith.constant 0 : index
    %c2848 = arith.constant 2848 : index
    %54 = vector.load %arg7[%c0_58, %c2848] : memref<8x6656xbf16, #tpu.memory_space<vmem>>, vector<8x1280xbf16>
    %c56_59 = arith.constant 56 : index
    %c0_60 = arith.constant 0 : index
    %55 = vector.load %arg8[%c56_59, %c0_60] : memref<80x1280xbf16, #tpu.memory_space<vmem>>, vector<8x1280xbf16>
    tpu.vector_store %arg8[%c56_59, %c0_60], %54 {strides = array<i32>} : memref<80x1280xbf16, #tpu.memory_space<vmem>>, vector<8x1280xbf16>,
    %c0_61 = arith.constant 0 : index
    %c2850 = arith.constant 2850 : index
    %56 = vector.load %arg7[%c0_61, %c2850] : memref<8x6656xbf16, #tpu.memory_space<vmem>>, vector<8x1280xbf16>
    %c64_62 = arith.constant 64 : index
    %c0_63 = arith.constant 0 : index
    %57 = vector.load %arg8[%c64_62, %c0_63] : memref<80x1280xbf16, #tpu.memory_space<vmem>>, vector<8x1280xbf16>
    tpu.vector_store %arg8[%c64_62, %c0_63], %56 {strides = array<i32>} : memref<80x1280xbf16, #tpu.memory_space<vmem>>, vector<8x1280xbf16>,
    %c0_64 = arith.constant 0 : index
    %c0_65 = arith.constant 0 : index
    %c0_66 = arith.constant 0 : index
    %58 = vector.load %arg4[%c0_64, %c0_65, %c0_66] : memref<5x8x72xbf16, #tpu.memory_space<vmem>>, vector<1x8x72xbf16>
    %59 = vector.shape_cast %58 : vector<1x8x72xbf16> to vector<8x72xbf16>
    %c0_67 = arith.constant 0 : index
    %c0_68 = arith.constant 0 : index
    %60 = vector.load %arg8[%c0_67, %c0_68] : memref<80x1280xbf16, #tpu.memory_space<vmem>>, vector<72x1280xbf16>
    %cst_69 = arith.constant dense<0.000000e+00> : vector<8x1280xf32>
    %61 = tpu.matmul %59, %60, %cst_69 {dimension_numbers = #tpu.dot_dimension_numbers<[1], [0], [0], [1], [0, 0, 1, 1], [], []>} : vector<8x72xbf16>, vector<72x1280xbf16>, vector<8x1280xf32> -> vector<8x1280xf32>
    %c1 = arith.constant 1 : index
    %c0_70 = arith.constant 0 : index
    %c0_71 = arith.constant 0 : index
    %62 = vector.load %arg5[%c1, %c0_70, %c0_71] : memref<6x8x1xf32, #tpu.memory_space<vmem>>, vector<1x8x1xf32>
    %63 = vector.shape_cast %62 : vector<1x8x1xf32> to vector<8x1xf32>
    %64 = vector.broadcast %63 : vector<8x1xf32> to vector<8x1280xf32>
    %65 = arith.addf %61, %64 : vector<8x1280xf32>
    %cst_72 = arith.constant 0.000000e+00 : f32
    %66 = vector.broadcast %cst_72 : f32 to vector<8x1280xf32>
    %67 = arith.maximumf %65, %66 : vector<8x1280xf32>
    %68 = arith.addf %36, %67 : vector<8x1280xf32>
    %69 = arith.mulf %67, %5 : vector<8x1280xf32>
    %70 = arith.truncf %69 : vector<8x1280xf32> to vector<8x1280xbf16>
    %c0_73 = arith.constant 0 : index
    %c2688_74 = arith.constant 2688 : index
    %71 = vector.load %arg7[%c0_73, %c2688_74] : memref<8x6656xbf16, #tpu.memory_space<vmem>>, vector<8x1280xbf16>
    tpu.vector_store %arg7[%c0_73, %c2688_74], %70 {strides = array<i32>} : memref<8x6656xbf16, #tpu.memory_space<vmem>>, vector<8x1280xbf16>,
    %c0_75 = arith.constant 0 : index
    %c2364 = arith.constant 2364 : index
    %72 = vector.load %arg7[%c0_75, %c2364] : memref<8x6656xbf16, #tpu.memory_space<vmem>>, vector<8x1280xbf16>
    %c0_76 = arith.constant 0 : index
    %c0_77 = arith.constant 0 : index
    %73 = vector.load %arg8[%c0_76, %c0_77] : memref<80x1280xbf16, #tpu.memory_space<vmem>>, vector<8x1280xbf16>
    tpu.vector_store %arg8[%c0_76, %c0_77], %72 {strides = array<i32>} : memref<80x1280xbf16, #tpu.memory_space<vmem>>, vector<8x1280xbf16>,
    %c0_78 = arith.constant 0 : index
    %c2368 = arith.constant 2368 : index
    %74 = vector.load %arg7[%c0_78, %c2368] : memref<8x6656xbf16, #tpu.memory_space<vmem>>, vector<8x1280xbf16>
    %c8_79 = arith.constant 8 : index
    %c0_80 = arith.constant 0 : index
    %75 = vector.load %arg8[%c8_79, %c0_80] : memref<80x1280xbf16, #tpu.memory_space<vmem>>, vector<8x1280xbf16>
    tpu.vector_store %arg8[%c8_79, %c0_80], %74 {strides = array<i32>} : memref<80x1280xbf16, #tpu.memory_space<vmem>>, vector<8x1280xbf16>,
    %c0_81 = arith.constant 0 : index
    %c2372 = arith.constant 2372 : index
    %76 = vector.load %arg7[%c0_81, %c2372] : memref<8x6656xbf16, #tpu.memory_space<vmem>>, vector<8x1280xbf16>
    %c16_82 = arith.constant 16 : index
    %c0_83 = arith.constant 0 : index
    %77 = vector.load %arg8[%c16_82, %c0_83] : memref<80x1280xbf16, #tpu.memory_space<vmem>>, vector<8x1280xbf16>
    tpu.vector_store %arg8[%c16_82, %c0_83], %76 {strides = array<i32>} : memref<80x1280xbf16, #tpu.memory_space<vmem>>, vector<8x1280xbf16>,
    %c0_84 = arith.constant 0 : index
    %c2684 = arith.constant 2684 : index
    %78 = vector.load %arg7[%c0_84, %c2684] : memref<8x6656xbf16, #tpu.memory_space<vmem>>, vector<8x1280xbf16>
    %c24_85 = arith.constant 24 : index
    %c0_86 = arith.constant 0 : index
    %79 = vector.load %arg8[%c24_85, %c0_86] : memref<80x1280xbf16, #tpu.memory_space<vmem>>, vector<8x1280xbf16>
    tpu.vector_store %arg8[%c24_85, %c0_86], %78 {strides = array<i32>} : memref<80x1280xbf16, #tpu.memory_space<vmem>>, vector<8x1280xbf16>,
    %c0_87 = arith.constant 0 : index
    %c2688_88 = arith.constant 2688 : index
    %80 = vector.load %arg7[%c0_87, %c2688_88] : memref<8x6656xbf16, #tpu.memory_space<vmem>>, vector<8x1280xbf16>
    %c32_89 = arith.constant 32 : index
    %c0_90 = arith.constant 0 : index
    %81 = vector.load %arg8[%c32_89, %c0_90] : memref<80x1280xbf16, #tpu.memory_space<vmem>>, vector<8x1280xbf16>
    tpu.vector_store %arg8[%c32_89, %c0_90], %80 {strides = array<i32>} : memref<80x1280xbf16, #tpu.memory_space<vmem>>, vector<8x1280xbf16>,
    %c0_91 = arith.constant 0 : index
    %c2692 = arith.constant 2692 : index
    %82 = vector.load %arg7[%c0_91, %c2692] : memref<8x6656xbf16, #tpu.memory_space<vmem>>, vector<8x1280xbf16>
    %c40_92 = arith.constant 40 : index
    %c0_93 = arith.constant 0 : index
    %83 = vector.load %arg8[%c40_92, %c0_93] : memref<80x1280xbf16, #tpu.memory_space<vmem>>, vector<8x1280xbf16>
    tpu.vector_store %arg8[%c40_92, %c0_93], %82 {strides = array<i32>} : memref<80x1280xbf16, #tpu.memory_space<vmem>>, vector<8x1280xbf16>,
    %c0_94 = arith.constant 0 : index
    %c3004 = arith.constant 3004 : index
    %84 = vector.load %arg7[%c0_94, %c3004] : memref<8x6656xbf16, #tpu.memory_space<vmem>>, vector<8x1280xbf16>
    %c48_95 = arith.constant 48 : index
    %c0_96 = arith.constant 0 : index
    %85 = vector.load %arg8[%c48_95, %c0_96] : memref<80x1280xbf16, #tpu.memory_space<vmem>>, vector<8x1280xbf16>
    tpu.vector_store %arg8[%c48_95, %c0_96], %84 {strides = array<i32>} : memref<80x1280xbf16, #tpu.memory_space<vmem>>, vector<8x1280xbf16>,
    %c0_97 = arith.constant 0 : index
    %c3008 = arith.constant 3008 : index
    %86 = vector.load %arg7[%c0_97, %c3008] : memref<8x6656xbf16, #tpu.memory_space<vmem>>, vector<8x1280xbf16>
    %c56_98 = arith.constant 56 : index
    %c0_99 = arith.constant 0 : index
    %87 = vector.load %arg8[%c56_98, %c0_99] : memref<80x1280xbf16, #tpu.memory_space<vmem>>, vector<8x1280xbf16>
    tpu.vector_store %arg8[%c56_98, %c0_99], %86 {strides = array<i32>} : memref<80x1280xbf16, #tpu.memory_space<vmem>>, vector<8x1280xbf16>,
    %c0_100 = arith.constant 0 : index
    %c3012 = arith.constant 3012 : index
    %88 = vector.load %arg7[%c0_100, %c3012] : memref<8x6656xbf16, #tpu.memory_space<vmem>>, vector<8x1280xbf16>
    %c64_101 = arith.constant 64 : index
    %c0_102 = arith.constant 0 : index
    %89 = vector.load %arg8[%c64_101, %c0_102] : memref<80x1280xbf16, #tpu.memory_space<vmem>>, vector<8x1280xbf16>
    tpu.vector_store %arg8[%c64_101, %c0_102], %88 {strides = array<i32>} : memref<80x1280xbf16, #tpu.memory_space<vmem>>, vector<8x1280xbf16>,
    %c1_103 = arith.constant 1 : index
    %c0_104 = arith.constant 0 : index
    %c0_105 = arith.constant 0 : index
    %90 = vector.load %arg4[%c1_103, %c0_104, %c0_105] : memref<5x8x72xbf16, #tpu.memory_space<vmem>>, vector<1x8x72xbf16>
    %91 = vector.shape_cast %90 : vector<1x8x72xbf16> to vector<8x72xbf16>
    %c0_106 = arith.constant 0 : index
    %c0_107 = arith.constant 0 : index
    %92 = vector.load %arg8[%c0_106, %c0_107] : memref<80x1280xbf16, #tpu.memory_space<vmem>>, vector<72x1280xbf16>
    %cst_108 = arith.constant dense<0.000000e+00> : vector<8x1280xf32>
    %93 = tpu.matmul %91, %92, %cst_108 {dimension_numbers = #tpu.dot_dimension_numbers<[1], [0], [0], [1], [0, 0, 1, 1], [], []>} : vector<8x72xbf16>, vector<72x1280xbf16>, vector<8x1280xf32> -> vector<8x1280xf32>
    %c2 = arith.constant 2 : index
    %c0_109 = arith.constant 0 : index
    %c0_110 = arith.constant 0 : index
    %94 = vector.load %arg5[%c2, %c0_109, %c0_110] : memref<6x8x1xf32, #tpu.memory_space<vmem>>, vector<1x8x1xf32>
    %95 = vector.shape_cast %94 : vector<1x8x1xf32> to vector<8x1xf32>
    %96 = vector.broadcast %95 : vector<8x1xf32> to vector<8x1280xf32>
    %97 = arith.addf %93, %96 : vector<8x1280xf32>
    %cst_111 = arith.constant 0.000000e+00 : f32
    %98 = vector.broadcast %cst_111 : f32 to vector<8x1280xf32>
    %99 = arith.maximumf %97, %98 : vector<8x1280xf32>
    %100 = arith.addf %68, %99 : vector<8x1280xf32>
    %101 = arith.mulf %99, %5 : vector<8x1280xf32>
    %102 = arith.truncf %101 : vector<8x1280xf32> to vector<8x1280xbf16>
    %c0_112 = arith.constant 0 : index
    %c2688_113 = arith.constant 2688 : index
    %103 = vector.load %arg7[%c0_112, %c2688_113] : memref<8x6656xbf16, #tpu.memory_space<vmem>>, vector<8x1280xbf16>
    tpu.vector_store %arg7[%c0_112, %c2688_113], %102 {strides = array<i32>} : memref<8x6656xbf16, #tpu.memory_space<vmem>>, vector<8x1280xbf16>,
    %c0_114 = arith.constant 0 : index
    %c2040 = arith.constant 2040 : index
    %104 = vector.load %arg7[%c0_114, %c2040] : memref<8x6656xbf16, #tpu.memory_space<vmem>>, vector<8x1280xbf16>
    %c0_115 = arith.constant 0 : index
    %c0_116 = arith.constant 0 : index
    %105 = vector.load %arg8[%c0_115, %c0_116] : memref<80x1280xbf16, #tpu.memory_space<vmem>>, vector<8x1280xbf16>
    tpu.vector_store %arg8[%c0_115, %c0_116], %104 {strides = array<i32>} : memref<80x1280xbf16, #tpu.memory_space<vmem>>, vector<8x1280xbf16>,
    %c0_117 = arith.constant 0 : index
    %c2048 = arith.constant 2048 : index
    %106 = vector.load %arg7[%c0_117, %c2048] : memref<8x6656xbf16, #tpu.memory_space<vmem>>, vector<8x1280xbf16>
    %c8_118 = arith.constant 8 : index
    %c0_119 = arith.constant 0 : index
    %107 = vector.load %arg8[%c8_118, %c0_119] : memref<80x1280xbf16, #tpu.memory_space<vmem>>, vector<8x1280xbf16>
    tpu.vector_store %arg8[%c8_118, %c0_119], %106 {strides = array<i32>} : memref<80x1280xbf16, #tpu.memory_space<vmem>>, vector<8x1280xbf16>,
    %c0_120 = arith.constant 0 : index
    %c2056 = arith.constant 2056 : index
    %108 = vector.load %arg7[%c0_120, %c2056] : memref<8x6656xbf16, #tpu.memory_space<vmem>>, vector<8x1280xbf16>
    %c16_121 = arith.constant 16 : index
    %c0_122 = arith.constant 0 : index
    %109 = vector.load %arg8[%c16_121, %c0_122] : memref<80x1280xbf16, #tpu.memory_space<vmem>>, vector<8x1280xbf16>
    tpu.vector_store %arg8[%c16_121, %c0_122], %108 {strides = array<i32>} : memref<80x1280xbf16, #tpu.memory_space<vmem>>, vector<8x1280xbf16>,
    %c0_123 = arith.constant 0 : index
    %c2680 = arith.constant 2680 : index
    %110 = vector.load %arg7[%c0_123, %c2680] : memref<8x6656xbf16, #tpu.memory_space<vmem>>, vector<8x1280xbf16>
    %c24_124 = arith.constant 24 : index
    %c0_125 = arith.constant 0 : index
    %111 = vector.load %arg8[%c24_124, %c0_125] : memref<80x1280xbf16, #tpu.memory_space<vmem>>, vector<8x1280xbf16>
    tpu.vector_store %arg8[%c24_124, %c0_125], %110 {strides = array<i32>} : memref<80x1280xbf16, #tpu.memory_space<vmem>>, vector<8x1280xbf16>,
    %c0_126 = arith.constant 0 : index
    %c2688_127 = arith.constant 2688 : index
    %112 = vector.load %arg7[%c0_126, %c2688_127] : memref<8x6656xbf16, #tpu.memory_space<vmem>>, vector<8x1280xbf16>
    %c32_128 = arith.constant 32 : index
    %c0_129 = arith.constant 0 : index
    %113 = vector.load %arg8[%c32_128, %c0_129] : memref<80x1280xbf16, #tpu.memory_space<vmem>>, vector<8x1280xbf16>
    tpu.vector_store %arg8[%c32_128, %c0_129], %112 {strides = array<i32>} : memref<80x1280xbf16, #tpu.memory_space<vmem>>, vector<8x1280xbf16>,
    %c0_130 = arith.constant 0 : index
    %c2696 = arith.constant 2696 : index
    %114 = vector.load %arg7[%c0_130, %c2696] : memref<8x6656xbf16, #tpu.memory_space<vmem>>, vector<8x1280xbf16>
    %c40_131 = arith.constant 40 : index
    %c0_132 = arith.constant 0 : index
    %115 = vector.load %arg8[%c40_131, %c0_132] : memref<80x1280xbf16, #tpu.memory_space<vmem>>, vector<8x1280xbf16>
    tpu.vector_store %arg8[%c40_131, %c0_132], %114 {strides = array<i32>} : memref<80x1280xbf16, #tpu.memory_space<vmem>>, vector<8x1280xbf16>,
    %c0_133 = arith.constant 0 : index
    %c3320 = arith.constant 3320 : index
    %116 = vector.load %arg7[%c0_133, %c3320] : memref<8x6656xbf16, #tpu.memory_space<vmem>>, vector<8x1280xbf16>
    %c48_134 = arith.constant 48 : index
    %c0_135 = arith.constant 0 : index
    %117 = vector.load %arg8[%c48_134, %c0_135] : memref<80x1280xbf16, #tpu.memory_space<vmem>>, vector<8x1280xbf16>
    tpu.vector_store %arg8[%c48_134, %c0_135], %116 {strides = array<i32>} : memref<80x1280xbf16, #tpu.memory_space<vmem>>, vector<8x1280xbf16>,
    %c0_136 = arith.constant 0 : index
    %c3328 = arith.constant 3328 : index
    %118 = vector.load %arg7[%c0_136, %c3328] : memref<8x6656xbf16, #tpu.memory_space<vmem>>, vector<8x1280xbf16>
    %c56_137 = arith.constant 56 : index
    %c0_138 = arith.constant 0 : index
    %119 = vector.load %arg8[%c56_137, %c0_138] : memref<80x1280xbf16, #tpu.memory_space<vmem>>, vector<8x1280xbf16>
    tpu.vector_store %arg8[%c56_137, %c0_138], %118 {strides = array<i32>} : memref<80x1280xbf16, #tpu.memory_space<vmem>>, vector<8x1280xbf16>,
    %c0_139 = arith.constant 0 : index
    %c3336 = arith.constant 3336 : index
    %120 = vector.load %arg7[%c0_139, %c3336] : memref<8x6656xbf16, #tpu.memory_space<vmem>>, vector<8x1280xbf16>
    %c64_140 = arith.constant 64 : index
    %c0_141 = arith.constant 0 : index
    %121 = vector.load %arg8[%c64_140, %c0_141] : memref<80x1280xbf16, #tpu.memory_space<vmem>>, vector<8x1280xbf16>
    tpu.vector_store %arg8[%c64_140, %c0_141], %120 {strides = array<i32>} : memref<80x1280xbf16, #tpu.memory_space<vmem>>, vector<8x1280xbf16>,
    %c2_142 = arith.constant 2 : index
    %c0_143 = arith.constant 0 : index
    %c0_144 = arith.constant 0 : index
    %122 = vector.load %arg4[%c2_142, %c0_143, %c0_144] : memref<5x8x72xbf16, #tpu.memory_space<vmem>>, vector<1x8x72xbf16>
    %123 = vector.shape_cast %122 : vector<1x8x72xbf16> to vector<8x72xbf16>
    %c0_145 = arith.constant 0 : index
    %c0_146 = arith.constant 0 : index
    %124 = vector.load %arg8[%c0_145, %c0_146] : memref<80x1280xbf16, #tpu.memory_space<vmem>>, vector<72x1280xbf16>
    %cst_147 = arith.constant dense<0.000000e+00> : vector<8x1280xf32>
    %125 = tpu.matmul %123, %124, %cst_147 {dimension_numbers = #tpu.dot_dimension_numbers<[1], [0], [0], [1], [0, 0, 1, 1], [], []>} : vector<8x72xbf16>, vector<72x1280xbf16>, vector<8x1280xf32> -> vector<8x1280xf32>
    %c3 = arith.constant 3 : index
    %c0_148 = arith.constant 0 : index
    %c0_149 = arith.constant 0 : index
    %126 = vector.load %arg5[%c3, %c0_148, %c0_149] : memref<6x8x1xf32, #tpu.memory_space<vmem>>, vector<1x8x1xf32>
    %127 = vector.shape_cast %126 : vector<1x8x1xf32> to vector<8x1xf32>
    %128 = vector.broadcast %127 : vector<8x1xf32> to vector<8x1280xf32>
    %129 = arith.addf %125, %128 : vector<8x1280xf32>
    %cst_150 = arith.constant 0.000000e+00 : f32
    %130 = vector.broadcast %cst_150 : f32 to vector<8x1280xf32>
    %131 = arith.maximumf %129, %130 : vector<8x1280xf32>
    %132 = arith.addf %100, %131 : vector<8x1280xf32>
    %133 = arith.mulf %131, %5 : vector<8x1280xf32>
    %134 = arith.truncf %133 : vector<8x1280xf32> to vector<8x1280xbf16>
    %c0_151 = arith.constant 0 : index
    %c2688_152 = arith.constant 2688 : index
    %135 = vector.load %arg7[%c0_151, %c2688_152] : memref<8x6656xbf16, #tpu.memory_space<vmem>>, vector<8x1280xbf16>
    tpu.vector_store %arg7[%c0_151, %c2688_152], %134 {strides = array<i32>} : memref<8x6656xbf16, #tpu.memory_space<vmem>>, vector<8x1280xbf16>,
    %c0_153 = arith.constant 0 : index
    %c1392 = arith.constant 1392 : index
    %136 = vector.load %arg7[%c0_153, %c1392] : memref<8x6656xbf16, #tpu.memory_space<vmem>>, vector<8x1280xbf16>
    %c0_154 = arith.constant 0 : index
    %c0_155 = arith.constant 0 : index
    %137 = vector.load %arg8[%c0_154, %c0_155] : memref<80x1280xbf16, #tpu.memory_space<vmem>>, vector<8x1280xbf16>
    tpu.vector_store %arg8[%c0_154, %c0_155], %136 {strides = array<i32>} : memref<80x1280xbf16, #tpu.memory_space<vmem>>, vector<8x1280xbf16>,
    %c0_156 = arith.constant 0 : index
    %c1408 = arith.constant 1408 : index
    %138 = vector.load %arg7[%c0_156, %c1408] : memref<8x6656xbf16, #tpu.memory_space<vmem>>, vector<8x1280xbf16>
    %c8_157 = arith.constant 8 : index
    %c0_158 = arith.constant 0 : index
    %139 = vector.load %arg8[%c8_157, %c0_158] : memref<80x1280xbf16, #tpu.memory_space<vmem>>, vector<8x1280xbf16>
    tpu.vector_store %arg8[%c8_157, %c0_158], %138 {strides = array<i32>} : memref<80x1280xbf16, #tpu.memory_space<vmem>>, vector<8x1280xbf16>,
    %c0_159 = arith.constant 0 : index
    %c1424 = arith.constant 1424 : index
    %140 = vector.load %arg7[%c0_159, %c1424] : memref<8x6656xbf16, #tpu.memory_space<vmem>>, vector<8x1280xbf16>
    %c16_160 = arith.constant 16 : index
    %c0_161 = arith.constant 0 : index
    %141 = vector.load %arg8[%c16_160, %c0_161] : memref<80x1280xbf16, #tpu.memory_space<vmem>>, vector<8x1280xbf16>
    tpu.vector_store %arg8[%c16_160, %c0_161], %140 {strides = array<i32>} : memref<80x1280xbf16, #tpu.memory_space<vmem>>, vector<8x1280xbf16>,
    %c0_162 = arith.constant 0 : index
    %c2672 = arith.constant 2672 : index
    %142 = vector.load %arg7[%c0_162, %c2672] : memref<8x6656xbf16, #tpu.memory_space<vmem>>, vector<8x1280xbf16>
    %c24_163 = arith.constant 24 : index
    %c0_164 = arith.constant 0 : index
    %143 = vector.load %arg8[%c24_163, %c0_164] : memref<80x1280xbf16, #tpu.memory_space<vmem>>, vector<8x1280xbf16>
    tpu.vector_store %arg8[%c24_163, %c0_164], %142 {strides = array<i32>} : memref<80x1280xbf16, #tpu.memory_space<vmem>>, vector<8x1280xbf16>,
    %c0_165 = arith.constant 0 : index
    %c2688_166 = arith.constant 2688 : index
    %144 = vector.load %arg7[%c0_165, %c2688_166] : memref<8x6656xbf16, #tpu.memory_space<vmem>>, vector<8x1280xbf16>
    %c32_167 = arith.constant 32 : index
    %c0_168 = arith.constant 0 : index
    %145 = vector.load %arg8[%c32_167, %c0_168] : memref<80x1280xbf16, #tpu.memory_space<vmem>>, vector<8x1280xbf16>
    tpu.vector_store %arg8[%c32_167, %c0_168], %144 {strides = array<i32>} : memref<80x1280xbf16, #tpu.memory_space<vmem>>, vector<8x1280xbf16>,
    %c0_169 = arith.constant 0 : index
    %c2704 = arith.constant 2704 : index
    %146 = vector.load %arg7[%c0_169, %c2704] : memref<8x6656xbf16, #tpu.memory_space<vmem>>, vector<8x1280xbf16>
    %c40_170 = arith.constant 40 : index
    %c0_171 = arith.constant 0 : index
    %147 = vector.load %arg8[%c40_170, %c0_171] : memref<80x1280xbf16, #tpu.memory_space<vmem>>, vector<8x1280xbf16>
    tpu.vector_store %arg8[%c40_170, %c0_171], %146 {strides = array<i32>} : memref<80x1280xbf16, #tpu.memory_space<vmem>>, vector<8x1280xbf16>,
    %c0_172 = arith.constant 0 : index
    %c3952 = arith.constant 3952 : index
    %148 = vector.load %arg7[%c0_172, %c3952] : memref<8x6656xbf16, #tpu.memory_space<vmem>>, vector<8x1280xbf16>
    %c48_173 = arith.constant 48 : index
    %c0_174 = arith.constant 0 : index
    %149 = vector.load %arg8[%c48_173, %c0_174] : memref<80x1280xbf16, #tpu.memory_space<vmem>>, vector<8x1280xbf16>
    tpu.vector_store %arg8[%c48_173, %c0_174], %148 {strides = array<i32>} : memref<80x1280xbf16, #tpu.memory_space<vmem>>, vector<8x1280xbf16>,
    %c0_175 = arith.constant 0 : index
    %c3968 = arith.constant 3968 : index
    %150 = vector.load %arg7[%c0_175, %c3968] : memref<8x6656xbf16, #tpu.memory_space<vmem>>, vector<8x1280xbf16>
    %c56_176 = arith.constant 56 : index
    %c0_177 = arith.constant 0 : index
    %151 = vector.load %arg8[%c56_176, %c0_177] : memref<80x1280xbf16, #tpu.memory_space<vmem>>, vector<8x1280xbf16>
    tpu.vector_store %arg8[%c56_176, %c0_177], %150 {strides = array<i32>} : memref<80x1280xbf16, #tpu.memory_space<vmem>>, vector<8x1280xbf16>,
    %c0_178 = arith.constant 0 : index
    %c3984 = arith.constant 3984 : index
    %152 = vector.load %arg7[%c0_178, %c3984] : memref<8x6656xbf16, #tpu.memory_space<vmem>>, vector<8x1280xbf16>
    %c64_179 = arith.constant 64 : index
    %c0_180 = arith.constant 0 : index
    %153 = vector.load %arg8[%c64_179, %c0_180] : memref<80x1280xbf16, #tpu.memory_space<vmem>>, vector<8x1280xbf16>
    tpu.vector_store %arg8[%c64_179, %c0_180], %152 {strides = array<i32>} : memref<80x1280xbf16, #tpu.memory_space<vmem>>, vector<8x1280xbf16>,
    %c3_181 = arith.constant 3 : index
    %c0_182 = arith.constant 0 : index
    %c0_183 = arith.constant 0 : index
    %154 = vector.load %arg4[%c3_181, %c0_182, %c0_183] : memref<5x8x72xbf16, #tpu.memory_space<vmem>>, vector<1x8x72xbf16>
    %155 = vector.shape_cast %154 : vector<1x8x72xbf16> to vector<8x72xbf16>
    %c0_184 = arith.constant 0 : index
    %c0_185 = arith.constant 0 : index
    %156 = vector.load %arg8[%c0_184, %c0_185] : memref<80x1280xbf16, #tpu.memory_space<vmem>>, vector<72x1280xbf16>
    %cst_186 = arith.constant dense<0.000000e+00> : vector<8x1280xf32>
    %157 = tpu.matmul %155, %156, %cst_186 {dimension_numbers = #tpu.dot_dimension_numbers<[1], [0], [0], [1], [0, 0, 1, 1], [], []>} : vector<8x72xbf16>, vector<72x1280xbf16>, vector<8x1280xf32> -> vector<8x1280xf32>
    %c4 = arith.constant 4 : index
    %c0_187 = arith.constant 0 : index
    %c0_188 = arith.constant 0 : index
    %158 = vector.load %arg5[%c4, %c0_187, %c0_188] : memref<6x8x1xf32, #tpu.memory_space<vmem>>, vector<1x8x1xf32>
    %159 = vector.shape_cast %158 : vector<1x8x1xf32> to vector<8x1xf32>
    %160 = vector.broadcast %159 : vector<8x1xf32> to vector<8x1280xf32>
    %161 = arith.addf %157, %160 : vector<8x1280xf32>
    %cst_189 = arith.constant 0.000000e+00 : f32
    %162 = vector.broadcast %cst_189 : f32 to vector<8x1280xf32>
    %163 = arith.maximumf %161, %162 : vector<8x1280xf32>
    %164 = arith.addf %132, %163 : vector<8x1280xf32>
    %165 = arith.mulf %163, %5 : vector<8x1280xf32>
    %166 = arith.truncf %165 : vector<8x1280xf32> to vector<8x1280xbf16>
    %c0_190 = arith.constant 0 : index
    %c2688_191 = arith.constant 2688 : index
    %167 = vector.load %arg7[%c0_190, %c2688_191] : memref<8x6656xbf16, #tpu.memory_space<vmem>>, vector<8x1280xbf16>
    tpu.vector_store %arg7[%c0_190, %c2688_191], %166 {strides = array<i32>} : memref<8x6656xbf16, #tpu.memory_space<vmem>>, vector<8x1280xbf16>,
    %c0_192 = arith.constant 0 : index
    %c96 = arith.constant 96 : index
    %168 = vector.load %arg7[%c0_192, %c96] : memref<8x6656xbf16, #tpu.memory_space<vmem>>, vector<8x1280xbf16>
    %c0_193 = arith.constant 0 : index
    %c0_194 = arith.constant 0 : index
    %169 = vector.load %arg8[%c0_193, %c0_194] : memref<80x1280xbf16, #tpu.memory_space<vmem>>, vector<8x1280xbf16>
    tpu.vector_store %arg8[%c0_193, %c0_194], %168 {strides = array<i32>} : memref<80x1280xbf16, #tpu.memory_space<vmem>>, vector<8x1280xbf16>,
    %c0_195 = arith.constant 0 : index
    %c128 = arith.constant 128 : index
    %170 = vector.load %arg7[%c0_195, %c128] : memref<8x6656xbf16, #tpu.memory_space<vmem>>, vector<8x1280xbf16>
    %c8_196 = arith.constant 8 : index
    %c0_197 = arith.constant 0 : index
    %171 = vector.load %arg8[%c8_196, %c0_197] : memref<80x1280xbf16, #tpu.memory_space<vmem>>, vector<8x1280xbf16>
    tpu.vector_store %arg8[%c8_196, %c0_197], %170 {strides = array<i32>} : memref<80x1280xbf16, #tpu.memory_space<vmem>>, vector<8x1280xbf16>,
    %c0_198 = arith.constant 0 : index
    %c160 = arith.constant 160 : index
    %172 = vector.load %arg7[%c0_198, %c160] : memref<8x6656xbf16, #tpu.memory_space<vmem>>, vector<8x1280xbf16>
    %c16_199 = arith.constant 16 : index
    %c0_200 = arith.constant 0 : index
    %173 = vector.load %arg8[%c16_199, %c0_200] : memref<80x1280xbf16, #tpu.memory_space<vmem>>, vector<8x1280xbf16>
    tpu.vector_store %arg8[%c16_199, %c0_200], %172 {strides = array<i32>} : memref<80x1280xbf16, #tpu.memory_space<vmem>>, vector<8x1280xbf16>,
    %c0_201 = arith.constant 0 : index
    %c2656 = arith.constant 2656 : index
    %174 = vector.load %arg7[%c0_201, %c2656] : memref<8x6656xbf16, #tpu.memory_space<vmem>>, vector<8x1280xbf16>
    %c24_202 = arith.constant 24 : index
    %c0_203 = arith.constant 0 : index
    %175 = vector.load %arg8[%c24_202, %c0_203] : memref<80x1280xbf16, #tpu.memory_space<vmem>>, vector<8x1280xbf16>
    tpu.vector_store %arg8[%c24_202, %c0_203], %174 {strides = array<i32>} : memref<80x1280xbf16, #tpu.memory_space<vmem>>, vector<8x1280xbf16>,
    %c0_204 = arith.constant 0 : index
    %c2688_205 = arith.constant 2688 : index
    %176 = vector.load %arg7[%c0_204, %c2688_205] : memref<8x6656xbf16, #tpu.memory_space<vmem>>, vector<8x1280xbf16>
    %c32_206 = arith.constant 32 : index
    %c0_207 = arith.constant 0 : index
    %177 = vector.load %arg8[%c32_206, %c0_207] : memref<80x1280xbf16, #tpu.memory_space<vmem>>, vector<8x1280xbf16>
    tpu.vector_store %arg8[%c32_206, %c0_207], %176 {strides = array<i32>} : memref<80x1280xbf16, #tpu.memory_space<vmem>>, vector<8x1280xbf16>,
    %c0_208 = arith.constant 0 : index
    %c2720 = arith.constant 2720 : index
    %178 = vector.load %arg7[%c0_208, %c2720] : memref<8x6656xbf16, #tpu.memory_space<vmem>>, vector<8x1280xbf16>
    %c40_209 = arith.constant 40 : index
    %c0_210 = arith.constant 0 : index
    %179 = vector.load %arg8[%c40_209, %c0_210] : memref<80x1280xbf16, #tpu.memory_space<vmem>>, vector<8x1280xbf16>
    tpu.vector_store %arg8[%c40_209, %c0_210], %178 {strides = array<i32>} : memref<80x1280xbf16, #tpu.memory_space<vmem>>, vector<8x1280xbf16>,
    %c0_211 = arith.constant 0 : index
    %c5216 = arith.constant 5216 : index
    %180 = vector.load %arg7[%c0_211, %c5216] : memref<8x6656xbf16, #tpu.memory_space<vmem>>, vector<8x1280xbf16>
    %c48_212 = arith.constant 48 : index
    %c0_213 = arith.constant 0 : index
    %181 = vector.load %arg8[%c48_212, %c0_213] : memref<80x1280xbf16, #tpu.memory_space<vmem>>, vector<8x1280xbf16>
    tpu.vector_store %arg8[%c48_212, %c0_213], %180 {strides = array<i32>} : memref<80x1280xbf16, #tpu.memory_space<vmem>>, vector<8x1280xbf16>,
    %c0_214 = arith.constant 0 : index
    %c5248 = arith.constant 5248 : index
    %182 = vector.load %arg7[%c0_214, %c5248] : memref<8x6656xbf16, #tpu.memory_space<vmem>>, vector<8x1280xbf16>
    %c56_215 = arith.constant 56 : index
    %c0_216 = arith.constant 0 : index
    %183 = vector.load %arg8[%c56_215, %c0_216] : memref<80x1280xbf16, #tpu.memory_space<vmem>>, vector<8x1280xbf16>
    tpu.vector_store %arg8[%c56_215, %c0_216], %182 {strides = array<i32>} : memref<80x1280xbf16, #tpu.memory_space<vmem>>, vector<8x1280xbf16>,
    %c0_217 = arith.constant 0 : index
    %c5280 = arith.constant 5280 : index
    %184 = vector.load %arg7[%c0_217, %c5280] : memref<8x6656xbf16, #tpu.memory_space<vmem>>, vector<8x1280xbf16>
    %c64_218 = arith.constant 64 : index
    %c0_219 = arith.constant 0 : index
    %185 = vector.load %arg8[%c64_218, %c0_219] : memref<80x1280xbf16, #tpu.memory_space<vmem>>, vector<8x1280xbf16>
    tpu.vector_store %arg8[%c64_218, %c0_219], %184 {strides = array<i32>} : memref<80x1280xbf16, #tpu.memory_space<vmem>>, vector<8x1280xbf16>,
    %c4_220 = arith.constant 4 : index
    %c0_221 = arith.constant 0 : index
    %c0_222 = arith.constant 0 : index
    %186 = vector.load %arg4[%c4_220, %c0_221, %c0_222] : memref<5x8x72xbf16, #tpu.memory_space<vmem>>, vector<1x8x72xbf16>
    %187 = vector.shape_cast %186 : vector<1x8x72xbf16> to vector<8x72xbf16>
    %c0_223 = arith.constant 0 : index
    %c0_224 = arith.constant 0 : index
    %188 = vector.load %arg8[%c0_223, %c0_224] : memref<80x1280xbf16, #tpu.memory_space<vmem>>, vector<72x1280xbf16>
    %cst_225 = arith.constant dense<0.000000e+00> : vector<8x1280xf32>
    %189 = tpu.matmul %187, %188, %cst_225 {dimension_numbers = #tpu.dot_dimension_numbers<[1], [0], [0], [1], [0, 0, 1, 1], [], []>} : vector<8x72xbf16>, vector<72x1280xbf16>, vector<8x1280xf32> -> vector<8x1280xf32>
    %c5 = arith.constant 5 : index
    %c0_226 = arith.constant 0 : index
    %c0_227 = arith.constant 0 : index
    %190 = vector.load %arg5[%c5, %c0_226, %c0_227] : memref<6x8x1xf32, #tpu.memory_space<vmem>>, vector<1x8x1xf32>
    %191 = vector.shape_cast %190 : vector<1x8x1xf32> to vector<8x1xf32>
    %192 = vector.broadcast %191 : vector<8x1xf32> to vector<8x1280xf32>
    %193 = arith.addf %189, %192 : vector<8x1280xf32>
    %cst_228 = arith.constant 0.000000e+00 : f32
    %194 = vector.broadcast %cst_228 : f32 to vector<8x1280xf32>
    %195 = arith.maximumf %193, %194 : vector<8x1280xf32>
    %196 = arith.addf %164, %195 : vector<8x1280xf32>
    %c0_229 = arith.constant 0 : index
    %c0_230 = arith.constant 0 : index
    %c0_231 = arith.constant 0 : index
    %197 = vector.load %arg6[%c0_229, %c0_230, %c0_231] : memref<1x8x1280xf32, #tpu.memory_space<vmem>>, vector<1x8x1280xf32>
    %198 = vector.shape_cast %197 : vector<1x8x1280xf32> to vector<8x1280xf32>
    %199 = vector.shape_cast %196 : vector<8x1280xf32> to vector<1x8x1280xf32>
    tpu.vector_store %arg6[%c0_229, %c0_230, %c0_231], %199 {strides = array<i32>} : memref<1x8x1280xf32, #tpu.memory_space<vmem>>, vector<1x8x1280xf32>,
    return
  }
  func.func @transform_0(%arg0: i32) -> (i32, i32, i32) {
    %c0_i32 = arith.constant 0 : i32
    %c0_i32_0 = arith.constant 0 : i32
    %c0_i32_1 = arith.constant 0 : i32
    return %arg0, %c0_i32, %c0_i32_0 : i32, i32, i32
  }
  func.func @transform_1(%arg0: i32) -> (i32, i32) {
    %c0_i32 = arith.constant 0 : i32
    %c0_i32_0 = arith.constant 0 : i32
    %c0_i32_1 = arith.constant 0 : i32
    return %c0_i32, %c0_i32_0 : i32, i32
  }
  func.func @transform_2(%arg0: i32) -> (i32, i32) {
    %c0_i32 = arith.constant 0 : i32
    %c0_i32_0 = arith.constant 0 : i32
    %c0_i32_1 = arith.constant 0 : i32
    return %c0_i32, %c0_i32_0 : i32, i32
  }
  func.func @transform_3(%arg0: i32) -> (i32, i32, i32) {
    %c0_i32 = arith.constant 0 : i32
    %c0_i32_0 = arith.constant 0 : i32
    %c0_i32_1 = arith.constant 0 : i32
    %c0_i32_2 = arith.constant 0 : i32
    return %c0_i32, %c0_i32_0, %c0_i32_1 : i32, i32, i32
  }
  func.func @transform_4(%arg0: i32) -> (i32, i32, i32) {
    %c0_i32 = arith.constant 0 : i32
    %c0_i32_0 = arith.constant 0 : i32
    %c0_i32_1 = arith.constant 0 : i32
    %c0_i32_2 = arith.constant 0 : i32
    return %c0_i32, %c0_i32_0, %c0_i32_1 : i32, i32, i32
  }
  func.func @transform_5(%arg0: i32) -> (i32, i32, i32) {
    %c0_i32 = arith.constant 0 : i32
    %c0_i32_0 = arith.constant 0 : i32
    %c0_i32_1 = arith.constant 0 : i32
    return %arg0, %c0_i32, %c0_i32_0 : i32, i32, i32
  }
}

</mosaic_0001>

<bundles_post_ra>
// kernel: tpu_custom_call.1
= control target key start
LH: loop header
LB: loop body
LE: loop exit
PB: predicated region body
PF: predicated region fallthrough
CT: control target
= control target key end

     0   :  { %10 = vsyncpa [#allocation5], 0  ;;  %s9426_s0 = inlined_call_operand.hbm [shape: f32[2,8,1280], index: 0, kind: input, shape index: {}]   ;;  %s9427_s1 = inlined_call_operand.vmem [shape: f32[1,1280], index: 1, kind: input, shape index: {}]   ;;  %s9428_s2 = inlined_call_operand.vmem [shape: bf16[8,72], index: 2, kind: input, shape index: {}]   ;;  %s9429_s3 = inlined_call_operand.vmem [shape: bf16[5,8,72], index: 3, kind: input, shape index: {}]   ;;  %s9430_s4 = inlined_call_operand.vmem [shape: f32[6,8,1], index: 4, kind: input, shape index: {}]   ;;  %s9431_s5 = inlined_call_operand.hbm [shape: f32[2,8,1280], index: 5, kind: output, shape index: {}]  }
   0x1   :  { %12 = vsyncpa [#allocation5 + $0x1], 0 }
   0x2   :  { %13 = vsyncpa [#allocation6], 0 }
   0x3   :  { %15 = vsyncpa [#allocation6 + $0x1], 0  ;;  %s7035_s18 = smov 0   ;;  %s7037_s19 = smov 0  }
   0x4   :  { %s7039_s20 = smov 0   ;;  %s7041_s21 = smov 0  }
   0x5 LB: > { %s7056_s22 = sadd.s32 4294967295, %s6976_s21   ;;  %s5522_s23 = sadd.s32 4294967294, %s6976_s21   ;;  %s6976_s21 = sphi %s7041_s21, %s9583_s21   ;;  %s6972_s20 = sphi %s7039_s20, %s9582_s20   ;;  %s6968_s19 = sphi %s7037_s19, %s9581_s19   ;;  %s6964_s18 = sphi %s7035_s18, %s9580_s18  }
   0x6   : > { %s7060_s24 = sadd.s32 1, %s6976_s21   ;;  %s28_s25 = sadd.s32 1, %s6972_s20 }
   0x7   : > { %s25_s26 = ssub.s32 %s6976_s21, %s7060_s24  ;;  %p35_p0 = scmp.ne.s32.totalorder %s6972_s20, %s6968_s19 }
   0x8   : > { %p26_p1 = scmp.eq.s32.totalorder %s25_s26, 0  ;;  %p36_p2 = scmp.eq.s32.totalorder %s6976_s21, 0 }
   0x9   : > { %p41_p3 = scmp.ne.s32.totalorder %s6968_s19, %s6964_s18  ;;  %p42_p4 = scmp.eq.s32.totalorder %s7056_s22, 0 }
   0xa   : > { %s7072_s27 = scalar_select %p26_p1, %s6972_s20, %s28_s25  }
   0xb   : > { %p37_p5 = por %p36_p2, %p35_p0  ;;  %p7074_p6 = por %p42_p4, %p41_p3 }
   0xc   : > { %p149_p7 = scmp.eq.s32.totalorder %s7056_s22, 1  ;;  %p155_p8 = scmp.eq.s32.totalorder %s5522_s23, 1 }
   0xd   : > { %p5524_p9 = scmp.ge.s32.totalorder %s6976_s21, 2  ;;  %p6816_p10 = scmp.lt.s32.totalorder %s6976_s21, 2 }
   0xe   : > { %p7081_p11 = por %p149_p7, %p35_p0  ;;  %p7085_p12 = por %p155_p8, %p41_p3 }
   0xf   : > { %s187_s6 = sand.u32 1, %s6972_s20   ;;  %s6801_s7 = smul.u32 80, %s6976_s21 }
  0x10   : > { %s6800_s8 = smul.u32 80, %s187_s6  ;;  %p7094_p13 = pnand %p6816_p10, %p37_p5 }
  0x11   : > { %s196_s11 = scalar_lea.hbm %s9426_s0, %s6801_s7  ;;  %s188_s16 = scalar_lea.sflag [#allocation5], %s187_s6 }
  0x12   : > { %s198_s13 = sshll.u32 %s196_s11, 4  ;;  %s191_s14 = scalar_lea.vmem [#allocation4], %s6800_s8  ;;  %s199_s13 = int_to_ptr.hbm [resolvable:$true] %s198_s13 }
  0x13   : > { %s200_s15 = sshll.u32 %s191_s14, 4  ;;  %s6880_s17 = sshra.s32 %s199_s13, 4  ;;  %s201_s15 = int_to_ptr.vmem [resolvable:$true] %s200_s15  ;;  %s6881_s17 = int_to_ptr.hbm [resolvable:$true] %s6880_s17 }
  0x14   : > { %s6882_s23 = scalar_lea.hbm %s6881_s17, 80  ;;  %p6884_p1 = pneg %p7094_p13 }
  0x15   : > { %p6883_p0 = scmp.ne.s32.totalorder %s6881_s17, %s6882_s23  ;;  %s6887_s7 = scalar_lea.hbm %s9426_s0, 160 }
  0x16   : > { %p6888_p4 = scmp.lt.s32.totalorder %s6881_s17, %s9426_s0  ;;  %p6889_p5 = scmp.lt.s32.totalorder %s6887_s7, %s6882_s23 }
  0x17   : > { %p6885_p2 = pnand %p6884_p1, %p6883_p0 }
  0x18   : > { %p6890_p7 = por %p6889_p5, %p6888_p4 }
  0x19   : > { %p6886_p3 = pneg %p6885_p2 }
  0x1b   : > { %p6891_p8 = pnand %p6890_p7, %p6886_p3 }
  0x1d   : > { %6894 = shalt.err (!%p6891_p8)
}
  0x1e   : > { %6811 = dma.hbm_to_vmem [thread:$0]  (!%p7094_p13), %s199_s13, 1280, %s201_s15, %s188_s16  }
  0x1f   : > { %p5526_p10 = scmp.ge.s32.totalorder %s6976_s21, 1  ;;  %p205_p0 = scmp.lt.s32.totalorder %s6976_s21, 3 }
  0x21   : > { %p206_p1 = pnand %p5526_p10, %p205_p0 }
  0x23   : > { %209 = sbr.rel (%p206_p1) target bundleno = 2080 (0x820), region = 40 }
  0x28   : > { %s7111_s6 = sand.u32 1, %s6968_s19  }
  0x29   : > { %s6802_s8 = smul.u32 80, %s7111_s6  ;;  %s212_s11 = scalar_lea.sflag [#allocation5], %s7111_s6 }
  0x2b   : > { %s7115_s14 = scalar_lea.vmem [#allocation4], %s6802_s8 }
  0x2c   : > { %6955 = dma.done.wait (%p7074_p6), %s212_s11, 1280  }
  0x2d   : > { %6957 = vsyncadd (%p7074_p6), %s212_s11, 4294966016  ;;  %s7121_s12 = scalar_lea.vmem [#allocation7], %s6802_s8  ;;  %p5527_p13 = scmp.ne.s32.totalorder %s7056_s22, 0 }
  0x2f   : > { %247 = sbr.rel (%p5527_p13) target bundleno = 79 (0x4f), region = 48 }
  0x34   : > { %v6978_v0 = vmov 0  }
  0x35   : > { %248 = vst [vmem:[#allocation2] sm:$0xff] %v6978_v0 }
  0x36   : > { %249 = vst [vmem:[#allocation2 + $0x8] sm:$0xff] %v6978_v0 }
  0x37   : > { %250 = vst [vmem:[#allocation2 + $0x10] sm:$0xff] %v6978_v0 }
  0x38   : > { %251 = vst [vmem:[#allocation2 + $0x18] sm:$0xff] %v6978_v0 }
  0x39   : > { %252 = vst [vmem:[#allocation2 + $0x20] sm:$0xff] %v6978_v0 }
  0x3a   : > { %253 = vst [vmem:[#allocation2 + $0x28] sm:$0xff] %v6978_v0 }
  0x3b   : > { %254 = vst [vmem:[#allocation2 + $0x30] sm:$0xff] %v6978_v0 }
  0x3c   : > { %255 = vst [vmem:[#allocation2 + $0x38] sm:$0xff] %v6978_v0 }
  0x3d   : > { %256 = vst [vmem:[#allocation2 + $0x40] sm:$0xff] %v6978_v0 }
  0x3e   : > { %257 = vst [vmem:[#allocation2 + $0x48] sm:$0xff] %v6978_v0 }
  0x3f   : > { %258 = vst [vmem:[#allocation2 + $0x50] sm:$0xff] %v6978_v0 }
  0x40   : > { %259 = vst [vmem:[#allocation2 + $0x58] sm:$0xff] %v6978_v0 }
  0x41   : > { %260 = vst [vmem:[#allocation2 + $0x60] sm:$0xff] %v6978_v0 }
  0x42   : > { %261 = vst [vmem:[#allocation2 + $0x68] sm:$0xff] %v6978_v0 }
  0x43   : > { %262 = vst [vmem:[#allocation2 + $0x70] sm:$0xff] %v6978_v0 }
  0x44   : > { %263 = vst [vmem:[#allocation2 + $0x78] sm:$0xff] %v6978_v0 }
  0x45   : > { %264 = vst [vmem:[#allocation2 + $0x80] sm:$0xff] %v6978_v0 }
  0x46   : > { %265 = vst [vmem:[#allocation2 + $0x88] sm:$0xff] %v6978_v0 }
  0x47   : > { %266 = vst [vmem:[#allocation2 + $0x90] sm:$0xff] %v6978_v0 }
  0x48   : > { %267 = vst [vmem:[#allocation2 + $0x98] sm:$0xff] %v6978_v0 }
  0x49   : > { %268 = vst [vmem:[#allocation2 + $0xa0] sm:$0xff] %v6978_v0 }
  0x4a   : > { %269 = vst [vmem:[#allocation2 + $0xa8] sm:$0xff] %v6978_v0 }
  0x4b   : > { %270 = vst [vmem:[#allocation2 + $0xb0] sm:$0xff] %v6978_v0 }
  0x4c   : > { %271 = vst [vmem:[#allocation2 + $0xb8] sm:$0xff] %v6978_v0 }
  0x4d   : > { %272 = vst [vmem:[#allocation2 + $0xc0] sm:$0xff] %v6978_v0 }
  0x4e   : > { %273 = vst [vmem:[#allocation2 + $0xc8] sm:$0xff] %v6978_v0 }
  0x4f PF: > { %v298_v1 = vld [vmem:[%s7115_s14] sm:$0xff]  ;;  %v299_v2 = vld [vmem:[%s7115_s14 + $0x8] sm:$0xff]  ;;  %v300_v3 = vld [vmem:[%s7115_s14 + $0x10] sm:$0xff]  ;;  %s6979_s28 = smov 47   ;;  %s6980_s13 = smov 48   ;;  %vm348_vm0 = vcmask 1043456  }
  0x50   : > { %v308_v4 = vpack.c.bf16 %v299_v2, %v298_v1  ;;  %v301_v5 = vld [vmem:[%s7115_s14 + $0x18] sm:$0xff]  ;;  %v302_v6 = vld [vmem:[%s7115_s14 + $0x20] sm:$0xff]  ;;  %v303_v7 = vld [vmem:[%s7115_s14 + $0x28] sm:$0xff]  ;;  %s6981_s15 = smov 49   ;;  %s6982_s16 = smov 127   ;;  %vm666_vm1 = vcmask 392192  }
  0x51   : > { %v309_v8 = vpack.c.bf16 %v301_v5, %v300_v3  ;;  %v304_v9 = vld [vmem:[%s7115_s14 + $0x30] sm:$0xff]  ;;  %v305_v10 = vld [vmem:[%s7115_s14 + $0x38] sm:$0xff]  ;;  %v310_v11 = vpack.c.bf16 %v303_v7, %v302_v6  ;;  %s6983_s17 = smov 1   ;;  %s6984_s23 = smov 79   ;;  %v306_v15 = vld [vmem:[%s7115_s14 + $0x40] sm:$0xff]  ;;  %vm717_vm2 = vcmask 384000  }
  0x52   : > { %313 = vst [vmem:[#allocation2 + $0x54] sm:$0xff] %v308_v4  ;;  %698 = vrot.lane.b32.xlu0 %v308_v4, %s6979_s28  ;;  %647 = vrot.lane.b32.xlu2 %v308_v4, %s6980_s13  ;;  %v311_v12 = vpack.c.bf16 %v305_v10, %v304_v9  ;;  %v307_v16 = vld [vmem:[%s7115_s14 + $0x48] sm:$0xff]  ;;  %s6985_s25 = smov 81   ;;  %s6986_s26 = smov 80   ;;  %vm615_vm3 = vcmask 400384   ;;  %vm564_vm4 = vcmask 1039360  }
  0x53   : > { %596 = vrot.lane.b32.xlu1 %v308_v4, %s6981_s15  ;;  %314 = vst [vmem:[#allocation2 + $0x5c] sm:$0xff] %v309_v8  ;;  %v312_v17 = vpack.c.bf16 %v307_v16, %v306_v15  ;;  %v691_v20 = vld [vmem:[#allocation2 + $0x7c] sm:$0xf]  ;;  %vm452_vm5 = vcmask 646144   ;;  %vm503_vm6 = vcmask 7168   ;;  %vm350_vm7 = vcmask 662528  }
  0x54   : > { %315 = vst [vmem:[#allocation2 + $0x64] sm:$0xff] %v310_v11  ;;  %v640_v22 = vld [vmem:[#allocation2 + $0x7c] sm:$0xf]  ;;  %vm401_vm8 = vcmask 654336   ;;  %vm1014_vm9 = vcmask 588800   ;;  %s6988_s11 = smov 30  }
  0x55   : > { %316 = vst [vmem:[#allocation2 + $0x6c] sm:$0xff] %v311_v12  ;;  %v589_v23 = vld [vmem:[#allocation2 + $0x7c] sm:$0xf]  ;;  %s6989_s14 = smov 32   ;;  %vm1342_vm10 = vcmask 244736   ;;  %vm1240_vm11 = vcmask 277504  }
  0x56   : > { %528 = vst [vmem:[#allocation3 + $0xa0] sm:$0xff] %v308_v4  ;;  %v538_v29 = vld [vmem:[#allocation2 + $0x7c] sm:$0xf]  ;;  %vm1291_vm12 = vcmask 261120   ;;  %vm1607_vm13 = vcmask 769024   ;;  %vm1454_vm14 = vcmask 1031168  }
  0x57   : > { %529 = vst [vmem:[#allocation3 + $0xa8] sm:$0xff] %v309_v8  ;;  %vm1505_vm15 = vcmask 801792   ;;  %s7001_s9 = smov 120  }
  0x58   : > { %530 = vst [vmem:[#allocation3 + $0xb0] sm:$0xff] %v310_v11 }
  0x59   : > { %531 = vst [vmem:[#allocation3 + $0xb8] sm:$0xff] %v311_v12  ;;  %v472_v13 = vld [vmem:[#allocation2 + $0x50] sm:$0xff] }
  0x5a   : > { %700 = vrot.lane.b32.xlu0 %v309_v8, %s6979_s28  ;;  %649 = vrot.lane.b32.xlu2 %v309_v8, %s6980_s13  ;;  %v422_v14 = vld [vmem:[#allocation2 + $0x58] sm:$0xff]  ;;  %317 = vst [vmem:[#allocation2 + $0x74] sm:$0xff] %v312_v17 }
  0x5b   : > { %598 = vrot.lane.b32.xlu1 %v309_v8, %s6981_s15  ;;  %532 = vst [vmem:[#allocation3 + $0xc0] sm:$0xff] %v312_v17  ;;  %v423_v18 = vld [vmem:[#allocation2 + $0x60] sm:$0xff] }
  0x5c   : > { %v424_v19 = vld [vmem:[#allocation2 + $0x68] sm:$0xff] }
  0x61   : > { %v425_v28 = vld [vmem:[#allocation2 + $0x70] sm:$0xff]  ;;  %v426_v32 = vld [vmem:[#allocation2 + $0x78] sm:$0xf] }
  0x62   : > { %702 = vrot.lane.b32.xlu0 %v310_v11, %s6979_s28  ;;  %547 = vrot.lane.b32.xlu2 %v309_v8, %s6982_s16  ;;  %v477_v36 = vld [vmem:[#allocation2 + $0x78] sm:$0xf] }
  0x63   : > { %545 = vrot.lane.b32.xlu1 %v308_v4, %s6982_s16  ;;  %v375_v37 = vld [vmem:[#allocation2 + $0x78] sm:$0xf] }
  0x64   : > { %v323_v38 = vld [vmem:[#allocation2 + $0x78] sm:$0xf] }
  0x6a   : > { %484 = vrot.lane.b32.xlu2 %v472_v13, %s6983_s17  ;;  %433 = vrot.lane.b32.xlu0 %v472_v13, %s6984_s23 }
  0x6b   : > { %435 = vrot.lane.b32.xlu1 %v422_v14, %s6984_s23 }
  0x72   : > { %600 = vrot.lane.b32.xlu2 %v310_v11, %s6981_s15  ;;  %486 = vrot.lane.b32.xlu0 %v422_v14, %s6983_s17 }
  0x73   : > { %704 = vrot.lane.b32.xlu1 %v311_v12, %s6979_s28 }
  0x7a   : > { %651 = vrot.lane.b32.xlu0 %v310_v11, %s6980_s13  ;;  %332 = vrot.lane.b32.xlu2 %v422_v14, %s6985_s25 }
  0x7b   : > { %330 = vrot.lane.b32.xlu1 %v472_v13, %s6985_s25 }
  0x82   : > { %382 = vrot.lane.b32.xlu0 %v472_v13, %s6986_s26  ;;  %549 = vrot.lane.b32.xlu2 %v310_v11, %s6982_s16 }
  0x83   : > { %384 = vrot.lane.b32.xlu1 %v422_v14, %s6986_s26 }
  0x8a   : > { %602 = vrot.lane.b32.xlu0 %v311_v12, %s6981_s15  ;;  %437 = vrot.lane.b32.xlu2 %v423_v18, %s6984_s23 }
  0x8b   : > { %653 = vrot.lane.b32.xlu1 %v311_v12, %s6980_s13 }
  0x92   : > { %488 = vrot.lane.b32.xlu0 %v423_v18, %s6983_s17  ;;  %551 = vrot.lane.b32.xlu2 %v311_v12, %s6982_s16 }
  0x93   : > { %706 = vrot.lane.b32.xlu1 %v312_v17, %s6979_s28 }
  0x9a   : > { %334 = vrot.lane.b32.xlu0 %v423_v18, %s6985_s25  ;;  %439 = vrot.lane.b32.xlu2 %v424_v19, %s6984_s23 }
  0x9b   : > { %386 = vrot.lane.b32.xlu1 %v423_v18, %s6986_s26 }
  0xa2   : > { %490 = vrot.lane.b32.xlu0 %v424_v19, %s6983_s17  ;;  %604 = vrot.lane.b32.xlu2 %v312_v17, %s6981_s15 }
  0xa3   : > { %708 = vrot.lane.b32.xlu1 %v691_v20, %s6979_s28  ;;  %s6990_s28 = smov 34  }
  0xaa   : > { %655 = vrot.lane.b32.xlu0 %v312_v17, %s6980_s13  ;;  %388 = vrot.lane.b32.xlu2 %v424_v19, %s6986_s26 }
  0xab   : > { %336 = vrot.lane.b32.xlu1 %v424_v19, %s6985_s25 }
  0xac   : > { %v648_v21 = vpop.permute.xlu2 %647 }
  0xad   : > { %v659_v24 = vrot.slane %v648_v21, 4 }
  0xb2   : > { %553 = vrot.lane.b32.xlu0 %v312_v17, %s6982_s16  ;;  %657 = vrot.lane.b32.xlu2 %v640_v22, %s6980_s13  ;;  %s6991_s13 = smov 94  }
  0xb3   : > { %606 = vrot.lane.b32.xlu1 %v589_v23, %s6981_s15  ;;  %s6992_s15 = smov 98  }
  0xb4   : > { %v7173_v25 = vpop.permute.xlu2 %649 }
  0xb5   : > { %v660_v26 = vrot.slane %v7173_v25, 4 }
  0xb7   : > { %v665_v27 = vsel %vm348_vm0, %v659_v24, %v660_v26  ;;  %v5610_v24 = vld [vmem:[#allocation3 + $0xa0] sm:$0xf] }
  0xb8   : > { %v667_v30 = vsel %vm666_vm1, %v648_v21, %v665_v27  ;;  %v6580_v27 = vld [vmem:[#allocation3 + $0xa4] sm:$0xf] }
  0xb9   : > { %681 = vst [vmem:[#allocation3 + $0x118] sm:$0xff] %v667_v30 }
  0xba   : > { %441 = vrot.lane.b32.xlu0 %v425_v28, %s6984_s23  ;;  %555 = vrot.lane.b32.xlu2 %v538_v29, %s6982_s16  ;;  %s6998_s16 = smov 64  }
  0xbb   : > { %492 = vrot.lane.b32.xlu1 %v425_v28, %s6983_s17 }
  0xbc   : > { %v7183_v31 = vpop.permute.xlu2 %547 }
  0xbd   : > { %v558_v57 = vrot.slane %v7183_v31, 4 }
  0xc0   : > { %v6595_v4 = vld [vmem:[#allocation3 + $0x114] sm:$0xf0]  ;;  %v5652_v8 = vld [vmem:[#allocation3 + $0x118] sm:$0xf0] }
  0xc2   : > { %338 = vrot.lane.b32.xlu0 %v425_v28, %s6985_s25  ;;  %443 = vrot.lane.b32.xlu2 %v426_v32, %s6984_s23  ;;  %s6993_s23 = smov 96  }
  0xc3   : > { %390 = vrot.lane.b32.xlu1 %v425_v28, %s6986_s26 }
  0xc4   : > { %v699_v33 = vpop.permute.xlu0 %698  ;;  %v7188_v34 = vpop.permute.xlu2 %484 }
  0xc5   : > { %v597_v35 = vpop.permute.xlu1 %596  ;;  %v710_v41 = vrot.slane %v699_v33, 4 }
  0xc6   : > { %v608_v45 = vrot.slane %v597_v35, 4 }
  0xca   : > { %494 = vrot.lane.b32.xlu0 %v477_v36, %s6983_s17  ;;  %392 = vrot.lane.b32.xlu2 %v375_v37, %s6986_s26  ;;  %s6995_s26 = smov 2   ;;  %s6999_s17 = smov 124  }
  0xcb   : > { %340 = vrot.lane.b32.xlu1 %v323_v38, %s6985_s25  ;;  %s6994_s25 = smov 126  }
  0xcc   : > { %v701_v39 = vpop.permute.xlu0 %700  ;;  %v7193_v40 = vpop.permute.xlu2 %600 }
  0xcd   : > { %v711_v42 = vrot.slane %v701_v39, 4  ;;  %v599_v43 = vpop.permute.xlu1 %598  ;;  %v610_v44 = vrot.slane %v7193_v40, 4 }
  0xce   : > { %v609_v46 = vrot.slane %v599_v43, 4 }
  0xcf   : > { %v716_v47 = vsel %vm348_vm0, %v710_v41, %v711_v42 }
  0xd0   : > { %v718_v48 = vsel %vm717_vm2, %v699_v33, %v716_v47  ;;  %v614_v49 = vsel %vm348_vm0, %v608_v45, %v609_v46  ;;  %v617_v50 = vsel %vm348_vm0, %v609_v46, %v610_v44 }
  0xd1   : > { %v616_v51 = vsel %vm615_vm3, %v597_v35, %v614_v49  ;;  %v618_v52 = vsel %vm615_vm3, %v599_v43, %v617_v50  ;;  %v914_v53 = vunpack.c.l.b16 %v718_v48  ;;  %v915_v54 = vunpack.c.h.b16 %v718_v48 }
  0xd2   : > { %630 = vst [vmem:[#allocation3 + $0xf0] sm:$0xff] %v616_v51 }
  0xd3   : > { %631 = vst [vmem:[#allocation3 + $0xf8] sm:$0xff] %v618_v52  ;;  %v964_v55 = vpack.c.b16 %v914_v53, %v914_v53  ;;  %v965_v56 = vpack.c.b16 %v915_v54, %v915_v54 }
  0xd4   : > { %v7205_v58 = vpop.permute.xlu0 %702  ;;  %v7207_v59 = vpop.permute.xlu2 %332 }
  0xd5   : > { %v712_v60 = vrot.slane %v7205_v58, 4  ;;  %v546_v61 = vpop.permute.xlu1 %545  ;;  %v1020_v62 = vsel %vm348_vm0, %v964_v55, 0  ;;  %v1023_v63 = vsel %vm348_vm0, %v965_v56, 0  ;;  %v343_v48 = vrot.slane %v7207_v59, 4 }
  0xd6   : > { %v557_v0 = vrot.slane %v546_v61, 4  ;;  %1052 = vmatpush.bf16.msra.mxu0 %v1020_v62  ;;  %1065 = vmatpush.bf16.msra.mxu1 %v1023_v63 }
  0xd7   : > { %v719_v1 = vsel %vm348_vm0, %v711_v42, %v712_v60 }
  0xd8   : > { %v720_v2 = vsel %vm717_vm2, %v701_v39, %v719_v1  ;;  %v563_v3 = vsel %vm348_vm0, %v557_v0, %v558_v57  ;;  %v496_v39 = vrot.slane %v7188_v34, 4 }
  0xd9   : > { %v565_v5 = vsel %vm564_vm4, %v546_v61, %v563_v3  ;;  %v5650_v6 = vld [vmem:[#allocation3 + $0xf0] sm:$0xf]  ;;  %v6590_v7 = vld [vmem:[#allocation3 + $0xf4] sm:$0xf]  ;;  %v916_v9 = vunpack.c.l.b16 %v720_v2  ;;  %v917_v10 = vunpack.c.h.b16 %v720_v2 }
  0xda   : > { %579 = vst [vmem:[#allocation3 + $0xc8] sm:$0xff] %v565_v5  ;;  %v5651_v11 = vor.u32 %v6595_v4, %v5650_v6  ;;  %v5655_v12 = vor.u32 %v6590_v7, %v5652_v8  ;;  %v6987_v7 = vmov 0  }
  0xdb   : > { %v966_v13 = vpack.c.b16 %v916_v9, %v916_v9  ;;  %v967_v14 = vpack.c.b16 %v917_v10, %v917_v10  ;;  %6877 = vset.pattern.permute.xlu0 %v6987_v7  ;;  %6878 = vset.pattern.permute.xlu2 %v6987_v7 }
  0xdc   : > { %v434_v15 = vpop.permute.xlu0 %433  ;;  %v550_v16 = vpop.permute.xlu2 %549  ;;  %1053 = vmatpush.bf16.msra.mxu0 %v5651_v11  ;;  %1066 = vmatpush.bf16.msra.mxu1 %v5655_v12 }
  0xdd   : > { %v436_v17 = vpop.permute.xlu1 %435  ;;  %v445_v18 = vrot.slane %v434_v15, 4  ;;  %v559_v19 = vrot.slane %v550_v16, 4  ;;  %v1026_v20 = vsel %vm348_vm0, %v966_v13, 0  ;;  %v1029_v21 = vsel %vm348_vm0, %v967_v14, 0  ;;  %6879 = vset.pattern.permute.xlu1 %v6987_v7  ;;  %v5658_v14 = vld [vmem:[#allocation3 + $0xf8] sm:$0xf] }
  0xde   : > { %v446_v22 = vrot.slane %v436_v17, 4  ;;  %1078 = vmatpush.bf16.msra.mxu2 %v1026_v20  ;;  %1091 = vmatpush.bf16.msra.mxu3 %v1029_v21 }
  0xdf   : > { %v566_v23 = vsel %vm348_vm0, %v558_v57, %v559_v19 }
  0xe0   : > { %v451_v28 = vsel %vm348_vm0, %v445_v18, %v446_v22  ;;  %v567_v29 = vsel %vm564_vm4, %v7183_v31, %v566_v23  ;;  %v6591_v18 = vld [vmem:[#allocation3 + $0xfc] sm:$0xf]  ;;  %v5618_v23 = vld [vmem:[#allocation3 + $0xa8] sm:$0xf] }
  0xe1   : > { %v453_v30 = vsel %vm452_vm5, %v434_v15, %v451_v28  ;;  %580 = vst [vmem:[#allocation3 + $0xd0] sm:$0xff] %v567_v29  ;;  %v6585_v32 = vld [vmem:[#allocation3 + $0xc4] sm:$0xf0]  ;;  %v5612_v33 = vld [vmem:[#allocation3 + $0xc8] sm:$0xf0] }
  0xe2   : > { %467 = vst [vmem:[#allocation3 + $0x50] sm:$0xff] %v453_v30  ;;  %v5611_v35 = vor.u32 %v6585_v32, %v5610_v24  ;;  %v5615_v36 = vor.u32 %v6580_v27, %v5612_v33  ;;  %v6581_v24 = vld [vmem:[#allocation3 + $0xac] sm:$0xf] }
  0xe4   : > { %v7225_v37 = vpop.permute.xlu0 %486  ;;  %v438_v38 = vpop.permute.xlu2 %437  ;;  %1054 = vmatpush.bf16.msra.mxu0 %v5611_v35  ;;  %1067 = vmatpush.bf16.msra.mxu1 %v5615_v36 }
  0xe5   : > { %v7228_v41 = vpop.permute.xlu1 %704  ;;  %v497_v31 = vrot.slane %v7225_v37, 4  ;;  %v447_v42 = vrot.slane %v438_v38, 4 }
  0xe6   : > { %v713_v2 = vrot.slane %v7228_v41, 4 }
  0xe7   : > { %v502_v43 = vsel %vm348_vm0, %v496_v39, %v497_v31  ;;  %v454_v45 = vsel %vm348_vm0, %v446_v22, %v447_v42 }
  0xe8   : > { %v504_v46 = vsel %vm503_vm6, %v7188_v34, %v502_v43  ;;  %v455_v47 = vsel %vm452_vm5, %v436_v17, %v454_v45  ;;  %v721_v8 = vsel %vm348_vm0, %v712_v60, %v713_v2  ;;  %v6586_v27 = vld [vmem:[#allocation3 + $0xcc] sm:$0xf0]  ;;  %v5620_v28 = vld [vmem:[#allocation3 + $0xd0] sm:$0xf0] }
  0xe9   : > { %518 = vst [vmem:[#allocation3 + $0x78] sm:$0xff] %v504_v46  ;;  %v5570_v56 = vld [vmem:[#allocation3 + $0x50] sm:$0xf]  ;;  %v6570_v0 = vld [vmem:[#allocation3 + $0x54] sm:$0xf]  ;;  %v722_v15 = vsel %vm717_vm2, %v7205_v58, %v721_v8  ;;  %v5623_v39 = vor.u32 %v6581_v24, %v5620_v28 }
  0xea   : > { %468 = vst [vmem:[#allocation3 + $0x58] sm:$0xff] %v455_v47  ;;  %v918_v58 = vunpack.c.l.b16 %v722_v15  ;;  %v919_v32 = vunpack.c.h.b16 %v722_v15  ;;  %v5626_v15 = vld [vmem:[#allocation3 + $0xb0] sm:$0xf] }
  0xec   : > { %v7239_v49 = vpop.permute.xlu0 %651  ;;  %v7241_v50 = vpop.permute.xlu2 %551  ;;  %v968_v46 = vpack.c.b16 %v918_v58, %v918_v58 }
  0xed   : > { %v661_v51 = vrot.slane %v7239_v49, 4  ;;  %v560_v52 = vrot.slane %v7241_v50, 4  ;;  %v331_v53 = vpop.permute.xlu1 %330 }
  0xee   : > { %v342_v54 = vrot.slane %v331_v53, 4 }
  0xef   : > { %v668_v34 = vsel %vm348_vm0, %v660_v26, %v661_v51  ;;  %v568_v55 = vsel %vm348_vm0, %v559_v19, %v560_v52 }
  0xf0   : > { %v669_v57 = vsel %vm666_vm1, %v7173_v25, %v668_v34  ;;  %v569_v61 = vsel %vm564_vm4, %v550_v16, %v568_v55  ;;  %v349_v62 = vsel %vm348_vm0, %v342_v54, %v343_v48  ;;  %v6575_v63 = vld [vmem:[#allocation3 + $0x74] sm:$0xf0]  ;;  %v5572_v1 = vld [vmem:[#allocation3 + $0x78] sm:$0xf0]  ;;  %v783_v25 = vld [vmem:[%s9430_s4] sm:$0xff]  ;;  %v969_v55 = vpack.c.b16 %v919_v32, %v919_v32 }
  0xf1   : > { %682 = vst [vmem:[#allocation3 + $0x120] sm:$0xff] %v669_v57  ;;  %v351_v26 = vsel %vm350_vm7, %v331_v53, %v349_v62  ;;  %v5571_v3 = vor.u32 %v6575_v63, %v5570_v56  ;;  %v5575_v4 = vor.u32 %v6570_v0, %v5572_v1  ;;  %786 = vperm.xlu0 %6877, %v783_v25   ;;  %v1032_v0 = vsel %vm348_vm0, %v968_v46, 0  ;;  %v7314_v1 = vld [vmem:[%s9428_s2] sm:$0xf]  ;;  %v5578_v32 = vld [vmem:[#allocation3 + $0x58] sm:$0xf] }
  0xf2   : > { %581 = vst [vmem:[#allocation3 + $0xd8] sm:$0xff] %v569_v61 }
  0xf3   : > { %365 = vst [vmem:[#allocation3] sm:$0xff] %v351_v26  ;;  %1055 = vmatpush.bf16.msra.mxu0 %v5571_v3  ;;  %1068 = vmatpush.bf16.msra.mxu1 %v5575_v4 }
  0xf4   : > { %v383_v5 = vpop.permute.xlu0 %382  ;;  %v7264_v6 = vpop.permute.xlu2 %439 }
  0xf5   : > { %v394_v9 = vrot.slane %v383_v5, 4  ;;  %v448_v10 = vrot.slane %v7264_v6, 4  ;;  %v7272_v11 = vpop.permute.xlu1 %384 }
  0xf6   : > { %v395_v12 = vrot.slane %v7272_v11, 4 }
  0xf7   : > { %v456_v13 = vsel %vm348_vm0, %v447_v42, %v448_v10 }
  0xf8   : > { %v457_v60 = vsel %vm452_vm5, %v438_v38, %v456_v13  ;;  %v400_v16 = vsel %vm348_vm0, %v394_v9, %v395_v12  ;;  %v6596_v17 = vld [vmem:[#allocation3 + $0x11c] sm:$0xf0]  ;;  %v5660_v19 = vld [vmem:[#allocation3 + $0x120] sm:$0xf0]  ;;  %v5619_v38 = vor.u32 %v6586_v27, %v5618_v23 }
  0xf9   : > { %469 = vst [vmem:[#allocation3 + $0x60] sm:$0xff] %v457_v60  ;;  %v402_v20 = vsel %vm401_vm8, %v383_v5, %v400_v16  ;;  %v5659_v21 = vor.u32 %v6596_v17, %v5658_v14  ;;  %v5663_v22 = vor.u32 %v6591_v18, %v5660_v19  ;;  %v6582_v60 = vld [vmem:[#allocation3 + $0xb4] sm:$0xf]  ;;  %v6587_v18 = vld [vmem:[#allocation3 + $0xd4] sm:$0xf0] }
  0xfa   : > { %416 = vst [vmem:[#allocation3 + $0x28] sm:$0xff] %v402_v20  ;;  %v5530_v34 = vld [vmem:[#allocation3] sm:$0xf]  ;;  %v5628_v19 = vld [vmem:[#allocation3 + $0xd8] sm:$0xf0]  ;;  %v5627_v24 = vor.u32 %v6587_v18, %v5626_v15 }
  0xfb   : > { %1079 = vmatpush.bf16.msra.mxu2 %v5659_v21  ;;  %1092 = vmatpush.bf16.msra.mxu3 %v5663_v22  ;;  %v5631_v27 = vor.u32 %v6582_v60, %v5628_v19 }
  0xfc   : > { %v603_v29 = vpop.permute.xlu0 %602  ;;  %v7285_v30 = vpop.permute.xlu2 %604 }
  0xfd   : > { %v611_v33 = vrot.slane %v603_v29, 4  ;;  %v612_v35 = vrot.slane %v7285_v30, 4  ;;  %v7288_v36 = vpop.permute.xlu1 %653 }
  0xfe   : > { %v662_v42 = vrot.slane %v7288_v36, 4 }
  0xff   : > { %v619_v43 = vsel %vm348_vm0, %v610_v44, %v611_v33  ;;  %v621_v45 = vsel %vm348_vm0, %v611_v33, %v612_v35  ;;  %1080 = vmatpush.bf16.msra.mxu2 %v5619_v38  ;;  %1093 = vmatpush.bf16.msra.mxu3 %v5623_v39  ;;  %v6560_v44 = vld [vmem:[#allocation3 + $0x4] sm:$0xf]  ;;  %v6571_v39 = vld [vmem:[#allocation3 + $0x5c] sm:$0xf] }
 0x100   : > { %v620_v47 = vsel %vm615_vm3, %v7193_v40, %v619_v43  ;;  %v622_v53 = vsel %vm615_vm3, %v603_v29, %v621_v45  ;;  %v670_v54 = vsel %vm348_vm0, %v661_v51, %v662_v42  ;;  %v1035_v51 = vsel %vm348_vm0, %v969_v55, 0  ;;  %v5586_v60 = vld [vmem:[#allocation3 + $0x60] sm:$0xf] }
 0x101   : > { %632 = vst [vmem:[#allocation3 + $0x100] sm:$0xff] %v620_v47  ;;  %v671_v56 = vsel %vm666_vm1, %v7239_v49, %v670_v54  ;;  %v6565_v57 = vld [vmem:[#allocation3 + $0x24] sm:$0xf0]  ;;  %v5532_v61 = vld [vmem:[#allocation3 + $0x28] sm:$0xf0] }
 0x102   : > { %633 = vst [vmem:[#allocation3 + $0x108] sm:$0xff] %v622_v53  ;;  %v5531_v62 = vor.u32 %v6565_v57, %v5530_v34  ;;  %v5535_v40 = vor.u32 %v6560_v44, %v5532_v61 }
 0x103   : > { %683 = vst [vmem:[#allocation3 + $0x128] sm:$0xff] %v671_v56 }
 0x104   : > { %1056 = vmatpush.bf16.msra.mxu0 %v5531_v62  ;;  %1069 = vmatpush.bf16.msra.mxu1 %v5535_v40  ;;  %v7307_v63 = vpop.permute.xlu0 %488  ;;  %v7329_v8 = vpop.permute.xlu2 %388 }
 0x105   : > { %v498_v49 = vrot.slane %v7307_v63, 4  ;;  %v7317_v26 = vpop.permute.xlu1 %706  ;;  %v397_v17 = vrot.slane %v7329_v8, 4 }
 0x106   : > { %v714_v7 = vrot.slane %v7317_v26, 4 }
 0x107   : > { %v505_v3 = vsel %vm348_vm0, %v497_v31, %v498_v49  ;;  %5688 = vmatmul.msk.bf16.vlgmr.msra.gmra.mxu0 %vm1014_vm9, %v7314_v1  ;;  %5689 = vmatmul.msk.bf16.vlgmr.msra.gmra.mxu1 %vm1014_vm9, %v7314_v1 }
 0x108   : > { %1104 = vmatpush.bf16.msrb.mxu0 %v1032_v0  ;;  %1117 = vmatpush.bf16.msrb.mxu1 %v1035_v51  ;;  %v506_v4 = vsel %vm503_vm6, %v7225_v37, %v505_v3  ;;  %v5666_v25 = vld [vmem:[#allocation3 + $0x100] sm:$0xf]  ;;  %v6592_v5 = vld [vmem:[#allocation3 + $0x104] sm:$0xf]  ;;  %v723_v37 = vsel %vm348_vm0, %v713_v2, %v714_v7 }
 0x109   : > { %519 = vst [vmem:[#allocation3 + $0x80] sm:$0xff] %v506_v4  ;;  %v724_v28 = vsel %vm717_vm2, %v7228_v41, %v723_v37  ;;  %v6572_v37 = vld [vmem:[#allocation3 + $0x64] sm:$0xf] }
 0x10a   : > { %v6597_v9 = vld [vmem:[#allocation3 + $0x124] sm:$0xf0]  ;;  %v5668_v13 = vld [vmem:[#allocation3 + $0x128] sm:$0xf0]  ;;  %v920_v46 = vunpack.c.l.b16 %v724_v28  ;;  %v921_v47 = vunpack.c.h.b16 %v724_v28 }
 0x10b   : > { %v5667_v14 = vor.u32 %v6597_v9, %v5666_v25  ;;  %v5671_v31 = vor.u32 %v6592_v5, %v5668_v13 }
 0x10c   : > { %v7331_v16 = vpop.permute.xlu0 %334  ;;  %v970_v56 = vpack.c.b16 %v920_v46, %v920_v46  ;;  %v971_v57 = vpack.c.b16 %v921_v47, %v921_v47 }
 0x10d   : > { %1105 = vmatpush.bf16.msrb.mxu0 %v5667_v14  ;;  %1118 = vmatpush.bf16.msrb.mxu1 %v5671_v31  ;;  %v344_v20 = vrot.slane %v7331_v16, 4  ;;  %v387_v21 = vpop.permute.xlu1 %386 }
 0x10e   : > { %v396_v22 = vrot.slane %v387_v21, 4  ;;  %v1038_v25 = vsel %vm348_vm0, %v970_v56, 0 }
 0x10f   : > { %v352_v23 = vsel %vm348_vm0, %v343_v48, %v344_v20 }
 0x110   : > { %v353_v2 = vsel %vm350_vm7, %v7207_v59, %v352_v23  ;;  %v403_v58 = vsel %vm348_vm0, %v395_v12, %v396_v22  ;;  %v405_v29 = vsel %vm348_vm0, %v396_v22, %v397_v17  ;;  %v6576_v33 = vld [vmem:[#allocation3 + $0x7c] sm:$0xf0]  ;;  %v5580_v38 = vld [vmem:[#allocation3 + $0x80] sm:$0xf0]  ;;  %v658_v12 = vpop.permute.xlu2 %657 }
 0x111   : > { %366 = vst [vmem:[#allocation3 + $0x8] sm:$0xff] %v353_v2  ;;  %v404_v48 = vsel %vm401_vm8, %v7272_v11, %v403_v58  ;;  %v406_v41 = vsel %vm401_vm8, %v387_v21, %v405_v29  ;;  %1106 = vmatpush.bf16.msrb.mxu0 %v5627_v24  ;;  %1119 = vmatpush.bf16.msrb.mxu1 %v5631_v27  ;;  %v664_v3 = vrot.slane %v658_v12, 4 }
 0x112   : > { %v5579_v59 = vor.u32 %v6576_v33, %v5578_v32  ;;  %417 = vst [vmem:[#allocation3 + $0x30] sm:$0xff] %v404_v48  ;;  %v5583_v43 = vor.u32 %v6571_v39, %v5580_v38 }
 0x113   : > { %418 = vst [vmem:[#allocation3 + $0x38] sm:$0xff] %v406_v41 }
 0x114   : > { %1081 = vmatpush.bf16.msra.mxu2 %v5579_v59  ;;  %1094 = vmatpush.bf16.msra.mxu3 %v5583_v43  ;;  %v7358_v45 = vpop.permute.xlu0 %490  ;;  %v6593_v43 = vld [vmem:[#allocation3 + $0x10c] sm:$0xf] }
 0x115   : > { %v499_v53 = vrot.slane %v7358_v45, 4  ;;  %v709_v54 = vpop.permute.xlu1 %708 }
 0x116   : > { %v715_v40 = vrot.slane %v709_v54, 4 }
 0x117   : > { %v507_v11 = vsel %vm348_vm0, %v498_v49, %v499_v53  ;;  %v1041_v49 = vsel %vm348_vm0, %v971_v57, 0 }
 0x118   : > { %v508_v34 = vsel %vm503_vm6, %v7307_v63, %v507_v11  ;;  %v5538_v44 = vld [vmem:[#allocation3 + $0x8] sm:$0xf]  ;;  %v6561_v55 = vld [vmem:[#allocation3 + $0xc] sm:$0xf]  ;;  %v556_v9 = vpop.permute.xlu2 %555  ;;  %v725_v13 = vsel %vm348_vm0, %v714_v7, %v715_v40 }
 0x119   : > { %520 = vst [vmem:[#allocation3 + $0x88] sm:$0xff] %v508_v34  ;;  %v6566_v61 = vld [vmem:[#allocation3 + $0x2c] sm:$0xf0]  ;;  %v5540_v62 = vld [vmem:[#allocation3 + $0x30] sm:$0xf0]  ;;  %v726_v22 = vsel %vm717_vm2, %v7317_v26, %v725_v13  ;;  %v562_v27 = vrot.slane %v556_v9, 4 }
 0x11a   : > { %v5539_v0 = vor.u32 %v6566_v61, %v5538_v44  ;;  %v5543_v51 = vor.u32 %v6561_v55, %v5540_v62  ;;  %v922_v2 = vunpack.c.l.b16 %v726_v22  ;;  %v923_v29 = vunpack.c.h.b16 %v726_v22  ;;  %v6567_v47 = vld [vmem:[#allocation3 + $0x34] sm:$0xf0]  ;;  %v5548_v54 = vld [vmem:[#allocation3 + $0x38] sm:$0xf0] }
 0x11b   : > { %vm1556_vm2 = vcmask 785408  }
 0x11c   : > { %1082 = vmatpush.bf16.msra.mxu2 %v5539_v0  ;;  %1095 = vmatpush.bf16.msra.mxu3 %v5543_v51  ;;  %v656_v4 = vpop.permute.xlu0 %655  ;;  %v972_v46 = vpack.c.b16 %v922_v2, %v922_v2  ;;  %v973_v44 = vpack.c.b16 %v923_v29, %v923_v29 }
 0x11d   : > { %v663_v5 = vrot.slane %v656_v4, 4  ;;  %v7368_v63 = vpop.permute.xlu1 %336 }
 0x11e   : > { %v345_v14 = vrot.slane %v7368_v63, 4  ;;  %v1047_v40 = vsel %vm348_vm0, %v973_v44, 0 }
 0x11f   : > { %v672_v31 = vsel %vm348_vm0, %v662_v42, %v663_v5  ;;  %v674_v15 = vsel %vm348_vm0, %v663_v5, %v664_v3  ;;  %5690 = vmatmul.msk.bf16.vlgmr.msra.gmra.mxu2 %vm1014_vm9, %v7314_v1  ;;  %5691 = vmatmul.msk.bf16.vlgmr.msra.gmra.mxu3 %vm1014_vm9, %v7314_v1  ;;  %v5634_v3 = vld [vmem:[#allocation3 + $0xb8] sm:$0xf] }
 0x120   : > { %1130 = vmatpush.bf16.msrb.mxu2 %v1038_v25  ;;  %1143 = vmatpush.bf16.msrb.mxu3 %v1041_v49  ;;  %v673_v18 = vsel %vm666_vm1, %v7288_v36, %v672_v31  ;;  %v675_v7 = vsel %vm666_vm1, %v656_v4, %v674_v15  ;;  %v354_v42 = vsel %vm348_vm0, %v344_v20, %v345_v14  ;;  %v6577_v19 = vld [vmem:[#allocation3 + $0x84] sm:$0xf0]  ;;  %v5588_v21 = vld [vmem:[#allocation3 + $0x88] sm:$0xf0]  ;;  %v444_v38 = vpop.permute.xlu2 %443  ;;  %v6583_v4 = vld [vmem:[#allocation3 + $0xbc] sm:$0xf] }
 0x121   : > { %684 = vst [vmem:[#allocation3 + $0x130] sm:$0xff] %v673_v18  ;;  %v355_v23 = vsel %vm350_vm7, %v7331_v16, %v354_v42  ;;  %v5587_v24 = vor.u32 %v6577_v19, %v5586_v60  ;;  %v5591_v36 = vor.u32 %v6572_v37, %v5588_v21  ;;  %v5674_v16 = vld [vmem:[#allocation3 + $0x108] sm:$0xf]  ;;  %v1311_v37 = vld [vmem:[#allocation2 + $0x4c] sm:$0xff]  ;;  %vm1393_vm1 = vcmask 15360  }
 0x122   : > { %685 = vst [vmem:[#allocation3 + $0x138] sm:$0xff] %v675_v7  ;;  %1323 = vrot.lane.b32.xlu1 %v1311_v37, %s6988_s11  ;;  %1272 = vrot.lane.b32.xlu0 %v1311_v37, %s6989_s14 }
 0x123   : > { %367 = vst [vmem:[#allocation3 + $0x10] sm:$0xff] %v355_v23  ;;  %1107 = vmatpush.bf16.msrb.mxu0 %v5587_v24  ;;  %1120 = vmatpush.bf16.msrb.mxu1 %v5591_v36  ;;  %v5642_v23 = vld [vmem:[#allocation3 + $0xc0] sm:$0xf]  ;;  %v6584_v24 = vld [vmem:[#allocation3 + $0xc4] sm:$0xf] }
 0x124   : > { %v554_v28 = vpop.permute.xlu0 %553 }
 0x125   : > { %v561_v20 = vrot.slane %v554_v28, 4  ;;  %v607_v58 = vpop.permute.xlu1 %606 }
 0x126   : > { %v613_v32 = vrot.slane %v607_v58, 4 }
 0x127   : > { %v570_v26 = vsel %vm348_vm0, %v560_v52, %v561_v20  ;;  %v572_v33 = vsel %vm348_vm0, %v561_v20, %v562_v27 }
 0x128   : > { %v571_v48 = vsel %vm564_vm4, %v7241_v50, %v570_v26  ;;  %v573_v41 = vsel %vm564_vm4, %v554_v28, %v572_v33  ;;  %v623_v59 = vsel %vm348_vm0, %v612_v35, %v613_v32  ;;  %v6598_v39 = vld [vmem:[#allocation3 + $0x12c] sm:$0xf0]  ;;  %v5676_v12 = vld [vmem:[#allocation3 + $0x130] sm:$0xf0]  ;;  %v450_v35 = vrot.slane %v444_v38, 4  ;;  %v393_v42 = vpop.permute.xlu2 %392 }
 0x129   : > { %582 = vst [vmem:[#allocation3 + $0xe0] sm:$0xff] %v571_v48  ;;  %v624_v52 = vsel %vm615_vm3, %v7285_v30, %v623_v59  ;;  %v5675_v11 = vor.u32 %v6598_v39, %v5674_v16  ;;  %v5679_v34 = vor.u32 %v6593_v43, %v5676_v12  ;;  %v1044_v30 = vsel %vm348_vm0, %v972_v46, 0  ;;  %v6599_v18 = vld [vmem:[#allocation3 + $0x134] sm:$0xf0]  ;;  %v5684_v7 = vld [vmem:[#allocation3 + $0x138] sm:$0xf0] }
 0x12a   : > { %583 = vst [vmem:[#allocation3 + $0xe8] sm:$0xff] %v573_v41  ;;  %v5546_v50 = vld [vmem:[#allocation3 + $0x10] sm:$0xf]  ;;  %v6562_v55 = vld [vmem:[#allocation3 + $0x14] sm:$0xf]  ;;  %v399_v27 = vrot.slane %v393_v42, 4  ;;  %1221 = vrot.lane.b32.xlu1 %v1311_v37, %s6990_s28 }
 0x12b   : > { %634 = vst [vmem:[#allocation3 + $0x110] sm:$0xff] %v624_v52  ;;  %v5547_v56 = vor.u32 %v6567_v47, %v5546_v50  ;;  %v5551_v57 = vor.u32 %v6562_v55, %v5548_v54  ;;  %1131 = vmatpush.bf16.msrb.mxu2 %v5675_v11  ;;  %1144 = vmatpush.bf16.msrb.mxu3 %v5679_v34  ;;  %vm2139_vm3 = vcmask 556032   ;;  %vm2353_vm4 = vcmask 1014784  }
 0x12c   : > { %v442_v61 = vpop.permute.xlu0 %441 }
 0x12d   : > { %1108 = vmatpush.bf16.msrb.mxu0 %v5547_v56  ;;  %1121 = vmatpush.bf16.msrb.mxu1 %v5551_v57  ;;  %v449_v62 = vrot.slane %v442_v61, 4  ;;  %v7408_v0 = vpop.permute.xlu1 %492 }
 0x12e   : > { %v500_v51 = vrot.slane %v7408_v0, 4 }
 0x12f   : > { %v458_v25 = vsel %vm348_vm0, %v448_v10, %v449_v62  ;;  %v460_v49 = vsel %vm348_vm0, %v449_v62, %v450_v35 }
 0x130   : > { %v459_v5 = vsel %vm452_vm5, %v7264_v6, %v458_v25  ;;  %v461_v9 = vsel %vm452_vm5, %v442_v61, %v460_v49  ;;  %v509_v13 = vsel %vm348_vm0, %v499_v53, %v500_v51  ;;  %5692 = vmatmul.msk.bf16.vlgmr.msrb.gmra.mxu0 %vm1014_vm9, %v7314_v1  ;;  %5693 = vmatmul.msk.bf16.vlgmr.msrb.gmra.mxu1 %vm1014_vm9, %v7314_v1  ;;  %v6588_v10 = vld [vmem:[#allocation3 + $0xdc] sm:$0xf0]  ;;  %v5636_v31 = vld [vmem:[#allocation3 + $0xe0] sm:$0xf0]  ;;  %vm2292_vm5 = vcmask 31744  }
 0x131   : > { %1156 = vmatpush.bf16.msra.mxu0 %v1044_v30  ;;  %1169 = vmatpush.bf16.msra.mxu1 %v1047_v40  ;;  %470 = vst [vmem:[#allocation3 + $0x68] sm:$0xff] %v459_v5  ;;  %v510_v6 = vsel %vm503_vm6, %v7358_v45, %v509_v13  ;;  %v5635_v15 = vor.u32 %v6588_v10, %v5634_v3  ;;  %v6589_v28 = vld [vmem:[#allocation3 + $0xe4] sm:$0xf0]  ;;  %v5644_v45 = vld [vmem:[#allocation3 + $0xe8] sm:$0xf0] }
 0x132   : > { %v5639_v60 = vor.u32 %v6583_v4, %v5636_v31  ;;  %471 = vst [vmem:[#allocation3 + $0x70] sm:$0xff] %v461_v9  ;;  %v5682_v19 = vld [vmem:[#allocation3 + $0x110] sm:$0xf]  ;;  %v6594_v53 = vld [vmem:[#allocation3 + $0x114] sm:$0xf]  ;;  %v5643_v32 = vor.u32 %v6589_v28, %v5642_v23  ;;  %v5647_v26 = vor.u32 %v6584_v24, %v5644_v45 }
 0x133   : > { %521 = vst [vmem:[#allocation3 + $0x90] sm:$0xff] %v510_v6  ;;  %1132 = vmatpush.bf16.msrb.mxu2 %v5635_v15  ;;  %v5683_v21 = vor.u32 %v6599_v18, %v5682_v19  ;;  %v5687_v22 = vor.u32 %v6594_v53, %v5684_v7  ;;  %v1581_v13 = vld [vmem:[#allocation2 + $0x80] sm:$0xf] }
 0x134   : > { %1145 = vmatpush.bf16.msrb.mxu3 %v5639_v60  ;;  %v339_v36 = vpop.permute.xlu0 %338  ;;  %1598 = vrot.lane.b32.xlu1 %v1581_v13, %s6991_s13  ;;  %v1479_v10 = vld [vmem:[#allocation2 + $0x80] sm:$0xf] }
 0x135   : > { %1157 = vmatpush.bf16.msra.mxu0 %v5683_v21  ;;  %1170 = vmatpush.bf16.msra.mxu1 %v5687_v22  ;;  %v346_v2 = vrot.slane %v339_v36, 4  ;;  %v391_v20 = vpop.permute.xlu1 %390  ;;  %v7466_v6 = vld [vmem:[%s9427_s1] sm:$0xff] }
 0x136   : > { %v398_v58 = vrot.slane %v391_v20, 4  ;;  %v1530_v15 = vld [vmem:[#allocation2 + $0x80] sm:$0xf]  ;;  %v7476_v42 = vperm.slane %v7466_v6, 1 }
 0x137   : > { %v356_v29 = vsel %vm348_vm0, %v345_v14, %v346_v2  ;;  %1547 = vrot.lane.b32.xlu0 %v1530_v15, %s6993_s23 }
 0x138   : > { %v357_v33 = vsel %vm350_vm7, %v7368_v63, %v356_v29  ;;  %v407_v16 = vsel %vm348_vm0, %v397_v17, %v398_v58  ;;  %v409_v38 = vsel %vm348_vm0, %v398_v58, %v399_v27  ;;  %v5594_v48 = vld [vmem:[#allocation3 + $0x68] sm:$0xf]  ;;  %v6573_v41 = vld [vmem:[#allocation3 + $0x6c] sm:$0xf]  ;;  %v7501_v58 = vperm.slane %v7466_v6, 3 }
 0x139   : > { %368 = vst [vmem:[#allocation3 + $0x18] sm:$0xff] %v357_v33  ;;  %v408_v59 = vsel %vm401_vm8, %v7329_v8, %v407_v16  ;;  %v410_v39 = vsel %vm401_vm8, %v391_v20, %v409_v38  ;;  %1158 = vmatpush.bf16.msra.mxu0 %v5643_v32  ;;  %1171 = vmatpush.bf16.msra.mxu1 %v5647_v26  ;;  %v5602_v61 = vld [vmem:[#allocation3 + $0x70] sm:$0xf]  ;;  %v6574_v30 = vld [vmem:[#allocation3 + $0x74] sm:$0xf]  ;;  %vm3097_vm8 = vcmask 982016  }
 0x13a   : > { %419 = vst [vmem:[#allocation3 + $0x40] sm:$0xff] %v408_v59  ;;  %v6578_v14 = vld [vmem:[#allocation3 + $0x8c] sm:$0xf0]  ;;  %v5596_v43 = vld [vmem:[#allocation3 + $0x90] sm:$0xf0] }
 0x13b   : > { %420 = vst [vmem:[#allocation3 + $0x48] sm:$0xff] %v410_v39  ;;  %v5595_v63 = vor.u32 %v6578_v14, %v5594_v48  ;;  %v5599_v12 = vor.u32 %v6573_v41, %v5596_v43  ;;  %v7516_v14 = vperm.slane %v7466_v6, 4 }
 0x13c   : > { %v495_v46 = vpop.permute.xlu0 %494  ;;  %1496 = vrot.lane.b32.xlu1 %v1479_v10, %s6992_s15 }
 0x13d   : > { %1133 = vmatpush.bf16.msrb.mxu2 %v5595_v63  ;;  %1146 = vmatpush.bf16.msrb.mxu3 %v5599_v12  ;;  %v501_v17 = vrot.slane %v495_v46, 4  ;;  %v341_v52 = vpop.permute.xlu1 %340  ;;  %9490 = vst [vmem:[#allocation10_spill] sm:$0xff] %v7516_v14  ;;  %v7522_v63 = vperm.slane %v7466_v6, 5 }
 0x13e   : > { %v347_v47 = vrot.slane %v341_v52, 4 }
 0x13f   : > { %v511_v8 = vsel %vm348_vm0, %v500_v51, %v501_v17  ;;  %9491 = vst [vmem:[#allocation11_spill] sm:$0xff] %v7522_v63 }
 0x140   : > { %v512_v54 = vsel %vm503_vm6, %v7408_v0, %v511_v8  ;;  %v358_v11 = vsel %vm348_vm0, %v346_v2, %v347_v47  ;;  %v5554_v34 = vld [vmem:[#allocation3 + $0x18] sm:$0xf]  ;;  %v6563_v44 = vld [vmem:[#allocation3 + $0x1c] sm:$0xf]  ;;  %v7495_v2 = vperm.slane %v7466_v6, 2  ;;  %vm2190_vm6 = vcmask 523264  }
 0x141   : > { %522 = vst [vmem:[#allocation3 + $0x98] sm:$0xff] %v512_v54  ;;  %v359_v50 = vsel %vm350_vm7, %v339_v36, %v358_v11  ;;  %v6568_v55 = vld [vmem:[#allocation3 + $0x3c] sm:$0xf0]  ;;  %v5556_v56 = vld [vmem:[#allocation3 + $0x40] sm:$0xf0]  ;;  %vm2241_vm7 = vcmask 490496  }
 0x142   : > { %369 = vst [vmem:[#allocation3 + $0x20] sm:$0xff] %v359_v50  ;;  %v5555_v57 = vor.u32 %v6568_v55, %v5554_v34  ;;  %v5559_v35 = vor.u32 %v6563_v44, %v5556_v56  ;;  %v6569_v25 = vld [vmem:[#allocation3 + $0x44] sm:$0xf0]  ;;  %v5564_v49 = vld [vmem:[#allocation3 + $0x48] sm:$0xf0]  ;;  %v7545_v56 = vperm.slane %v7466_v6, 6 }
 0x144   : > { %1134 = vmatpush.bf16.msrb.mxu2 %v5555_v57  ;;  %1147 = vmatpush.bf16.msrb.mxu3 %v5559_v35  ;;  %9492 = vst [vmem:[#allocation12_spill] sm:$0xff] %v7545_v56  ;;  %v7551_v35 = vperm.slane %v7466_v6, 7 }
 0x146   : > { %9493 = vst [vmem:[#allocation13_spill] sm:$0xff] %v7551_v35 }
 0x147   : > { %5694 = vmatmul.msk.bf16.vlgmr.msrb.gmra.mxu2 %vm1014_vm9, %v7314_v1  ;;  %5695 = vmatmul.msk.bf16.vlgmr.msrb.gmra.mxu3 %vm1014_vm9, %v7314_v1 }
 0x148   : > { %v6579_v62 = vld [vmem:[#allocation3 + $0x94] sm:$0xf0]  ;;  %v5604_v40 = vld [vmem:[#allocation3 + $0x98] sm:$0xf0] }
 0x149   : > { %v5603_v0 = vor.u32 %v6579_v62, %v5602_v61  ;;  %v5607_v51 = vor.u32 %v6574_v30, %v5604_v40  ;;  %v5562_v3 = vld [vmem:[#allocation3 + $0x20] sm:$0xf]  ;;  %v6564_v4 = vld [vmem:[#allocation3 + $0x24] sm:$0xf]  ;;  %v275_v40 = vld [vmem:[%s9427_s1 + $0x8] sm:$0x3] }
 0x14a   : > { %v5563_v5 = vor.u32 %v6569_v25, %v5562_v3  ;;  %v5567_v9 = vor.u32 %v6564_v4, %v5564_v49  ;;  %v7570_v25 = vperm.slane %v275_v40, 0 }
 0x14b   : > { %1159 = vmatpush.bf16.msra.mxu0 %v5603_v0  ;;  %1172 = vmatpush.bf16.msra.mxu1 %v5607_v51 }
 0x14c   : > { %9494 = vst [vmem:[#allocation14_spill] sm:$0xff] %v7570_v25 }
 0x14f   : > { %1160 = vmatpush.bf16.msra.mxu0 %v5563_v5  ;;  %1173 = vmatpush.bf16.msra.mxu1 %v5567_v9  ;;  %v7575_v5 = vperm.slane %v275_v40, 1 }
 0x151   : > { %9496 = vst [vmem:[#allocation16_spill] sm:$0xff] %v7575_v5 }
 0x152   : > { %5696 = vmatmul.msk.bf16.vlgmr.msra.gmra.mxu0 %vm1014_vm9, %v7314_v1  ;;  %5697 = vmatmul.msk.bf16.vlgmr.msra.gmra.mxu1 %vm1014_vm9, %v7314_v1  ;;  %v7470_v1 = vperm.slane %v7466_v6, 0 }
 0x163   : > { %v7461_v31 = vpop.permute.xlu0 %786 }
 0x184   : > { %v1058_v60 = vpop.f32.mrf.mxu0  ;;  %v1071_v18 = vpop.f32.mrf.mxu1 }
 0x185   : > { %v7473_v7 = vadd.f32 %v1058_v60, %v7461_v31  ;;  %v7479_v19 = vadd.f32 %v1071_v18, %v7461_v31 }
 0x187   : > { %v9451_v53 = vmax.f32 %v7473_v7, 0.0  ;;  %v9440_v37 = vmax.f32 %v7479_v19, 0.0 }
 0x189   : > { %v1189_v21 = vmul.f32 %v9451_v53, %v7470_v1  ;;  %v1190_v22 = vmul.f32 %v9440_v37, %v7476_v42 }
 0x18b   : > { %v1199_v23 = vpack.c.bf16 %v1190_v22, %v1189_v21 }
 0x18c   : > { %v1060_v24 = vpop.f32.mrf.mxu0  ;;  %v1073_v36 = vpop.f32.mrf.mxu1 }
 0x18d   : > { %1204 = vst [vmem:[#allocation2 + $0x54] sm:$0xff] %v1199_v23  ;;  %1274 = vrot.lane.b32.xlu1 %v1199_v23, %s6989_s14  ;;  %1435 = vrot.lane.b32.xlu2 %v1199_v23, %s6994_s25 }
 0x18e   : > { %1418 = vst [vmem:[#allocation3 + $0xa0] sm:$0xff] %v1199_v23 }
 0x194   : > { %v1362_v27 = vld [vmem:[#allocation2 + $0x50] sm:$0xff]  ;;  %v1324_v22 = vpop.permute.xlu1 %1323 }
 0x195   : > { %1325 = vrot.lane.b32.xlu2 %v1199_v23, %s6988_s11  ;;  %1374 = vrot.lane.b32.xlu0 %v1362_v27, %s6995_s26 }
 0x19d   : > { %1223 = vrot.lane.b32.xlu2 %v1199_v23, %s6990_s28 }
 0x1a2   : > { %v1084_v28 = vpop.f32.mrf.mxu2  ;;  %v1097_v45 = vpop.f32.mrf.mxu3 }
 0x1a3   : > { %v7498_v20 = vadd.f32 %v1084_v28, %v7461_v31  ;;  %v7504_v29 = vadd.f32 %v1097_v45, %v7461_v31  ;;  %v1222_v28 = vpop.permute.xlu1 %1221 }
 0x1a5   : > { %v9439_v32 = vmax.f32 %v7498_v20, 0.0  ;;  %v9438_v26 = vmax.f32 %v7504_v29, 0.0 }
 0x1a7   : > { %v1191_v33 = vmul.f32 %v9439_v32, %v7495_v2  ;;  %v1192_v16 = vmul.f32 %v9438_v26, %v7501_v58 }
 0x1a9   : > { %v1200_v38 = vpack.c.bf16 %v1192_v16, %v1191_v33  ;;  %v1335_v16 = vrot.slane %v1324_v22, 4 }
 0x1aa   : > { %v1086_v48 = vpop.f32.mrf.mxu2  ;;  %v1099_v41 = vpop.f32.mrf.mxu3 }
 0x1ab   : > { %1205 = vst [vmem:[#allocation2 + $0x5c] sm:$0xff] %v1200_v38  ;;  %1327 = vrot.lane.b32.xlu2 %v1200_v38, %s6988_s11  ;;  %v7605_v33 = vpop.permute.xlu1 %1598 }
 0x1ac   : > { %1419 = vst [vmem:[#allocation3 + $0xa8] sm:$0xff] %v1200_v38 }
 0x1ad   : > { %v1110_v59 = vpop.f32.mrf.mxu0  ;;  %v1123_v39 = vpop.f32.mrf.mxu1 }
 0x1ae   : > { %v7519_v43 = vadd.f32 %v1110_v59, %v7461_v31  ;;  %v7525_v12 = vadd.f32 %v1123_v39, %v7461_v31 }
 0x1b0   : > { %v9437_v46 = vmax.f32 %v7519_v43, 0.0  ;;  %v9436_v17 = vmax.f32 %v7525_v12, 0.0 }
 0x1b2   : > { %v1193_v52 = vmul.f32 %v9437_v46, %v7516_v14  ;;  %v1194_v47 = vmul.f32 %v9436_v17, %v7522_v63  ;;  %v1525_v8 = vld [vmem:[#allocation2 + $0x58] sm:$0xff] }
 0x1b3   : > { %1537 = vrot.lane.b32.xlu0 %v1525_v8, %s6993_s23  ;;  %1588 = vrot.lane.b32.xlu1 %v1525_v8, %s6991_s13  ;;  %v7614_v39 = vpop.permute.xlu1 %1496 }
 0x1b4   : > { %v1201_v54 = vpack.c.bf16 %v1194_v47, %v1193_v52  ;;  %1225 = vrot.lane.b32.xlu2 %v1200_v38, %s6990_s28  ;;  %v1233_v52 = vrot.slane %v1222_v28, 4 }
 0x1b5   : > { %v1112_v11 = vpop.f32.mrf.mxu0  ;;  %v1125_v34 = vpop.f32.mrf.mxu1 }
 0x1b6   : > { %1206 = vst [vmem:[#allocation2 + $0x64] sm:$0xff] %v1201_v54 }
 0x1b7   : > { %1420 = vst [vmem:[#allocation3 + $0xb0] sm:$0xff] %v1201_v54 }
 0x1bb   : > { %1437 = vrot.lane.b32.xlu0 %v1200_v38, %s6994_s25  ;;  %1486 = vrot.lane.b32.xlu1 %v1525_v8, %s6992_s15 }
 0x1bd   : > { %v1577_v44 = vld [vmem:[#allocation2 + $0x60] sm:$0xff] }
 0x1be   : > { %1590 = vrot.lane.b32.xlu2 %v1577_v44, %s6991_s13 }
 0x1c3   : > { %1439 = vrot.lane.b32.xlu0 %v1201_v54, %s6994_s25  ;;  %1376 = vrot.lane.b32.xlu1 %v1525_v8, %s6995_s26 }
 0x1c6   : > { %1488 = vrot.lane.b32.xlu2 %v1577_v44, %s6992_s15 }
 0x1ca   : > { %v1136_v50 = vpop.f32.mrf.mxu2  ;;  %v1149_v55 = vpop.f32.mrf.mxu3 }
 0x1cb   : > { %v7548_v57 = vadd.f32 %v1136_v50, %v7461_v31  ;;  %v7554_v61 = vadd.f32 %v1149_v55, %v7461_v31  ;;  %1329 = vrot.lane.b32.xlu0 %v1201_v54, %s6988_s11  ;;  %1276 = vrot.lane.b32.xlu1 %v1200_v38, %s6989_s14  ;;  %v1273_v50 = vpop.permute.xlu0 %1272 }
 0x1cc   : > { %v1284_v55 = vrot.slane %v1273_v50, 4 }
 0x1cd   : > { %v9435_v62 = vmax.f32 %v7548_v57, 0.0  ;;  %v9434_v30 = vmax.f32 %v7554_v61, 0.0 }
 0x1ce   : > { %1278 = vrot.lane.b32.xlu2 %v1201_v54, %s6989_s14 }
 0x1cf   : > { %v1195_v0 = vmul.f32 %v9435_v62, %v7545_v56  ;;  %v1196_v51 = vmul.f32 %v9434_v30, %v7551_v35  ;;  %v1162_v3 = vpop.f32.mrf.mxu0  ;;  %v1175_v4 = vpop.f32.mrf.mxu1 }
 0x1d0   : > { %v7573_v49 = vadd.f32 %v1162_v3, %v7461_v31  ;;  %v7578_v9 = vadd.f32 %v1175_v4, %v7461_v31 }
 0x1d1   : > { %v7580_v13 = vpack.c.bf16 %v1196_v51, %v1195_v0 }
 0x1d2   : > { %9495 = vst [vmem:[#allocation15_spill] sm:$0xff] %v7573_v49  ;;  %v9433_v10 = vmax.f32 %v7573_v49, 0.0  ;;  %v9432_v6 = vmax.f32 %v7578_v9, 0.0  ;;  %v1138_v15 = vpop.f32.mrf.mxu2  ;;  %v1151_v60 = vpop.f32.mrf.mxu3 }
 0x1d3   : > { %9497 = vst [vmem:[#allocation17_spill] sm:$0xff] %v7578_v9  ;;  %1227 = vrot.lane.b32.xlu0 %v1201_v54, %s6990_s28  ;;  %1539 = vrot.lane.b32.xlu1 %v1577_v44, %s6993_s23  ;;  %v1428_v54 = vld [vmem:[#allocation2 + $0x7c] sm:$0xf] }
 0x1d4   : > { %1207 = vst [vmem:[#allocation2 + $0x6c] sm:$0xff] %v7580_v13  ;;  %v1197_v18 = vmul.f32 %v9433_v10, %v7570_v25  ;;  %v1198_v31 = vmul.f32 %v9432_v6, %v7575_v5 }
 0x1d5   : > { %1421 = vst [vmem:[#allocation3 + $0xb8] sm:$0xff] %v7580_v13 }
 0x1d6   : > { %v1203_v21 = vpack.c.bf16 %v1198_v31, %v1197_v18 }
 0x1d7   : > { %v1164_v23 = vpop.f32.mrf.mxu0  ;;  %v1177_v24 = vpop.f32.mrf.mxu1 }
 0x1d8   : > { %1208 = vst [vmem:[#allocation2 + $0x74] sm:$0xff] %v1203_v21 }
 0x1d9   : > { %1422 = vst [vmem:[#allocation3 + $0xc0] sm:$0xff] %v1203_v21 }
 0x1db   : > { %v1578_v36 = vld [vmem:[#allocation2 + $0x68] sm:$0xff]  ;;  %1378 = vrot.lane.b32.xlu1 %v1577_v44, %s6995_s26 }
 0x1dc   : > { %1592 = vrot.lane.b32.xlu2 %v1578_v36, %s6991_s13 }
 0x1df   : > { %v1579_v27 = vld [vmem:[#allocation2 + $0x70] sm:$0xff]  ;;  %v1580_v47 = vld [vmem:[#allocation2 + $0x78] sm:$0xff] }
 0x1e0   : > { %1594 = vrot.lane.b32.xlu0 %v1579_v27, %s6991_s13  ;;  %v1316_v51 = vld [vmem:[#allocation2 + $0x74] sm:$0xf]  ;;  %v1367_v18 = vld [vmem:[#allocation2 + $0x78] sm:$0xf] }
 0x1e3   : > { %1541 = vrot.lane.b32.xlu1 %v1578_v36, %s6993_s23 }
 0x1e4   : > { %1490 = vrot.lane.b32.xlu2 %v1578_v36, %s6992_s15 }
 0x1e7   : > { %v7599_v45 = vpop.permute.xlu2 %1435 }
 0x1e8   : > { %1492 = vrot.lane.b32.xlu0 %v1579_v27, %s6992_s15 }
 0x1eb   : > { %1441 = vrot.lane.b32.xlu1 %v7580_v13, %s6994_s25 }
 0x1ec   : > { %1380 = vrot.lane.b32.xlu2 %v1578_v36, %s6995_s26  ;;  %v7646_v36 = vpop.permute.xlu0 %1547 }
 0x1ef   : > { %v1326_v38 = vpop.permute.xlu2 %1325 }
 0x1f0   : > { %1331 = vrot.lane.b32.xlu0 %v7580_v13, %s6988_s11  ;;  %v1336_v48 = vrot.slane %v1326_v38, 4 }
 0x1f2   : > { %v1341_v41 = vsel %vm348_vm0, %v1335_v16, %v1336_v48  ;;  %v1214_v16 = vld [vmem:[#allocation2 + $0x74] sm:$0xf] }
 0x1f3   : > { %1229 = vrot.lane.b32.xlu1 %v7580_v13, %s6990_s28  ;;  %v1343_v59 = vsel %vm1342_vm10, %v1324_v22, %v1341_v41  ;;  %v1265_v22 = vld [vmem:[#allocation2 + $0x74] sm:$0xf] }
 0x1f4   : > { %1543 = vrot.lane.b32.xlu2 %v1579_v27, %s6993_s23  ;;  %1357 = vst [vmem:[#allocation3 + $0x50] sm:$0xff] %v1343_v59 }
 0x1f7   : > { %v1224_v8 = vpop.permute.xlu2 %1223 }
 0x1f8   : > { %1596 = vrot.lane.b32.xlu0 %v1580_v47, %s6991_s13  ;;  %v1234_v11 = vrot.slane %v1224_v8, 4  ;;  %s6996_s13 = smov 68  }
 0x1fa   : > { %v1239_v34 = vsel %vm348_vm0, %v1233_v52, %v1234_v11 }
 0x1fb   : > { %1443 = vrot.lane.b32.xlu1 %v1203_v21, %s6994_s25  ;;  %v1241_v44 = vsel %vm1240_vm11, %v1222_v28, %v1239_v34  ;;  %v5741_v26 = vld [vmem:[#allocation3 + $0x50] sm:$0xf] }
 0x1fc   : > { %1445 = vrot.lane.b32.xlu2 %v1428_v54, %s6994_s25  ;;  %1255 = vst [vmem:[#allocation3] sm:$0xff] %v1241_v44  ;;  %s7000_s25 = smov 4  }
 0x1ff   : > { %v7621_v40 = vpop.permute.xlu1 %1274 }
 0x200   : > { %1494 = vrot.lane.b32.xlu0 %v1580_v47, %s6992_s15  ;;  %v1285_v0 = vrot.slane %v7621_v40, 4  ;;  %s6997_s15 = smov 60  }
 0x202   : > { %v1290_v3 = vsel %vm348_vm0, %v1284_v55, %v1285_v0  ;;  %v1447_v55 = vrot.slane %v7599_v45, 4 }
 0x203   : > { %1333 = vrot.lane.b32.xlu1 %v1316_v51, %s6988_s11  ;;  %v1292_v4 = vsel %vm1291_vm12, %v1273_v50, %v1290_v3  ;;  %v6600_v32 = vld [vmem:[#allocation3 + $0x4] sm:$0xf]  ;;  %s7002_s11 = smov 8  }
 0x204   : > { %1545 = vrot.lane.b32.xlu2 %v1580_v47, %s6993_s23  ;;  %1306 = vst [vmem:[#allocation3 + $0x28] sm:$0xff] %v1292_v4 }
 0x205   : > { %v7631_v15 = vpop.permute.xlu2 %1327 }
 0x206   : > { %v1337_v60 = vrot.slane %v7631_v15, 4 }
 0x208   : > { %1384 = vrot.lane.b32.xlu0 %v1367_v18, %s6995_s26  ;;  %v1344_v31 = vsel %vm348_vm0, %v1336_v48, %v1337_v60  ;;  %v1375_v48 = vpop.permute.xlu0 %1374 }
 0x209   : > { %v1345_v21 = vsel %vm1342_vm10, %v1326_v38, %v1344_v31 }
 0x20a   : > { %1358 = vst [vmem:[#allocation3 + $0x58] sm:$0xff] %v1345_v21 }
 0x20b   : > { %1282 = vrot.lane.b32.xlu1 %v1265_v22, %s6989_s14  ;;  %v5703_v37 = vld [vmem:[#allocation3 + $0x28] sm:$0xf0] }
 0x20c   : > { %1382 = vrot.lane.b32.xlu2 %v1579_v27, %s6995_s26 }
 0x20e   : > { %v7641_v23 = vpop.permute.xlu2 %1225 }
 0x20f   : > { %v1235_v24 = vrot.slane %v7641_v23, 4 }
 0x210   : > { %1280 = vrot.lane.b32.xlu0 %v7580_v13, %s6989_s14 }
 0x211   : > { %v1242_v28 = vsel %vm348_vm0, %v1234_v11, %v1235_v24 }
 0x212   : > { %v1243_v38 = vsel %vm1240_vm11, %v1224_v8, %v1242_v28 }
 0x213   : > { %1256 = vst [vmem:[#allocation3 + $0x8] sm:$0xff] %v1243_v38 }
 0x214   : > { %1231 = vrot.lane.b32.xlu2 %v1214_v16, %s6990_s28  ;;  %s7003_s28 = smov 112  }
 0x218   : > { %v1591_v27 = vpop.permute.xlu2 %1590 }
 0x219   : > { %v1601_v13 = vrot.slane %v1591_v27, 4 }
 0x220   : > { %v7653_v41 = vpop.permute.xlu2 %1488 }
 0x221   : > { %v1499_v51 = vrot.slane %v7653_v41, 4 }
 0x225   : > { %v7655_v59 = vpop.permute.xlu0 %1537  ;;  %v1589_v52 = vpop.permute.xlu1 %1588 }
 0x226   : > { %v1600_v47 = vrot.slane %v1589_v52, 4 }
 0x228   : > { %v1606_v54 = vsel %vm348_vm0, %v1600_v47, %v1601_v13  ;;  %v7661_v21 = vpop.permute.xlu2 %1278 }
 0x229   : > { %v1608_v11 = vsel %vm1607_vm13, %v1589_v52, %v1606_v54 }
 0x22a   : > { %v1805_v34 = vunpack.c.l.b16 %v1608_v11  ;;  %v1806_v44 = vunpack.c.h.b16 %v1608_v11 }
 0x22c   : > { %v1855_v8 = vpack.c.b16 %v1805_v34, %v1805_v34  ;;  %v1856_v50 = vpack.c.b16 %v1806_v44, %v1806_v44  ;;  %v1386_v34 = vrot.slane %v1375_v48, 4 }
 0x22d   : > { %v1438_v3 = vpop.permute.xlu0 %1437  ;;  %v1487_v4 = vpop.permute.xlu1 %1486 }
 0x22e   : > { %v1448_v18 = vrot.slane %v1438_v3, 4  ;;  %v1498_v31 = vrot.slane %v1487_v4, 4  ;;  %v1909_v22 = vsel %vm348_vm0, %v1855_v8, 0  ;;  %v1912_v28 = vsel %vm348_vm0, %v1856_v50, 0 }
 0x22f   : > { %1941 = vmatpush.bf16.msra.mxu2 %v1909_v22  ;;  %1954 = vmatpush.bf16.msra.mxu3 %v1912_v28 }
 0x230   : > { %v1453_v16 = vsel %vm348_vm0, %v1447_v55, %v1448_v18  ;;  %v1504_v38 = vsel %vm348_vm0, %v1498_v31, %v1499_v51 }
 0x231   : > { %v1455_v52 = vsel %vm1454_vm14, %v7599_v45, %v1453_v16  ;;  %v1506_v47 = vsel %vm1505_vm15, %v1487_v4, %v1504_v38 }
 0x232   : > { %1469 = vst [vmem:[#allocation3 + $0xc8] sm:$0xff] %v1455_v52 }
 0x233   : > { %1520 = vst [vmem:[#allocation3 + $0xf0] sm:$0xff] %v1506_v47 }
 0x235   : > { %v7670_v54 = vpop.permute.xlu0 %1439  ;;  %v1377_v11 = vpop.permute.xlu1 %1376 }
 0x236   : > { %v1449_v44 = vrot.slane %v7670_v54, 4  ;;  %v1387_v8 = vrot.slane %v1377_v11, 4  ;;  %v7673_v50 = vpop.permute.xlu2 %1592 }
 0x237   : > { %v1602_v55 = vrot.slane %v7673_v50, 4 }
 0x238   : > { %v1456_v45 = vsel %vm348_vm0, %v1448_v18, %v1449_v44  ;;  %v1392_v4 = vsel %vm348_vm0, %v1386_v34, %v1387_v8  ;;  %v1287_v34 = vrot.slane %v7661_v21, 4 }
 0x239   : > { %v1457_v31 = vsel %vm1454_vm14, %v1438_v3, %v1456_v45  ;;  %v1609_v22 = vsel %vm348_vm0, %v1601_v13, %v1602_v55  ;;  %v1394_v28 = vsel %vm1393_vm1, %v1375_v48, %v1392_v4 }
 0x23a   : > { %1470 = vst [vmem:[#allocation3 + $0xd0] sm:$0xff] %v1457_v31  ;;  %v1610_v16 = vsel %vm1607_vm13, %v1591_v27, %v1609_v22 }
 0x23b   : > { %v1807_v38 = vunpack.c.l.b16 %v1610_v16  ;;  %v1808_v52 = vunpack.c.h.b16 %v1610_v16  ;;  %1408 = vst [vmem:[#allocation3 + $0x78] sm:$0xff] %v1394_v28 }
 0x23d   : > { %v7686_v47 = vpop.permute.xlu0 %1329  ;;  %v1277_v6 = vpop.permute.xlu1 %1276  ;;  %v1857_v18 = vpack.c.b16 %v1807_v38, %v1807_v38  ;;  %v1858_v10 = vpack.c.b16 %v1808_v52, %v1808_v52 }
 0x23e   : > { %v1338_v3 = vrot.slane %v7686_v47, 4  ;;  %v1286_v45 = vrot.slane %v1277_v6, 4  ;;  %v7690_v30 = vpop.permute.xlu2 %1490 }
 0x23f   : > { %v1500_v48 = vrot.slane %v7690_v30, 4  ;;  %v1915_v13 = vsel %vm348_vm0, %v1857_v18, 0  ;;  %v1918_v27 = vsel %vm348_vm0, %v1858_v10, 0 }
 0x240   : > { %v1346_v4 = vsel %vm348_vm0, %v1337_v60, %v1338_v3  ;;  %v1293_v31 = vsel %vm348_vm0, %v1285_v0, %v1286_v45  ;;  %v1295_v22 = vsel %vm348_vm0, %v1286_v45, %v1287_v34  ;;  %1967 = vmatpush.bf16.msrb.mxu0 %v1915_v13  ;;  %1980 = vmatpush.bf16.msrb.mxu1 %v1918_v27 }
 0x241   : > { %v1347_v28 = vsel %vm1342_vm10, %v7631_v15, %v1346_v4  ;;  %v1294_v10 = vsel %vm1291_vm12, %v7621_v40, %v1293_v31  ;;  %v1296_v16 = vsel %vm1291_vm12, %v1277_v6, %v1295_v22  ;;  %v1507_v60 = vsel %vm348_vm0, %v1499_v51, %v1500_v48 }
 0x242   : > { %1359 = vst [vmem:[#allocation3 + $0x60] sm:$0xff] %v1347_v28  ;;  %v1508_v0 = vsel %vm1505_vm15, %v7653_v41, %v1507_v60  ;;  %v1549_v15 = vrot.slane %v7655_v59, 4 }
 0x243   : > { %1307 = vst [vmem:[#allocation3 + $0x30] sm:$0xff] %v1294_v10 }
 0x244   : > { %1308 = vst [vmem:[#allocation3 + $0x38] sm:$0xff] %v1296_v16  ;;  %v5821_v16 = vld [vmem:[#allocation3 + $0xf0] sm:$0xf] }
 0x245   : > { %1521 = vst [vmem:[#allocation3 + $0xf8] sm:$0xff] %v1508_v0  ;;  %v7716_v38 = vpop.permute.xlu0 %1227  ;;  %v1540_v52 = vpop.permute.xlu1 %1539 }
 0x246   : > { %v1236_v40 = vrot.slane %v7716_v38, 4  ;;  %v1550_v6 = vrot.slane %v1540_v52, 4  ;;  %v7720_v18 = vpop.permute.xlu2 %1380 }
 0x247   : > { %v1389_v4 = vrot.slane %v7720_v18, 4 }
 0x248   : > { %v1244_v41 = vsel %vm348_vm0, %v1235_v24, %v1236_v40  ;;  %v1555_v51 = vsel %vm348_vm0, %v1549_v15, %v1550_v6 }
 0x249   : > { %v1245_v45 = vsel %vm1240_vm11, %v7641_v23, %v1244_v41  ;;  %v1557_v13 = vsel %vm1556_vm2, %v7655_v59, %v1555_v51  ;;  %v6630_v59 = vld [vmem:[#allocation3 + $0xf4] sm:$0xf] }
 0x24a   : > { %1257 = vst [vmem:[#allocation3 + $0x10] sm:$0xff] %v1245_v45  ;;  %v6625_v45 = vld [vmem:[#allocation3 + $0xc4] sm:$0xf0] }
 0x24b   : > { %1571 = vst [vmem:[#allocation3 + $0x118] sm:$0xff] %v1557_v13  ;;  %v5783_v13 = vld [vmem:[#allocation3 + $0xc8] sm:$0xf0] }
 0x24d   : > { %v1379_v27 = vpop.permute.xlu1 %1378 }
 0x24e   : > { %v1388_v31 = vrot.slane %v1379_v27, 4  ;;  %v7733_v22 = vpop.permute.xlu2 %1543 }
 0x250   : > { %v1395_v28 = vsel %vm348_vm0, %v1387_v8, %v1388_v31  ;;  %v1397_v24 = vsel %vm348_vm0, %v1388_v31, %v1389_v4  ;;  %v1552_v31 = vrot.slane %v7733_v22, 4 }
 0x251   : > { %v1396_v10 = vsel %vm1393_vm1, %v1377_v11, %v1395_v28  ;;  %v1398_v23 = vsel %vm1393_vm1, %v1379_v27, %v1397_v24 }
 0x252   : > { %1409 = vst [vmem:[#allocation3 + $0x80] sm:$0xff] %v1396_v10  ;;  %v7741_v60 = vpop.permute.xlu0 %1594  ;;  %v6635_v0 = vld [vmem:[#allocation3 + $0x114] sm:$0xf0]  ;;  %v5823_v15 = vld [vmem:[#allocation3 + $0x118] sm:$0xf0] }
 0x253   : > { %1410 = vst [vmem:[#allocation3 + $0x88] sm:$0xff] %v1398_v23  ;;  %v1603_v41 = vrot.slane %v7741_v60, 4  ;;  %v5822_v51 = vor.u32 %v6635_v0, %v5821_v16  ;;  %v5826_v8 = vor.u32 %v6630_v59, %v5823_v15  ;;  %v5781_v23 = vld [vmem:[#allocation3 + $0xa0] sm:$0xf]  ;;  %v6620_v16 = vld [vmem:[#allocation3 + $0xa4] sm:$0xf] }
 0x254   : > { %v5782_v59 = vor.u32 %v6625_v45, %v5781_v23  ;;  %v5786_v0 = vor.u32 %v6620_v16, %v5783_v13  ;;  %v6610_v45 = vld [vmem:[#allocation3 + $0x54] sm:$0xf]  ;;  %v5701_v23 = vld [vmem:[#allocation3] sm:$0xf]  ;;  %v6605_v16 = vld [vmem:[#allocation3 + $0x24] sm:$0xf0] }
 0x255   : > { %v1611_v11 = vsel %vm348_vm0, %v1602_v55, %v1603_v41  ;;  %1942 = vmatpush.bf16.msra.mxu2 %v5822_v51  ;;  %1955 = vmatpush.bf16.msra.mxu3 %v5826_v8  ;;  %v1542_v27 = vpop.permute.xlu1 %1541  ;;  %v6615_v55 = vld [vmem:[#allocation3 + $0x74] sm:$0xf0]  ;;  %v5743_v51 = vld [vmem:[#allocation3 + $0x78] sm:$0xf0] }
 0x256   : > { %v1612_v28 = vsel %vm1607_vm13, %v7673_v50, %v1611_v11  ;;  %v1551_v24 = vrot.slane %v1542_v27, 4  ;;  %v7752_v10 = vpop.permute.xlu2 %1445  ;;  %v5742_v13 = vor.u32 %v6615_v55, %v5741_v26  ;;  %v5706_v55 = vor.u32 %v6600_v32, %v5703_v37 }
 0x257   : > { %v1809_v8 = vunpack.c.l.b16 %v1612_v28  ;;  %v1810_v50 = vunpack.c.h.b16 %v1612_v28 }
 0x258   : > { %v1558_v15 = vsel %vm348_vm0, %v1550_v6, %v1551_v24  ;;  %v1560_v62 = vsel %vm348_vm0, %v1551_v24, %v1552_v31  ;;  %v5746_v24 = vor.u32 %v6610_v45, %v5743_v51  ;;  %v5829_v51 = vld [vmem:[#allocation3 + $0xf8] sm:$0xf] }
 0x259   : > { %v1559_v17 = vsel %vm1556_vm2, %v1540_v52, %v1558_v15  ;;  %v1561_v46 = vsel %vm1556_vm2, %v1542_v27, %v1560_v62  ;;  %1943 = vmatpush.bf16.msra.mxu2 %v5782_v59  ;;  %1956 = vmatpush.bf16.msra.mxu3 %v5786_v0  ;;  %v1859_v52 = vpack.c.b16 %v1809_v8, %v1809_v8  ;;  %v1554_v59 = vrot.slane %v7646_v36, 4  ;;  %v6631_v8 = vld [vmem:[#allocation3 + $0xfc] sm:$0xf] }
 0x25a   : > { %1572 = vst [vmem:[#allocation3 + $0x120] sm:$0xff] %v1559_v17  ;;  %v7758_v11 = vpop.permute.xlu0 %1492  ;;  %v5702_v15 = vor.u32 %v6605_v16, %v5701_v23 }
 0x25b   : > { %1573 = vst [vmem:[#allocation3 + $0x128] sm:$0xff] %v1561_v46  ;;  %v1501_v6 = vrot.slane %v7758_v11, 4  ;;  %v1860_v46 = vpack.c.b16 %v1810_v50, %v1810_v50  ;;  %v1921_v50 = vsel %vm348_vm0, %v1859_v52, 0 }
 0x25d   : > { %v1509_v17 = vsel %vm348_vm0, %v1500_v48, %v1501_v6  ;;  %1944 = vmatpush.bf16.msra.mxu2 %v5742_v13  ;;  %1957 = vmatpush.bf16.msra.mxu3 %v5746_v24  ;;  %v7766_v62 = vpop.permute.xlu1 %1441  ;;  %v7775_v48 = vld [vmem:[%s9429_s3] sm:$0xf]  ;;  %v1924_v24 = vsel %vm348_vm0, %v1860_v46, 0  ;;  %v5791_v46 = vld [vmem:[#allocation3 + $0xd0] sm:$0xf0] }
 0x25e   : > { %v1510_v26 = vsel %vm1505_vm15, %v7690_v30, %v1509_v17  ;;  %v1450_v27 = vrot.slane %v7766_v62, 4  ;;  %v1546_v28 = vpop.permute.xlu2 %1545  ;;  %v6626_v17 = vld [vmem:[#allocation3 + $0xcc] sm:$0xf0] }
 0x25f   : > { %1522 = vst [vmem:[#allocation3 + $0x100] sm:$0xff] %v1510_v26  ;;  %v1553_v0 = vrot.slane %v1546_v28, 4 }
 0x260   : > { %v1458_v30 = vsel %vm348_vm0, %v1449_v44, %v1450_v27 }
 0x261   : > { %v1459_v36 = vsel %vm1454_vm14, %v7670_v54, %v1458_v30  ;;  %v1562_v37 = vsel %vm348_vm0, %v1552_v31, %v1553_v0  ;;  %v1564_v32 = vsel %vm348_vm0, %v1553_v0, %v1554_v59  ;;  %1945 = vmatpush.bf16.msra.mxu2 %v5702_v15  ;;  %1958 = vmatpush.bf16.msra.mxu3 %v5706_v55  ;;  %v6636_v45 = vld [vmem:[#allocation3 + $0x11c] sm:$0xf0]  ;;  %v5831_v13 = vld [vmem:[#allocation3 + $0x120] sm:$0xf0]  ;;  %v6621_v59 = vld [vmem:[#allocation3 + $0xac] sm:$0xf] }
 0x262   : > { %1471 = vst [vmem:[#allocation3 + $0xd8] sm:$0xff] %v1459_v36  ;;  %v1563_v44 = vsel %vm1556_vm2, %v7733_v22, %v1562_v37  ;;  %v1565_v23 = vsel %vm1556_vm2, %v1546_v28, %v1564_v32  ;;  %v7791_v16 = vpop.permute.xlu0 %1331  ;;  %v5830_v52 = vor.u32 %v6636_v45, %v5829_v51  ;;  %v5834_v54 = vor.u32 %v6631_v8, %v5831_v13  ;;  %v5789_v22 = vld [vmem:[#allocation3 + $0xa8] sm:$0xf]  ;;  %v5839_v15 = vld [vmem:[#allocation3 + $0x128] sm:$0xf0] }
 0x263   : > { %1574 = vst [vmem:[#allocation3 + $0x130] sm:$0xff] %v1563_v44  ;;  %v1339_v31 = vrot.slane %v7791_v16, 4  ;;  %v6637_v0 = vld [vmem:[#allocation3 + $0x124] sm:$0xf0]  ;;  %v1605_v55 = vrot.slane %v7605_v33, 4  ;;  %v5794_v32 = vor.u32 %v6621_v59, %v5791_v46 }
 0x264   : > { %1575 = vst [vmem:[#allocation3 + $0x138] sm:$0xff] %v1565_v23  ;;  %5859 = vmatmul.msk.bf16.vlgmr.msra.gmra.mxu2 %vm1014_vm9, %v7775_v48  ;;  %5860 = vmatmul.msk.bf16.vlgmr.msra.gmra.mxu3 %vm1014_vm9, %v7775_v48  ;;  %v5751_v44 = vld [vmem:[#allocation3 + $0x80] sm:$0xf0]  ;;  %v6611_v59 = vld [vmem:[#allocation3 + $0x5c] sm:$0xf] }
 0x265   : > { %1993 = vmatpush.bf16.msrb.mxu2 %v1921_v50  ;;  %2006 = vmatpush.bf16.msrb.mxu3 %v1924_v24  ;;  %v1348_v26 = vsel %vm348_vm0, %v1338_v3, %v1339_v31  ;;  %v7803_v28 = vpop.permute.xlu1 %1229  ;;  %v5790_v50 = vor.u32 %v6626_v17, %v5789_v22  ;;  %v6616_v24 = vld [vmem:[#allocation3 + $0x7c] sm:$0xf0]  ;;  %v6622_v22 = vld [vmem:[#allocation3 + $0xb4] sm:$0xf] }
 0x266   : > { %1968 = vmatpush.bf16.msrb.mxu0 %v5830_v52  ;;  %1981 = vmatpush.bf16.msrb.mxu1 %v5834_v54  ;;  %v1349_v30 = vsel %vm1342_vm10, %v7686_v47, %v1348_v26  ;;  %v1237_v51 = vrot.slane %v7803_v28, 4  ;;  %v7809_v8 = vpop.permute.xlu2 %1382  ;;  %v5837_v36 = vld [vmem:[#allocation3 + $0x100] sm:$0xf]  ;;  %v6632_v37 = vld [vmem:[#allocation3 + $0x104] sm:$0xf] }
 0x267   : > { %1360 = vst [vmem:[#allocation3 + $0x68] sm:$0xff] %v1349_v30  ;;  %v1390_v3 = vrot.slane %v7809_v8, 4  ;;  %v5838_v45 = vor.u32 %v6637_v0, %v5837_v36  ;;  %v5842_v13 = vor.u32 %v6632_v37, %v5839_v15  ;;  %v5749_v47 = vld [vmem:[#allocation3 + $0x58] sm:$0xf]  ;;  %v5797_v54 = vld [vmem:[#allocation3 + $0xb0] sm:$0xf] }
 0x268   : > { %v1246_v33 = vsel %vm348_vm0, %v1236_v40, %v1237_v51  ;;  %v6606_v26 = vld [vmem:[#allocation3 + $0x2c] sm:$0xf0]  ;;  %v5711_v0 = vld [vmem:[#allocation3 + $0x30] sm:$0xf0]  ;;  %v5750_v30 = vor.u32 %v6616_v24, %v5749_v47  ;;  %v5709_v36 = vld [vmem:[#allocation3 + $0x8] sm:$0xf] }
 0x269   : > { %v1247_v23 = vsel %vm1240_vm11, %v7716_v38, %v1246_v33  ;;  %v1399_v52 = vsel %vm348_vm0, %v1389_v4, %v1390_v3  ;;  %v6627_v17 = vld [vmem:[#allocation3 + $0xd4] sm:$0xf0]  ;;  %v5799_v46 = vld [vmem:[#allocation3 + $0xd8] sm:$0xf0]  ;;  %1994 = vmatpush.bf16.msrb.mxu2 %v5838_v45  ;;  %2007 = vmatpush.bf16.msrb.mxu3 %v5842_v13  ;;  %v6617_v37 = vld [vmem:[#allocation3 + $0x84] sm:$0xf0]  ;;  %v5710_v45 = vor.u32 %v6606_v26, %v5709_v36 }
 0x26a   : > { %1969 = vmatpush.bf16.msrb.mxu0 %v5790_v50  ;;  %1982 = vmatpush.bf16.msrb.mxu1 %v5794_v32  ;;  %1258 = vst [vmem:[#allocation3 + $0x18] sm:$0xff] %v1247_v23  ;;  %v1400_v40 = vsel %vm1393_vm1, %v7720_v18, %v1399_v52  ;;  %v1597_v38 = vpop.permute.xlu0 %1596  ;;  %v5698_v4 = vld [vmem:[%s9430_s4 + $0x8] sm:$0xff]  ;;  %v5754_v50 = vor.u32 %v6611_v59, %v5751_v44  ;;  %v1452_v32 = vrot.slane %v7752_v10, 4  ;;  %v6601_v13 = vld [vmem:[#allocation3 + $0xc] sm:$0xf] }
 0x26b   : > { %1411 = vst [vmem:[#allocation3 + $0x90] sm:$0xff] %v1400_v40  ;;  %v1604_v15 = vrot.slane %v1597_v38, 4  ;;  %1677 = vperm.xlu2 %6878, %v5698_v4   ;;  %v5798_v33 = vor.u32 %v6627_v17, %v5797_v54  ;;  %v5802_v18 = vor.u32 %v6622_v22, %v5799_v46  ;;  %v5714_v47 = vor.u32 %v6601_v13, %v5711_v0  ;;  %v5757_v24 = vld [vmem:[#allocation3 + $0x60] sm:$0xf]  ;;  %v5759_v44 = vld [vmem:[#allocation3 + $0x88] sm:$0xf0] }
 0x26c   : > { %v5758_v22 = vor.u32 %v6617_v37, %v5757_v24 }
 0x26d   : > { %v1613_v23 = vsel %vm348_vm0, %v1603_v41, %v1604_v15  ;;  %v1615_v52 = vsel %vm348_vm0, %v1604_v15, %v1605_v55  ;;  %v1444_v40 = vpop.permute.xlu1 %1443  ;;  %1995 = vmatpush.bf16.msrb.mxu2 %v5798_v33  ;;  %2008 = vmatpush.bf16.msrb.mxu3 %v5802_v18  ;;  %v6612_v41 = vld [vmem:[#allocation3 + $0x64] sm:$0xf]  ;;  %v5717_v33 = vld [vmem:[#allocation3 + $0x10] sm:$0xf]  ;;  %v6602_v18 = vld [vmem:[#allocation3 + $0x14] sm:$0xf] }
 0x26e   : > { %1970 = vmatpush.bf16.msrb.mxu0 %v5750_v30  ;;  %1983 = vmatpush.bf16.msrb.mxu1 %v5754_v50  ;;  %v1614_v59 = vsel %vm1607_vm13, %v7741_v60, %v1613_v23  ;;  %v1616_v10 = vsel %vm1607_vm13, %v1597_v38, %v1615_v52  ;;  %v1451_v54 = vrot.slane %v1444_v40, 4  ;;  %v1232_v17 = vpop.permute.xlu2 %1231  ;;  %v5762_v30 = vor.u32 %v6612_v41, %v5759_v44  ;;  %v6607_v23 = vld [vmem:[#allocation3 + $0x34] sm:$0xf0]  ;;  %v5719_v52 = vld [vmem:[#allocation3 + $0x38] sm:$0xf0] }
 0x26f   : > { %v1238_v46 = vrot.slane %v1232_v17, 4  ;;  %v1811_v26 = vunpack.c.l.b16 %v1614_v59  ;;  %v1812_v55 = vunpack.c.h.b16 %v1614_v59  ;;  %v1813_v4 = vunpack.c.l.b16 %v1616_v10  ;;  %v7861_v17 = vld [vmem:[#allocation2 + $0x48] sm:$0xff] }
 0x270   : > { %v1460_v0 = vsel %vm348_vm0, %v1450_v27, %v1451_v54  ;;  %v1462_v15 = vsel %vm348_vm0, %v1451_v54, %v1452_v32  ;;  %v1814_v60 = vunpack.c.h.b16 %v1616_v10  ;;  %v1503_v38 = vrot.slane %v7614_v39, 4  ;;  %2120 = vrot.lane.b32.xlu1 %v7861_v17, %s6996_s13  ;;  %2222 = vrot.lane.b32.xlu0 %v7861_v17, %s6997_s15 }
 0x271   : > { %v1461_v50 = vsel %vm1454_vm14, %v7766_v62, %v1460_v0  ;;  %v1463_v36 = vsel %vm1454_vm14, %v1444_v40, %v1462_v15  ;;  %v1248_v37 = vsel %vm348_vm0, %v1237_v51, %v1238_v46  ;;  %1996 = vmatpush.bf16.msrb.mxu2 %v5758_v22  ;;  %2009 = vmatpush.bf16.msrb.mxu3 %v5762_v30  ;;  %v5847_v15 = vld [vmem:[#allocation3 + $0x130] sm:$0xf0]  ;;  %v6639_v30 = vld [vmem:[#allocation3 + $0x134] sm:$0xf0]  ;;  %vm3911_vm13 = vcmask 916480  }
 0x272   : > { %1971 = vmatpush.bf16.msrb.mxu0 %v5710_v45  ;;  %1984 = vmatpush.bf16.msrb.mxu1 %v5714_v47  ;;  %1472 = vst [vmem:[#allocation3 + $0xe0] sm:$0xff] %v1461_v50  ;;  %v1249_v27 = vsel %vm1240_vm11, %v7803_v28, %v1248_v37  ;;  %v1495_v39 = vpop.permute.xlu0 %1494  ;;  %v1861_v32 = vpack.c.b16 %v1811_v26, %v1811_v26  ;;  %v5855_v50 = vld [vmem:[#allocation3 + $0x138] sm:$0xf0]  ;;  %vm3850_vm11 = vcmask 130048  }
 0x273   : > { %v1862_v13 = vpack.c.b16 %v1812_v55, %v1812_v55  ;;  %1473 = vst [vmem:[#allocation3 + $0xe8] sm:$0xff] %v1463_v36  ;;  %v1502_v62 = vrot.slane %v1495_v39, 4  ;;  %v1863_v40 = vpack.c.b16 %v1813_v4, %v1813_v4  ;;  %v1864_v24 = vpack.c.b16 %v1814_v60, %v1814_v60  ;;  %v6638_v4 = vld [vmem:[#allocation3 + $0x12c] sm:$0xf0] }
 0x274   : > { %1259 = vst [vmem:[#allocation3 + $0x20] sm:$0xff] %v1249_v27  ;;  %v5718_v51 = vor.u32 %v6607_v23, %v5717_v33  ;;  %v5722_v28 = vor.u32 %v6602_v18, %v5719_v52  ;;  %v1927_v45 = vsel %vm348_vm0, %v1861_v32, 0  ;;  %v5805_v52 = vld [vmem:[#allocation3 + $0xb8] sm:$0xf] }
 0x275   : > { %5861 = vmatmul.msk.bf16.vlgmr.msrb.gmra.mxu0 %vm1014_vm9, %v7775_v48  ;;  %5862 = vmatmul.msk.bf16.vlgmr.msrb.gmra.mxu1 %vm1014_vm9, %v7775_v48  ;;  %v1930_v47 = vsel %vm348_vm0, %v1862_v13, 0  ;;  %v1511_v44 = vsel %vm348_vm0, %v1501_v6, %v1502_v62  ;;  %v1513_v59 = vsel %vm348_vm0, %v1502_v62, %v1503_v38  ;;  %v1334_v10 = vpop.permute.xlu1 %1333  ;;  %v1933_v54 = vsel %vm348_vm0, %v1863_v40, 0  ;;  %v6623_v40 = vld [vmem:[#allocation3 + $0xbc] sm:$0xf] }
 0x276   : > { %2019 = vmatpush.bf16.msra.mxu0 %v1927_v45  ;;  %2032 = vmatpush.bf16.msra.mxu1 %v1930_v47  ;;  %v1512_v22 = vsel %vm1505_vm15, %v7758_v11, %v1511_v44  ;;  %v1514_v46 = vsel %vm1505_vm15, %v1495_v39, %v1513_v59  ;;  %v1340_v41 = vrot.slane %v1334_v10, 4  ;;  %v1936_v26 = vsel %vm348_vm0, %v1864_v24, 0  ;;  %v5813_v47 = vld [vmem:[#allocation3 + $0xc0] sm:$0xf]  ;;  %v6624_v44 = vld [vmem:[#allocation3 + $0xc4] sm:$0xf] }
 0x277   : > { %1997 = vmatpush.bf16.msrb.mxu2 %v5718_v51  ;;  %2010 = vmatpush.bf16.msrb.mxu3 %v5722_v28  ;;  %1523 = vst [vmem:[#allocation3 + $0x108] sm:$0xff] %v1512_v22  ;;  %v5767_v22 = vld [vmem:[#allocation3 + $0x90] sm:$0xf0] }
 0x278   : > { %1524 = vst [vmem:[#allocation3 + $0x110] sm:$0xff] %v1514_v46  ;;  %v1350_v6 = vsel %vm348_vm0, %v1339_v31, %v1340_v41  ;;  %2171 = vrot.lane.b32.xlu0 %v7861_v17, %s6998_s16 }
 0x279   : > { %v1351_v11 = vsel %vm1342_vm10, %v7791_v16, %v1350_v6  ;;  %v6628_v13 = vld [vmem:[#allocation3 + $0xdc] sm:$0xf0]  ;;  %v5807_v62 = vld [vmem:[#allocation3 + $0xe0] sm:$0xf0]  ;;  %v6613_v6 = vld [vmem:[#allocation3 + $0x6c] sm:$0xf] }
 0x27a   : > { %5863 = vmatmul.msk.bf16.vlgmr.msrb.gmra.mxu2 %vm1014_vm9, %v7775_v48  ;;  %5864 = vmatmul.msk.bf16.vlgmr.msrb.gmra.mxu3 %vm1014_vm9, %v7775_v48  ;;  %1361 = vst [vmem:[#allocation3 + $0x70] sm:$0xff] %v1351_v11  ;;  %v1385_v55 = vpop.permute.xlu0 %1384  ;;  %v5806_v28 = vor.u32 %v6628_v13, %v5805_v52  ;;  %v5810_v45 = vor.u32 %v6623_v40, %v5807_v62  ;;  %vm3036_vm10 = vcmask 64512  }
 0x27b   : > { %2045 = vmatpush.bf16.msra.mxu2 %v1933_v54  ;;  %2058 = vmatpush.bf16.msra.mxu3 %v1936_v26  ;;  %v1391_v31 = vrot.slane %v1385_v55, 4  ;;  %v6618_v54 = vld [vmem:[#allocation3 + $0x8c] sm:$0xf0]  ;;  %v5765_v26 = vld [vmem:[#allocation3 + $0x68] sm:$0xf] }
 0x27d   : > { %v1401_v0 = vsel %vm348_vm0, %v1390_v3, %v1391_v31  ;;  %v1283_v27 = vpop.permute.xlu1 %1282  ;;  %v5815_v3 = vld [vmem:[#allocation3 + $0xe8] sm:$0xf0] }
 0x27e   : > { %v1402_v60 = vsel %vm1393_vm1, %v7809_v8, %v1401_v0  ;;  %v5845_v16 = vld [vmem:[#allocation3 + $0x108] sm:$0xf]  ;;  %v6633_v38 = vld [vmem:[#allocation3 + $0x10c] sm:$0xf]  ;;  %v1289_v24 = vrot.slane %v1283_v27, 4  ;;  %v5818_v10 = vor.u32 %v6624_v44, %v5815_v3 }
 0x27f   : > { %1412 = vst [vmem:[#allocation3 + $0x98] sm:$0xff] %v1402_v60  ;;  %v5846_v36 = vor.u32 %v6638_v4, %v5845_v16  ;;  %v5850_v37 = vor.u32 %v6633_v38, %v5847_v15  ;;  %v5853_v33 = vld [vmem:[#allocation3 + $0x110] sm:$0xf]  ;;  %v6634_v18 = vld [vmem:[#allocation3 + $0x114] sm:$0xf] }
 0x280   : > { %v5854_v39 = vor.u32 %v6639_v30, %v5853_v33  ;;  %v5858_v32 = vor.u32 %v6634_v18, %v5855_v50  ;;  %v6629_v8 = vld [vmem:[#allocation3 + $0xe4] sm:$0xf0]  ;;  %v5766_v30 = vor.u32 %v6618_v54, %v5765_v26  ;;  %v5725_v38 = vld [vmem:[#allocation3 + $0x18] sm:$0xf]  ;;  %v6603_v50 = vld [vmem:[#allocation3 + $0x1c] sm:$0xf] }
 0x281   : > { %2020 = vmatpush.bf16.msra.mxu0 %v5846_v36  ;;  %2033 = vmatpush.bf16.msra.mxu1 %v5850_v37  ;;  %v5814_v59 = vor.u32 %v6629_v8, %v5813_v47  ;;  %v5773_v11 = vld [vmem:[#allocation3 + $0x70] sm:$0xf]  ;;  %v6614_v0 = vld [vmem:[#allocation3 + $0x74] sm:$0xf]  ;;  %v5733_v37 = vld [vmem:[#allocation3 + $0x20] sm:$0xf] }
 0x282   : > { %2046 = vmatpush.bf16.msra.mxu2 %v5854_v39  ;;  %2059 = vmatpush.bf16.msra.mxu3 %v5858_v32  ;;  %v1281_v23 = vpop.permute.xlu0 %1280  ;;  %v6604_v39 = vld [vmem:[#allocation3 + $0x24] sm:$0xf]  ;;  %v2477_v8 = vld [vmem:[#allocation2 + $0x7c] sm:$0xff]  ;;  %v2478_v3 = vld [vmem:[#allocation2 + $0x84] sm:$0xf] }
 0x283   : > { %v1288_v51 = vrot.slane %v1281_v23, 4  ;;  %2493 = vrot.lane.b32.xlu1 %v2477_v8, %s6997_s15  ;;  %2443 = vrot.lane.b32.xlu0 %v2477_v8, %s6998_s16 }
 0x284   : > { %2393 = vrot.lane.b32.xlu2 %v2477_v8, %s6996_s13 }
 0x285   : > { %v1297_v46 = vsel %vm348_vm0, %v1287_v34, %v1288_v51  ;;  %v1299_v41 = vsel %vm348_vm0, %v1288_v51, %v1289_v24  ;;  %2021 = vmatpush.bf16.msra.mxu0 %v5806_v28  ;;  %2034 = vmatpush.bf16.msra.mxu1 %v5810_v45  ;;  %v5770_v34 = vor.u32 %v6613_v6, %v5767_v22 }
 0x286   : > { %v1298_v55 = vsel %vm1291_vm12, %v7661_v21, %v1297_v46  ;;  %v1300_v31 = vsel %vm1291_vm12, %v1281_v23, %v1299_v41  ;;  %2047 = vmatpush.bf16.msra.mxu2 %v5814_v59  ;;  %2060 = vmatpush.bf16.msra.mxu3 %v5818_v10  ;;  %v6619_v4 = vld [vmem:[#allocation3 + $0x94] sm:$0xf0]  ;;  %v5775_v15 = vld [vmem:[#allocation3 + $0x98] sm:$0xf0] }
 0x287   : > { %1309 = vst [vmem:[#allocation3 + $0x40] sm:$0xff] %v1298_v55  ;;  %v5774_v60 = vor.u32 %v6619_v4, %v5773_v11  ;;  %v5778_v16 = vor.u32 %v6614_v0, %v5775_v15 }
 0x288   : > { %1310 = vst [vmem:[#allocation3 + $0x48] sm:$0xff] %v1300_v31 }
 0x289   : > { %2022 = vmatpush.bf16.msra.mxu0 %v5766_v30  ;;  %2035 = vmatpush.bf16.msra.mxu1 %v5770_v34 }
 0x28a   : > { %2048 = vmatpush.bf16.msra.mxu2 %v5774_v60  ;;  %2061 = vmatpush.bf16.msra.mxu3 %v5778_v16 }
 0x28b   : > { %2495 = vrot.lane.b32.xlu1 %v2478_v3, %s6997_s15 }
 0x28e   : > { %v6608_v21 = vld [vmem:[#allocation3 + $0x3c] sm:$0xf0]  ;;  %v5727_v36 = vld [vmem:[#allocation3 + $0x40] sm:$0xf0] }
 0x28f   : > { %v5726_v33 = vor.u32 %v6608_v21, %v5725_v38  ;;  %v5730_v18 = vor.u32 %v6603_v50, %v5727_v36  ;;  %v6609_v27 = vld [vmem:[#allocation3 + $0x44] sm:$0xf0]  ;;  %v5735_v32 = vld [vmem:[#allocation3 + $0x48] sm:$0xf0] }
 0x290   : > { %v5734_v13 = vor.u32 %v6609_v27, %v5733_v37  ;;  %v5738_v62 = vor.u32 %v6604_v39, %v5735_v32 }
 0x291   : > { %2023 = vmatpush.bf16.msra.mxu0 %v5726_v33  ;;  %2036 = vmatpush.bf16.msra.mxu1 %v5730_v18 }
 0x292   : > { %2049 = vmatpush.bf16.msra.mxu2 %v5734_v13  ;;  %2062 = vmatpush.bf16.msra.mxu3 %v5738_v62 }
 0x294   : > { %5865 = vmatmul.msk.bf16.vlgmr.msra.gmra.mxu0 %vm1014_vm9, %v7775_v48  ;;  %5866 = vmatmul.msk.bf16.vlgmr.msra.gmra.mxu1 %vm1014_vm9, %v7775_v48 }
 0x295   : > { %5867 = vmatmul.msk.bf16.vlgmr.msra.gmra.mxu2 %vm1014_vm9, %v7775_v48  ;;  %5868 = vmatmul.msk.bf16.vlgmr.msra.gmra.mxu3 %vm1014_vm9, %v7775_v48 }
 0x2c5   : > { %v7906_v23 = vpop.permute.xlu2 %1677 }
 0x2e7   : > { %v1947_v52 = vpop.f32.mrf.mxu2  ;;  %v1960_v40 = vpop.f32.mrf.mxu3 }
 0x2e8   : > { %v7909_v24 = vadd.f32 %v1947_v52, %v7906_v23  ;;  %v7912_v51 = vadd.f32 %v1960_v40, %v7906_v23 }
 0x2ea   : > { %v9450_v48 = vmax.f32 %v7909_v24, 0.0  ;;  %v9449_v28 = vmax.f32 %v7912_v51, 0.0 }
 0x2ec   : > { %v2088_v45 = vmul.f32 %v9450_v48, %v7470_v1  ;;  %v2089_v47 = vmul.f32 %v9449_v28, %v7476_v42 }
 0x2ee   : > { %v2098_v44 = vpack.c.bf16 %v2089_v47, %v2088_v45 }
 0x2ef   : > { %v1949_v59 = vpop.f32.mrf.mxu2  ;;  %v1962_v10 = vpop.f32.mrf.mxu3 }
 0x2f0   : > { %2103 = vst [vmem:[#allocation2 + $0x54] sm:$0xff] %v2098_v44 }
 0x2f1   : > { %2317 = vst [vmem:[#allocation3 + $0xa0] sm:$0xff] %v2098_v44 }
 0x2f2   : > { %v1973_v54 = vpop.f32.mrf.mxu0  ;;  %v1986_v22 = vpop.f32.mrf.mxu1 }
 0x2f3   : > { %v7923_v46 = vadd.f32 %v1973_v54, %v7906_v23  ;;  %v7926_v41 = vadd.f32 %v1986_v22, %v7906_v23 }
 0x2f5   : > { %v9448_v26 = vmax.f32 %v7923_v46, 0.0  ;;  %v9447_v6 = vmax.f32 %v7926_v41, 0.0 }
 0x2f7   : > { %v2090_v11 = vmul.f32 %v9448_v26, %v7495_v2  ;;  %v2091_v55 = vmul.f32 %v9447_v6, %v7501_v58  ;;  %v2261_v27 = vld [vmem:[#allocation2 + $0x50] sm:$0xff] }
 0x2f9   : > { %v2099_v31 = vpack.c.bf16 %v2091_v55, %v2090_v11 }
 0x2fa   : > { %v1975_v4 = vpop.f32.mrf.mxu0  ;;  %v1988_v0 = vpop.f32.mrf.mxu1 }
 0x2fb   : > { %2104 = vst [vmem:[#allocation2 + $0x5c] sm:$0xff] %v2099_v31  ;;  %2485 = vrot.lane.b32.xlu0 %v2099_v31, %s6997_s15  ;;  %2435 = vrot.lane.b32.xlu1 %v2099_v31, %s6998_s16 }
 0x2fc   : > { %2385 = vrot.lane.b32.xlu2 %v2099_v31, %s6996_s13  ;;  %2318 = vst [vmem:[#allocation3 + $0xa8] sm:$0xff] %v2099_v31 }
 0x2fd   : > { %v1999_v15 = vpop.f32.mrf.mxu2  ;;  %v2012_v30 = vpop.f32.mrf.mxu3 }
 0x2fe   : > { %v7940_v34 = vadd.f32 %v1999_v15, %v7906_v23  ;;  %v7943_v60 = vadd.f32 %v2012_v30, %v7906_v23 }
 0x300   : > { %v9446_v16 = vmax.f32 %v7940_v34, 0.0  ;;  %v9445_v38 = vmax.f32 %v7943_v60, 0.0 }
 0x302   : > { %v2092_v50 = vmul.f32 %v9446_v16, %v7516_v14  ;;  %v2093_v21 = vmul.f32 %v9445_v38, %v7522_v63  ;;  %v2262_v36 = vld [vmem:[#allocation2 + $0x58] sm:$0xff] }
 0x303   : > { %2334 = vrot.lane.b32.xlu1 %v2098_v44, %s6999_s17  ;;  %2275 = vrot.lane.b32.xlu0 %v2262_v36, %s7000_s25 }
 0x304   : > { %v2100_v37 = vpack.c.bf16 %v2093_v21, %v2092_v50  ;;  %2336 = vrot.lane.b32.xlu2 %v2099_v31, %s6999_s17  ;;  %v2378_v21 = vld [vmem:[#allocation2 + $0x84] sm:$0xf] }
 0x305   : > { %v2001_v33 = vpop.f32.mrf.mxu2  ;;  %v2014_v18 = vpop.f32.mrf.mxu3 }
 0x306   : > { %2105 = vst [vmem:[#allocation2 + $0x64] sm:$0xff] %v2100_v37  ;;  %v8013_v33 = vpop.permute.xlu0 %2222  ;;  %v2121_v18 = vpop.permute.xlu1 %2120 }
 0x307   : > { %2319 = vst [vmem:[#allocation3 + $0xb0] sm:$0xff] %v2100_v37  ;;  %v2234_v38 = vrot.slane %v8013_v33, 4 }
 0x30b   : > { %2224 = vrot.lane.b32.xlu1 %v2261_v27, %s6997_s15  ;;  %2124 = vrot.lane.b32.xlu0 %v2262_v36, %s6996_s13 }
 0x30c   : > { %2273 = vrot.lane.b32.xlu2 %v2261_v27, %s7000_s25 }
 0x30d   : > { %v2111_v30 = vld [vmem:[#allocation2 + $0x60] sm:$0xff] }
 0x311   : > { %v2025_v39 = vpop.f32.mrf.mxu0  ;;  %v2038_v32 = vpop.f32.mrf.mxu1 }
 0x312   : > { %v7960_v13 = vadd.f32 %v2025_v39, %v7906_v23  ;;  %v7963_v62 = vadd.f32 %v2038_v32, %v7906_v23  ;;  %v2327_v32 = vld [vmem:[#allocation2 + $0x7c] sm:$0xf] }
 0x313   : > { %2173 = vrot.lane.b32.xlu1 %v2261_v27, %s6998_s16  ;;  %2387 = vrot.lane.b32.xlu0 %v2100_v37, %s6996_s13 }
 0x314   : > { %2122 = vrot.lane.b32.xlu2 %v2261_v27, %s6996_s13  ;;  %v9444_v8 = vmax.f32 %v7960_v13, 0.0  ;;  %v9443_v3 = vmax.f32 %v7963_v62, 0.0  ;;  %v2428_v27 = vld [vmem:[#allocation2 + $0x84] sm:$0xf] }
 0x316   : > { %v2094_v52 = vmul.f32 %v9444_v8, %v7545_v56  ;;  %v2095_v40 = vmul.f32 %v9443_v3, %v7551_v35 }
 0x318   : > { %v2101_v45 = vpack.c.bf16 %v2095_v40, %v2094_v52  ;;  %v2051_v47 = vpop.f32.mrf.mxu2  ;;  %v2064_v44 = vpop.f32.mrf.mxu3 }
 0x319   : > { %v7977_v59 = vadd.f32 %v2051_v47, %v7906_v23  ;;  %v7980_v10 = vadd.f32 %v2064_v44, %v7906_v23  ;;  %v2027_v54 = vpop.f32.mrf.mxu0  ;;  %v2040_v22 = vpop.f32.mrf.mxu1 }
 0x31a   : > { %2106 = vst [vmem:[#allocation2 + $0x6c] sm:$0xff] %v2101_v45  ;;  %v8020_v52 = vpop.permute.xlu0 %2171  ;;  %v8022_v47 = vpop.permute.xlu1 %2493  ;;  %v5870_v54 = vld [vmem:[%s9430_s4 + $0x10] sm:$0xff] }
 0x31b   : > { %9498 = vst [vmem:[#allocation18_spill] sm:$0xff] %v7977_v59  ;;  %2175 = vrot.lane.b32.xlu1 %v2262_v36, %s6998_s16  ;;  %2489 = vrot.lane.b32.xlu0 %v2101_v45, %s6997_s15  ;;  %v9442_v11 = vmax.f32 %v7977_v59, 0.0  ;;  %v9441_v55 = vmax.f32 %v7980_v10, 0.0  ;;  %v9504_v35 = vrot.slane %v8022_v47, 4 }
 0x31c   : > { %9499 = vst [vmem:[#allocation19_spill] sm:$0xff] %v7980_v10  ;;  %2226 = vrot.lane.b32.xlu2 %v2262_v36, %s6997_s15 }
 0x31d   : > { %2320 = vst [vmem:[#allocation3 + $0xb8] sm:$0xff] %v2101_v45  ;;  %v2096_v31 = vmul.f32 %v9442_v11, %v7570_v25  ;;  %v2097_v23 = vmul.f32 %v9441_v55, %v7575_v5 }
 0x31f   : > { %v2102_v4 = vpack.c.bf16 %v2097_v23, %v2096_v31 }
 0x320   : > { %v2053_v0 = vpop.f32.mrf.mxu2  ;;  %v2066_v15 = vpop.f32.mrf.mxu3 }
 0x321   : > { %2107 = vst [vmem:[#allocation2 + $0x74] sm:$0xff] %v2102_v4  ;;  %v2264_v50 = vld [vmem:[#allocation2 + $0x68] sm:$0xff]  ;;  %v2113_v40 = vld [vmem:[#allocation2 + $0x70] sm:$0xf] }
 0x322   : > { %2321 = vst [vmem:[#allocation3 + $0xc0] sm:$0xff] %v2102_v4  ;;  %v2215_v22 = vld [vmem:[#allocation2 + $0x70] sm:$0xf]  ;;  %v8032_v31 = vpop.permute.xlu0 %2443  ;;  %v8035_v23 = vpop.permute.xlu1 %2495 }
 0x323   : > { %2487 = vrot.lane.b32.xlu1 %v2100_v37, %s6997_s15  ;;  %2439 = vrot.lane.b32.xlu0 %v2101_v45, %s6998_s16  ;;  %v2164_v0 = vld [vmem:[#allocation2 + $0x70] sm:$0xf] }
 0x324   : > { %2437 = vrot.lane.b32.xlu2 %v2100_v37, %s6998_s16 }
 0x328   : > { %v2265_v36 = vld [vmem:[#allocation2 + $0x70] sm:$0xff] }
 0x32b   : > { %2126 = vrot.lane.b32.xlu1 %v2111_v30, %s6996_s13  ;;  %2277 = vrot.lane.b32.xlu0 %v2111_v30, %s7000_s25 }
 0x32c   : > { %2389 = vrot.lane.b32.xlu2 %v2101_v45, %s6996_s13 }
 0x333   : > { %2491 = vrot.lane.b32.xlu1 %v2102_v4, %s6997_s15  ;;  %2279 = vrot.lane.b32.xlu0 %v2264_v50, %s7000_s25 }
 0x334   : > { %2338 = vrot.lane.b32.xlu2 %v2100_v37, %s6999_s17  ;;  %v8011_v37 = vpop.permute.xlu2 %2393 }
 0x33b   : > { %2441 = vrot.lane.b32.xlu1 %v2102_v4, %s6998_s16  ;;  %2391 = vrot.lane.b32.xlu0 %v2102_v4, %s6996_s13 }
 0x33c   : > { %2340 = vrot.lane.b32.xlu2 %v2101_v45, %s6999_s17  ;;  %v2266_v45 = vld [vmem:[#allocation2 + $0x78] sm:$0xf] }
 0x343   : > { %2395 = vrot.lane.b32.xlu1 %v2378_v21, %s6996_s13  ;;  %2230 = vrot.lane.b32.xlu0 %v2264_v50, %s6997_s15  ;;  %v2132_v21 = vrot.slane %v2121_v18, 4 }
 0x344   : > { %2228 = vrot.lane.b32.xlu2 %v2111_v30, %s6997_s15 }
 0x34b   : > { %2281 = vrot.lane.b32.xlu1 %v2265_v36, %s7000_s25  ;;  %2342 = vrot.lane.b32.xlu0 %v2102_v4, %s6999_s17 }
 0x34c   : > { %2177 = vrot.lane.b32.xlu2 %v2111_v30, %s6998_s16 }
 0x353   : > { %2179 = vrot.lane.b32.xlu1 %v2264_v50, %s6998_s16  ;;  %2128 = vrot.lane.b32.xlu0 %v2264_v50, %s6996_s13 }
 0x354   : > { %2445 = vrot.lane.b32.xlu2 %v2428_v27, %s6998_s16 }
 0x356   : > { %v8018_v39 = vpop.permute.xlu2 %2385 }
 0x35b   : > { %2130 = vrot.lane.b32.xlu1 %v2113_v40, %s6996_s13  ;;  %2283 = vrot.lane.b32.xlu0 %v2266_v45, %s7000_s25  ;;  %s7004_s25 = smov 16  }
 0x35c   : > { %2344 = vrot.lane.b32.xlu2 %v2327_v32, %s6999_s17 }
 0x35e   : > { %v8027_v44 = vpop.permute.xlu2 %2336 }
 0x363   : > { %2574 = vperm.xlu0 %6877, %v5870_v54   ;;  %v2347_v54 = vrot.slane %v8027_v44, 4 }
 0x364   : > { %2232 = vrot.lane.b32.xlu2 %v2215_v22, %s6997_s15 }
 0x366   : > { %v2274_v4 = vpop.permute.xlu2 %2273 }
 0x367   : > { %v2285_v22 = vrot.slane %v2274_v4, 4 }
 0x36c   : > { %2181 = vrot.lane.b32.xlu2 %v2164_v0, %s6998_s16 }
 0x36d   : > { %v8038_v15 = vpop.permute.xlu0 %2485  ;;  %v2436_v30 = vpop.permute.xlu1 %2435 }
 0x36e   : > { %v2123_v50 = vpop.permute.xlu2 %2122  ;;  %v2447_v28 = vrot.slane %v2436_v30, 4 }
 0x36f   : > { %v2133_v36 = vrot.slane %v2123_v50, 4 }
 0x371   : > { %v2138_v27 = vsel %vm348_vm0, %v2132_v21, %v2133_v36 }
 0x372   : > { %v2140_v32 = vsel %vm2139_vm3, %v2121_v18, %v2138_v27 }
 0x373   : > { %2154 = vst [vmem:[#allocation3] sm:$0xff] %v2140_v32 }
 0x375   : > { %v2335_v40 = vpop.permute.xlu1 %2334  ;;  %v8042_v45 = vpop.permute.xlu0 %2275 }
 0x376   : > { %v2346_v0 = vrot.slane %v2335_v40, 4  ;;  %v9453_v55 = vrot.slane %v8042_v45, 4  ;;  %v8046_v11 = vpop.permute.xlu2 %2226 }
 0x377   : > { %v9452_v16 = vrot.slane %v8046_v11, 4  ;;  %v9502_v25 = vrot.slane %v8046_v11, 4 }
 0x378   : > { %v2352_v3 = vsel %vm348_vm0, %v2346_v0, %v2347_v54  ;;  %v2291_v18 = vsel %vm348_vm0, %v2285_v22, %v9453_v55 }
 0x379   : > { %v2354_v21 = vsel %vm2353_vm4, %v2335_v40, %v2352_v3  ;;  %v2293_v27 = vsel %vm2292_vm5, %v2274_v4, %v2291_v18 }
 0x37a   : > { %2368 = vst [vmem:[#allocation3 + $0xc8] sm:$0xff] %v2354_v21 }
 0x37b   : > { %2307 = vst [vmem:[#allocation3 + $0x78] sm:$0xff] %v2293_v27 }
 0x37d   : > { %v2225_v32 = vpop.permute.xlu1 %2224  ;;  %v8054_v8 = vpop.permute.xlu0 %2124 }
 0x37e   : > { %v2235_v6 = vrot.slane %v2225_v32, 4  ;;  %v2134_v0 = vrot.slane %v8054_v8, 4  ;;  %v2438_v26 = vpop.permute.xlu2 %2437 }
 0x37f   : > { %v2448_v22 = vrot.slane %v2438_v26, 4 }
 0x380   : > { %v2240_v3 = vsel %vm348_vm0, %v2234_v38, %v2235_v6  ;;  %v2243_v4 = vsel %vm348_vm0, %v2235_v6, %v9452_v16  ;;  %v2141_v40 = vsel %vm348_vm0, %v2133_v36, %v2134_v0  ;;  %v2397_v16 = vrot.slane %v8018_v39, 4 }
 0x381   : > { %v2242_v18 = vsel %vm2241_vm7, %v8013_v33, %v2240_v3  ;;  %v2244_v21 = vsel %vm2241_vm7, %v2225_v32, %v2243_v4  ;;  %v2142_v27 = vsel %vm2139_vm3, %v2123_v50, %v2141_v40  ;;  %v2453_v48 = vsel %vm348_vm0, %v2447_v28, %v2448_v22  ;;  %v5955_v59 = vld [vmem:[#allocation3 + $0xc8] sm:$0xf0] }
 0x382   : > { %2256 = vst [vmem:[#allocation3 + $0x50] sm:$0xff] %v2242_v18  ;;  %v2454_v38 = vsel %vm2190_vm6, %v2436_v30, %v2453_v48  ;;  %v2183_v36 = vrot.slane %v8020_v52, 4 }
 0x383   : > { %2257 = vst [vmem:[#allocation3 + $0x58] sm:$0xff] %v2244_v21 }
 0x384   : > { %2155 = vst [vmem:[#allocation3 + $0x8] sm:$0xff] %v2142_v27 }
 0x385   : > { %2468 = vst [vmem:[#allocation3 + $0x118] sm:$0xff] %v2454_v38  ;;  %v2174_v6 = vpop.permute.xlu1 %2173  ;;  %v2388_v53 = vpop.permute.xlu0 %2387 }
 0x386   : > { %v2184_v55 = vrot.slane %v2174_v6, 4  ;;  %v2398_v33 = vrot.slane %v2388_v53, 4  ;;  %v8074_v3 = vpop.permute.xlu2 %2389 }
 0x387   : > { %v9454_v50 = vrot.slane %v8074_v3, 4 }
 0x388   : > { %v2189_v28 = vsel %vm348_vm0, %v2183_v36, %v2184_v55  ;;  %v2403_v32 = vsel %vm348_vm0, %v2397_v16, %v2398_v33 }
 0x389   : > { %v2191_v48 = vsel %vm2190_vm6, %v8020_v52, %v2189_v28  ;;  %v2404_v30 = vsel %vm2139_vm3, %v8018_v39, %v2403_v32  ;;  %v2405_v4 = vsel %vm348_vm0, %v2398_v33, %v9454_v50  ;;  %v2497_v32 = vrot.slane %v8038_v15, 4 }
 0x38a   : > { %2205 = vst [vmem:[#allocation3 + $0x28] sm:$0xff] %v2191_v48  ;;  %v2406_v40 = vsel %vm2139_vm3, %v2388_v53, %v2405_v4 }
 0x38b   : > { %2418 = vst [vmem:[#allocation3 + $0xf0] sm:$0xff] %v2404_v30 }
 0x38c   : > { %2419 = vst [vmem:[#allocation3 + $0xf8] sm:$0xff] %v2406_v40 }
 0x38d   : > { %v8087_v18 = vpop.permute.xlu1 %2175  ;;  %v8089_v21 = vpop.permute.xlu0 %2489 }
 0x38e   : > { %v9455_v16 = vrot.slane %v8087_v18, 4  ;;  %v2339_v27 = vpop.permute.xlu2 %2338  ;;  %v9456_v48 = vrot.slane %v8089_v21, 4 }
 0x38f   : > { %v2348_v52 = vrot.slane %v2339_v27, 4 }
 0x390   : > { %v2192_v39 = vsel %vm348_vm0, %v2184_v55, %v9455_v16 }
 0x391   : > { %v2193_v38 = vsel %vm2190_vm6, %v2174_v6, %v2192_v39  ;;  %v2355_v36 = vsel %vm348_vm0, %v2347_v54, %v2348_v52 }
 0x392   : > { %2206 = vst [vmem:[#allocation3 + $0x30] sm:$0xff] %v2193_v38  ;;  %v2356_v53 = vsel %vm2353_vm4, %v8027_v44, %v2355_v36 }
 0x393   : > { %2369 = vst [vmem:[#allocation3 + $0xd0] sm:$0xff] %v2356_v53 }
 0x395   : > { %v2488_v33 = vpop.permute.xlu1 %2487  ;;  %v8099_v28 = vpop.permute.xlu0 %2439 }
 0x396   : > { %v2498_v30 = vrot.slane %v2488_v33, 4  ;;  %v8103_v4 = vpop.permute.xlu2 %2340  ;;  %v9457_v55 = vrot.slane %v8099_v28, 4 }
 0x397   : > { %v9458_v6 = vrot.slane %v8103_v4, 4 }
 0x398   : > { %v2503_v54 = vsel %vm348_vm0, %v2497_v32, %v2498_v30  ;;  %v2505_v44 = vsel %vm348_vm0, %v2498_v30, %v9456_v48  ;;  %v2455_v40 = vsel %vm348_vm0, %v2448_v22, %v9457_v55  ;;  %v8122_v22 = vld [vmem:[#allocation3 + $0x24] sm:$0xf0]  ;;  %v8124_v55 = vld [vmem:[#allocation3 + $0x28] sm:$0xf0] }
 0x399   : > { %v2504_v39 = vsel %vm2241_vm7, %v8038_v15, %v2503_v54  ;;  %v2506_v38 = vsel %vm2241_vm7, %v2488_v33, %v2505_v44  ;;  %v2357_v36 = vsel %vm348_vm0, %v2348_v52, %v9458_v6  ;;  %v2456_v53 = vsel %vm2190_vm6, %v2438_v26, %v2455_v40  ;;  %v3056_v15 = vld [vmem:[#allocation2 + $0x40] sm:$0xff] }
 0x39a   : > { %v2358_v32 = vsel %vm2353_vm4, %v2339_v27, %v2357_v36  ;;  %2469 = vst [vmem:[#allocation3 + $0x120] sm:$0xff] %v2456_v53  ;;  %v2702_v50 = vunpack.c.l.b16 %v2504_v39  ;;  %v2703_v30 = vunpack.c.h.b16 %v2504_v39  ;;  %v2704_v16 = vunpack.c.l.b16 %v2506_v38  ;;  %v8126_v52 = vld [vmem:[#allocation3 + $0x2c] sm:$0xf0]  ;;  %v8128_v26 = vld [vmem:[#allocation3 + $0x30] sm:$0xf0]  ;;  %3078 = vrot.lane.b32.xlu1 %v3056_v15, %s7001_s9 }
 0x39b   : > { %2370 = vst [vmem:[#allocation3 + $0xd8] sm:$0xff] %v2358_v32  ;;  %v2705_v48 = vunpack.c.h.b16 %v2506_v38  ;;  %v5993_v36 = vld [vmem:[#allocation3 + $0xf0] sm:$0xf] }
 0x39c   : > { %v2752_v33 = vpack.c.b16 %v2702_v50, %v2702_v50  ;;  %v2753_v54 = vpack.c.b16 %v2703_v30, %v2703_v30  ;;  %v2754_v44 = vpack.c.b16 %v2704_v16, %v2704_v16  ;;  %3061 = vst [vmem:[#allocation3 + $0x28] sm:$0xff] %v3056_v15  ;;  %v6670_v30 = vld [vmem:[#allocation3 + $0xf4] sm:$0xf]  ;;  %v6675_v15 = vld [vmem:[#allocation3 + $0x114] sm:$0xf0] }
 0x39d   : > { %v8130_v27 = vpop.permute.xlu1 %2126  ;;  %v8132_v40 = vpop.permute.xlu0 %2277  ;;  %v2755_v39 = vpack.c.b16 %v2705_v48, %v2705_v48  ;;  %3062 = vst [vmem:[#allocation3 + $0x30] sm:$0xff] %v7861_v17 }
 0x39e   : > { %v9463_v50 = vrot.slane %v8130_v27, 4  ;;  %v8137_v38 = vpop.permute.xlu2 %2228  ;;  %v2806_v53 = vsel %vm348_vm0, %v2752_v33, 0  ;;  %v2809_v32 = vsel %vm348_vm0, %v2753_v54, 0  ;;  %v2812_v17 = vsel %vm348_vm0, %v2754_v44, 0  ;;  %v6001_v44 = vld [vmem:[#allocation3 + $0xf8] sm:$0xf] }
 0x39f   : > { %v9467_v6 = vrot.slane %v8137_v38, 4  ;;  %2838 = vmatpush.bf16.msrb.mxu0 %v2806_v53  ;;  %2851 = vmatpush.bf16.msrb.mxu1 %v2809_v32  ;;  %v2815_v48 = vsel %vm348_vm0, %v2755_v39, 0  ;;  %v9500_v33 = vrot.slane %v8132_v40, 4  ;;  %v9501_v54 = vrot.slane %v8042_v45, 4  ;;  %v5995_v32 = vld [vmem:[#allocation3 + $0x118] sm:$0xf0] }
 0x3a0   : > { %v2143_v16 = vsel %vm348_vm0, %v2134_v0, %v9463_v50  ;;  %2864 = vmatpush.bf16.msrb.mxu2 %v2812_v17  ;;  %2877 = vmatpush.bf16.msrb.mxu3 %v2815_v48  ;;  %v5994_v53 = vor.u32 %v6675_v15, %v5993_v36  ;;  %v5998_v10 = vor.u32 %v6670_v30, %v5995_v32  ;;  %v6650_v30 = vld [vmem:[#allocation3 + $0x54] sm:$0xf] }
 0x3a1   : > { %v2294_v5 = vsel %vm348_vm0, %v9501_v54, %v9500_v33  ;;  %v2144_v39 = vsel %vm2139_vm3, %v8054_v8, %v2143_v16  ;;  %v2245_v0 = vsel %vm348_vm0, %v9502_v25, %v9467_v6  ;;  %v6676_v9 = vld [vmem:[#allocation3 + $0x11c] sm:$0xf0]  ;;  %v6671_v33 = vld [vmem:[#allocation3 + $0xfc] sm:$0xf]  ;;  %v6003_v17 = vld [vmem:[#allocation3 + $0x120] sm:$0xf0] }
 0x3a2   : > { %v2295_v50 = vsel %vm2292_vm5, %v8042_v45, %v2294_v5  ;;  %2156 = vst [vmem:[#allocation3 + $0x10] sm:$0xff] %v2144_v39  ;;  %v2246_v36 = vsel %vm2241_vm7, %v8046_v11, %v2245_v0  ;;  %v6002_v48 = vor.u32 %v6676_v9, %v6001_v44  ;;  %v6006_v15 = vor.u32 %v6671_v33, %v6003_v17  ;;  %v5953_v8 = vld [vmem:[#allocation3 + $0xa0] sm:$0xf]  ;;  %v6665_v16 = vld [vmem:[#allocation3 + $0xc4] sm:$0xf0]  ;;  %v8166_v5 = vld [vmem:[#allocation2 + $0x80] sm:$0xff] }
 0x3a3   : > { %v6660_v54 = vld [vmem:[#allocation3 + $0xa4] sm:$0xf]  ;;  %2258 = vst [vmem:[#allocation3 + $0x60] sm:$0xff] %v2246_v36  ;;  %2839 = vmatpush.bf16.msrb.mxu0 %v5994_v53  ;;  %2852 = vmatpush.bf16.msrb.mxu1 %v5998_v10  ;;  %v6666_v25 = vld [vmem:[#allocation3 + $0xcc] sm:$0xf0]  ;;  %v5954_v44 = vor.u32 %v6665_v16, %v5953_v8 }
 0x3a4   : > { %v5963_v6 = vld [vmem:[#allocation3 + $0xd0] sm:$0xf0]  ;;  %2308 = vst [vmem:[#allocation3 + $0x80] sm:$0xff] %v2295_v50  ;;  %2865 = vmatpush.bf16.msrb.mxu2 %v6002_v48  ;;  %2878 = vmatpush.bf16.msrb.mxu3 %v6006_v15  ;;  %v5913_v45 = vld [vmem:[#allocation3 + $0x50] sm:$0xf]  ;;  %v5958_v39 = vor.u32 %v6660_v54, %v5955_v59  ;;  %v9503_v54 = vrot.slane %v8089_v21, 4 }
 0x3a5   : > { %v2492_v9 = vpop.permute.xlu1 %2491  ;;  %v8169_v32 = vpop.permute.xlu0 %2279  ;;  %v5961_v0 = vld [vmem:[#allocation3 + $0xa8] sm:$0xf]  ;;  %v6661_v33 = vld [vmem:[#allocation3 + $0xac] sm:$0xf]  ;;  %3305 = vrot.lane.b32.xlu0 %v8166_v5, %s7001_s9  ;;  %v6655_v48 = vld [vmem:[#allocation3 + $0x74] sm:$0xf0] }
 0x3a6   : > { %v2500_v10 = vrot.slane %v2492_v9, 4  ;;  %v8173_v53 = vpop.permute.xlu2 %2177  ;;  %v5962_v17 = vor.u32 %v6666_v25, %v5961_v0  ;;  %v5966_v36 = vor.u32 %v6661_v33, %v5963_v6  ;;  %v5915_v15 = vld [vmem:[#allocation3 + $0x78] sm:$0xf0]  ;;  %v5914_v8 = vor.u32 %v6655_v48, %v5913_v45 }
 0x3a7   : > { %v9471_v11 = vrot.slane %v8173_v53, 4  ;;  %2840 = vmatpush.bf16.msrb.mxu0 %v5954_v44  ;;  %2853 = vmatpush.bf16.msrb.mxu1 %v5958_v39  ;;  %v5918_v59 = vor.u32 %v6650_v30, %v5915_v15  ;;  %v9505_v6 = vrot.slane %v8169_v32, 4  ;;  %v9506_v25 = vrot.slane %v8132_v40, 4 }
 0x3a8   : > { %v2507_v49 = vsel %vm348_vm0, %v9503_v54, %v2500_v10  ;;  %v2509_v50 = vsel %vm348_vm0, %v2500_v10, %v9504_v35  ;;  %2866 = vmatpush.bf16.msrb.mxu2 %v5962_v17  ;;  %2879 = vmatpush.bf16.msrb.mxu3 %v5966_v36  ;;  %v9507_v44 = vrot.slane %v8087_v18, 4  ;;  %v5921_v10 = vld [vmem:[#allocation3 + $0x58] sm:$0xf]  ;;  %v6651_v17 = vld [vmem:[#allocation3 + $0x5c] sm:$0xf] }
 0x3a9   : > { %v2296_v0 = vsel %vm348_vm0, %v9506_v25, %v9505_v6  ;;  %v2508_v45 = vsel %vm2241_vm7, %v8089_v21, %v2507_v49  ;;  %v2510_v30 = vsel %vm2241_vm7, %v2492_v9, %v2509_v50  ;;  %v2451_v21 = vrot.slane %v8032_v31, 4  ;;  %v6640_v25 = vld [vmem:[#allocation3 + $0x4] sm:$0xf] }
 0x3aa   : > { %v2194_v39 = vsel %vm348_vm0, %v9507_v44, %v9471_v11  ;;  %v2297_v35 = vsel %vm2292_vm5, %v8132_v40, %v2296_v0  ;;  %v2706_v36 = vunpack.c.l.b16 %v2508_v45  ;;  %v2707_v48 = vunpack.c.h.b16 %v2508_v45  ;;  %v5873_v40 = vld [vmem:[#allocation3] sm:$0xf]  ;;  %v5881_v11 = vld [vmem:[#allocation3 + $0x8] sm:$0xf] }
 0x3ab   : > { %v2195_v33 = vsel %vm2190_vm6, %v8087_v18, %v2194_v39  ;;  %2309 = vst [vmem:[#allocation3 + $0x88] sm:$0xff] %v2297_v35  ;;  %v2708_v49 = vunpack.c.l.b16 %v2510_v30  ;;  %2841 = vmatpush.bf16.msrb.mxu0 %v5914_v8  ;;  %2854 = vmatpush.bf16.msrb.mxu1 %v5918_v59  ;;  %v6656_v9 = vld [vmem:[#allocation3 + $0x7c] sm:$0xf0]  ;;  %v5923_v50 = vld [vmem:[#allocation3 + $0x80] sm:$0xf0]  ;;  %v2709_v15 = vunpack.c.h.b16 %v2510_v30  ;;  %v5874_v35 = vor.u32 %v8122_v22, %v5873_v40 }
 0x3ac   : > { %2207 = vst [vmem:[#allocation3 + $0x38] sm:$0xff] %v2195_v33  ;;  %v5922_v54 = vor.u32 %v6656_v9, %v5921_v10  ;;  %v5926_v6 = vor.u32 %v6651_v17, %v5923_v50  ;;  %v2756_v0 = vpack.c.b16 %v2706_v36, %v2706_v36  ;;  %v2757_v18 = vpack.c.b16 %v2707_v48, %v2707_v48  ;;  %v6641_v30 = vld [vmem:[#allocation3 + $0xc] sm:$0xf]  ;;  %v8225_v40 = vld [vmem:[%s9429_s3 + $0x4] sm:$0xf] }
 0x3ad   : > { %v2442_v44 = vpop.permute.xlu1 %2441  ;;  %v2392_v39 = vpop.permute.xlu0 %2391  ;;  %v5878_v45 = vor.u32 %v6640_v25, %v8124_v55  ;;  %v2758_v16 = vpack.c.b16 %v2708_v49, %v2708_v49  ;;  %v2759_v33 = vpack.c.b16 %v2709_v15, %v2709_v15  ;;  %v5882_v22 = vor.u32 %v8126_v52, %v5881_v11 }
 0x3ae   : > { %v2450_v8 = vrot.slane %v2442_v44, 4  ;;  %v2446_v59 = vpop.permute.xlu2 %2445  ;;  %v2400_v56 = vrot.slane %v2392_v39, 4  ;;  %2867 = vmatpush.bf16.msrb.mxu2 %v5922_v54  ;;  %2880 = vmatpush.bf16.msrb.mxu3 %v5926_v6  ;;  %v2818_v10 = vsel %vm348_vm0, %v2756_v0, 0  ;;  %v2821_v17 = vsel %vm348_vm0, %v2757_v18, 0 }
 0x3af   : > { %v2452_v36 = vrot.slane %v2446_v59, 4  ;;  %2842 = vmatpush.bf16.msrb.mxu0 %v5874_v35  ;;  %2855 = vmatpush.bf16.msrb.mxu1 %v5878_v45  ;;  %v5886_v55 = vor.u32 %v6641_v30, %v8128_v26  ;;  %v9508_v48 = vrot.slane %v8099_v28, 4  ;;  %v9509_v50 = vrot.slane %v8074_v3, 4 }
 0x3b0   : > { %v2459_v9 = vsel %vm348_vm0, %v2450_v8, %v2451_v21  ;;  %v9510_v54 = vrot.slane %v8011_v37, 4  ;;  %v2827_v0 = vsel %vm348_vm0, %v2759_v33, 0  ;;  %v9512_v33 = vrot.slane %v8137_v38, 4 }
 0x3b1   : > { %v2457_v49 = vsel %vm348_vm0, %v9508_v48, %v2450_v8  ;;  %v2407_v15 = vsel %vm348_vm0, %v9509_v50, %v2400_v56  ;;  %v2460_v26 = vsel %vm2190_vm6, %v2442_v44, %v2459_v9  ;;  %v2461_v11 = vsel %vm348_vm0, %v2451_v21, %v2452_v36 }
 0x3b2   : > { %v2409_v6 = vsel %vm348_vm0, %v2400_v56, %v9510_v54  ;;  %v2458_v52 = vsel %vm2190_vm6, %v8099_v28, %v2457_v49  ;;  %v2462_v25 = vsel %vm2190_vm6, %v8032_v31, %v2461_v11  ;;  %v2408_v56 = vsel %vm2139_vm3, %v8074_v3, %v2407_v15  ;;  %2868 = vmatpush.bf16.msrb.mxu2 %v5882_v22  ;;  %v8257_v49 = vld [vmem:[#allocation2 + $0x88] sm:$0xff] }
 0x3b3   : > { %2890 = vmatpush.bf16.msra.mxu0 %v2818_v10  ;;  %2903 = vmatpush.bf16.msra.mxu1 %v2821_v17  ;;  %2470 = vst [vmem:[#allocation3 + $0x128] sm:$0xff] %v2458_v52  ;;  %v2824_v28 = vsel %vm348_vm0, %v2758_v16, 0  ;;  %v2410_v21 = vsel %vm2139_vm3, %v2392_v39, %v2409_v6  ;;  %v2502_v39 = vrot.slane %v8035_v23, 4  ;;  %v9511_v35 = vmov %v9510_v54  ;;  %v6667_v23 = vld [vmem:[#allocation3 + $0xd4] sm:$0xf0] }
 0x3b4   : > { %2881 = vmatpush.bf16.msrb.mxu3 %v5886_v55  ;;  %2471 = vst [vmem:[#allocation3 + $0x130] sm:$0xff] %v2460_v26  ;;  %6031 = vmatmul.msk.bf16.vlgmr.msrb.gmra.mxu0 %vm1014_vm9, %v8225_v40  ;;  %v9513_v9 = vrot.slane %v8022_v47, 4 }
 0x3b5   : > { %2472 = vst [vmem:[#allocation3 + $0x138] sm:$0xff] %v2462_v25  ;;  %6032 = vmatmul.msk.bf16.vlgmr.msrb.gmra.mxu1 %vm1014_vm9, %v8225_v40  ;;  %v2396_v31 = vpop.permute.xlu1 %2395  ;;  %v2231_v3 = vpop.permute.xlu0 %2230  ;;  %6033 = vmatmul.msk.bf16.vlgmr.msrb.gmra.mxu2 %vm1014_vm9, %v8225_v40 }
 0x3b6   : > { %2916 = vmatpush.bf16.msra.mxu2 %v2824_v28  ;;  %2420 = vst [vmem:[#allocation3 + $0x100] sm:$0xff] %v2408_v56  ;;  %v2402_v16 = vrot.slane %v2396_v31, 4  ;;  %v2345_v18 = vpop.permute.xlu2 %2344  ;;  %v2238_v44 = vrot.slane %v2231_v3, 4 }
 0x3b7   : > { %6034 = vmatmul.msk.bf16.vlgmr.msrb.gmra.mxu3 %vm1014_vm9, %v8225_v40  ;;  %2421 = vst [vmem:[#allocation3 + $0x108] sm:$0xff] %v2410_v21  ;;  %v2351_v50 = vrot.slane %v2345_v18, 4  ;;  %v5971_v18 = vld [vmem:[#allocation3 + $0xd8] sm:$0xf0] }
 0x3b8   : > { %2929 = vmatpush.bf16.msra.mxu3 %v2827_v0  ;;  %v2411_v45 = vsel %vm348_vm0, %v9511_v35, %v2402_v16  ;;  %v2247_v8 = vsel %vm348_vm0, %v9512_v33, %v2238_v44  ;;  %v5969_v16 = vld [vmem:[#allocation3 + $0xb0] sm:$0xf] }
 0x3b9   : > { %v2412_v59 = vsel %vm2139_vm3, %v8011_v37, %v2411_v45  ;;  %v2248_v30 = vsel %vm2241_vm7, %v8137_v38, %v2247_v8  ;;  %v2511_v37 = vsel %vm348_vm0, %v9513_v9, %v2502_v39  ;;  %v5970_v35 = vor.u32 %v6667_v23, %v5969_v16  ;;  %v5889_v16 = vld [vmem:[#allocation3 + $0x10] sm:$0xf] }
 0x3ba   : > { %2422 = vst [vmem:[#allocation3 + $0x110] sm:$0xff] %v2412_v59  ;;  %v6677_v10 = vld [vmem:[#allocation3 + $0x124] sm:$0xf0]  ;;  %v6011_v17 = vld [vmem:[#allocation3 + $0x128] sm:$0xf0]  ;;  %v9514_v45 = vrot.slane %v8169_v32, 4 }
 0x3bb   : > { %v6678_v36 = vld [vmem:[#allocation3 + $0x12c] sm:$0xf0]  ;;  %v6019_v22 = vld [vmem:[#allocation3 + $0x130] sm:$0xf0]  ;;  %2259 = vst [vmem:[#allocation3 + $0x68] sm:$0xff] %v2248_v30  ;;  %v9515_v8 = vrot.slane %v8103_v4, 4 }
 0x3bc   : > { %v8253_v55 = vld [vmem:[#allocation3 + $0x134] sm:$0xf0]  ;;  %v8255_v48 = vld [vmem:[#allocation3 + $0x138] sm:$0xf0]  ;;  %3285 = vst [vmem:[#allocation3 + $0x130] sm:$0xff] %v8166_v5  ;;  %v2512_v5 = vsel %vm2241_vm7, %v8022_v47, %v2511_v37 }
 0x3bd   : > { %v6009_v15 = vld [vmem:[#allocation3 + $0x100] sm:$0xf]  ;;  %v6672_v38 = vld [vmem:[#allocation3 + $0x104] sm:$0xf]  ;;  %v8263_v54 = vpop.permute.xlu1 %2281  ;;  %v2343_v25 = vpop.permute.xlu0 %2342  ;;  %3286 = vst [vmem:[#allocation3 + $0x138] sm:$0xff] %v8257_v49 }
 0x3be   : > { %v6010_v6 = vor.u32 %v6677_v10, %v6009_v15  ;;  %v6014_v52 = vor.u32 %v6672_v38, %v6011_v17  ;;  %v6017_v26 = vld [vmem:[#allocation3 + $0x108] sm:$0xf]  ;;  %v6673_v11 = vld [vmem:[#allocation3 + $0x10c] sm:$0xf]  ;;  %v2289_v56 = vrot.slane %v8263_v54, 4  ;;  %v2233_v28 = vpop.permute.xlu2 %2232  ;;  %v2350_v31 = vrot.slane %v2343_v25, 4 }
 0x3bf   : > { %v6018_v0 = vor.u32 %v6678_v36, %v6017_v26  ;;  %v6022_v21 = vor.u32 %v6673_v11, %v6019_v22  ;;  %v2239_v39 = vrot.slane %v2233_v28, 4  ;;  %v6662_v10 = vld [vmem:[#allocation3 + $0xb4] sm:$0xf]  ;;  %v6657_v37 = vld [vmem:[#allocation3 + $0x84] sm:$0xf0]  ;;  %v2710_v38 = vunpack.c.l.b16 %v2512_v5 }
 0x3c0   : > { %2891 = vmatpush.bf16.msra.mxu0 %v6010_v6  ;;  %2904 = vmatpush.bf16.msra.mxu1 %v6014_v52  ;;  %v2298_v33 = vsel %vm348_vm0, %v9514_v45, %v2289_v56  ;;  %v2359_v59 = vsel %vm348_vm0, %v9515_v8, %v2350_v31  ;;  %v2361_v30 = vsel %vm348_vm0, %v2350_v31, %v2351_v50  ;;  %v5931_v15 = vld [vmem:[#allocation3 + $0x88] sm:$0xf0]  ;;  %v2711_v50 = vunpack.c.h.b16 %v2512_v5  ;;  %v6652_v6 = vld [vmem:[#allocation3 + $0x64] sm:$0xf]  ;;  %v6647_v11 = vld [vmem:[#allocation3 + $0x34] sm:$0xf0] }
 0x3c1   : > { %2917 = vmatpush.bf16.msra.mxu2 %v6018_v0  ;;  %2930 = vmatpush.bf16.msra.mxu3 %v6022_v21  ;;  %v2299_v47 = vsel %vm2292_vm5, %v8169_v32, %v2298_v33  ;;  %v2249_v17 = vsel %vm348_vm0, %v2238_v44, %v2239_v39  ;;  %v2360_v36 = vsel %vm2353_vm4, %v8103_v4, %v2359_v59  ;;  %v5929_v32 = vld [vmem:[#allocation3 + $0x60] sm:$0xf]  ;;  %v9516_v5 = vrot.slane %v8173_v53, 4  ;;  %v6642_v8 = vld [vmem:[#allocation3 + $0x14] sm:$0xf] }
 0x3c2   : > { %v5974_v22 = vor.u32 %v6662_v10, %v5971_v18  ;;  %2310 = vst [vmem:[#allocation3 + $0x90] sm:$0xff] %v2299_v47  ;;  %v2250_v23 = vsel %vm2241_vm7, %v2231_v3, %v2249_v17  ;;  %v2362_v9 = vsel %vm2353_vm4, %v2343_v25, %v2361_v30  ;;  %v5930_v52 = vor.u32 %v6657_v37, %v5929_v32  ;;  %v5891_v25 = vld [vmem:[#allocation3 + $0x38] sm:$0xf0]  ;;  %v5977_v17 = vld [vmem:[#allocation3 + $0xb8] sm:$0xf] }
 0x3c3   : > { %2260 = vst [vmem:[#allocation3 + $0x70] sm:$0xff] %v2250_v23  ;;  %v5934_v4 = vor.u32 %v6652_v6, %v5931_v15  ;;  %v2760_v21 = vpack.c.b16 %v2710_v38, %v2710_v38  ;;  %v2761_v18 = vpack.c.b16 %v2711_v50, %v2711_v50  ;;  %v5890_v33 = vor.u32 %v6647_v11, %v5889_v16  ;;  %v6674_v37 = vld [vmem:[#allocation3 + $0x114] sm:$0xf] }
 0x3c4   : > { %2892 = vmatpush.bf16.msra.mxu0 %v5970_v35  ;;  %2905 = vmatpush.bf16.msra.mxu1 %v5974_v22  ;;  %2371 = vst [vmem:[#allocation3 + $0xe0] sm:$0xff] %v2360_v36  ;;  %v9517_v35 = vrot.slane %v8130_v27, 4  ;;  %v5894_v47 = vor.u32 %v6642_v8, %v5891_v25  ;;  %v6663_v36 = vld [vmem:[#allocation3 + $0xbc] sm:$0xf]  ;;  %v6030_v11 = vor.u32 %v6674_v37, %v8255_v48 }
 0x3c5   : > { %2372 = vst [vmem:[#allocation3 + $0xe8] sm:$0xff] %v2362_v9  ;;  %v2180_v44 = vpop.permute.xlu1 %2179  ;;  %v2129_v26 = vpop.permute.xlu0 %2128  ;;  %v2830_v23 = vsel %vm348_vm0, %v2760_v21, 0  ;;  %v6025_v9 = vld [vmem:[#allocation3 + $0x110] sm:$0xf] }
 0x3c6   : > { %v2187_v28 = vrot.slane %v2180_v44, 4  ;;  %v2182_v3 = vpop.permute.xlu2 %2181  ;;  %v2136_v0 = vrot.slane %v2129_v26, 4 }
 0x3c7   : > { %v2188_v31 = vrot.slane %v2182_v3, 4 }
 0x3c8   : > { %2893 = vmatpush.bf16.msra.mxu0 %v5930_v52  ;;  %2906 = vmatpush.bf16.msra.mxu1 %v5934_v4  ;;  %v2196_v39 = vsel %vm348_vm0, %v9516_v5, %v2187_v28  ;;  %v2145_v45 = vsel %vm348_vm0, %v9517_v35, %v2136_v0  ;;  %v6026_v4 = vor.u32 %v8253_v55, %v6025_v9  ;;  %v6653_v5 = vld [vmem:[#allocation3 + $0x6c] sm:$0xf] }
 0x3c9   : > { %v2197_v59 = vsel %vm2190_vm6, %v8173_v53, %v2196_v39  ;;  %v2198_v30 = vsel %vm348_vm0, %v2187_v28, %v2188_v31  ;;  %v2146_v10 = vsel %vm2139_vm3, %v8130_v27, %v2145_v45  ;;  %v2833_v53 = vsel %vm348_vm0, %v2761_v18, 0  ;;  %v6658_v28 = vld [vmem:[#allocation3 + $0x8c] sm:$0xf0]  ;;  %v5939_v3 = vld [vmem:[#allocation3 + $0x90] sm:$0xf0] }
 0x3ca   : > { %2208 = vst [vmem:[#allocation3 + $0x40] sm:$0xff] %v2197_v59  ;;  %v2199_v22 = vsel %vm2190_vm6, %v2180_v44, %v2198_v30  ;;  %v5937_v18 = vld [vmem:[#allocation3 + $0x68] sm:$0xf]  ;;  %v5942_v35 = vor.u32 %v6653_v5, %v5939_v3  ;;  %v5985_v45 = vld [vmem:[#allocation3 + $0xc0] sm:$0xf]  ;;  %v9521_v5 = vmax.f32 %v7912_v51, 0.0 }
 0x3cb   : > { %2209 = vst [vmem:[#allocation3 + $0x48] sm:$0xff] %v2199_v22  ;;  %v6668_v15 = vld [vmem:[#allocation3 + $0xdc] sm:$0xf0]  ;;  %v5979_v38 = vld [vmem:[#allocation3 + $0xe0] sm:$0xf0]  ;;  %v5938_v39 = vor.u32 %v6658_v28, %v5937_v18  ;;  %v9520_v18 = vmax.f32 %v7479_v19, 0.0 }
 0x3cc   : > { %2894 = vmatpush.bf16.msra.mxu0 %v5890_v33  ;;  %2907 = vmatpush.bf16.msra.mxu1 %v5894_v47  ;;  %2157 = vst [vmem:[#allocation3 + $0x18] sm:$0xff] %v2146_v10  ;;  %v5978_v27 = vor.u32 %v6668_v15, %v5977_v17  ;;  %v5982_v50 = vor.u32 %v6663_v36, %v5979_v38  ;;  %v6669_v25 = vld [vmem:[#allocation3 + $0xe4] sm:$0xf0]  ;;  %v5987_v21 = vld [vmem:[#allocation3 + $0xe8] sm:$0xf0] }
 0x3cd   : > { %v2131_v32 = vpop.permute.xlu1 %2130  ;;  %v2284_v6 = vpop.permute.xlu0 %2283  ;;  %v6664_v33 = vld [vmem:[#allocation3 + $0xc4] sm:$0xf]  ;;  %v5986_v8 = vor.u32 %v6669_v25, %v5985_v45  ;;  %v6654_v36 = vld [vmem:[#allocation3 + $0x74] sm:$0xf]  ;;  %v9518_v25 = vmax.f32 %v7473_v7, 0.0 }
 0x3ce   : > { %v2137_v52 = vrot.slane %v2131_v32, 4  ;;  %v2290_v44 = vrot.slane %v2284_v6, 4  ;;  %2918 = vmatpush.bf16.msra.mxu2 %v5978_v27  ;;  %2931 = vmatpush.bf16.msra.mxu3 %v5982_v50  ;;  %v3067_v32 = vld [vmem:[#allocation2 + $0x48] sm:$0xff]  ;;  %v3005_v6 = vld [vmem:[#allocation2 + $0x3c] sm:$0xff] }
 0x3cf   : > { %6035 = vmatmul.msk.bf16.vlgmr.msra.gmra.mxu0 %vm1014_vm9, %v8225_v40  ;;  %6036 = vmatmul.msk.bf16.vlgmr.msra.gmra.mxu1 %vm1014_vm9, %v8225_v40 }
 0x3d0   : > { %2942 = vmatpush.bf16.msrb.mxu0 %v2830_v23  ;;  %2955 = vmatpush.bf16.msrb.mxu1 %v2833_v53  ;;  %v2147_v31 = vsel %vm348_vm0, %v2136_v0, %v2137_v52  ;;  %v2300_v16 = vsel %vm348_vm0, %v2289_v56, %v2290_v44  ;;  %v5990_v0 = vor.u32 %v6664_v33, %v5987_v21  ;;  %v3006_v52 = vld [vmem:[#allocation2 + $0x44] sm:$0xff]  ;;  %v8323_v44 = vld [vmem:[#allocation2 + $0x7c] sm:$0xff]  ;;  %v9519_v21 = vmax.f32 %v7909_v24, 0.0 }
 0x3d1   : > { %v2148_v55 = vsel %vm2139_vm3, %v2129_v26, %v2147_v31  ;;  %v2301_v48 = vsel %vm2292_vm5, %v8263_v54, %v2300_v16  ;;  %v6648_v59 = vld [vmem:[#allocation3 + $0x3c] sm:$0xf0]  ;;  %v5899_v30 = vld [vmem:[#allocation3 + $0x40] sm:$0xf0]  ;;  %v5945_v54 = vld [vmem:[#allocation3 + $0x70] sm:$0xf]  ;;  %3080 = vrot.lane.b32.xlu2 %v3067_v32, %s7001_s9  ;;  %3017 = vrot.lane.b32.xlu1 %v3005_v6, %s7002_s11 }
 0x3d2   : > { %2158 = vst [vmem:[#allocation3 + $0x20] sm:$0xff] %v2148_v55  ;;  %2919 = vmatpush.bf16.msra.mxu2 %v5938_v39  ;;  %2932 = vmatpush.bf16.msra.mxu3 %v5942_v35  ;;  %v6649_v15 = vld [vmem:[#allocation3 + $0x44] sm:$0xf0]  ;;  %v5907_v38 = vld [vmem:[#allocation3 + $0x48] sm:$0xf0]  ;;  %v2078_v31 = vadd.f32 %v9519_v21, %v9518_v25  ;;  %v2079_v55 = vadd.f32 %v9521_v5, %v9520_v18  ;;  %v9529_v25 = vmax.f32 %v7943_v60, 0.0 }
 0x3d3   : > { %2311 = vst [vmem:[#allocation3 + $0x98] sm:$0xff] %v2301_v48  ;;  %v5897_v56 = vld [vmem:[#allocation3 + $0x18] sm:$0xf]  ;;  %v6643_v10 = vld [vmem:[#allocation3 + $0x1c] sm:$0xf] }
 0x3d4   : > { %2943 = vmatpush.bf16.msrb.mxu0 %v6026_v4  ;;  %2956 = vmatpush.bf16.msrb.mxu1 %v6030_v11  ;;  %v5898_v26 = vor.u32 %v6648_v59, %v5897_v56  ;;  %v5902_v47 = vor.u32 %v6643_v10, %v5899_v30  ;;  %v9522_v30 = vmax.f32 %v7498_v20, 0.0  ;;  %v9523_v56 = vmax.f32 %v7923_v46, 0.0 }
 0x3d5   : > { %v8327_v4 = vpop.permute.xlu0 %2574 }
 0x3d6   : > { %2920 = vmatpush.bf16.msra.mxu2 %v5898_v26  ;;  %2933 = vmatpush.bf16.msra.mxu3 %v5902_v47  ;;  %v2080_v10 = vadd.f32 %v9523_v56, %v9522_v30  ;;  %v9524_v26 = vmax.f32 %v7504_v29, 0.0  ;;  %v9525_v47 = vmax.f32 %v7926_v41, 0.0 }
 0x3d8   : > { %2944 = vmatpush.bf16.msrb.mxu0 %v5986_v8  ;;  %2957 = vmatpush.bf16.msrb.mxu1 %v5990_v0 }
 0x3d9   : > { %6037 = vmatmul.msk.bf16.vlgmr.msra.gmra.mxu2 %vm1014_vm9, %v8225_v40  ;;  %6038 = vmatmul.msk.bf16.vlgmr.msra.gmra.mxu3 %vm1014_vm9, %v8225_v40  ;;  %v5905_v37 = vld [vmem:[#allocation3 + $0x20] sm:$0xf]  ;;  %v6644_v53 = vld [vmem:[#allocation3 + $0x24] sm:$0xf] }
 0x3da   : > { %v6659_v17 = vld [vmem:[#allocation3 + $0x94] sm:$0xf0]  ;;  %v5947_v22 = vld [vmem:[#allocation3 + $0x98] sm:$0xf0]  ;;  %v5906_v27 = vor.u32 %v6649_v15, %v5905_v37  ;;  %v5910_v50 = vor.u32 %v6644_v53, %v5907_v38  ;;  %3019 = vrot.lane.b32.xlu2 %v3006_v52, %s7002_s11  ;;  %3245 = vrot.lane.b32.xlu1 %v8323_v44, %s7002_s11 }
 0x3db   : > { %v5946_v23 = vor.u32 %v6659_v17, %v5945_v54  ;;  %v5950_v9 = vor.u32 %v6654_v36, %v5947_v22  ;;  %v2081_v54 = vadd.f32 %v9525_v47, %v9524_v26 }
 0x3dd   : > { %2945 = vmatpush.bf16.msrb.mxu0 %v5946_v23  ;;  %2958 = vmatpush.bf16.msrb.mxu1 %v5950_v9 }
 0x3e1   : > { %2946 = vmatpush.bf16.msrb.mxu0 %v5906_v27  ;;  %2959 = vmatpush.bf16.msrb.mxu1 %v5910_v50 }
 0x3e4   : > { %6039 = vmatmul.msk.bf16.vlgmr.msrb.gmra.mxu0 %vm1014_vm9, %v8225_v40  ;;  %6040 = vmatmul.msk.bf16.vlgmr.msrb.gmra.mxu1 %vm1014_vm9, %v8225_v40 }
 0x431   : > { %v2844_v11 = vpop.f32.mrf.mxu0 }
 0x432   : > { %v2857_v28 = vpop.f32.mrf.mxu1  ;;  %v2845_v40 = vadd.f32 %v2844_v11, %v8327_v4  ;;  %v9526_v11 = vmax.f32 %v7519_v43, 0.0 }
 0x433   : > { %v2858_v3 = vadd.f32 %v2857_v28, %v8327_v4  ;;  %v9527_v28 = vmax.f32 %v7940_v34, 0.0 }
 0x434   : > { %v2965_v16 = vmax.f32 %v2845_v40, 0.0 }
 0x435   : > { %v2966_v48 = vmax.f32 %v2858_v3, 0.0  ;;  %v2082_v40 = vadd.f32 %v9527_v28, %v9526_v11  ;;  %v9528_v3 = vmax.f32 %v7525_v12, 0.0  ;;  %v9543_v28 = vld [vmem:[#allocation17_spill] sm:$0xff] }
 0x436   : > { %v8339_v39 = vadd.f32 %v2965_v16, %v2078_v31  ;;  %v2985_v35 = vmul.f32 %v2965_v16, %v7470_v1 }
 0x437   : > { %v8342_v45 = vadd.f32 %v2966_v48, %v2079_v55  ;;  %v2986_v33 = vmul.f32 %v2966_v48, %v7476_v42  ;;  %v2083_v21 = vadd.f32 %v9529_v25, %v9528_v3  ;;  %v9545_v3 = vld [vmem:[#allocation19_spill] sm:$0xff] }
 0x438   : > { %v2870_v7 = vpop.f32.mrf.mxu2  ;;  %v9546_v25 = vmax.f32 %v9545_v3, 0.0 }
 0x439   : > { %v8345_v8 = vpack.c.bf16 %v2986_v33, %v2985_v35  ;;  %v2871_v0 = vadd.f32 %v2870_v7, %v8327_v4  ;;  %v2846_v59 = vpop.f32.mrf.mxu0 }
 0x43a   : > { %v2883_v24 = vpop.f32.mrf.mxu3  ;;  %v2859_v51 = vpop.f32.mrf.mxu1  ;;  %v9533_v59 = vmax.f32 %v7554_v61, 0.0  ;;  %v3007_v61 = vld [vmem:[#allocation2 + $0x4c] sm:$0xff] }
 0x43b   : > { %v2884_v19 = vadd.f32 %v2883_v24, %v8327_v4  ;;  %3000 = vst [vmem:[#allocation2 + $0x54] sm:$0xff] %v8345_v8  ;;  %3189 = vrot.lane.b32.xlu2 %v8345_v8, %s7001_s9  ;;  %v2967_v17 = vmax.f32 %v2871_v0, 0.0  ;;  %v9531_v24 = vmax.f32 %v7548_v57, 0.0  ;;  %v9532_v0 = vmax.f32 %v7960_v13, 0.0 }
 0x43c   : > { %3172 = vst [vmem:[#allocation3 + $0xa0] sm:$0xff] %v8345_v8  ;;  %v9534_v51 = vmax.f32 %v7963_v62, 0.0 }
 0x43d   : > { %v2968_v36 = vmax.f32 %v2884_v19, 0.0  ;;  %v8361_v22 = vadd.f32 %v2967_v17, %v2080_v10  ;;  %v2987_v23 = vmul.f32 %v2967_v17, %v7495_v2  ;;  %v2084_v19 = vadd.f32 %v9532_v0, %v9531_v24  ;;  %v9536_v17 = vld [vmem:[#allocation12_spill] sm:$0xff] }
 0x43e   : > { %v2085_v30 = vadd.f32 %v9534_v51, %v9533_v59  ;;  %v3292_v51 = vld [vmem:[#allocation2 + $0x90] sm:$0xf] }
 0x43f   : > { %v8364_v9 = vadd.f32 %v2968_v36, %v2081_v54  ;;  %v2988_v20 = vmul.f32 %v2968_v36, %v7501_v58 }
 0x440   : > { %v2872_v46 = vpop.f32.mrf.mxu2 }
 0x441   : > { %v8367_v37 = vpack.c.bf16 %v2988_v20, %v2987_v23  ;;  %v9538_v20 = vld [vmem:[#allocation13_spill] sm:$0xff] }
 0x442   : > { %v2885_v53 = vpop.f32.mrf.mxu3  ;;  %v3117_v29 = vld [vmem:[#allocation2 + $0x50] sm:$0xff] }
 0x443   : > { %3001 = vst [vmem:[#allocation2 + $0x5c] sm:$0xff] %v8367_v37  ;;  %3129 = vrot.lane.b32.xlu0 %v3117_v29, %s7002_s11  ;;  %3082 = vrot.lane.b32.xlu1 %v3117_v29, %s7001_s9 }
 0x444   : > { %3173 = vst [vmem:[#allocation3 + $0xa8] sm:$0xff] %v8367_v37 }
 0x445   : > { %3063 = vst [vmem:[#allocation3 + $0x38] sm:$0xff] %v3117_v29 }
 0x44a   : > { %v8373_v41 = vld [vmem:[#allocation2 + $0x58] sm:$0xff] }
 0x44b   : > { %3064 = vst [vmem:[#allocation3 + $0x40] sm:$0xff] %v8373_v41  ;;  %3191 = vrot.lane.b32.xlu0 %v8367_v37, %s7001_s9  ;;  %3131 = vrot.lane.b32.xlu1 %v8373_v41, %s7002_s11 }
 0x44c   : > { %v8380_v15 = vld [vmem:[#allocation3 + $0x34] sm:$0xf0]  ;;  %v8382_v38 = vld [vmem:[#allocation3 + $0x38] sm:$0xf0]  ;;  %v2896_v27 = vpop.f32.mrf.mxu0  ;;  %v2909_v50 = vpop.f32.mrf.mxu1 }
 0x44d   : > { %3877 = vst [vmem:[#allocation3 + $0x38] sm:$0xff] %v3005_v6  ;;  %v2897_v32 = vadd.f32 %v2896_v27, %v8327_v4  ;;  %v2910_v52 = vadd.f32 %v2909_v50, %v8327_v4  ;;  %v9539_v27 = vld [vmem:[#allocation15_spill] sm:$0xff] }
 0x44e   : > { %v9540_v50 = vmax.f32 %v9539_v27, 0.0 }
 0x44f   : > { %v2969_v31 = vmax.f32 %v2897_v32, 0.0  ;;  %v2970_v16 = vmax.f32 %v2910_v52, 0.0  ;;  %v9541_v32 = vld [vmem:[#allocation18_spill] sm:$0xff] }
 0x450   : > { %v9542_v52 = vmax.f32 %v9541_v32, 0.0 }
 0x451   : > { %v8394_v18 = vadd.f32 %v2969_v31, %v2082_v40  ;;  %v2989_v6 = vmul.f32 %v2969_v31, %v7516_v14  ;;  %v8397_v5 = vadd.f32 %v2970_v16, %v2083_v21  ;;  %v2990_v55 = vmul.f32 %v2970_v16, %v7522_v63 }
 0x452   : > { %v2086_v11 = vadd.f32 %v9542_v52, %v9540_v50  ;;  %v9544_v40 = vmax.f32 %v9543_v28, 0.0  ;;  %v3232_v28 = vld [vmem:[#allocation2 + $0x8c] sm:$0xf] }
 0x453   : > { %9530 = vst [vmem:[#allocation20_spill] sm:$0xff] %v8397_v5  ;;  %v2997_v48 = vpack.c.bf16 %v2990_v55, %v2989_v6 }
 0x454   : > { %v2898_v43 = vpop.f32.mrf.mxu0  ;;  %v2911_v35 = vpop.f32.mrf.mxu1  ;;  %v2087_v21 = vadd.f32 %v9546_v25, %v9544_v40  ;;  %v3182_v40 = vld [vmem:[#allocation2 + $0x7c] sm:$0xf] }
 0x455   : > { %3002 = vst [vmem:[#allocation2 + $0x64] sm:$0xff] %v2997_v48  ;;  %3239 = vrot.lane.b32.xlu0 %v2997_v48, %s7002_s11  ;;  %3193 = vrot.lane.b32.xlu2 %v2997_v48, %s7001_s9 }
 0x456   : > { %3174 = vst [vmem:[#allocation3 + $0xb0] sm:$0xff] %v2997_v48  ;;  %v9548_v48 = vld [vmem:[#allocation14_spill] sm:$0xff] }
 0x45c   : > { %v8402_v12 = vld [vmem:[#allocation2 + $0x60] sm:$0xff]  ;;  %v2922_v34 = vpop.f32.mrf.mxu2  ;;  %v2935_v60 = vpop.f32.mrf.mxu3 }
 0x45d   : > { %3065 = vst [vmem:[#allocation3 + $0x48] sm:$0xff] %v8402_v12  ;;  %v2923_v33 = vadd.f32 %v2922_v34, %v8327_v4  ;;  %v2936_v7 = vadd.f32 %v2935_v60, %v8327_v4  ;;  %v9550_v34 = vld [vmem:[#allocation16_spill] sm:$0xff]  ;;  %v3010_v25 = vld [vmem:[#allocation2 + $0x64] sm:$0xf] }
 0x45f   : > { %v2971_v56 = vmax.f32 %v2923_v33, 0.0  ;;  %v2972_v10 = vmax.f32 %v2936_v7, 0.0 }
 0x461   : > { %v2948_v26 = vpop.f32.mrf.mxu0  ;;  %v2961_v47 = vpop.f32.mrf.mxu1  ;;  %v8415_v54 = vadd.f32 %v2971_v56, %v2084_v19  ;;  %v2991_v36 = vmul.f32 %v2971_v56, %v9536_v17  ;;  %v8418_v23 = vadd.f32 %v2972_v10, %v2085_v30  ;;  %v2992_v57 = vmul.f32 %v2972_v10, %v9538_v20 }
 0x462   : > { %v2949_v13 = vadd.f32 %v2948_v26, %v8327_v4  ;;  %v2962_v46 = vadd.f32 %v2961_v47, %v8327_v4  ;;  %v3081_v10 = vpop.permute.xlu2 %3080  ;;  %v3231_v26 = vld [vmem:[#allocation2 + $0x84] sm:$0xff] }
 0x463   : > { %9535 = vst [vmem:[#allocation21_spill] sm:$0xff] %v8415_v54  ;;  %v2998_v29 = vpack.c.bf16 %v2992_v57, %v2991_v36  ;;  %v3079_v57 = vpop.permute.xlu1 %3078 }
 0x464   : > { %9537 = vst [vmem:[#allocation22_spill] sm:$0xff] %v8418_v23  ;;  %v8423_v53 = vld [vmem:[#allocation3 + $0x44] sm:$0xf0]  ;;  %v8425_v62 = vld [vmem:[#allocation3 + $0x48] sm:$0xf0]  ;;  %v2973_v31 = vmax.f32 %v2949_v13, 0.0  ;;  %v2924_v4 = vpop.f32.mrf.mxu2  ;;  %v2937_v6 = vpop.f32.mrf.mxu3 }
 0x465   : > { %3879 = vst [vmem:[#allocation3 + $0x48] sm:$0xff] %v3007_v61  ;;  %v2974_v16 = vmax.f32 %v2962_v46, 0.0  ;;  %3195 = vrot.lane.b32.xlu0 %v2998_v29, %s7001_s9  ;;  %v3091_v13 = vrot.slane %v3081_v10, 4  ;;  %v3090_v46 = vrot.slane %v3079_v57, 4 }
 0x466   : > { %3003 = vst [vmem:[#allocation2 + $0x6c] sm:$0xff] %v2998_v29  ;;  %v8436_v55 = vadd.f32 %v2973_v31, %v2086_v11  ;;  %v2993_v43 = vmul.f32 %v2973_v31, %v9548_v48 }
 0x467   : > { %v8439_v35 = vadd.f32 %v2974_v16, %v2087_v21  ;;  %v2994_v60 = vmul.f32 %v2974_v16, %v9550_v34  ;;  %3175 = vst [vmem:[#allocation3 + $0xb8] sm:$0xff] %v2998_v29  ;;  %v8488_v21 = vpop.permute.xlu0 %3305 }
 0x468   : > { %9547 = vst [vmem:[#allocation15_spill] sm:$0xff] %v8436_v55 }
 0x469   : > { %9549 = vst [vmem:[#allocation18_spill] sm:$0xff] %v8439_v35  ;;  %v2999_v33 = vpack.c.bf16 %v2994_v60, %v2993_v43  ;;  %v2950_v7 = vpop.f32.mrf.mxu0  ;;  %v2963_v24 = vpop.f32.mrf.mxu1 }
 0x46a   : > { %v8464_v27 = vpop.permute.xlu2 %3019 }
 0x46b   : > { %3004 = vst [vmem:[#allocation2 + $0x74] sm:$0xff] %v2999_v33  ;;  %v3018_v50 = vpop.permute.xlu1 %3017  ;;  %v9551_v48 = vrot.slane %v8464_v27, 4 }
 0x46c   : > { %3176 = vst [vmem:[#allocation3 + $0xc0] sm:$0xff] %v2999_v33  ;;  %v3029_v32 = vrot.slane %v3018_v50, 4 }
 0x46d   : > { %v3287_v0 = vld [vmem:[#allocation2 + $0x68] sm:$0xff]  ;;  %3133 = vrot.lane.b32.xlu0 %v8402_v12, %s7002_s11 }
 0x46e   : > { %3299 = vrot.lane.b32.xlu1 %v3287_v0, %s7001_s9  ;;  %3282 = vst [vmem:[#allocation3 + $0x118] sm:$0xff] %v3287_v0 }
 0x472   : > { %v3288_v19 = vld [vmem:[#allocation2 + $0x70] sm:$0xff]  ;;  %v3289_v59 = vld [vmem:[#allocation2 + $0x78] sm:$0xff] }
 0x473   : > { %3301 = vrot.lane.b32.xlu2 %v3288_v19, %s7001_s9  ;;  %3283 = vst [vmem:[#allocation3 + $0x120] sm:$0xff] %v3288_v19  ;;  %v3122_v3 = vld [vmem:[#allocation2 + $0x78] sm:$0xf] }
 0x474   : > { %3284 = vst [vmem:[#allocation3 + $0x128] sm:$0xff] %v3289_v59 }
 0x475   : > { %v8446_v30 = vld [vmem:[#allocation3 + $0x114] sm:$0xf0]  ;;  %v8448_v56 = vld [vmem:[#allocation3 + $0x118] sm:$0xf0]  ;;  %3309 = vrot.lane.b32.xlu0 %v3292_v51, %s7001_s9 }
 0x476   : > { %3241 = vrot.lane.b32.xlu1 %v2998_v29, %s7002_s11  ;;  %4096 = vst [vmem:[#allocation3 + $0x118] sm:$0xff] %v8323_v44  ;;  %v3096_v44 = vsel %vm348_vm0, %v3090_v46, %v3091_v13 }
 0x477   : > { %v3098_v29 = vsel %vm3097_vm8, %v3079_v57, %v3096_v44 }
 0x478   : > { %3112 = vst [vmem:[#allocation3 + $0x50] sm:$0xff] %v3098_v29 }
 0x47a   : > { %v8453_v47 = vld [vmem:[#allocation3 + $0x11c] sm:$0xf0]  ;;  %v8455_v36 = vld [vmem:[#allocation3 + $0x120] sm:$0xf0] }
 0x47b   : > { %3084 = vrot.lane.b32.xlu2 %v8373_v41, %s7001_s9  ;;  %4097 = vst [vmem:[#allocation3 + $0x120] sm:$0xff] %v3231_v26  ;;  %v9476_v41 = vrot.slane %v8464_v27, 4 }
 0x47d   : > { %3243 = vrot.lane.b32.xlu0 %v2999_v33, %s7002_s11  ;;  %v3035_v52 = vsel %vm348_vm0, %v3029_v32, %v9476_v41 }
 0x47e   : > { %3135 = vrot.lane.b32.xlu1 %v3287_v0, %s7002_s11  ;;  %v3037_v11 = vsel %vm3036_vm10, %v3018_v50, %v3035_v52 }
 0x47f   : > { %3051 = vst [vmem:[#allocation3] sm:$0xff] %v3037_v11  ;;  %v6085_v17 = vld [vmem:[#allocation3 + $0x50] sm:$0xf]  ;;  %v6690_v54 = vld [vmem:[#allocation3 + $0x54] sm:$0xf] }
 0x483   : > { %3303 = vrot.lane.b32.xlu2 %v3289_v59, %s7001_s9 }
 0x485   : > { %3247 = vrot.lane.b32.xlu0 %v3231_v26, %s7002_s11 }
 0x486   : > { %3021 = vrot.lane.b32.xlu1 %v3007_v61, %s7002_s11  ;;  %v3071_v61 = vld [vmem:[#allocation2 + $0x68] sm:$0xf] }
 0x48b   : > { %3307 = vrot.lane.b32.xlu2 %v8257_v49, %s7001_s9  ;;  %v8486_v49 = vpop.permute.xlu1 %3245 }
 0x48d   : > { %3199 = vrot.lane.b32.xlu0 %v3182_v40, %s7001_s9 }
 0x48e   : > { %3249 = vrot.lane.b32.xlu1 %v3232_v28, %s7002_s11 }
 0x493   : > { %3023 = vrot.lane.b32.xlu2 %v8345_v8, %s7002_s11 }
 0x495   : > { %3137 = vrot.lane.b32.xlu0 %v3288_v19, %s7002_s11  ;;  %v3190_v8 = vpop.permute.xlu2 %3189 }
 0x496   : > { %3086 = vrot.lane.b32.xlu1 %v8402_v12, %s7001_s9  ;;  %v3201_v60 = vrot.slane %v3190_v8, 4 }
 0x49b   : > { %3088 = vrot.lane.b32.xlu2 %v3071_v61, %s7001_s9 }
 0x49d   : > { %3027 = vrot.lane.b32.xlu0 %v3010_v25, %s7002_s11 }
 0x49e   : > { %3139 = vrot.lane.b32.xlu1 %v3122_v3, %s7002_s11 }
 0x4a3   : > { %3197 = vrot.lane.b32.xlu2 %v2999_v33, %s7001_s9 }
 0x4ab   : > { %3025 = vrot.lane.b32.xlu2 %v8367_v37, %s7002_s11 }
 0x4af   : > { %v3194_v43 = vpop.permute.xlu2 %3193 }
 0x4b0   : > { %v3203_v24 = vrot.slane %v3194_v43, 4 }
 0x4b3   : > { %4115 = vrot.lane.b32.xlu2 %v3231_v26, %s7003_s28 }
 0x4b5   : > { %v3130_v12 = vpop.permute.xlu0 %3129  ;;  %v3083_v31 = vpop.permute.xlu1 %3082 }
 0x4b6   : > { %v3092_v16 = vrot.slane %v3083_v31, 4  ;;  %v3141_v0 = vrot.slane %v3130_v12, 4 }
 0x4b8   : > { %v3099_v4 = vsel %vm348_vm0, %v3091_v13, %v3092_v16 }
 0x4b9   : > { %v3100_v6 = vsel %vm3097_vm8, %v3081_v10, %v3099_v4 }
 0x4ba   : > { %3113 = vst [vmem:[#allocation3 + $0x58] sm:$0xff] %v3100_v6 }
 0x4bd   : > { %v3192_v33 = vpop.permute.xlu0 %3191  ;;  %v3132_v7 = vpop.permute.xlu1 %3131 }
 0x4be   : > { %v3202_v19 = vrot.slane %v3192_v33, 4  ;;  %v3142_v37 = vrot.slane %v3132_v7, 4 }
 0x4c0   : > { %v3207_v59 = vsel %vm348_vm0, %v3201_v60, %v3202_v19  ;;  %v3209_v51 = vsel %vm348_vm0, %v3202_v19, %v3203_v24  ;;  %v3147_v26 = vsel %vm348_vm0, %v3141_v0, %v3142_v37 }
 0x4c1   : > { %v3208_v57 = vsel %vm3097_vm8, %v3190_v8, %v3207_v59  ;;  %v3210_v13 = vsel %vm3097_vm8, %v3192_v33, %v3209_v51  ;;  %v3148_v10 = vsel %vm3036_vm10, %v3130_v12, %v3147_v26 }
 0x4c2   : > { %3222 = vst [vmem:[#allocation3 + $0xc8] sm:$0xff] %v3208_v57 }
 0x4c3   : > { %3223 = vst [vmem:[#allocation3 + $0xd0] sm:$0xff] %v3210_v13 }
 0x4c4   : > { %3162 = vst [vmem:[#allocation3 + $0x78] sm:$0xff] %v3148_v10 }
 0x4c7   : > { %v3240_v44 = vpop.permute.xlu0 %3239 }
 0x4cb   : > { %v6087_v34 = vld [vmem:[#allocation3 + $0x78] sm:$0xf0] }
 0x4cd   : > { %v3302_v46 = vpop.permute.xlu2 %3301 }
 0x4ce   : > { %v3312_v25 = vrot.slane %v3302_v46, 4 }
 0x4d5   : > { %v8501_v29 = vpop.permute.xlu2 %3084 }
 0x4d6   : > { %v9474_v50 = vrot.slane %v8501_v29, 4 }
 0x4d7   : > { %v8507_v52 = vpop.permute.xlu0 %3195 }
 0x4d8   : > { %v3101_v32 = vsel %vm348_vm0, %v3092_v16, %v9474_v50  ;;  %v9475_v28 = vrot.slane %v8507_v52, 4 }
 0x4d9   : > { %v3102_v11 = vsel %vm3097_vm8, %v3083_v31, %v3101_v32  ;;  %v8528_v32 = vld [vmem:[#allocation3 + $0x28] sm:$0xf0] }
 0x4da   : > { %3114 = vst [vmem:[#allocation3 + $0x60] sm:$0xff] %v3102_v11  ;;  %v3211_v40 = vsel %vm348_vm0, %v3203_v24, %v9475_v28  ;;  %v8530_v11 = vld [vmem:[#allocation2 + $0x2c] sm:$0xff] }
 0x4db   : > { %v3212_v61 = vsel %vm3097_vm8, %v3194_v43, %v3211_v40 }
 0x4dc   : > { %3224 = vst [vmem:[#allocation3 + $0xd8] sm:$0xff] %v3212_v61 }
 0x4dd   : > { %v8515_v3 = vpop.permute.xlu2 %3303 }
 0x4de   : > { %v3313_v8 = vrot.slane %v8515_v3, 4 }
 0x4df   : > { %v3134_v4 = vpop.permute.xlu0 %3133 }
 0x4e0   : > { %v3319_v12 = vsel %vm348_vm0, %v3312_v25, %v3313_v8  ;;  %v3300_v16 = vpop.permute.xlu1 %3299  ;;  %v3143_v60 = vrot.slane %v3134_v4, 4 }
 0x4e1   : > { %v3320_v31 = vsel %vm3097_vm8, %v3302_v46, %v3319_v12  ;;  %v3311_v6 = vrot.slane %v3300_v16, 4  ;;  %v8526_v46 = vld [vmem:[#allocation3 + $0x24] sm:$0xf0] }
 0x4e2   : > { %v3518_v33 = vunpack.c.l.b16 %v3320_v31  ;;  %v3519_v0 = vunpack.c.h.b16 %v3320_v31  ;;  %v3149_v43 = vsel %vm348_vm0, %v3142_v37, %v3143_v60  ;;  %3875 = vst [vmem:[#allocation3 + $0x28] sm:$0xff] %v8530_v11 }
 0x4e3   : > { %v3317_v24 = vsel %vm348_vm0, %v3311_v6, %v3312_v25  ;;  %v3150_v59 = vsel %vm3036_vm10, %v3132_v7, %v3149_v43 }
 0x4e4   : > { %v3318_v19 = vsel %vm3097_vm8, %v3300_v16, %v3317_v24  ;;  %v3568_v51 = vpack.c.b16 %v3518_v33, %v3518_v33  ;;  %v3569_v26 = vpack.c.b16 %v3519_v0, %v3519_v0  ;;  %3163 = vst [vmem:[#allocation3 + $0x80] sm:$0xff] %v3150_v59  ;;  %v3251_v16 = vrot.slane %v3240_v44, 4  ;;  %v8545_v59 = vld [vmem:[#allocation3 + $0x128] sm:$0xf0] }
 0x4e5   : > { %v8524_v57 = vpop.permute.xlu2 %3307  ;;  %v3516_v13 = vunpack.c.l.b16 %v3318_v19  ;;  %v3517_v10 = vunpack.c.h.b16 %v3318_v19  ;;  %v8543_v19 = vld [vmem:[#allocation3 + $0x124] sm:$0xf0] }
 0x4e6   : > { %v3626_v40 = vsel %vm348_vm0, %v3568_v51, 0  ;;  %v3629_v37 = vsel %vm348_vm0, %v3569_v26, 0  ;;  %v4093_v51 = vld [vmem:[#allocation2 + $0x8c] sm:$0xff]  ;;  %v9553_v5 = vrot.slane %v8524_v57, 4 }
 0x4e7   : > { %3678 = vmatpush.bf16.msra.mxu0 %v3626_v40  ;;  %3691 = vmatpush.bf16.msra.mxu1 %v3629_v37  ;;  %v3566_v7 = vpack.c.b16 %v3516_v13, %v3516_v13  ;;  %v3567_v61 = vpack.c.b16 %v3517_v10, %v3517_v10  ;;  %v8535_v12 = vpop.permute.xlu0 %3309  ;;  %4098 = vst [vmem:[#allocation3 + $0x128] sm:$0xff] %v4093_v51  ;;  %v3254_v10 = vrot.slane %v8486_v49, 4 }
 0x4e8   : > { %v3242_v25 = vpop.permute.xlu1 %3241  ;;  %4117 = vrot.lane.b32.xlu0 %v4093_v51, %s7003_s28 }
 0x4e9   : > { %v3252_v31 = vrot.slane %v3242_v25, 4  ;;  %v3620_v6 = vsel %vm348_vm0, %v3566_v7, 0  ;;  %v3623_v33 = vsel %vm348_vm0, %v3567_v61, 0 }
 0x4ea   : > { %3652 = vmatpush.bf16.msrb.mxu2 %v3620_v6  ;;  %3665 = vmatpush.bf16.msrb.mxu3 %v3623_v33 }
 0x4eb   : > { %v3257_v0 = vsel %vm348_vm0, %v3251_v16, %v3252_v31 }
 0x4ec   : > { %v3258_v24 = vsel %vm3036_vm10, %v3240_v44, %v3257_v0  ;;  %v3314_v44 = vrot.slane %v8488_v21, 4 }
 0x4ed   : > { %3272 = vst [vmem:[#allocation3 + $0xf0] sm:$0xff] %v3258_v24  ;;  %v8541_v43 = vpop.permute.xlu2 %3023 }
 0x4ee   : > { %v3321_v6 = vsel %vm348_vm0, %v3313_v8, %v3314_v44  ;;  %v6042_v8 = vld [vmem:[%s9430_s4 + $0x18] sm:$0xff] }
 0x4ef   : > { %v3244_v13 = vpop.permute.xlu0 %3243  ;;  %3388 = vperm.xlu1 %6879, %v6042_v8   ;;  %v8592_v8 = vld [vmem:[#allocation3 + $0x138] sm:$0xf0] }
 0x4f0   : > { %v8548_v26 = vpop.permute.xlu1 %3135  ;;  %v3253_v37 = vrot.slane %v3244_v13, 4 }
 0x4f1   : > { %v9477_v40 = vrot.slane %v8548_v26, 4 }
 0x4f2   : > { %v3259_v61 = vsel %vm348_vm0, %v3252_v31, %v3253_v37  ;;  %v3261_v16 = vsel %vm348_vm0, %v3253_v37, %v3254_v10  ;;  %v6705_v31 = vld [vmem:[#allocation3 + $0xc4] sm:$0xf0]  ;;  %v6700_v37 = vld [vmem:[#allocation3 + $0xa4] sm:$0xf] }
 0x4f3   : > { %v3151_v7 = vsel %vm348_vm0, %v3143_v60, %v9477_v40  ;;  %v3260_v51 = vsel %vm3036_vm10, %v3242_v25, %v3259_v61  ;;  %v3262_v50 = vsel %vm3036_vm10, %v3244_v13, %v3261_v16  ;;  %v6127_v40 = vld [vmem:[#allocation3 + $0xc8] sm:$0xf0]  ;;  %v8571_v25 = vld [vmem:[#allocation3 + $0x30] sm:$0xf0]  ;;  %v3322_v13 = vsel %vm3097_vm8, %v8515_v3, %v3321_v6 }
 0x4f4   : > { %v3152_v33 = vsel %vm3036_vm10, %v3134_v4, %v3151_v7  ;;  %v6165_v0 = vld [vmem:[#allocation3 + $0xf0] sm:$0xf]  ;;  %v6710_v24 = vld [vmem:[#allocation3 + $0xf4] sm:$0xf]  ;;  %3273 = vst [vmem:[#allocation3 + $0xf8] sm:$0xff] %v3260_v51  ;;  %v8586_v51 = vld [vmem:[#allocation2 + $0x94] sm:$0xff]  ;;  %v6130_v6 = vor.u32 %v6700_v37, %v6127_v40  ;;  %v3520_v35 = vunpack.c.l.b16 %v3322_v13  ;;  %v3521_v37 = vunpack.c.h.b16 %v3322_v13 }
 0x4f5   : > { %3164 = vst [vmem:[#allocation3 + $0x88] sm:$0xff] %v3152_v33  ;;  %v8562_v28 = vpop.permute.xlu2 %3088  ;;  %v6166_v41 = vor.u32 %v8446_v30, %v6165_v0  ;;  %v6170_v60 = vor.u32 %v6710_v24, %v8448_v56  ;;  %v6125_v4 = vld [vmem:[#allocation3 + $0xa0] sm:$0xf]  ;;  %v8569_v7 = vld [vmem:[#allocation3 + $0x2c] sm:$0xf0]  ;;  %v8575_v30 = vld [vmem:[#allocation2 + $0x34] sm:$0xff] }
 0x4f6   : > { %3274 = vst [vmem:[#allocation3 + $0x100] sm:$0xff] %v3262_v50  ;;  %v8577_v56 = vld [vmem:[#allocation3 + $0x12c] sm:$0xf0]  ;;  %v8579_v61 = vld [vmem:[#allocation3 + $0x130] sm:$0xf0]  ;;  %v6126_v3 = vor.u32 %v6705_v31, %v6125_v4  ;;  %v9552_v31 = vrot.slane %v8541_v43, 4 }
 0x4f7   : > { %3653 = vmatpush.bf16.msrb.mxu2 %v6166_v41  ;;  %3666 = vmatpush.bf16.msrb.mxu3 %v6170_v60  ;;  %v8583_v24 = vpop.permute.xlu0 %3247  ;;  %3876 = vst [vmem:[#allocation3 + $0x30] sm:$0xff] %v8575_v30  ;;  %v8588_v41 = vld [vmem:[#allocation3 + $0x134] sm:$0xf0]  ;;  %v8594_v16 = vld [vmem:[#allocation2 + $0x9c] sm:$0xff] }
 0x4f8   : > { %v3022_v0 = vpop.permute.xlu1 %3021  ;;  %v3255_v60 = vrot.slane %v8583_v24, 4  ;;  %4099 = vst [vmem:[#allocation3 + $0x130] sm:$0xff] %v8586_v51  ;;  %v6695_v33 = vld [vmem:[#allocation3 + $0x74] sm:$0xf0] }
 0x4f9   : > { %v3031_v50 = vrot.slane %v3022_v0, 4  ;;  %4100 = vst [vmem:[#allocation3 + $0x138] sm:$0xff] %v8594_v16 }
 0x4fa   : > { %v3263_v4 = vsel %vm348_vm0, %v3254_v10, %v3255_v60  ;;  %v6090_v10 = vor.u32 %v6690_v54, %v6087_v34  ;;  %v3316_v54 = vrot.slane %v8535_v12, 4  ;;  %v8626_v12 = vld [vmem:[#allocation3 + $0x3c] sm:$0xf0] }
 0x4fb   : > { %v3038_v55 = vsel %vm348_vm0, %v9551_v48, %v3031_v50  ;;  %v3040_v40 = vsel %vm348_vm0, %v3031_v50, %v9552_v31  ;;  %3654 = vmatpush.bf16.msrb.mxu2 %v6126_v3  ;;  %3667 = vmatpush.bf16.msrb.mxu3 %v6130_v6  ;;  %v3264_v63 = vsel %vm3036_vm10, %v8486_v49, %v3263_v4  ;;  %v6045_v48 = vld [vmem:[#allocation3] sm:$0xf]  ;;  %v6173_v13 = vld [vmem:[#allocation3 + $0xf8] sm:$0xf]  ;;  %v6711_v31 = vld [vmem:[#allocation3 + $0xfc] sm:$0xf] }
 0x4fc   : > { %v3039_v20 = vsel %vm3036_vm10, %v8464_v27, %v3038_v55  ;;  %v3041_v23 = vsel %vm3036_vm10, %v3022_v0, %v3040_v40  ;;  %v3323_v50 = vsel %vm348_vm0, %v3314_v44, %v9553_v5  ;;  %v6086_v6 = vor.u32 %v6695_v33, %v6085_v17  ;;  %v6680_v27 = vld [vmem:[#allocation3 + $0x4] sm:$0xf]  ;;  %3275 = vst [vmem:[#allocation3 + $0x108] sm:$0xff] %v3264_v63  ;;  %v6706_v4 = vld [vmem:[#allocation3 + $0xcc] sm:$0xf0] }
 0x4fd   : > { %3052 = vst [vmem:[#allocation3 + $0x8] sm:$0xff] %v3039_v20  ;;  %v3198_v3 = vpop.permute.xlu2 %3197  ;;  %v3570_v0 = vpack.c.b16 %v3520_v35, %v3520_v35  ;;  %v6174_v40 = vor.u32 %v8453_v47, %v6173_v13  ;;  %v6178_v14 = vor.u32 %v6711_v31, %v8455_v36  ;;  %v3571_v49 = vpack.c.b16 %v3521_v37, %v3521_v37  ;;  %v6135_v5 = vld [vmem:[#allocation3 + $0xd0] sm:$0xf0]  ;;  %v6133_v63 = vld [vmem:[#allocation3 + $0xa8] sm:$0xf] }
 0x4fe   : > { %3053 = vst [vmem:[#allocation3 + $0x10] sm:$0xff] %v3041_v23  ;;  %v3205_v55 = vrot.slane %v3198_v3, 4  ;;  %v8616_v17 = vsel %vm3097_vm8, %v8488_v21, %v3323_v50  ;;  %v9554_v23 = vrot.slane %v8507_v52, 4  ;;  %v6046_v34 = vor.u32 %v8526_v46, %v6045_v48  ;;  %v6701_v36 = vld [vmem:[#allocation3 + $0xac] sm:$0xf] }
 0x4ff   : > { %3655 = vmatpush.bf16.msrb.mxu2 %v6086_v6  ;;  %3668 = vmatpush.bf16.msrb.mxu3 %v6090_v10  ;;  %v3200_v47 = vpop.permute.xlu0 %3199  ;;  %v6050_v21 = vor.u32 %v6680_v27, %v8528_v32  ;;  %v8628_v50 = vld [vmem:[#allocation3 + $0x40] sm:$0xf0]  ;;  %v3632_v6 = vsel %vm348_vm0, %v3570_v0, 0  ;;  %v6134_v46 = vor.u32 %v6706_v4, %v6133_v63  ;;  %v6138_v48 = vor.u32 %v6701_v36, %v6135_v5  ;;  %v8636_v10 = vld [vmem:[#allocation2 + $0x44] sm:$0xff]  ;;  %v6181_v31 = vld [vmem:[#allocation3 + $0x100] sm:$0xf] }
 0x500   : > { %v3213_v20 = vsel %vm348_vm0, %v9554_v23, %v3205_v55  ;;  %v3250_v35 = vpop.permute.xlu1 %3249  ;;  %3679 = vmatpush.bf16.msra.mxu0 %v6174_v40  ;;  %3692 = vmatpush.bf16.msra.mxu1 %v6178_v14  ;;  %v3206_v37 = vrot.slane %v3200_v47, 4  ;;  %v8634_v14 = vld [vmem:[%s9429_s3 + $0x8] sm:$0xf]  ;;  %v3635_v32 = vsel %vm348_vm0, %v3571_v49, 0  ;;  %v6712_v27 = vld [vmem:[#allocation3 + $0x104] sm:$0xf]  ;;  %v3522_v0 = vunpack.c.l.b16 %v8616_v17 }
 0x501   : > { %v3214_v44 = vsel %vm3097_vm8, %v8507_v52, %v3213_v20  ;;  %v3256_v33 = vrot.slane %v3250_v35, 4  ;;  %3878 = vst [vmem:[#allocation3 + $0x40] sm:$0xff] %v8636_v10  ;;  %v9555_v40 = vrot.slane %v8524_v57, 4  ;;  %v6707_v49 = vld [vmem:[#allocation3 + $0xd4] sm:$0xf0]  ;;  %v3523_v20 = vunpack.c.h.b16 %v8616_v17 }
 0x502   : > { %3225 = vst [vmem:[#allocation3 + $0xe0] sm:$0xff] %v3214_v44  ;;  %v3215_v13 = vsel %vm348_vm0, %v3205_v55, %v3206_v37  ;;  %v6696_v23 = vld [vmem:[#allocation3 + $0x7c] sm:$0xf0]  ;;  %v6095_v55 = vld [vmem:[#allocation3 + $0x80] sm:$0xf0] }
 0x503   : > { %v3265_v52 = vsel %vm348_vm0, %v3255_v60, %v3256_v33  ;;  %3656 = vmatpush.bf16.msrb.mxu2 %v6046_v34  ;;  %3669 = vmatpush.bf16.msrb.mxu3 %v6050_v21  ;;  %v3325_v4 = vsel %vm348_vm0, %v9555_v40, %v3316_v54  ;;  %v3216_v60 = vsel %vm3097_vm8, %v3198_v3, %v3215_v13  ;;  %v6141_v34 = vld [vmem:[#allocation3 + $0xb0] sm:$0xf]  ;;  %v6093_v17 = vld [vmem:[#allocation3 + $0x58] sm:$0xf]  ;;  %v6691_v47 = vld [vmem:[#allocation3 + $0x5c] sm:$0xf] }
 0x504   : > { %v3266_v5 = vsel %vm3036_vm10, %v8583_v24, %v3265_v52  ;;  %3680 = vmatpush.bf16.msra.mxu0 %v6134_v46  ;;  %3693 = vmatpush.bf16.msra.mxu1 %v6138_v48  ;;  %3226 = vst [vmem:[#allocation3 + $0xe8] sm:$0xff] %v3216_v60  ;;  %v6182_v3 = vor.u32 %v8543_v19, %v6181_v31  ;;  %v6143_v44 = vld [vmem:[#allocation3 + $0xd8] sm:$0xf0]  ;;  %v6053_v37 = vld [vmem:[#allocation3 + $0x8] sm:$0xf]  ;;  %v9556_v46 = vrot.slane %v8541_v43, 4 }
 0x505   : > { %3276 = vst [vmem:[#allocation3 + $0x110] sm:$0xff] %v3266_v5  ;;  %v8650_v35 = vpop.permute.xlu2 %3025  ;;  %v6186_v54 = vor.u32 %v6712_v27, %v8545_v59  ;;  %v8661_v63 = vsel %vm3097_vm8, %v8524_v57, %v3325_v4  ;;  %v6142_v36 = vor.u32 %v6707_v49, %v6141_v34  ;;  %v6094_v33 = vor.u32 %v6696_v23, %v6093_v17  ;;  %v4042_v13 = vld [vmem:[#allocation2 + $0x80] sm:$0xff] }
 0x506   : > { %6203 = vmatmul.msk.bf16.vlgmr.msrb.gmra.mxu2 %vm1014_vm9, %v8634_v14  ;;  %6204 = vmatmul.msk.bf16.vlgmr.msrb.gmra.mxu3 %vm1014_vm9, %v8634_v14  ;;  %v3033_v24 = vrot.slane %v8650_v35, 4  ;;  %v6098_v21 = vor.u32 %v6691_v47, %v6095_v55  ;;  %v3572_v52 = vpack.c.b16 %v3522_v0, %v3522_v0  ;;  %v3573_v57 = vpack.c.b16 %v3523_v20, %v3523_v20  ;;  %v4101_v31 = vld [vmem:[#allocation2 + $0x7c] sm:$0xff]  ;;  %v6702_v5 = vld [vmem:[#allocation3 + $0xb4] sm:$0xf] }
 0x507   : > { %3704 = vmatpush.bf16.msra.mxu2 %v3632_v6  ;;  %3717 = vmatpush.bf16.msra.mxu3 %v3635_v32  ;;  %v6681_v6 = vld [vmem:[#allocation3 + $0xc] sm:$0xf]  ;;  %v8668_v59 = vpop.permute.xlu0 %3137  ;;  %v4043_v32 = vld [vmem:[#allocation2 + $0x88] sm:$0xff]  ;;  %v3095_v27 = vrot.slane %v8562_v28, 4  ;;  %v6146_v49 = vor.u32 %v6702_v5, %v6143_v44  ;;  %v6054_v23 = vor.u32 %v8569_v7, %v6053_v37  ;;  %v3524_v0 = vunpack.c.l.b16 %v8661_v63  ;;  %v6697_v7 = vld [vmem:[#allocation3 + $0x84] sm:$0xf0] }
 0x508   : > { %v3042_v19 = vsel %vm348_vm0, %v9556_v46, %v3033_v24  ;;  %v3087_v48 = vpop.permute.xlu1 %3086  ;;  %3681 = vmatpush.bf16.msra.mxu0 %v6094_v33  ;;  %3694 = vmatpush.bf16.msra.mxu1 %v6098_v21  ;;  %v3145_v60 = vrot.slane %v8668_v59, 4  ;;  %v3525_v55 = vunpack.c.h.b16 %v8661_v63  ;;  %v9557_v28 = vrot.slane %v8501_v29, 4  ;;  %v6101_v33 = vld [vmem:[#allocation3 + $0x60] sm:$0xf]  ;;  %v6692_v21 = vld [vmem:[#allocation3 + $0x64] sm:$0xf] }
 0x509   : > { %v3043_v40 = vsel %vm3036_vm10, %v8541_v43, %v3042_v19  ;;  %v3094_v4 = vrot.slane %v3087_v48, 4  ;;  %4057 = vrot.lane.b32.xlu0 %v4043_v32, %s7004_s25  ;;  %4055 = vrot.lane.b32.xlu2 %v4042_v13, %s7004_s25  ;;  %v9558_v34 = vrot.slane %v8548_v26, 4  ;;  %v6058_v17 = vor.u32 %v6681_v6, %v8571_v25  ;;  %v6189_v6 = vld [vmem:[#allocation3 + $0x108] sm:$0xf]  ;;  %v6713_v46 = vld [vmem:[#allocation3 + $0x10c] sm:$0xf] }
 0x50a   : > { %3054 = vst [vmem:[#allocation3 + $0x18] sm:$0xff] %v3043_v40  ;;  %4113 = vrot.lane.b32.xlu1 %v4101_v31, %s7003_s28  ;;  %v3638_v37 = vsel %vm348_vm0, %v3572_v52, 0  ;;  %v3641_v25 = vsel %vm348_vm0, %v3573_v57, 0  ;;  %v3575_v32 = vpack.c.b16 %v3525_v55, %v3525_v55  ;;  %v6190_v31 = vor.u32 %v8577_v56, %v6189_v6  ;;  %v3882_v40 = vld [vmem:[#allocation2 + $0x3c] sm:$0xff]  ;;  %v6149_v56 = vld [vmem:[#allocation3 + $0xb8] sm:$0xf] }
 0x50b   : > { %3705 = vmatpush.bf16.msra.mxu2 %v6182_v3  ;;  %3718 = vmatpush.bf16.msra.mxu3 %v6186_v54  ;;  %v3103_v43 = vsel %vm348_vm0, %v9557_v28, %v3094_v4  ;;  %v3105_v20 = vsel %vm348_vm0, %v3094_v4, %v3095_v27  ;;  %v3153_v3 = vsel %vm348_vm0, %v9558_v34, %v3145_v60  ;;  %v6103_v54 = vld [vmem:[#allocation3 + $0x88] sm:$0xf0]  ;;  %v6708_v27 = vld [vmem:[#allocation3 + $0xdc] sm:$0xf0] }
 0x50c   : > { %v3104_v47 = vsel %vm3097_vm8, %v8501_v29, %v3103_v43  ;;  %v3106_v63 = vsel %vm3097_vm8, %v3087_v48, %v3105_v20  ;;  %v3154_v44 = vsel %vm3036_vm10, %v8548_v26, %v3153_v3  ;;  %3682 = vmatpush.bf16.msra.mxu0 %v6054_v23  ;;  %3695 = vmatpush.bf16.msra.mxu1 %v6058_v17  ;;  %v6061_v48 = vld [vmem:[#allocation3 + $0x10] sm:$0xf]  ;;  %v6682_v26 = vld [vmem:[#allocation3 + $0x14] sm:$0xf]  ;;  %v3647_v28 = vsel %vm348_vm0, %v3575_v32, 0 }
 0x50d   : > { %3115 = vst [vmem:[#allocation3 + $0x68] sm:$0xff] %v3104_v47  ;;  %v6102_v29 = vor.u32 %v6697_v7, %v6101_v33  ;;  %v6106_v19 = vor.u32 %v6692_v21, %v6103_v54  ;;  %v6194_v57 = vor.u32 %v6713_v46, %v8579_v61  ;;  %v6062_v23 = vor.u32 %v8380_v15, %v6061_v48  ;;  %v6197_v20 = vld [vmem:[#allocation3 + $0x110] sm:$0xf]  ;;  %v6703_v3 = vld [vmem:[#allocation3 + $0xbc] sm:$0xf] }
 0x50e   : > { %3116 = vst [vmem:[#allocation3 + $0x70] sm:$0xff] %v3106_v63  ;;  %v6150_v34 = vor.u32 %v6708_v27, %v6149_v56  ;;  %v6159_v33 = vld [vmem:[#allocation3 + $0xe8] sm:$0xf0] }
 0x50f   : > { %3706 = vmatpush.bf16.msra.mxu2 %v6142_v36  ;;  %3719 = vmatpush.bf16.msra.mxu3 %v6146_v49  ;;  %v3574_v36 = vpack.c.b16 %v3524_v0, %v3524_v0  ;;  %3165 = vst [vmem:[#allocation3 + $0x90] sm:$0xff] %v3154_v44  ;;  %v3028_v52 = vpop.permute.xlu0 %3027  ;;  %v6151_v49 = vld [vmem:[#allocation3 + $0xe0] sm:$0xf0]  ;;  %v6066_v0 = vor.u32 %v6682_v26, %v8382_v38  ;;  %v6709_v44 = vld [vmem:[#allocation3 + $0xe4] sm:$0xf0] }
 0x510   : > { %3730 = vmatpush.bf16.msrb.mxu0 %v3638_v37  ;;  %3743 = vmatpush.bf16.msrb.mxu1 %v3641_v25  ;;  %v3140_v13 = vpop.permute.xlu1 %3139  ;;  %v3034_v5 = vrot.slane %v3028_v52, 4  ;;  %v6154_v7 = vor.u32 %v6703_v3, %v6151_v49  ;;  %v6157_v37 = vld [vmem:[#allocation3 + $0xc0] sm:$0xf]  ;;  %v6704_v25 = vld [vmem:[#allocation3 + $0xc4] sm:$0xf] }
 0x511   : > { %v3146_v4 = vrot.slane %v3140_v13, 4  ;;  %6205 = vmatmul.msk.bf16.vlgmr.msra.gmra.mxu0 %vm1014_vm9, %v8634_v14  ;;  %6206 = vmatmul.msk.bf16.vlgmr.msra.gmra.mxu1 %vm1014_vm9, %v8634_v14  ;;  %v3644_v55 = vsel %vm348_vm0, %v3574_v36, 0  ;;  %v6683_v21 = vld [vmem:[#allocation3 + $0x1c] sm:$0xf]  ;;  %v6158_v6 = vor.u32 %v6709_v44, %v6157_v37  ;;  %v6162_v46 = vor.u32 %v6704_v25, %v6159_v33  ;;  %v9560_v37 = vld [vmem:[#allocation20_spill] sm:$0xff] }
 0x512   : > { %v3044_v43 = vsel %vm348_vm0, %v3033_v24, %v3034_v5  ;;  %4121 = vrot.lane.b32.xlu0 %v8594_v16, %s7003_s28  ;;  %3896 = vrot.lane.b32.xlu2 %v3882_v40, %s7003_s28  ;;  %v6198_v16 = vor.u32 %v8588_v41, %v6197_v20  ;;  %v6069_v41 = vld [vmem:[#allocation3 + $0x18] sm:$0xf]  ;;  %v6074_v36 = vor.u32 %v6683_v21, %v8628_v50  ;;  %v4045_v50 = vld [vmem:[#allocation2 + $0x98] sm:$0xff] }
 0x513   : > { %3707 = vmatpush.bf16.msra.mxu2 %v6102_v29  ;;  %3720 = vmatpush.bf16.msra.mxu3 %v6106_v19  ;;  %v3155_v61 = vsel %vm348_vm0, %v3145_v60, %v3146_v4  ;;  %v3045_v38 = vsel %vm3036_vm10, %v8650_v35, %v3044_v43  ;;  %v6714_v60 = vld [vmem:[#allocation3 + $0x114] sm:$0xf]  ;;  %v6070_v19 = vor.u32 %v8626_v12, %v6069_v41 }
 0x514   : > { %3731 = vmatpush.bf16.msrb.mxu0 %v6190_v31  ;;  %3744 = vmatpush.bf16.msrb.mxu1 %v6194_v57  ;;  %v3156_v15 = vsel %vm3036_vm10, %v8668_v59, %v3155_v61  ;;  %v6109_v54 = vld [vmem:[#allocation3 + $0x68] sm:$0xf]  ;;  %v6693_v24 = vld [vmem:[#allocation3 + $0x6c] sm:$0xf]  ;;  %3055 = vst [vmem:[#allocation3 + $0x20] sm:$0xff] %v3045_v38  ;;  %v6202_v35 = vor.u32 %v6714_v60, %v8592_v8  ;;  %v4044_v31 = vld [vmem:[#allocation2 + $0x90] sm:$0xff] }
 0x515   : > { %3166 = vst [vmem:[#allocation3 + $0x98] sm:$0xff] %v3156_v15  ;;  %3894 = vrot.lane.b32.xlu1 %v8575_v30, %s7003_s28  ;;  %v6117_v30 = vld [vmem:[#allocation3 + $0x70] sm:$0xf]  ;;  %v6694_v48 = vld [vmem:[#allocation3 + $0x74] sm:$0xf] }
 0x516   : > { %v6698_v17 = vld [vmem:[#allocation3 + $0x8c] sm:$0xf0]  ;;  %v6111_v47 = vld [vmem:[#allocation3 + $0x90] sm:$0xf0] }
 0x517   : > { %3708 = vmatpush.bf16.msra.mxu2 %v6062_v23  ;;  %3721 = vmatpush.bf16.msra.mxu3 %v6066_v0  ;;  %v6110_v59 = vor.u32 %v6698_v17, %v6109_v54  ;;  %v6114_v63 = vor.u32 %v6693_v24, %v6111_v47  ;;  %v9559_v41 = vld [vmem:[#allocation10_spill] sm:$0xff] }
 0x518   : > { %3732 = vmatpush.bf16.msrb.mxu0 %v6150_v34  ;;  %3745 = vmatpush.bf16.msrb.mxu1 %v6154_v7 }
 0x51a   : > { %6207 = vmatmul.msk.bf16.vlgmr.msra.gmra.mxu2 %vm1014_vm9, %v8634_v14  ;;  %6208 = vmatmul.msk.bf16.vlgmr.msra.gmra.mxu3 %vm1014_vm9, %v8634_v14 }
 0x51b   : > { %3756 = vmatpush.bf16.msrb.mxu2 %v3644_v55  ;;  %3769 = vmatpush.bf16.msrb.mxu3 %v3647_v28  ;;  %v6077_v13 = vld [vmem:[#allocation3 + $0x20] sm:$0xf]  ;;  %v6684_v52 = vld [vmem:[#allocation3 + $0x24] sm:$0xf] }
 0x51c   : > { %3733 = vmatpush.bf16.msrb.mxu0 %v6110_v59  ;;  %3746 = vmatpush.bf16.msrb.mxu1 %v6114_v63  ;;  %v6699_v8 = vld [vmem:[#allocation3 + $0x94] sm:$0xf0]  ;;  %v6119_v29 = vld [vmem:[#allocation3 + $0x98] sm:$0xf0]  ;;  %v6082_v12 = vor.u32 %v6684_v52, %v8425_v62 }
 0x51d   : > { %4119 = vrot.lane.b32.xlu2 %v8586_v51, %s7003_s28  ;;  %v6118_v26 = vor.u32 %v6699_v8, %v6117_v30  ;;  %v6122_v32 = vor.u32 %v6694_v48, %v6119_v29  ;;  %3892 = vrot.lane.b32.xlu1 %v8530_v11, %s7003_s28  ;;  %v6078_v51 = vor.u32 %v8423_v53, %v6077_v13  ;;  %v3821_v11 = vld [vmem:[#allocation2 + $0x38] sm:$0xff]  ;;  %v3820_v53 = vld [vmem:[#allocation2 + $0x30] sm:$0xff] }
 0x51e   : > { %3835 = vrot.lane.b32.xlu0 %v3821_v11, %s7004_s25  ;;  %v9562_v13 = vld [vmem:[#allocation21_spill] sm:$0xff]  ;;  %v9564_v11 = vld [vmem:[#allocation22_spill] sm:$0xff] }
 0x51f   : > { %3757 = vmatpush.bf16.msrb.mxu2 %v6198_v16  ;;  %3770 = vmatpush.bf16.msrb.mxu3 %v6202_v35 }
 0x520   : > { %3734 = vmatpush.bf16.msrb.mxu0 %v6070_v19  ;;  %3747 = vmatpush.bf16.msrb.mxu1 %v6074_v36 }
 0x523   : > { %3758 = vmatpush.bf16.msrb.mxu2 %v6158_v6  ;;  %3771 = vmatpush.bf16.msrb.mxu3 %v6162_v46  ;;  %v9561_v6 = vld [vmem:[#allocation11_spill] sm:$0xff] }
 0x524   : > { %6209 = vmatmul.msk.bf16.vlgmr.msrb.gmra.mxu0 %vm1014_vm9, %v8634_v14  ;;  %6210 = vmatmul.msk.bf16.vlgmr.msrb.gmra.mxu1 %vm1014_vm9, %v8634_v14 }
 0x525   : > { %4061 = vrot.lane.b32.xlu1 %v4045_v50, %s7004_s25  ;;  %3833 = vrot.lane.b32.xlu2 %v3820_v53, %s7004_s25 }
 0x526   : > { %4059 = vrot.lane.b32.xlu0 %v4044_v31, %s7004_s25  ;;  %v9565_v31 = vld [vmem:[#allocation13_spill] sm:$0xff] }
 0x527   : > { %3759 = vmatpush.bf16.msrb.mxu2 %v6118_v26  ;;  %3772 = vmatpush.bf16.msrb.mxu3 %v6122_v32 }
 0x52b   : > { %3760 = vmatpush.bf16.msrb.mxu2 %v6078_v51  ;;  %3773 = vmatpush.bf16.msrb.mxu3 %v6082_v12  ;;  %v9563_v51 = vld [vmem:[#allocation12_spill] sm:$0xff] }
 0x52e   : > { %6211 = vmatmul.msk.bf16.vlgmr.msrb.gmra.mxu2 %vm1014_vm9, %v8634_v14  ;;  %6212 = vmatmul.msk.bf16.vlgmr.msrb.gmra.mxu3 %vm1014_vm9, %v8634_v14 }
 0x561   : > { %v8744_v62 = vpop.permute.xlu1 %3388 }
 0x589   : > { %v3658_v57 = vpop.f32.mrf.mxu2  ;;  %v3671_v27 = vpop.f32.mrf.mxu3 }
 0x58a   : > { %v3659_v40 = vadd.f32 %v3658_v57, %v8744_v62  ;;  %v3672_v14 = vadd.f32 %v3671_v27, %v8744_v62 }
 0x58c   : > { %v3779_v4 = vmax.f32 %v3659_v40, 0.0  ;;  %v3780_v5 = vmax.f32 %v3672_v14, 0.0  ;;  %v3819_v14 = vld [vmem:[#allocation2 + $0x28] sm:$0xff] }
 0x58e   : > { %v8749_v49 = vadd.f32 %v3779_v4, %v8339_v39  ;;  %v3799_v23 = vmul.f32 %v3779_v4, %v7470_v1  ;;  %v8753_v0 = vadd.f32 %v3780_v5, %v8342_v45  ;;  %v3800_v55 = vmul.f32 %v3780_v5, %v7476_v42  ;;  %v3684_v56 = vpop.f32.mrf.mxu0  ;;  %v3697_v61 = vpop.f32.mrf.mxu1 }
 0x58f   : > { %v3685_v28 = vadd.f32 %v3684_v56, %v8744_v62  ;;  %v3698_v43 = vadd.f32 %v3697_v61, %v8744_v62  ;;  %v8795_v61 = vpop.permute.xlu2 %4115 }
 0x590   : > { %v3809_v20 = vpack.c.bf16 %v3800_v55, %v3799_v23 }
 0x591   : > { %v3660_v34 = vpop.f32.mrf.mxu2  ;;  %v3673_v3 = vpop.f32.mrf.mxu3  ;;  %v3781_v15 = vmax.f32 %v3685_v28, 0.0  ;;  %v3782_v38 = vmax.f32 %v3698_v43, 0.0 }
 0x592   : > { %3814 = vst [vmem:[#allocation2 + $0x54] sm:$0xff] %v3809_v20  ;;  %v9568_v3 = vld [vmem:[#allocation14_spill] sm:$0xff] }
 0x593   : > { %v8759_v39 = vadd.f32 %v3781_v15, %v8361_v22  ;;  %v3801_v45 = vmul.f32 %v3781_v15, %v7495_v2  ;;  %v8763_v60 = vadd.f32 %v3782_v38, %v8364_v9  ;;  %v3802_v7 = vmul.f32 %v3782_v38, %v7501_v58  ;;  %3986 = vst [vmem:[#allocation3 + $0xa0] sm:$0xff] %v3809_v20  ;;  %v9569_v38 = vld [vmem:[#allocation18_spill] sm:$0xff] }
 0x595   : > { %v3810_v54 = vpack.c.bf16 %v3802_v7, %v3801_v45  ;;  %v9571_v7 = vld [vmem:[#allocation16_spill] sm:$0xff] }
 0x596   : > { %v3686_v24 = vpop.f32.mrf.mxu0  ;;  %v3699_v16 = vpop.f32.mrf.mxu1 }
 0x597   : > { %3815 = vst [vmem:[#allocation2 + $0x5c] sm:$0xff] %v3810_v54  ;;  %4005 = vrot.lane.b32.xlu1 %v3810_v54, %s7003_s28 }
 0x598   : > { %3987 = vst [vmem:[#allocation3 + $0xa8] sm:$0xff] %v3810_v54 }
 0x599   : > { %v3931_v17 = vld [vmem:[#allocation2 + $0x50] sm:$0xff] }
 0x59a   : > { %3943 = vrot.lane.b32.xlu2 %v3931_v17, %s7004_s25 }
 0x59d   : > { %v3710_v47 = vpop.f32.mrf.mxu2  ;;  %v3723_v35 = vpop.f32.mrf.mxu3 }
 0x59e   : > { %v3711_v22 = vadd.f32 %v3710_v47, %v8744_v62  ;;  %v3724_v9 = vadd.f32 %v3723_v35, %v8744_v62  ;;  %v3932_v44 = vld [vmem:[#allocation2 + $0x58] sm:$0xff] }
 0x59f   : > { %3945 = vrot.lane.b32.xlu0 %v3932_v44, %s7004_s25  ;;  %4003 = vrot.lane.b32.xlu1 %v3809_v20, %s7003_s28  ;;  %v9566_v20 = vld [vmem:[#allocation15_spill] sm:$0xff]  ;;  %v4106_v44 = vld [vmem:[#allocation2 + $0xa4] sm:$0xf] }
 0x5a0   : > { %v3783_v59 = vmax.f32 %v3711_v22, 0.0  ;;  %v3784_v63 = vmax.f32 %v3724_v9, 0.0 }
 0x5a1   : > { %v3736_v8 = vpop.f32.mrf.mxu0  ;;  %v3749_v29 = vpop.f32.mrf.mxu1 }
 0x5a2   : > { %v8771_v33 = vadd.f32 %v3783_v59, %v8394_v18  ;;  %v3803_v21 = vmul.f32 %v3783_v59, %v9559_v41  ;;  %v8775_v25 = vadd.f32 %v3784_v63, %v9560_v37  ;;  %v3804_v46 = vmul.f32 %v3784_v63, %v9561_v6  ;;  %v4118_v59 = vpop.permute.xlu0 %4117  ;;  %v3823_v63 = vld [vmem:[#allocation2 + $0x48] sm:$0xff] }
 0x5a3   : > { %v3737_v19 = vadd.f32 %v3736_v8, %v8744_v62  ;;  %v3750_v36 = vadd.f32 %v3749_v29, %v8744_v62 }
 0x5a4   : > { %v3811_v30 = vpack.c.bf16 %v3804_v46, %v3803_v21  ;;  %v4127_v46 = vrot.slane %v4118_v59, 4 }
 0x5a5   : > { %v3712_v18 = vpop.f32.mrf.mxu2  ;;  %v3725_v48 = vpop.f32.mrf.mxu3  ;;  %v3785_v26 = vmax.f32 %v3737_v19, 0.0  ;;  %v3786_v32 = vmax.f32 %v3750_v36, 0.0 }
 0x5a6   : > { %3816 = vst [vmem:[#allocation2 + $0x64] sm:$0xff] %v3811_v30  ;;  %4007 = vrot.lane.b32.xlu2 %v3811_v30, %s7003_s28 }
 0x5a7   : > { %v8784_v52 = vadd.f32 %v3785_v26, %v9562_v13  ;;  %v3805_v12 = vmul.f32 %v3785_v26, %v9563_v51  ;;  %v8788_v50 = vadd.f32 %v3786_v32, %v9564_v11  ;;  %v3806_v53 = vmul.f32 %v3786_v32, %v9565_v31  ;;  %3988 = vst [vmem:[#allocation3 + $0xb0] sm:$0xff] %v3811_v30  ;;  %v3996_v30 = vld [vmem:[#allocation2 + $0x7c] sm:$0xf]  ;;  %v3884_v26 = vld [vmem:[#allocation2 + $0x4c] sm:$0xff]  ;;  %v4114_v32 = vpop.permute.xlu1 %4113  ;;  %v3885_v13 = vld [vmem:[#allocation2 + $0x54] sm:$0xf] }
 0x5a8   : > { %v3822_v11 = vld [vmem:[#allocation2 + $0x40] sm:$0xff] }
 0x5a9   : > { %v3812_v57 = vpack.c.bf16 %v3806_v53, %v3805_v12  ;;  %v3738_v27 = vpop.f32.mrf.mxu0  ;;  %v3751_v40 = vpop.f32.mrf.mxu1  ;;  %v3824_v12 = vld [vmem:[#allocation2 + $0x50] sm:$0xf]  ;;  %v6214_v53 = vld [vmem:[%s9430_s4 + $0x20] sm:$0xff] }
 0x5aa   : > { %v8821_v37 = vpop.permute.xlu0 %4057  ;;  %v4126_v40 = vrot.slane %v8795_v61, 4 }
 0x5ab   : > { %3817 = vst [vmem:[#allocation2 + $0x6c] sm:$0xff] %v3812_v57  ;;  %v4067_v29 = vrot.slane %v8821_v37, 4 }
 0x5ac   : > { %3989 = vst [vmem:[#allocation3 + $0xb8] sm:$0xff] %v3812_v57 }
 0x5ad   : > { %v3933_v4 = vld [vmem:[#allocation2 + $0x60] sm:$0xff] }
 0x5ae   : > { %3831 = vrot.lane.b32.xlu2 %v3819_v14, %s7004_s25  ;;  %3947 = vrot.lane.b32.xlu1 %v3933_v4, %s7004_s25  ;;  %v4125_v4 = vrot.slane %v4114_v32, 4 }
 0x5af   : > { %v3895_v27 = vpop.permute.xlu1 %3894 }
 0x5b1   : > { %v3762_v5 = vpop.f32.mrf.mxu2  ;;  %v3775_v23 = vpop.f32.mrf.mxu3 }
 0x5b2   : > { %v3763_v55 = vadd.f32 %v3762_v5, %v8744_v62  ;;  %v3776_v56 = vadd.f32 %v3775_v23, %v8744_v62  ;;  %v3934_v16 = vld [vmem:[#allocation2 + $0x68] sm:$0xff]  ;;  %v8808_v62 = vpop.permute.xlu2 %4055  ;;  %v8848_v14 = vpop.permute.xlu0 %4121  ;;  %v3905_v5 = vrot.slane %v3895_v27, 4 }
 0x5b4   : > { %v3787_v28 = vmax.f32 %v3763_v55, 0.0  ;;  %v3788_v43 = vmax.f32 %v3776_v56, 0.0  ;;  %v4133_v55 = vsel %vm348_vm0, %v4126_v40, %v4127_v46  ;;  %v4131_v56 = vsel %vm348_vm0, %v4125_v4, %v4126_v40 }
 0x5b6   : > { %v8798_v34 = vadd.f32 %v3787_v28, %v9566_v20  ;;  %v3807_v15 = vmul.f32 %v3787_v28, %v9568_v3  ;;  %v8802_v45 = vadd.f32 %v3788_v43, %v9569_v38  ;;  %v3808_v54 = vmul.f32 %v3788_v43, %v9571_v7  ;;  %3898 = vrot.lane.b32.xlu2 %v8636_v10, %s7003_s28  ;;  %v4046_v43 = vld [vmem:[#allocation2 + $0xa0] sm:$0xf] }
 0x5b7   : > { %3949 = vrot.lane.b32.xlu1 %v3934_v16, %s7004_s25  ;;  %v4066_v10 = vrot.slane %v8808_v62, 4  ;;  %v4134_v20 = vsel %vm3911_vm13, %v8795_v61, %v4133_v55 }
 0x5b8   : > { %9567 = vst [vmem:[#allocation17_spill] sm:$0xff] %v8798_v34  ;;  %v3813_v24 = vpack.c.bf16 %v3808_v54, %v3807_v15  ;;  %v4132_v15 = vsel %vm3911_vm13, %v4114_v32, %v4131_v56 }
 0x5b9   : > { %9570 = vst [vmem:[#allocation19_spill] sm:$0xff] %v8802_v45  ;;  %v3764_v17 = vpop.f32.mrf.mxu2  ;;  %v3777_v47 = vpop.f32.mrf.mxu3  ;;  %v4073_v36 = vsel %vm348_vm0, %v4066_v10, %v4067_v29 }
 0x5ba   : > { %3818 = vst [vmem:[#allocation2 + $0x74] sm:$0xff] %v3813_v24  ;;  %v8813_v9 = vpop.permute.xlu2 %3896  ;;  %v4074_v48 = vsel %vm3850_vm11, %v8808_v62, %v4073_v36  ;;  %v8860_v16 = vpop.permute.xlu0 %3835  ;;  %v4332_v47 = vunpack.c.l.b16 %v4134_v20  ;;  %v8970_v62 = vld [vmem:[#allocation3 + $0x124] sm:$0xf0] }
 0x5bb   : > { %3990 = vst [vmem:[#allocation3 + $0xc0] sm:$0xff] %v3813_v24 }
 0x5bc   : > { %4087 = vst [vmem:[#allocation3 + $0xf8] sm:$0xff] %v4074_v48 }
 0x5bf   : > { %4011 = vrot.lane.b32.xlu1 %v3813_v24, %s7003_s28  ;;  %v3893_v24 = vpop.permute.xlu1 %3892 }
 0x5c0   : > { %v3904_v17 = vrot.slane %v3893_v24, 4 }
 0x5c1   : > { %v4041_v35 = vld [vmem:[#allocation2 + $0x78] sm:$0xff]  ;;  %v3935_v22 = vld [vmem:[#allocation2 + $0x70] sm:$0xff] }
 0x5c2   : > { %4053 = vrot.lane.b32.xlu0 %v4041_v35, %s7004_s25  ;;  %3951 = vrot.lane.b32.xlu2 %v3935_v22, %s7004_s25  ;;  %v8819_v21 = vpop.permute.xlu2 %4119  ;;  %v4333_v35 = vunpack.c.h.b16 %v4134_v20  ;;  %v4330_v22 = vunpack.c.l.b16 %v4132_v15 }
 0x5c3   : > { %v4128_v8 = vrot.slane %v8819_v21, 4  ;;  %v6345_v56 = vld [vmem:[#allocation3 + $0xf8] sm:$0xf] }
 0x5c4   : > { %v4383_v61 = vpack.c.b16 %v4333_v35, %v4333_v35 }
 0x5c5   : > { %v4135_v19 = vsel %vm348_vm0, %v4127_v46, %v4128_v8  ;;  %v4382_v46 = vpack.c.b16 %v4332_v47, %v4332_v47 }
 0x5c6   : > { %v8834_v18 = vsel %vm3911_vm13, %v4118_v59, %v4135_v19  ;;  %v9485_v59 = vrot.slane %v8860_v16, 4  ;;  %v4380_v19 = vpack.c.b16 %v4330_v22, %v4330_v22 }
 0x5c7   : > { %3839 = vrot.lane.b32.xlu1 %v3823_v63, %s7004_s25  ;;  %v4331_v63 = vunpack.c.h.b16 %v4132_v15  ;;  %v4440_v32 = vsel %vm348_vm0, %v4382_v46, 0  ;;  %v6751_v15 = vld [vmem:[#allocation3 + $0xfc] sm:$0xf] }
 0x5c8   : > { %4492 = vmatpush.bf16.msra.mxu2 %v4440_v32 }
 0x5c9   : > { %v4381_v48 = vpack.c.b16 %v4331_v63, %v4331_v63 }
 0x5ca   : > { %4009 = vrot.lane.b32.xlu0 %v3812_v57, %s7003_s28  ;;  %4123 = vrot.lane.b32.xlu2 %v4106_v44, %s7003_s28  ;;  %v3906_v57 = vrot.slane %v8813_v9, 4  ;;  %v3834_v38 = vpop.permute.xlu2 %3833  ;;  %v3910_v44 = vsel %vm348_vm0, %v3904_v17, %v3905_v5 }
 0x5cb   : > { %v3844_v54 = vrot.slane %v3834_v38, 4 }
 0x5cc   : > { %v3913_v23 = vsel %vm348_vm0, %v3905_v5, %v3906_v57  ;;  %v8877_v5 = vpop.permute.xlu1 %4061 }
 0x5cd   : > { %v3914_v28 = vsel %vm3911_vm13, %v3895_v27, %v3913_v23  ;;  %v3852_v36 = vsel %vm348_vm0, %v3844_v54, %v9485_v59  ;;  %v4060_v27 = vpop.permute.xlu0 %4059  ;;  %v9483_v55 = vrot.slane %v8877_v5, 4  ;;  %v9008_v59 = vld [vmem:[#allocation2 + $0xc4] sm:$0xff] }
 0x5ce   : > { %3927 = vst [vmem:[#allocation3 + $0x58] sm:$0xff] %v3914_v28  ;;  %v4068_v40 = vrot.slane %v4060_v27, 4  ;;  %v6756_v28 = vld [vmem:[#allocation3 + $0x11c] sm:$0xf0] }
 0x5cf   : > { %4013 = vrot.lane.b32.xlu1 %v3996_v30, %s7003_s28  ;;  %v3912_v30 = vsel %vm3911_vm13, %v3893_v24, %v3910_v44  ;;  %v6346_v20 = vor.u32 %v6756_v28, %v6345_v56 }
 0x5d0   : > { %3926 = vst [vmem:[#allocation3 + $0x50] sm:$0xff] %v3912_v30  ;;  %v4075_v4 = vsel %vm348_vm0, %v4067_v29, %v4068_v40  ;;  %v4077_v29 = vsel %vm348_vm0, %v4068_v40, %v9483_v55 }
 0x5d1   : > { %v4076_v23 = vsel %vm3850_vm11, %v8821_v37, %v4075_v4  ;;  %v4078_v17 = vsel %vm3850_vm11, %v4060_v27, %v4077_v29  ;;  %4493 = vmatpush.bf16.msra.mxu2 %v6346_v20  ;;  %v6305_v4 = vld [vmem:[#allocation3 + $0xa8] sm:$0xf]  ;;  %v6227_v29 = vld [vmem:[#allocation3 + $0x30] sm:$0xf0] }
 0x5d2   : > { %3900 = vrot.lane.b32.xlu0 %v3884_v26, %s7003_s28  ;;  %3902 = vrot.lane.b32.xlu2 %v3885_v13, %s7003_s28  ;;  %v3853_v26 = vsel %vm3850_vm11, %v3834_v38, %v3852_v36  ;;  %v4443_v13 = vsel %vm348_vm0, %v4383_v61, 0  ;;  %4088 = vst [vmem:[#allocation3 + $0x100] sm:$0xff] %v4076_v23  ;;  %v6347_v38 = vld [vmem:[#allocation3 + $0x120] sm:$0xf0]  ;;  %s6803_s28 = smul.u32 80, %s7056_s22  ;;  %s5449_s22 = sshll.u32 %s7121_s12, 4  ;;  %s5450_s22 = int_to_ptr.vmem [resolvable:$true] %s5449_s22 }
 0x5d3   : > { %3866 = vst [vmem:[#allocation3 + $0x8] sm:$0xff] %v3853_v26  ;;  %4505 = vmatpush.bf16.msra.mxu3 %v4443_v13  ;;  %v6350_v24 = vor.u32 %v6751_v15, %v6347_v38  ;;  %v6726_v38 = vld [vmem:[#allocation3 + $0x2c] sm:$0xf0] }
 0x5d4   : > { %4089 = vst [vmem:[#allocation3 + $0x108] sm:$0xff] %v4078_v17  ;;  %v8910_v17 = vld [vmem:[#allocation3 + $0x12c] sm:$0xf0]  ;;  %s5447_s16 = scalar_lea.hbm %s9431_s5, %s6803_s28 }
 0x5d5   : > { %s5451_s17 = sshll.u32 %s5447_s16, 4  ;;  %s5452_s17 = int_to_ptr.hbm [resolvable:$true] %s5451_s17 }
 0x5d6   : > { %s6924_s26 = sshra.s32 %s5452_s17, 4  ;;  %s6925_s26 = int_to_ptr.hbm [resolvable:$true] %s6924_s26 }
 0x5d7   : > { %3841 = vrot.lane.b32.xlu1 %v3824_v12, %s7004_s25  ;;  %v4434_v12 = vsel %vm348_vm0, %v4380_v19, 0  ;;  %4506 = vmatpush.bf16.msra.mxu3 %v6350_v24  ;;  %v4684_v24 = vld [vmem:[#allocation2 + $0xc] sm:$0xff]  ;;  %s6926_s7 = scalar_lea.hbm %s6925_s26, 80  ;;  %p6931_p4 = scmp.lt.s32.totalorder %s6925_s26, %s9431_s5 }
 0x5d8   : > { %4466 = vmatpush.bf16.msra.mxu0 %v4434_v12  ;;  %4689 = vst [vmem:[#allocation3 + $0x30] sm:$0xff] %v4684_v24  ;;  %p6927_p6 = scmp.ne.s32.totalorder %s6925_s26, %s6926_s7 }
 0x5da   : > { %3837 = vrot.lane.b32.xlu0 %v3822_v11, %s7004_s25  ;;  %4202 = vperm.xlu2 %6878, %v6214_v53   ;;  %v3936_v11 = vld [vmem:[#allocation2 + $0x78] sm:$0xf]  ;;  %v4437_v53 = vsel %vm348_vm0, %v4381_v48, 0  ;;  %p6928_p2 = pnand %p6927_p6, %p7081_p11 }
 0x5db   : > { %4479 = vmatpush.bf16.msra.mxu1 %v4437_v53 }
 0x5dc   : > { %p6929_p3 = pneg %p6928_p2 }
 0x5e2   : > { %4063 = vrot.lane.b32.xlu0 %v4046_v43, %s7004_s25  ;;  %v4904_v43 = vld [vmem:[#allocation2 + $0xac] sm:$0xff] }
 0x5e3   : > { %4927 = vrot.lane.b32.xlu1 %v4904_v43, %s6993_s23  ;;  %4909 = vst [vmem:[#allocation3 + $0x120] sm:$0xff] %v4904_v43  ;;  %v6741_v43 = vld [vmem:[#allocation3 + $0xac] sm:$0xf] }
 0x5ea   : > { %3953 = vrot.lane.b32.xlu0 %v3936_v11, %s7004_s25  ;;  %s5436_s25 = scalar_lea.sflag [#allocation6], %s7111_s6 }
 0x5eb   : > { %4707 = vrot.lane.b32.xlu1 %v4684_v24, %s6993_s23  ;;  %v6225_v24 = vld [vmem:[#allocation3 + $0x8] sm:$0xf] }
 0x5f4   : > { %v3944_v37 = vpop.permute.xlu2 %3943 }
 0x5f5   : > { %v3955_v12 = vrot.slane %v3944_v37, 4 }
 0x600   : > { %v8887_v47 = vpop.permute.xlu2 %4007 }
 0x601   : > { %v4017_v61 = vrot.slane %v8887_v47, 4 }
 0x608   : > { %v3832_v35 = vpop.permute.xlu2 %3831 }
 0x609   : > { %v3843_v22 = vrot.slane %v3832_v35, 4  ;;  %v4006_v46 = vpop.permute.xlu1 %4005 }
 0x60a   : > { %v4016_v19 = vrot.slane %v4006_v46, 4 }
 0x60b   : > { %v3849_v63 = vsel %vm348_vm0, %v3843_v22, %v3844_v54  ;;  %v8913_v22 = vld [vmem:[#allocation3 + $0x130] sm:$0xf0] }
 0x60c   : > { %v3851_v44 = vsel %vm3850_vm11, %v3832_v35, %v3849_v63  ;;  %v4023_v36 = vsel %vm348_vm0, %v4016_v19, %v4017_v61  ;;  %v8915_v63 = vld [vmem:[#allocation2 + $0xbc] sm:$0xff] }
 0x60d   : > { %3865 = vst [vmem:[#allocation3] sm:$0xff] %v3851_v44  ;;  %v4024_v48 = vsel %vm3911_vm13, %v4006_v46, %v4023_v36  ;;  %v4903_v44 = vld [vmem:[#allocation2 + $0xa4] sm:$0xff]  ;;  %v8921_v36 = vld [vmem:[#allocation3 + $0x118] sm:$0xf0] }
 0x60e   : > { %4037 = vst [vmem:[#allocation3 + $0xd0] sm:$0xff] %v4024_v48  ;;  %4925 = vrot.lane.b32.xlu0 %v4903_v44, %s6993_s23 }
 0x60f   : > { %4911 = vst [vmem:[#allocation3 + $0x130] sm:$0xff] %v8915_v63 }
 0x610   : > { %v8895_v30 = vpop.permute.xlu2 %3898 }
 0x611   : > { %v3907_v26 = vrot.slane %v8895_v30, 4  ;;  %v3946_v13 = vpop.permute.xlu0 %3945  ;;  %v4004_v53 = vpop.permute.xlu1 %4003 }
 0x612   : > { %v3956_v11 = vrot.slane %v3946_v13, 4  ;;  %v4015_v27 = vrot.slane %v4004_v53, 4 }
 0x613   : > { %v3915_v54 = vsel %vm348_vm0, %v3906_v57, %v3907_v26 }
 0x614   : > { %v3916_v32 = vsel %vm3911_vm13, %v8813_v9, %v3915_v54  ;;  %v3961_v40 = vsel %vm348_vm0, %v3955_v12, %v3956_v11  ;;  %v4021_v56 = vsel %vm348_vm0, %v4015_v27, %v4016_v19  ;;  %v8919_v19 = vld [vmem:[#allocation3 + $0x114] sm:$0xf0]  ;;  %v6217_v45 = vld [vmem:[#allocation3] sm:$0xf]  ;;  %v6720_v3 = vld [vmem:[#allocation3 + $0x4] sm:$0xf] }
 0x615   : > { %3928 = vst [vmem:[#allocation3 + $0x60] sm:$0xff] %v3916_v32  ;;  %v3962_v23 = vsel %vm3850_vm11, %v3944_v37, %v3961_v40  ;;  %v6746_v28 = vld [vmem:[#allocation3 + $0xcc] sm:$0xf0]  ;;  %v6307_v20 = vld [vmem:[#allocation3 + $0xd0] sm:$0xf0]  ;;  %v4022_v57 = vsel %vm3911_vm13, %v4004_v53, %v4021_v56  ;;  %v9484_v37 = vrot.slane %v8848_v14, 4 }
 0x616   : > { %3976 = vst [vmem:[#allocation3 + $0x78] sm:$0xff] %v3962_v23  ;;  %v6306_v9 = vor.u32 %v6746_v28, %v6305_v4  ;;  %v6310_v15 = vor.u32 %v6741_v43, %v6307_v20  ;;  %v6265_v28 = vld [vmem:[#allocation3 + $0x58] sm:$0xf] }
 0x617   : > { %4036 = vst [vmem:[#allocation3 + $0xc8] sm:$0xff] %v4022_v57  ;;  %v4137_v54 = vsel %vm348_vm0, %v4128_v8, %v9484_v37  ;;  %v6731_v57 = vld [vmem:[#allocation3 + $0x5c] sm:$0xf] }
 0x618   : > { %4494 = vmatpush.bf16.msra.mxu2 %v6306_v9  ;;  %4507 = vmatpush.bf16.msra.mxu3 %v6310_v15  ;;  %4908 = vst [vmem:[#allocation3 + $0x118] sm:$0xff] %v4903_v44  ;;  %v4138_v53 = vsel %vm3911_vm13, %v8819_v21, %v4137_v54  ;;  %v6721_v44 = vld [vmem:[#allocation3 + $0xc] sm:$0xf]  ;;  %v8942_v54 = vld [vmem:[#allocation3 + $0x24] sm:$0xf0] }
 0x619   : > { %v4336_v23 = vunpack.c.l.b16 %v4138_v53  ;;  %v9006_v37 = vld [vmem:[#allocation3 + $0x138] sm:$0xf0] }
 0x61c   : > { %v8931_v12 = vpop.permute.xlu2 %3951 }
 0x61d   : > { %v9482_v40 = vrot.slane %v8931_v12, 4 }
 0x620   : > { %v3948_v35 = vpop.permute.xlu1 %3947 }
 0x621   : > { %v3957_v46 = vrot.slane %v3948_v35, 4 }
 0x623   : > { %v3963_v48 = vsel %vm348_vm0, %v3956_v11, %v3957_v46  ;;  %v4337_v11 = vunpack.c.h.b16 %v4138_v53 }
 0x624   : > { %v3964_v32 = vsel %vm3850_vm11, %v3946_v13, %v3963_v48  ;;  %v4386_v48 = vpack.c.b16 %v4336_v23, %v4336_v23 }
 0x625   : > { %3977 = vst [vmem:[#allocation3 + $0x80] sm:$0xff] %v3964_v32  ;;  %v8944_v32 = vld [vmem:[#allocation3 + $0x28] sm:$0xf0] }
 0x629   : > { %v3950_v27 = vpop.permute.xlu1 %3949 }
 0x62a   : > { %v3958_v4 = vrot.slane %v3950_v27, 4 }
 0x62c   : > { %v3965_v56 = vsel %vm348_vm0, %v3957_v46, %v3958_v4  ;;  %v3967_v8 = vsel %vm348_vm0, %v3958_v4, %v9482_v40  ;;  %v6736_v20 = vld [vmem:[#allocation3 + $0x7c] sm:$0xf0]  ;;  %v6267_v21 = vld [vmem:[#allocation3 + $0x80] sm:$0xf0]  ;;  %v4387_v46 = vpack.c.b16 %v4337_v11, %v4337_v11  ;;  %v6226_v4 = vor.u32 %v6726_v38, %v6225_v24  ;;  %v8956_v11 = vld [vmem:[%s9429_s3 + $0xc] sm:$0xf]  ;;  %v8961_v38 = vpop.permute.xlu2 %4123 }
 0x62d   : > { %v3966_v13 = vsel %vm3850_vm11, %v3948_v35, %v3965_v56  ;;  %v3968_v43 = vsel %vm3850_vm11, %v3950_v27, %v3967_v8  ;;  %v6266_v9 = vor.u32 %v6736_v20, %v6265_v28  ;;  %v6270_v15 = vor.u32 %v6731_v57, %v6267_v21  ;;  %v8946_v35 = vld [vmem:[#allocation2 + $0x4] sm:$0xff]  ;;  %v6259_v40 = vld [vmem:[#allocation3 + $0x78] sm:$0xf0] }
 0x62e   : > { %3978 = vst [vmem:[#allocation3 + $0x88] sm:$0xff] %v3966_v13  ;;  %v6230_v56 = vor.u32 %v6721_v44, %v6227_v29  ;;  %v4452_v28 = vsel %vm348_vm0, %v4386_v48, 0  ;;  %v4455_v23 = vsel %vm348_vm0, %v4387_v46, 0  ;;  %v6361_v13 = vld [vmem:[#allocation3 + $0x108] sm:$0xf] }
 0x62f   : > { %3979 = vst [vmem:[#allocation3 + $0x90] sm:$0xff] %v3968_v43  ;;  %4495 = vmatpush.bf16.msra.mxu2 %v6266_v9  ;;  %4508 = vmatpush.bf16.msra.mxu3 %v6270_v15  ;;  %v6753_v43 = vld [vmem:[#allocation3 + $0x10c] sm:$0xf]  ;;  %v6362_v57 = vor.u32 %v8910_v17, %v6361_v13  ;;  %v4905_v9 = vld [vmem:[#allocation2 + $0xb4] sm:$0xff]  ;;  %v8977_v44 = vld [vmem:[#allocation3 + $0x3c] sm:$0xf0] }
 0x630   : > { %4688 = vst [vmem:[#allocation3 + $0x28] sm:$0xff] %v8946_v35  ;;  %v6366_v21 = vor.u32 %v6753_v43, %v8913_v22  ;;  %4929 = vrot.lane.b32.xlu1 %v4905_v9, %s6993_s23  ;;  %v8979_v48 = vld [vmem:[#allocation3 + $0x40] sm:$0xf0]  ;;  %v8981_v17 = vld [vmem:[#allocation2 + $0x1c] sm:$0xff] }
 0x631   : > { %v8948_v53 = vpop.permute.xlu1 %4011  ;;  %4691 = vst [vmem:[#allocation3 + $0x40] sm:$0xff] %v8981_v17 }
 0x632   : > { %v4019_v22 = vrot.slane %v8948_v53, 4 }
 0x633   : > { %4496 = vmatpush.bf16.msra.mxu2 %v6226_v4  ;;  %4509 = vmatpush.bf16.msra.mxu3 %v6230_v56 }
 0x634   : > { %v4054_v27 = vpop.permute.xlu0 %4053 }
 0x635   : > { %v4065_v8 = vrot.slane %v4054_v27, 4 }
 0x636   : > { %6377 = vmatmul.msk.bf16.vlgmr.msra.gmra.mxu2 %vm1014_vm9, %v8956_v11  ;;  %6378 = vmatmul.msk.bf16.vlgmr.msra.gmra.mxu3 %vm1014_vm9, %v8956_v11 }
 0x637   : > { %v4071_v20 = vsel %vm348_vm0, %v4065_v8, %v4066_v10  ;;  %4544 = vmatpush.bf16.msrb.mxu2 %v4452_v28  ;;  %4557 = vmatpush.bf16.msrb.mxu3 %v4455_v23  ;;  %v8972_v10 = vld [vmem:[#allocation3 + $0x128] sm:$0xf0] }
 0x638   : > { %v4072_v29 = vsel %vm3850_vm11, %v4054_v27, %v4071_v20  ;;  %4910 = vst [vmem:[#allocation3 + $0x128] sm:$0xff] %v4905_v9  ;;  %v6745_v20 = vld [vmem:[#allocation3 + $0xc4] sm:$0xf0] }
 0x639   : > { %4086 = vst [vmem:[#allocation3 + $0xf0] sm:$0xff] %v4072_v29  ;;  %v8975_v15 = vpop.permute.xlu1 %3839  ;;  %v6299_v29 = vld [vmem:[#allocation3 + $0xc8] sm:$0xf0]  ;;  %v8998_v9 = vld [vmem:[#allocation2 + $0x14] sm:$0xff] }
 0x63b   : > { %4545 = vmatpush.bf16.msrb.mxu2 %v6362_v57  ;;  %4558 = vmatpush.bf16.msrb.mxu3 %v6366_v21  ;;  %v3903_v57 = vpop.permute.xlu2 %3902  ;;  %v8994_v21 = vld [vmem:[#allocation3 + $0x34] sm:$0xf0] }
 0x63c   : > { %v4010_v24 = vpop.permute.xlu0 %4009 }
 0x63d   : > { %v4018_v46 = vrot.slane %v4010_v24, 4 }
 0x63f   : > { %v4025_v27 = vsel %vm348_vm0, %v4017_v61, %v4018_v46  ;;  %v4027_v4 = vsel %vm348_vm0, %v4018_v46, %v4019_v22  ;;  %v8996_v61 = vld [vmem:[#allocation3 + $0x38] sm:$0xf0]  ;;  %v6297_v46 = vld [vmem:[#allocation3 + $0xa0] sm:$0xf] }
 0x640   : > { %v4026_v56 = vsel %vm3911_vm13, %v8887_v47, %v4025_v27  ;;  %v4028_v8 = vsel %vm3911_vm13, %v4010_v24, %v4027_v4  ;;  %v6337_v28 = vld [vmem:[#allocation3 + $0xf0] sm:$0xf]  ;;  %v6750_v23 = vld [vmem:[#allocation3 + $0xf4] sm:$0xf]  ;;  %4690 = vst [vmem:[#allocation3 + $0x38] sm:$0xff] %v8998_v9  ;;  %v3909_v4 = vrot.slane %v3903_v57, 4 }
 0x641   : > { %4038 = vst [vmem:[#allocation3 + $0xd8] sm:$0xff] %v4026_v56  ;;  %v6338_v13 = vor.u32 %v8919_v19, %v6337_v28  ;;  %v6342_v43 = vor.u32 %v6750_v23, %v8921_v36  ;;  %v4014_v47 = vpop.permute.xlu1 %4013  ;;  %v6740_v19 = vld [vmem:[#allocation3 + $0xa4] sm:$0xf]  ;;  %v4334_v36 = vunpack.c.l.b16 %v8834_v18  ;;  %v6735_v23 = vld [vmem:[#allocation3 + $0x74] sm:$0xf0] }
 0x642   : > { %4039 = vst [vmem:[#allocation3 + $0xe0] sm:$0xff] %v4028_v8  ;;  %v4020_v27 = vrot.slane %v4014_v47, 4  ;;  %v6298_v8 = vor.u32 %v6745_v20, %v6297_v46  ;;  %v6302_v28 = vor.u32 %v6740_v19, %v6299_v29  ;;  %v6743_v29 = vld [vmem:[#allocation3 + $0xbc] sm:$0xf]  ;;  %v6257_v19 = vld [vmem:[#allocation3 + $0x50] sm:$0xf] }
 0x643   : > { %4467 = vmatpush.bf16.msra.mxu0 %v6338_v13  ;;  %4480 = vmatpush.bf16.msra.mxu1 %v6342_v43  ;;  %v4335_v13 = vunpack.c.h.b16 %v8834_v18  ;;  %v9004_v43 = vld [vmem:[#allocation3 + $0x134] sm:$0xf0] }
 0x644   : > { %v3901_v24 = vpop.permute.xlu0 %3900  ;;  %v4029_v55 = vsel %vm348_vm0, %v4019_v22, %v4020_v27  ;;  %v6321_v22 = vld [vmem:[#allocation3 + $0xb8] sm:$0xf]  ;;  %4912 = vst [vmem:[#allocation3 + $0x138] sm:$0xff] %v9008_v59  ;;  %v6730_v27 = vld [vmem:[#allocation3 + $0x54] sm:$0xf] }
 0x645   : > { %v3908_v56 = vrot.slane %v3901_v24, 4  ;;  %v4030_v20 = vsel %vm3911_vm13, %v8948_v53, %v4029_v55  ;;  %v3847_v55 = vrot.slane %v8975_v15, 4  ;;  %v4385_v34 = vpack.c.b16 %v4335_v13, %v4335_v13 }
 0x646   : > { %4040 = vst [vmem:[#allocation3 + $0xe8] sm:$0xff] %v4030_v20 }
 0x647   : > { %v3917_v47 = vsel %vm348_vm0, %v3907_v26, %v3908_v56  ;;  %v3919_v57 = vsel %vm348_vm0, %v3908_v56, %v3909_v4  ;;  %4468 = vmatpush.bf16.msra.mxu0 %v6298_v8  ;;  %4481 = vmatpush.bf16.msra.mxu1 %v6302_v28  ;;  %v6258_v26 = vor.u32 %v6735_v23, %v6257_v19 }
 0x648   : > { %v3918_v18 = vsel %vm3911_vm13, %v8895_v30, %v3917_v47  ;;  %v3920_v46 = vsel %vm3911_vm13, %v3901_v24, %v3919_v57  ;;  %v6262_v4 = vor.u32 %v6730_v27, %v6259_v40  ;;  %v4384_v28 = vpack.c.b16 %v4334_v36, %v4334_v36 }
 0x649   : > { %3929 = vst [vmem:[#allocation3 + $0x68] sm:$0xff] %v3918_v18  ;;  %v6748_v56 = vld [vmem:[#allocation3 + $0xdc] sm:$0xf0]  ;;  %v6323_v8 = vld [vmem:[#allocation3 + $0xe0] sm:$0xf0]  ;;  %v3842_v30 = vpop.permute.xlu1 %3841  ;;  %v6218_v40 = vor.u32 %v8942_v54, %v6217_v45  ;;  %v6222_v36 = vor.u32 %v6720_v3, %v8944_v32  ;;  %v4130_v57 = vrot.slane %v8961_v38, 4 }
 0x64a   : > { %3930 = vst [vmem:[#allocation3 + $0x70] sm:$0xff] %v3920_v46  ;;  %v6322_v53 = vor.u32 %v6748_v56, %v6321_v22  ;;  %v6326_v7 = vor.u32 %v6743_v29, %v6323_v8  ;;  %v3848_v47 = vrot.slane %v3842_v30, 4  ;;  %v4446_v20 = vsel %vm348_vm0, %v4384_v28, 0  ;;  %v6353_v29 = vld [vmem:[#allocation3 + $0x100] sm:$0xf] }
 0x64b   : > { %4469 = vmatpush.bf16.msra.mxu0 %v6258_v26  ;;  %4482 = vmatpush.bf16.msra.mxu1 %v6262_v4  ;;  %v4449_v22 = vsel %vm348_vm0, %v4385_v34, 0  ;;  %v9572_v18 = vrot.slane %v8860_v16, 4  ;;  %v6738_v45 = vld [vmem:[#allocation3 + $0x8c] sm:$0xf0]  ;;  %v6283_v54 = vld [vmem:[#allocation3 + $0x90] sm:$0xf0] }
 0x64c   : > { %4546 = vmatpush.bf16.msrb.mxu2 %v6322_v53  ;;  %4559 = vmatpush.bf16.msrb.mxu3 %v6326_v7  ;;  %v3838_v24 = vpop.permute.xlu0 %3837  ;;  %v3858_v13 = vsel %vm348_vm0, %v3847_v55, %v3848_v47  ;;  %v6752_v32 = vld [vmem:[#allocation3 + $0x104] sm:$0xf]  ;;  %v9573_v56 = vrot.slane %v8848_v14, 4  ;;  %v9045_v28 = vld [vmem:[#allocation3 + $0x44] sm:$0xf0]  ;;  %v9049_v53 = vld [vmem:[#allocation2 + $0x24] sm:$0xff] }
 0x64d   : > { %v3846_v23 = vrot.slane %v3838_v24, 4  ;;  %v3859_v3 = vsel %vm3850_vm11, %v8975_v15, %v3858_v13  ;;  %v6358_v8 = vor.u32 %v6752_v32, %v8972_v10  ;;  %v6747_v30 = vld [vmem:[#allocation3 + $0xd4] sm:$0xf0]  ;;  %v4853_v13 = vld [vmem:[#allocation2 + $0xa0] sm:$0xff] }
 0x64e   : > { %3869 = vst [vmem:[#allocation3 + $0x20] sm:$0xff] %v3859_v3  ;;  %v4139_v15 = vsel %vm348_vm0, %v9573_v56, %v4130_v57  ;;  %v4634_v57 = vld [vmem:[#allocation2 + $0x8] sm:$0xff]  ;;  %4865 = vrot.lane.b32.xlu2 %v4853_v13, %s6989_s14 }
 0x64f   : > { %v3854_v7 = vsel %vm348_vm0, %v9572_v18, %v3846_v23  ;;  %v3856_v46 = vsel %vm348_vm0, %v3846_v23, %v3847_v55  ;;  %4470 = vmatpush.bf16.msra.mxu0 %v6218_v40  ;;  %4483 = vmatpush.bf16.msra.mxu1 %v6222_v36  ;;  %v9047_v55 = vld [vmem:[#allocation3 + $0x48] sm:$0xf0]  ;;  %v6313_v23 = vld [vmem:[#allocation3 + $0xb0] sm:$0xf]  ;;  %v6742_v40 = vld [vmem:[#allocation3 + $0xb4] sm:$0xf] }
 0x650   : > { %v3855_v34 = vsel %vm3850_vm11, %v8860_v16, %v3854_v7  ;;  %v3857_v38 = vsel %vm3850_vm11, %v3838_v24, %v3856_v46  ;;  %v6281_v19 = vld [vmem:[#allocation3 + $0x68] sm:$0xf]  ;;  %v6733_v27 = vld [vmem:[#allocation3 + $0x6c] sm:$0xf]  ;;  %v6354_v16 = vor.u32 %v8970_v62, %v6353_v29  ;;  %v6315_v24 = vld [vmem:[#allocation3 + $0xd8] sm:$0xf0]  ;;  %v4140_v62 = vsel %vm3911_vm13, %v8848_v14, %v4139_v15  ;;  %4647 = vrot.lane.b32.xlu1 %v4634_v57, %s6989_s14 }
 0x651   : > { %3867 = vst [vmem:[#allocation3 + $0x10] sm:$0xff] %v3855_v34  ;;  %v6282_v26 = vor.u32 %v6738_v45, %v6281_v19  ;;  %v6286_v4 = vor.u32 %v6733_v27, %v6283_v54  ;;  %v4854_v36 = vld [vmem:[#allocation2 + $0xa8] sm:$0xff]  ;;  %v9574_v29 = vrot.slane %v8877_v5, 4  ;;  %v6737_v7 = vld [vmem:[#allocation3 + $0x84] sm:$0xf0]  ;;  %v4338_v3 = vunpack.c.l.b16 %v4140_v62 }
 0x652   : > { %3868 = vst [vmem:[#allocation3 + $0x18] sm:$0xff] %v3857_v38  ;;  %6375 = vmatmul.msk.bf16.vlgmr.msra.gmra.mxu0 %vm1014_vm9, %v8956_v11  ;;  %6376 = vmatmul.msk.bf16.vlgmr.msra.gmra.mxu1 %vm1014_vm9, %v8956_v11  ;;  %v6275_v46 = vld [vmem:[#allocation3 + $0x88] sm:$0xf0]  ;;  %v4339_v32 = vunpack.c.h.b16 %v4140_v62  ;;  %v6273_v19 = vld [vmem:[#allocation3 + $0x60] sm:$0xf] }
 0x653   : > { %4518 = vmatpush.bf16.msrb.mxu0 %v4446_v20  ;;  %4531 = vmatpush.bf16.msrb.mxu1 %v4449_v22  ;;  %4692 = vst [vmem:[#allocation3 + $0x48] sm:$0xff] %v9049_v53  ;;  %v6314_v20 = vor.u32 %v6747_v30, %v6313_v23  ;;  %v6318_v22 = vor.u32 %v6742_v40, %v6315_v24  ;;  %v6732_v27 = vld [vmem:[#allocation3 + $0x64] sm:$0xf]  ;;  %v6331_v40 = vld [vmem:[#allocation3 + $0xe8] sm:$0xf0] }
 0x654   : > { %4547 = vmatpush.bf16.msrb.mxu2 %v6282_v26  ;;  %4560 = vmatpush.bf16.msrb.mxu3 %v6286_v4  ;;  %v4064_v47 = vpop.permute.xlu0 %4063  ;;  %v6274_v26 = vor.u32 %v6737_v7, %v6273_v19  ;;  %v6278_v4 = vor.u32 %v6732_v27, %v6275_v46  ;;  %v4389_v30 = vpack.c.b16 %v4339_v32, %v4339_v32  ;;  %v6744_v57 = vld [vmem:[#allocation3 + $0xc4] sm:$0xf]  ;;  %v4856_v7 = vld [vmem:[#allocation2 + $0xb8] sm:$0xff]  ;;  %v4918_v32 = vld [vmem:[#allocation2 + $0xcc] sm:$0xf] }
 0x655   : > { %v4070_v10 = vrot.slane %v4064_v47, 4  ;;  %4867 = vrot.lane.b32.xlu0 %v4854_v36, %s6989_s14  ;;  %v6329_v36 = vld [vmem:[#allocation3 + $0xc0] sm:$0xf] }
 0x656   : > { %4931 = vrot.lane.b32.xlu2 %v8915_v63, %s6993_s23  ;;  %v4633_v63 = vld [vmem:[#allocation2] sm:$0xff]  ;;  %v6249_v46 = vld [vmem:[#allocation3 + $0x20] sm:$0xf] }
 0x657   : > { %4519 = vmatpush.bf16.msrb.mxu0 %v6354_v16  ;;  %4532 = vmatpush.bf16.msrb.mxu1 %v6358_v8  ;;  %v4079_v18 = vsel %vm348_vm0, %v9574_v29, %v4070_v10  ;;  %v4388_v16 = vpack.c.b16 %v4338_v3, %v4338_v3  ;;  %v6724_v3 = vld [vmem:[#allocation3 + $0x24] sm:$0xf] }
 0x658   : > { %v4080_v14 = vsel %vm3850_vm11, %v8877_v5, %v4079_v18  ;;  %v6233_v56 = vld [vmem:[#allocation3 + $0x10] sm:$0xf]  ;;  %v6722_v15 = vld [vmem:[#allocation3 + $0x14] sm:$0xf]  ;;  %4711 = vrot.lane.b32.xlu1 %v8981_v17, %s6993_s23  ;;  %v4461_v17 = vsel %vm348_vm0, %v4389_v30, 0 }
 0x659   : > { %4090 = vst [vmem:[#allocation3 + $0x110] sm:$0xff] %v4080_v14  ;;  %v6241_v45 = vld [vmem:[#allocation3 + $0x18] sm:$0xf]  ;;  %v6723_v54 = vld [vmem:[#allocation3 + $0x1c] sm:$0xf]  ;;  %v6234_v24 = vor.u32 %v8994_v21, %v6233_v56  ;;  %v6238_v47 = vor.u32 %v6722_v15, %v8996_v61  ;;  %v4458_v23 = vsel %vm348_vm0, %v4388_v16, 0 }
 0x65a   : > { %v6242_v34 = vor.u32 %v8977_v44, %v6241_v45  ;;  %v6246_v38 = vor.u32 %v6723_v54, %v8979_v48  ;;  %v9575_v44 = vrot.slane %v8931_v12, 4  ;;  %v6749_v61 = vld [vmem:[#allocation3 + $0xe4] sm:$0xf0]  ;;  %v6250_v45 = vor.u32 %v9045_v28, %v6249_v46  ;;  %v4855_v54 = vld [vmem:[#allocation2 + $0xb0] sm:$0xff]  ;;  %v4857_v30 = vld [vmem:[#allocation2 + $0xc0] sm:$0xff] }
 0x65b   : > { %4520 = vmatpush.bf16.msrb.mxu0 %v6314_v20  ;;  %4533 = vmatpush.bf16.msrb.mxu1 %v6318_v22  ;;  %v6330_v20 = vor.u32 %v6749_v61, %v6329_v36  ;;  %v6334_v22 = vor.u32 %v6744_v57, %v6331_v40  ;;  %v4635_v28 = vld [vmem:[#allocation2 + $0x10] sm:$0xff]  ;;  %v4636_v61 = vld [vmem:[#allocation2 + $0x18] sm:$0xff] }
 0x65c   : > { %4548 = vmatpush.bf16.msrb.mxu2 %v6242_v34  ;;  %4561 = vmatpush.bf16.msrb.mxu3 %v6246_v38  ;;  %v3954_v5 = vpop.permute.xlu0 %3953 }
 0x65d   : > { %v3960_v8 = vrot.slane %v3954_v5, 4  ;;  %4705 = vrot.lane.b32.xlu0 %v8946_v35, %s6993_s23 }
 0x65e   : > { %4869 = vrot.lane.b32.xlu2 %v4855_v54, %s6989_s14  ;;  %v4858_v54 = vld [vmem:[#allocation2 + $0xc8] sm:$0xf] }
 0x65f   : > { %4521 = vmatpush.bf16.msrb.mxu0 %v6274_v26  ;;  %4534 = vmatpush.bf16.msrb.mxu1 %v6278_v4  ;;  %v3969_v48 = vsel %vm348_vm0, %v9575_v44, %v3960_v8 }
 0x660   : > { %6381 = vmatmul.msk.bf16.vlgmr.msrb.gmra.mxu2 %vm1014_vm9, %v8956_v11  ;;  %6382 = vmatmul.msk.bf16.vlgmr.msrb.gmra.mxu3 %vm1014_vm9, %v8956_v11  ;;  %v3970_v35 = vsel %vm3850_vm11, %v8931_v12, %v3969_v48  ;;  %v6369_v62 = vld [vmem:[#allocation3 + $0x110] sm:$0xf]  ;;  %v6754_v10 = vld [vmem:[#allocation3 + $0x114] sm:$0xf] }
 0x661   : > { %3980 = vst [vmem:[#allocation3 + $0x98] sm:$0xff] %v3970_v35  ;;  %v6370_v12 = vor.u32 %v9004_v43, %v6369_v62  ;;  %v6374_v21 = vor.u32 %v6754_v10, %v9006_v37  ;;  %4933 = vrot.lane.b32.xlu1 %v9008_v59, %s6993_s23  ;;  %v6289_v43 = vld [vmem:[#allocation3 + $0x70] sm:$0xf]  ;;  %v6734_v37 = vld [vmem:[#allocation3 + $0x74] sm:$0xf]  ;;  %v6254_v59 = vor.u32 %v6724_v3, %v9047_v55  ;;  %v9104_v55 = vpop.permute.xlu2 %4202 }
 0x663   : > { %4522 = vmatpush.bf16.msrb.mxu0 %v6234_v24  ;;  %4535 = vmatpush.bf16.msrb.mxu1 %v6238_v47 }
 0x665   : > { %4645 = vrot.lane.b32.xlu0 %v4633_v63, %s6989_s14 }
 0x666   : > { %6379 = vmatmul.msk.bf16.vlgmr.msrb.gmra.mxu0 %vm1014_vm9, %v8956_v11  ;;  %6380 = vmatmul.msk.bf16.vlgmr.msrb.gmra.mxu1 %vm1014_vm9, %v8956_v11 }
 0x667   : > { %4570 = vmatpush.bf16.msra.mxu0 %v4458_v23  ;;  %4583 = vmatpush.bf16.msra.mxu1 %v4461_v17 }
 0x668   : > { %v6739_v13 = vld [vmem:[#allocation3 + $0x94] sm:$0xf0]  ;;  %v6291_v29 = vld [vmem:[#allocation3 + $0x98] sm:$0xf0]  ;;  %4935 = vrot.lane.b32.xlu2 %v4918_v32, %s6993_s23 }
 0x669   : > { %v6290_v18 = vor.u32 %v6739_v13, %v6289_v43  ;;  %v6294_v14 = vor.u32 %v6734_v37, %v6291_v29 }
 0x66b   : > { %4571 = vmatpush.bf16.msra.mxu0 %v6370_v12  ;;  %4584 = vmatpush.bf16.msra.mxu1 %v6374_v21  ;;  %v9129_v21 = vpop.permute.xlu1 %4927 }
 0x66d   : > { %4871 = vrot.lane.b32.xlu0 %v4856_v7, %s6989_s14 }
 0x66f   : > { %4572 = vmatpush.bf16.msra.mxu0 %v6330_v20  ;;  %4585 = vmatpush.bf16.msra.mxu1 %v6334_v22 }
 0x673   : > { %4573 = vmatpush.bf16.msra.mxu0 %v6290_v18  ;;  %4586 = vmatpush.bf16.msra.mxu1 %v6294_v14  ;;  %v9145_v14 = vpop.permute.xlu1 %4707 }
 0x675   : > { %4709 = vrot.lane.b32.xlu0 %v8998_v9, %s6993_s23 }
 0x677   : > { %4574 = vmatpush.bf16.msra.mxu0 %v6250_v45  ;;  %4587 = vmatpush.bf16.msra.mxu1 %v6254_v59 }
 0x67a   : > { %6383 = vmatmul.msk.bf16.vlgmr.msra.gmra.mxu0 %vm1014_vm9, %v8956_v11  ;;  %6384 = vmatmul.msk.bf16.vlgmr.msra.gmra.mxu1 %vm1014_vm9, %v8956_v11 }
 0x67d   : > { %4649 = vrot.lane.b32.xlu0 %v4635_v28, %s6989_s14 }
 0x680   : > { %v4926_v12 = vpop.permute.xlu0 %4925 }
 0x681   : > { %v4937_v63 = vrot.slane %v4926_v12, 4 }
 0x6a8   : > { %v4866_v3 = vpop.permute.xlu2 %4865 }
 0x6b9   : > { %v4498_v34 = vpop.f32.mrf.mxu2  ;;  %v4511_v38 = vpop.f32.mrf.mxu3 }
 0x6ba   : > { %v4499_v19 = vadd.f32 %v4498_v34, %v9104_v55  ;;  %v4512_v11 = vadd.f32 %v4511_v38, %v9104_v55 }
 0x6bc   : > { %v4595_v27 = vmax.f32 %v4499_v19, 0.0  ;;  %v4596_v26 = vmax.f32 %v4512_v11, 0.0 }
 0x6be   : > { %v9109_v9 = vadd.f32 %v4595_v27, %v8759_v39  ;;  %v4615_v4 = vmul.f32 %v4595_v27, %v7495_v2  ;;  %v9113_v5 = vadd.f32 %v4596_v26, %v8763_v60  ;;  %v4616_v56 = vmul.f32 %v4596_v26, %v7501_v58 }
 0x6c0   : > { %v4624_v15 = vpack.c.bf16 %v4616_v56, %v4615_v4 }
 0x6c1   : > { %v4500_v16 = vpop.f32.mrf.mxu2  ;;  %v4513_v8 = vpop.f32.mrf.mxu3 }
 0x6c2   : > { %4629 = vst [vmem:[#allocation2 + $0x5c] sm:$0xff] %v4624_v15  ;;  %4817 = vrot.lane.b32.xlu2 %v4624_v15, %s6993_s23 }
 0x6c3   : > { %4799 = vst [vmem:[#allocation3 + $0xa8] sm:$0xff] %v4624_v15 }
 0x6c7   : > { %v9143_v18 = vpop.permute.xlu0 %4867 }
 0x6ca   : > { %4873 = vrot.lane.b32.xlu2 %v4857_v30, %s6989_s14  ;;  %v9168_v30 = vpop.permute.xlu2 %4931 }
 0x6cf   : > { %v4472_v44 = vpop.f32.mrf.mxu0  ;;  %v4485_v39 = vpop.f32.mrf.mxu1 }
 0x6d0   : > { %v4473_v48 = vadd.f32 %v4472_v44, %v9104_v55  ;;  %v4486_v2 = vadd.f32 %v4485_v39, %v9104_v55 }
 0x6d2   : > { %v4593_v60 = vmax.f32 %v4473_v48, 0.0  ;;  %v4594_v24 = vmax.f32 %v4486_v2, 0.0  ;;  %v4940_v2 = vrot.slane %v9168_v30, 4 }
 0x6d4   : > { %v9121_v58 = vadd.f32 %v4593_v60, %v8749_v49  ;;  %v4613_v47 = vmul.f32 %v4593_v60, %v7470_v1  ;;  %v9125_v35 = vadd.f32 %v4594_v24, %v8753_v0  ;;  %v4614_v23 = vmul.f32 %v4594_v24, %v7476_v42 }
 0x6d5   : > { %v4938_v49 = vrot.slane %v9129_v21, 4 }
 0x6d6   : > { %v4623_v17 = vpack.c.bf16 %v4614_v23, %v4613_v47 }
 0x6d7   : > { %v4474_v62 = vpop.f32.mrf.mxu0  ;;  %v4487_v10 = vpop.f32.mrf.mxu1  ;;  %v4943_v1 = vsel %vm348_vm0, %v4937_v63, %v4938_v49 }
 0x6d8   : > { %4628 = vst [vmem:[#allocation2 + $0x54] sm:$0xff] %v4623_v17  ;;  %4815 = vrot.lane.b32.xlu1 %v4623_v17, %s6993_s23  ;;  %v9134_v42 = vsel %vm1556_vm2, %v4926_v12, %v4943_v1 }
 0x6d9   : > { %4798 = vst [vmem:[#allocation3 + $0xa0] sm:$0xff] %v4623_v17  ;;  %v5142_v44 = vunpack.c.l.b16 %v9134_v42  ;;  %v5143_v39 = vunpack.c.h.b16 %v9134_v42  ;;  %v4698_v17 = vld [vmem:[#allocation2 + $0x2c] sm:$0xf] }
 0x6db   : > { %v5192_v23 = vpack.c.b16 %v5142_v44, %v5142_v44  ;;  %v5193_v63 = vpack.c.b16 %v5143_v39, %v5143_v39 }
 0x6dd   : > { %v5246_v1 = vsel %vm348_vm0, %v5192_v23, 0  ;;  %v5249_v42 = vsel %vm348_vm0, %v5193_v63, 0  ;;  %v6511_v63 = vld [vmem:[#allocation3 + $0x118] sm:$0xf0] }
 0x6de   : > { %5278 = vmatpush.bf16.msra.mxu2 %v5246_v1  ;;  %5291 = vmatpush.bf16.msra.mxu3 %v5249_v42 }
 0x6df   : > { %v4744_v0 = vld [vmem:[#allocation2 + $0x58] sm:$0xff]  ;;  %v4743_v40 = vld [vmem:[#allocation2 + $0x50] sm:$0xff] }
 0x6e0   : > { %4757 = vrot.lane.b32.xlu0 %v4744_v0, %s6989_s14  ;;  %4755 = vrot.lane.b32.xlu2 %v4743_v40, %s6989_s14 }
 0x6e1   : > { %4651 = vrot.lane.b32.xlu1 %v4636_v61, %s6989_s14 }
 0x6e3   : > { %v4524_v36 = vpop.f32.mrf.mxu0  ;;  %v4537_v57 = vpop.f32.mrf.mxu1 }
 0x6e4   : > { %v4525_v20 = vadd.f32 %v4524_v36, %v9104_v55  ;;  %v4538_v22 = vadd.f32 %v4537_v57, %v9104_v55  ;;  %v4550_v13 = vpop.f32.mrf.mxu2  ;;  %v4563_v29 = vpop.f32.mrf.mxu3 }
 0x6e5   : > { %v4551_v43 = vadd.f32 %v4550_v13, %v9104_v55  ;;  %v4564_v37 = vadd.f32 %v4563_v29, %v9104_v55 }
 0x6e6   : > { %v4597_v7 = vmax.f32 %v4525_v20, 0.0  ;;  %v4598_v46 = vmax.f32 %v4538_v22, 0.0 }
 0x6e7   : > { %v4599_v45 = vmax.f32 %v4551_v43, 0.0  ;;  %v4600_v59 = vmax.f32 %v4564_v37, 0.0 }
 0x6e8   : > { %v9148_v32 = vadd.f32 %v4597_v7, %v8771_v33  ;;  %v4617_v28 = vmul.f32 %v4597_v7, %v9559_v41  ;;  %v9152_v34 = vadd.f32 %v4598_v46, %v8775_v25  ;;  %v4618_v38 = vmul.f32 %v4598_v46, %v9561_v6  ;;  %4875 = vrot.lane.b32.xlu0 %v4858_v54, %s6989_s14 }
 0x6e9   : > { %v9156_v19 = vadd.f32 %v4599_v45, %v8784_v52  ;;  %v4619_v11 = vmul.f32 %v4599_v45, %v9563_v51  ;;  %v9160_v27 = vadd.f32 %v4600_v59, %v8788_v50  ;;  %v4620_v26 = vmul.f32 %v4600_v59, %v9565_v31  ;;  %v4706_v50 = vpop.permute.xlu0 %4705  ;;  %v4930_v31 = vpop.permute.xlu1 %4929 }
 0x6ea   : > { %v4625_v4 = vpack.c.bf16 %v4618_v38, %v4617_v28  ;;  %v4878_v25 = vrot.slane %v9143_v18, 4  ;;  %v4718_v52 = vrot.slane %v9145_v14, 4  ;;  %v4877_v51 = vrot.slane %v4866_v3, 4 }
 0x6eb   : > { %v4626_v33 = vpack.c.bf16 %v4620_v26, %v4619_v11  ;;  %v4526_v41 = vpop.f32.mrf.mxu0  ;;  %v4539_v56 = vpop.f32.mrf.mxu1  ;;  %v4717_v16 = vrot.slane %v4706_v50, 4  ;;  %v4939_v8 = vrot.slane %v4930_v31, 4  ;;  %v9576_v11 = vld [vmem:[#allocation17_spill] sm:$0xff] }
 0x6ec   : > { %4630 = vst [vmem:[#allocation2 + $0x64] sm:$0xff] %v4625_v4  ;;  %v4552_v6 = vpop.f32.mrf.mxu2  ;;  %v4565_v15 = vpop.f32.mrf.mxu3  ;;  %4819 = vrot.lane.b32.xlu1 %v4625_v4, %s6993_s23  ;;  %v4883_v48 = vsel %vm348_vm0, %v4877_v51, %v4878_v25  ;;  %v9578_v41 = vld [vmem:[#allocation19_spill] sm:$0xff] }
 0x6ed   : > { %4631 = vst [vmem:[#allocation2 + $0x6c] sm:$0xff] %v4626_v33  ;;  %4821 = vrot.lane.b32.xlu2 %v4626_v33, %s6993_s23  ;;  %v4884_v60 = vsel %vm1291_vm12, %v4866_v3, %v4883_v48  ;;  %v4723_v24 = vsel %vm348_vm0, %v4717_v16, %v4718_v52  ;;  %v4945_v47 = vsel %vm348_vm0, %v4938_v49, %v4939_v8  ;;  %v4870_v3 = vpop.permute.xlu2 %4869  ;;  %v9579_v6 = vld [vmem:[#allocation16_spill] sm:$0xff]  ;;  %v4808_v16 = vld [vmem:[#allocation2 + $0x7c] sm:$0xf] }
 0x6ee   : > { %4800 = vst [vmem:[#allocation3 + $0xb0] sm:$0xff] %v4625_v4  ;;  %v4724_v62 = vsel %vm1556_vm2, %v4706_v50, %v4723_v24  ;;  %v4946_v10 = vsel %vm1556_vm2, %v9129_v21, %v4945_v47  ;;  %v4947_v12 = vsel %vm348_vm0, %v4939_v8, %v4940_v2  ;;  %v4879_v38 = vrot.slane %v4870_v3, 4  ;;  %v9577_v4 = vld [vmem:[#allocation14_spill] sm:$0xff] }
 0x6ef   : > { %4801 = vst [vmem:[#allocation3 + $0xb8] sm:$0xff] %v4626_v33  ;;  %v9188_v61 = vsel %vm1556_vm2, %v4930_v31, %v4947_v12  ;;  %v5144_v49 = vunpack.c.l.b16 %v4946_v10  ;;  %v5145_v0 = vunpack.c.h.b16 %v4946_v10  ;;  %v4637_v47 = vld [vmem:[#allocation2 + $0x20] sm:$0xff] }
 0x6f0   : > { %4898 = vst [vmem:[#allocation3 + $0xf0] sm:$0xff] %v4884_v60  ;;  %v4885_v50 = vsel %vm348_vm0, %v4878_v25, %v4879_v38 }
 0x6f1   : > { %4738 = vst [vmem:[#allocation3 + $0x50] sm:$0xff] %v4724_v62  ;;  %v5194_v20 = vpack.c.b16 %v5144_v49, %v5144_v49  ;;  %v5195_v22 = vpack.c.b16 %v5145_v0, %v5145_v0  ;;  %v4646_v43 = vpop.permute.xlu0 %4645  ;;  %v9197_v37 = vpop.permute.xlu1 %4647  ;;  %v4886_v8 = vsel %vm1291_vm12, %v9143_v18, %v4885_v50  ;;  %v6795_v62 = vld [vmem:[#allocation3 + $0x114] sm:$0xf0] }
 0x6f2   : > { %v4657_v7 = vrot.slane %v4646_v43, 4  ;;  %v4658_v46 = vrot.slane %v9197_v37, 4  ;;  %4899 = vst [vmem:[#allocation3 + $0xf8] sm:$0xff] %v4886_v8 }
 0x6f3   : > { %v4745_v40 = vld [vmem:[#allocation2 + $0x60] sm:$0xff]  ;;  %v5252_v45 = vsel %vm348_vm0, %v5194_v20, 0  ;;  %v5255_v59 = vsel %vm348_vm0, %v5195_v22, 0 }
 0x6f4   : > { %v4746_v21 = vld [vmem:[#allocation2 + $0x68] sm:$0xff]  ;;  %4715 = vrot.lane.b32.xlu1 %v4698_v17, %s6993_s23  ;;  %5304 = vmatpush.bf16.msrb.mxu0 %v5252_v45 }
 0x6f5   : > { %4761 = vrot.lane.b32.xlu0 %v4746_v21, %s6989_s14  ;;  %4759 = vrot.lane.b32.xlu2 %v4745_v40, %s6989_s14 }
 0x6f6   : > { %5317 = vmatpush.bf16.msrb.mxu1 %v5255_v59 }
 0x6f7   : > { %v4576_v36 = vpop.f32.mrf.mxu0  ;;  %v4589_v57 = vpop.f32.mrf.mxu1  ;;  %v6509_v17 = vld [vmem:[#allocation3 + $0xf0] sm:$0xf]  ;;  %v6790_v12 = vld [vmem:[#allocation3 + $0xf4] sm:$0xf] }
 0x6f8   : > { %v4577_v13 = vadd.f32 %v4576_v36, %v9104_v55  ;;  %v4590_v29 = vadd.f32 %v4589_v57, %v9104_v55  ;;  %v4663_v55 = vsel %vm348_vm0, %v4657_v7, %v4658_v46  ;;  %v6510_v10 = vor.u32 %v6795_v62, %v6509_v17  ;;  %v6796_v36 = vld [vmem:[#allocation3 + $0x11c] sm:$0xf0] }
 0x6f9   : > { %v4664_v51 = vsel %vm1291_vm12, %v4646_v43, %v4663_v55  ;;  %v4872_v48 = vpop.permute.xlu0 %4871  ;;  %v9222_v60 = vpop.permute.xlu1 %4711  ;;  %v6517_v1 = vld [vmem:[#allocation3 + $0xf8] sm:$0xf]  ;;  %v6514_v42 = vor.u32 %v6790_v12, %v6511_v63  ;;  %v6791_v22 = vld [vmem:[#allocation3 + $0xfc] sm:$0xf]  ;;  %v6469_v12 = vld [vmem:[#allocation3 + $0xa0] sm:$0xf] }
 0x6fa   : > { %v4601_v54 = vmax.f32 %v4577_v13, 0.0  ;;  %v4602_v28 = vmax.f32 %v4590_v29, 0.0  ;;  %4678 = vst [vmem:[#allocation3] sm:$0xff] %v4664_v51  ;;  %v4880_v25 = vrot.slane %v4872_v48, 4  ;;  %v4720_v23 = vrot.slane %v9222_v60, 4  ;;  %5279 = vmatpush.bf16.msra.mxu2 %v6510_v10 }
 0x6fb   : > { %v6518_v20 = vor.u32 %v6796_v36, %v6517_v1  ;;  %v6519_v13 = vld [vmem:[#allocation3 + $0x120] sm:$0xf0]  ;;  %5292 = vmatpush.bf16.msra.mxu3 %v6514_v42 }
 0x6fc   : > { %v9206_v26 = vadd.f32 %v4601_v54, %v9576_v11  ;;  %v4621_v33 = vmul.f32 %v4601_v54, %v9577_v4  ;;  %v9210_v56 = vadd.f32 %v4602_v28, %v9578_v41  ;;  %v4622_v15 = vmul.f32 %v4602_v28, %v9579_v6 }
 0x6fd   : > { %4713 = vrot.lane.b32.xlu0 %v9049_v53, %s6993_s23  ;;  %4825 = vrot.lane.b32.xlu2 %v4808_v16, %s6993_s23  ;;  %v4887_v24 = vsel %vm348_vm0, %v4879_v38, %v4880_v25  ;;  %v4936_v53 = vpop.permute.xlu2 %4935  ;;  %v6522_v7 = vor.u32 %v6791_v22, %v6519_v13 }
 0x6fe   : > { %v4627_v31 = vpack.c.bf16 %v4622_v15, %v4621_v33  ;;  %v4888_v18 = vsel %vm1291_vm12, %v4870_v3, %v4887_v24  ;;  %v4942_v40 = vrot.slane %v4936_v53, 4  ;;  %5305 = vmatpush.bf16.msrb.mxu0 %v6518_v20 }
 0x6ff   : > { %v4578_v44 = vpop.f32.mrf.mxu0  ;;  %v4591_v39 = vpop.f32.mrf.mxu1  ;;  %4900 = vst [vmem:[#allocation3 + $0x100] sm:$0xff] %v4888_v18  ;;  %5318 = vmatpush.bf16.msrb.mxu1 %v6522_v7 }
 0x700   : > { %4632 = vst [vmem:[#allocation2 + $0x74] sm:$0xff] %v4627_v31  ;;  %4823 = vrot.lane.b32.xlu1 %v4627_v31, %s6993_s23  ;;  %s6930_s23 = scalar_lea.hbm %s9431_s5, 160 }
 0x701   : > { %4802 = vst [vmem:[#allocation3 + $0xc0] sm:$0xff] %v4627_v31  ;;  %v4710_v57 = vpop.permute.xlu0 %4709  ;;  %v4934_v21 = vpop.permute.xlu1 %4933  ;;  %p6932_p5 = scmp.lt.s32.totalorder %s6930_s23, %s6926_s7 }
 0x702   : > { %v4719_v29 = vrot.slane %v4710_v57, 4  ;;  %v4941_v43 = vrot.slane %v4934_v21, 4 }
 0x703   : > { %p6933_p7 = por %p6932_p5, %p6931_p4 }
 0x704   : > { %v4725_v3 = vsel %vm348_vm0, %v4718_v52, %v4719_v29  ;;  %v4727_v45 = vsel %vm348_vm0, %v4719_v29, %v4720_v23  ;;  %v4949_v59 = vsel %vm348_vm0, %v4940_v2, %v4941_v43  ;;  %v4951_v54 = vsel %vm348_vm0, %v4941_v43, %v4942_v40  ;;  %v6386_v52 = vld [vmem:[%s9430_s4 + $0x28] sm:$0xff]  ;;  %v6780_v40 = vld [vmem:[#allocation3 + $0xa4] sm:$0xf] }
 0x705   : > { %v4726_v28 = vsel %vm1556_vm2, %v9145_v14, %v4725_v3  ;;  %v4728_v38 = vsel %vm1556_vm2, %v4710_v57, %v4727_v45  ;;  %v9246_v55 = vsel %vm1556_vm2, %v9168_v30, %v4949_v59  ;;  %v9252_v11 = vsel %vm1556_vm2, %v4934_v21, %v4951_v54  ;;  %v4638_v2 = vld [vmem:[#allocation2 + $0x28] sm:$0xf]  ;;  %v6429_v54 = vld [vmem:[#allocation3 + $0x50] sm:$0xf]  ;;  %p6934_p8 = pnand %p6933_p7, %p6929_p3 }
 0x706   : > { %4739 = vst [vmem:[#allocation3 + $0x58] sm:$0xff] %v4726_v28  ;;  %v5146_v43 = vunpack.c.l.b16 %v9188_v61 }
 0x707   : > { %v4748_v49 = vld [vmem:[#allocation2 + $0x78] sm:$0xf]  ;;  %v4747_v0 = vld [vmem:[#allocation2 + $0x70] sm:$0xff]  ;;  %4740 = vst [vmem:[#allocation3 + $0x60] sm:$0xff] %v4728_v38 }
 0x708   : > { %4765 = vrot.lane.b32.xlu0 %v4748_v49, %s6989_s14  ;;  %4653 = vrot.lane.b32.xlu1 %v4637_v47, %s6989_s14 }
 0x709   : > { %4763 = vrot.lane.b32.xlu2 %v4747_v0, %s6989_s14  ;;  %v4650_v14 = vpop.permute.xlu0 %4649 }
 0x70a   : > { %v4659_v4 = vrot.slane %v4650_v14, 4 }
 0x70c   : > { %v4665_v30 = vsel %vm348_vm0, %v4658_v46, %v4659_v4 }
 0x70d   : > { %v4666_v33 = vsel %vm1291_vm12, %v9197_v37, %v4665_v30  ;;  %v6770_v30 = vld [vmem:[#allocation3 + $0x54] sm:$0xf] }
 0x70e   : > { %4679 = vst [vmem:[#allocation3 + $0x8] sm:$0xff] %v4666_v33 }
 0x710   : > { %5014 = vperm.xlu0 %6877, %v6386_v52   ;;  %v5147_v52 = vunpack.c.h.b16 %v9188_v61  ;;  %v6760_v61 = vld [vmem:[#allocation3 + $0x4] sm:$0xf] }
 0x711   : > { %4655 = vrot.lane.b32.xlu2 %v4638_v2, %s6989_s14 }
 0x71c   : > { %v4818_v41 = vpop.permute.xlu2 %4817 }
 0x71d   : > { %v4828_v44 = vrot.slane %v4818_v41, 4 }
 0x724   : > { %v4874_v6 = vpop.permute.xlu2 %4873 }
 0x725   : > { %v4881_v15 = vrot.slane %v4874_v6, 4 }
 0x727   : > { %v4889_v51 = vsel %vm348_vm0, %v4880_v25, %v4881_v15 }
 0x728   : > { %v4890_v50 = vsel %vm1291_vm12, %v4872_v48, %v4889_v51 }
 0x729   : > { %4901 = vst [vmem:[#allocation3 + $0x108] sm:$0xff] %v4890_v50  ;;  %v6765_v50 = vld [vmem:[#allocation3 + $0x24] sm:$0xf0] }
 0x73a   : > { %v4756_v31 = vpop.permute.xlu2 %4755 }
 0x73b   : > { %v4767_v18 = vrot.slane %v4756_v31, 4 }
 0x747   : > { %v9262_v16 = vpop.permute.xlu2 %4821 }
 0x748   : > { %v4830_v7 = vrot.slane %v9262_v16, 4 }
 0x74a   : > { %v4816_v8 = vpop.permute.xlu1 %4815 }
 0x74b   : > { %v4827_v39 = vrot.slane %v4816_v8, 4 }
 0x74d   : > { %v4833_v46 = vsel %vm348_vm0, %v4827_v39, %v4828_v44 }
 0x74e   : > { %v4834_v24 = vsel %vm1556_vm2, %v4816_v8, %v4833_v46  ;;  %v6391_v8 = vld [vmem:[#allocation3 + $0x28] sm:$0xf0] }
 0x74f   : > { %4848 = vst [vmem:[#allocation3 + $0xc8] sm:$0xff] %v4834_v24  ;;  %v9266_v37 = vpop.permute.xlu2 %4759  ;;  %v6394_v24 = vor.u32 %v6760_v61, %v6391_v8  ;;  %v6771_v8 = vld [vmem:[#allocation3 + $0x5c] sm:$0xf] }
 0x750   : > { %v4769_v25 = vrot.slane %v9266_v37, 4 }
 0x752   : > { %v4758_v47 = vpop.permute.xlu0 %4757 }
 0x753   : > { %v4768_v17 = vrot.slane %v4758_v47, 4  ;;  %v9269_v48 = vpop.permute.xlu1 %4651 }
 0x754   : > { %v4660_v62 = vrot.slane %v9269_v48, 4 }
 0x755   : > { %v4773_v53 = vsel %vm348_vm0, %v4767_v18, %v4768_v17  ;;  %v4775_v10 = vsel %vm348_vm0, %v4768_v17, %v4769_v25  ;;  %v6525_v18 = vld [vmem:[#allocation3 + $0x100] sm:$0xf]  ;;  %v6797_v17 = vld [vmem:[#allocation3 + $0x124] sm:$0xf0] }
 0x756   : > { %v4774_v63 = vsel %vm1291_vm12, %v4756_v31, %v4773_v53  ;;  %v4776_v1 = vsel %vm1291_vm12, %v4758_v47, %v4775_v10  ;;  %v4667_v49 = vsel %vm348_vm0, %v4659_v4, %v4660_v62  ;;  %v6785_v0 = vld [vmem:[#allocation3 + $0xc4] sm:$0xf0]  ;;  %v6471_v42 = vld [vmem:[#allocation3 + $0xc8] sm:$0xf0]  ;;  %v5196_v31 = vpack.c.b16 %v5146_v43, %v5146_v43  ;;  %v9303_v10 = vld [vmem:[%s9429_s3 + $0x10] sm:$0xf] }
 0x757   : > { %4788 = vst [vmem:[#allocation3 + $0x78] sm:$0xff] %v4774_v63  ;;  %v4668_v36 = vsel %vm1291_vm12, %v4650_v14, %v4667_v49  ;;  %v6470_v57 = vor.u32 %v6785_v0, %v6469_v12  ;;  %v6474_v21 = vor.u32 %v6780_v40, %v6471_v42  ;;  %v9282_v20 = vpop.permute.xlu2 %4825  ;;  %v6792_v12 = vld [vmem:[#allocation3 + $0x104] sm:$0xf]  ;;  %v6527_v63 = vld [vmem:[#allocation3 + $0x128] sm:$0xf0]  ;;  %v5148_v42 = vunpack.c.l.b16 %v9246_v55 }
 0x758   : > { %4789 = vst [vmem:[#allocation3 + $0x80] sm:$0xff] %v4776_v1  ;;  %v5258_v47 = vsel %vm348_vm0, %v5196_v31, 0  ;;  %v6477_v40 = vld [vmem:[#allocation3 + $0xa8] sm:$0xf] }
 0x759   : > { %4680 = vst [vmem:[#allocation3 + $0x10] sm:$0xff] %v4668_v36  ;;  %5280 = vmatpush.bf16.msra.mxu2 %v6470_v57  ;;  %5293 = vmatpush.bf16.msra.mxu3 %v6474_v21  ;;  %v6526_v21 = vor.u32 %v6797_v17, %v6525_v18 }
 0x75a   : > { %v4876_v22 = vpop.permute.xlu0 %4875 }
 0x75b   : > { %v4882_v13 = vrot.slane %v4876_v22, 4  ;;  %v6530_v22 = vor.u32 %v6792_v12, %v6527_v63 }
 0x75d   : > { %v4891_v3 = vsel %vm348_vm0, %v4881_v15, %v4882_v13 }
 0x75e   : > { %v4820_v29 = vpop.permute.xlu1 %4819  ;;  %v4892_v59 = vsel %vm1291_vm12, %v4874_v6, %v4891_v3  ;;  %v6775_v28 = vld [vmem:[#allocation3 + $0x74] sm:$0xf0]  ;;  %v6431_v38 = vld [vmem:[#allocation3 + $0x78] sm:$0xf0]  ;;  %v6389_v6 = vld [vmem:[#allocation3] sm:$0xf] }
 0x75f   : > { %v4829_v45 = vrot.slane %v4820_v29, 4  ;;  %4902 = vst [vmem:[#allocation3 + $0x110] sm:$0xff] %v4892_v59  ;;  %v6430_v4 = vor.u32 %v6775_v28, %v6429_v54  ;;  %v6434_v51 = vor.u32 %v6770_v30, %v6431_v38  ;;  %v6390_v46 = vor.u32 %v6765_v50, %v6389_v6  ;;  %v6776_v38 = vld [vmem:[#allocation3 + $0x7c] sm:$0xf0] }
 0x761   : > { %v4835_v2 = vsel %vm348_vm0, %v4828_v44, %v4829_v45  ;;  %v4837_v14 = vsel %vm348_vm0, %v4829_v45, %v4830_v7  ;;  %5281 = vmatpush.bf16.msra.mxu2 %v6430_v4  ;;  %5294 = vmatpush.bf16.msra.mxu3 %v6434_v51  ;;  %v5197_v44 = vpack.c.b16 %v5147_v52, %v5147_v52  ;;  %v6485_v52 = vld [vmem:[#allocation3 + $0xb0] sm:$0xf]  ;;  %v5151_v4 = vunpack.c.h.b16 %v9252_v11 }
 0x762   : > { %v4836_v33 = vsel %vm1556_vm2, %v4818_v41, %v4835_v2  ;;  %v4838_v15 = vsel %vm1556_vm2, %v4820_v29, %v4837_v14  ;;  %v6781_v29 = vld [vmem:[#allocation3 + $0xac] sm:$0xf]  ;;  %v6439_v2 = vld [vmem:[#allocation3 + $0x80] sm:$0xf0]  ;;  %v5149_v14 = vunpack.c.h.b16 %v9246_v55  ;;  %v4832_v51 = vrot.slane %v9282_v20, 4 }
 0x763   : > { %4849 = vst [vmem:[#allocation3 + $0xd0] sm:$0xff] %v4836_v33  ;;  %v9295_v39 = vpop.permute.xlu2 %4763  ;;  %v5261_v0 = vsel %vm348_vm0, %v5197_v44, 0  ;;  %v6782_v33 = vld [vmem:[#allocation3 + $0xb4] sm:$0xf]  ;;  %v6397_v44 = vld [vmem:[#allocation3 + $0x8] sm:$0xf]  ;;  %v6442_v18 = vor.u32 %v6771_v8, %v6439_v2  ;;  %v5201_v12 = vpack.c.b16 %v5151_v4, %v5151_v4 }
 0x764   : > { %4850 = vst [vmem:[#allocation3 + $0xd8] sm:$0xff] %v4838_v15  ;;  %v4771_v49 = vrot.slane %v9295_v39, 4  ;;  %v6437_v15 = vld [vmem:[#allocation3 + $0x58] sm:$0xf]  ;;  %v5199_v17 = vpack.c.b16 %v5149_v14, %v5149_v14  ;;  %v6798_v2 = vld [vmem:[#allocation3 + $0x12c] sm:$0xf0] }
 0x765   : > { %5282 = vmatpush.bf16.msra.mxu2 %v6390_v46  ;;  %5295 = vmatpush.bf16.msra.mxu3 %v6394_v24  ;;  %v6438_v61 = vor.u32 %v6776_v38, %v6437_v15  ;;  %v5198_v46 = vpack.c.b16 %v5148_v42, %v5148_v42  ;;  %v6399_v42 = vld [vmem:[#allocation3 + $0x30] sm:$0xf0] }
 0x766   : > { %v9298_v41 = vpop.permute.xlu1 %4715  ;;  %v6535_v8 = vld [vmem:[#allocation3 + $0x130] sm:$0xf0] }
 0x767   : > { %v4762_v53 = vpop.permute.xlu0 %4761  ;;  %v4722_v24 = vrot.slane %v9298_v41, 4  ;;  %v5264_v38 = vsel %vm348_vm0, %v5198_v46, 0 }
 0x768   : > { %v4770_v1 = vrot.slane %v4762_v53, 4  ;;  %6547 = vmatmul.msk.bf16.vlgmr.msra.gmra.mxu2 %vm1014_vm9, %v9303_v10  ;;  %6548 = vmatmul.msk.bf16.vlgmr.msra.gmra.mxu3 %vm1014_vm9, %v9303_v10 }
 0x769   : > { %5330 = vmatpush.bf16.msrb.mxu2 %v5258_v47  ;;  %5343 = vmatpush.bf16.msrb.mxu3 %v5261_v0  ;;  %v6445_v0 = vld [vmem:[#allocation3 + $0x60] sm:$0xf] }
 0x76a   : > { %v4777_v36 = vsel %vm348_vm0, %v4769_v25, %v4770_v1  ;;  %v4779_v57 = vsel %vm348_vm0, %v4770_v1, %v4771_v49  ;;  %v6786_v13 = vld [vmem:[#allocation3 + $0xcc] sm:$0xf0]  ;;  %v6479_v43 = vld [vmem:[#allocation3 + $0xd0] sm:$0xf0] }
 0x76b   : > { %v4778_v3 = vsel %vm1291_vm12, %v9266_v37, %v4777_v36  ;;  %v4780_v45 = vsel %vm1291_vm12, %v4762_v53, %v4779_v57  ;;  %v6478_v25 = vor.u32 %v6786_v13, %v6477_v40  ;;  %v6482_v59 = vor.u32 %v6781_v29, %v6479_v43  ;;  %v6787_v54 = vld [vmem:[#allocation3 + $0xd4] sm:$0xf0]  ;;  %v6487_v28 = vld [vmem:[#allocation3 + $0xd8] sm:$0xf0]  ;;  %v6761_v40 = vld [vmem:[#allocation3 + $0xc] sm:$0xf]  ;;  %v4656_v43 = vpop.permute.xlu2 %4655 }
 0x76c   : > { %4790 = vst [vmem:[#allocation3 + $0x88] sm:$0xff] %v4778_v3  ;;  %v5150_v37 = vunpack.c.l.b16 %v9252_v11  ;;  %v6486_v30 = vor.u32 %v6787_v54, %v6485_v52  ;;  %v6490_v50 = vor.u32 %v6782_v33, %v6487_v28  ;;  %v6766_v11 = vld [vmem:[#allocation3 + $0x2c] sm:$0xf0]  ;;  %v6762_v28 = vld [vmem:[#allocation3 + $0x14] sm:$0xf] }
 0x76d   : > { %5331 = vmatpush.bf16.msrb.mxu2 %v6526_v21  ;;  %4791 = vst [vmem:[#allocation3 + $0x90] sm:$0xff] %v4780_v45  ;;  %5344 = vmatpush.bf16.msrb.mxu3 %v6530_v22  ;;  %v6772_v22 = vld [vmem:[#allocation3 + $0x64] sm:$0xf]  ;;  %v6398_v29 = vor.u32 %v6766_v11, %v6397_v44  ;;  %v6405_v54 = vld [vmem:[#allocation3 + $0x10] sm:$0xf] }
 0x76e   : > { %5306 = vmatpush.bf16.msrb.mxu0 %v6478_v25  ;;  %5319 = vmatpush.bf16.msrb.mxu1 %v6482_v59  ;;  %v5200_v53 = vpack.c.b16 %v5150_v37, %v5150_v37  ;;  %v6767_v25 = vld [vmem:[#allocation3 + $0x34] sm:$0xf0]  ;;  %v6407_v59 = vld [vmem:[#allocation3 + $0x38] sm:$0xf0]  ;;  %v6533_v52 = vld [vmem:[#allocation3 + $0x108] sm:$0xf] }
 0x76f   : > { %v4714_v6 = vpop.permute.xlu0 %4713  ;;  %v5267_v37 = vsel %vm348_vm0, %v5199_v17, 0  ;;  %v6799_v44 = vld [vmem:[#allocation3 + $0x134] sm:$0xf0]  ;;  %v6543_v11 = vld [vmem:[#allocation3 + $0x138] sm:$0xf0] }
 0x770   : > { %v4721_v55 = vrot.slane %v4714_v6, 4  ;;  %v5270_v4 = vsel %vm348_vm0, %v5200_v53, 0 }
 0x771   : > { %5332 = vmatpush.bf16.msrb.mxu2 %v6486_v30  ;;  %5345 = vmatpush.bf16.msrb.mxu3 %v6490_v50  ;;  %v5273_v30 = vsel %vm348_vm0, %v5201_v12, 0  ;;  %v6493_v12 = vld [vmem:[#allocation3 + $0xb8] sm:$0xf] }
 0x772   : > { %v4824_v31 = vpop.permute.xlu1 %4823  ;;  %5307 = vmatpush.bf16.msrb.mxu0 %v6438_v61  ;;  %v4729_v20 = vsel %vm348_vm0, %v4720_v23, %v4721_v55  ;;  %v4731_v63 = vsel %vm348_vm0, %v4721_v55, %v4722_v24  ;;  %5320 = vmatpush.bf16.msrb.mxu1 %v6442_v18  ;;  %v6793_v61 = vld [vmem:[#allocation3 + $0x10c] sm:$0xf]  ;;  %v6794_v18 = vld [vmem:[#allocation3 + $0x114] sm:$0xf] }
 0x773   : > { %v4831_v47 = vrot.slane %v4824_v31, 4  ;;  %v4730_v36 = vsel %vm1556_vm2, %v9222_v60, %v4729_v20  ;;  %v4732_v57 = vsel %vm1556_vm2, %v4714_v6, %v4731_v63  ;;  %v6777_v21 = vld [vmem:[#allocation3 + $0x84] sm:$0xf0]  ;;  %v6447_v13 = vld [vmem:[#allocation3 + $0x88] sm:$0xf0]  ;;  %v6402_v60 = vor.u32 %v6761_v40, %v6399_v42 }
 0x774   : > { %4741 = vst [vmem:[#allocation3 + $0x68] sm:$0xff] %v4730_v36  ;;  %v6446_v3 = vor.u32 %v6777_v21, %v6445_v0  ;;  %v6450_v45 = vor.u32 %v6772_v22, %v6447_v13  ;;  %v6410_v6 = vor.u32 %v6762_v28, %v6407_v59  ;;  %v6783_v20 = vld [vmem:[#allocation3 + $0xbc] sm:$0xf]  ;;  %v6546_v63 = vor.u32 %v6794_v18, %v6543_v11  ;;  %v6778_v13 = vld [vmem:[#allocation3 + $0x8c] sm:$0xf0] }
 0x775   : > { %v4839_v41 = vsel %vm348_vm0, %v4830_v7, %v4831_v47  ;;  %v4841_v1 = vsel %vm348_vm0, %v4831_v47, %v4832_v51  ;;  %4742 = vst [vmem:[#allocation3 + $0x70] sm:$0xff] %v4732_v57  ;;  %v6406_v51 = vor.u32 %v6767_v25, %v6405_v54  ;;  %v6541_v47 = vld [vmem:[#allocation3 + $0x110] sm:$0xf]  ;;  %v6501_v57 = vld [vmem:[#allocation3 + $0xc0] sm:$0xf] }
 0x776   : > { %v4840_v23 = vsel %vm1556_vm2, %v9262_v16, %v4839_v41  ;;  %v4842_v7 = vsel %vm1556_vm2, %v4824_v31, %v4841_v1  ;;  %5308 = vmatpush.bf16.msrb.mxu0 %v6398_v29  ;;  %5333 = vmatpush.bf16.msrb.mxu2 %v6446_v3  ;;  %v4662_v16 = vrot.slane %v4656_v43, 4  ;;  %v6534_v31 = vor.u32 %v6798_v2, %v6533_v52  ;;  %v6768_v43 = vld [vmem:[#allocation3 + $0x3c] sm:$0xf0]  ;;  %v6455_v3 = vld [vmem:[#allocation3 + $0x90] sm:$0xf0] }
 0x777   : > { %4851 = vst [vmem:[#allocation3 + $0xe0] sm:$0xff] %v4840_v23  ;;  %5346 = vmatpush.bf16.msrb.mxu3 %v6450_v45  ;;  %5321 = vmatpush.bf16.msrb.mxu1 %v6402_v60  ;;  %v6784_v23 = vld [vmem:[#allocation3 + $0xc4] sm:$0xf] }
 0x778   : > { %4852 = vst [vmem:[#allocation3 + $0xe8] sm:$0xff] %v4842_v7  ;;  %v6415_v25 = vld [vmem:[#allocation3 + $0x40] sm:$0xf0] }
 0x779   : > { %6549 = vmatmul.msk.bf16.vlgmr.msrb.gmra.mxu0 %vm1014_vm9, %v9303_v10 }
 0x77a   : > { %v4766_v14 = vpop.permute.xlu0 %4765  ;;  %5356 = vmatpush.bf16.msra.mxu0 %v5264_v38  ;;  %v4654_v33 = vpop.permute.xlu1 %4653  ;;  %5334 = vmatpush.bf16.msrb.mxu2 %v6406_v51 }
 0x77b   : > { %v4772_v15 = vrot.slane %v4766_v14, 4  ;;  %5369 = vmatpush.bf16.msra.mxu1 %v5267_v37  ;;  %v4661_v50 = vrot.slane %v4654_v33, 4  ;;  %5347 = vmatpush.bf16.msrb.mxu3 %v6410_v6  ;;  %v6453_v36 = vld [vmem:[#allocation3 + $0x68] sm:$0xf]  ;;  %v6773_v29 = vld [vmem:[#allocation3 + $0x6c] sm:$0xf] }
 0x77c   : > { %6550 = vmatmul.msk.bf16.vlgmr.msrb.gmra.mxu1 %vm1014_vm9, %v9303_v10  ;;  %v6454_v7 = vor.u32 %v6778_v13, %v6453_v36  ;;  %v6461_v45 = vld [vmem:[#allocation3 + $0x70] sm:$0xf]  ;;  %v6774_v60 = vld [vmem:[#allocation3 + $0x74] sm:$0xf]  ;;  %v6458_v28 = vor.u32 %v6773_v29, %v6455_v3  ;;  %v6769_v37 = vld [vmem:[#allocation3 + $0x44] sm:$0xf0] }
 0x77d   : > { %v4781_v46 = vsel %vm348_vm0, %v4771_v49, %v4772_v15  ;;  %v4669_v24 = vsel %vm348_vm0, %v4660_v62, %v4661_v50  ;;  %v4671_v55 = vsel %vm348_vm0, %v4661_v50, %v4662_v16  ;;  %v6538_v62 = vor.u32 %v6793_v61, %v6535_v8  ;;  %6551 = vmatmul.msk.bf16.vlgmr.msrb.gmra.mxu2 %vm1014_vm9, %v9303_v10  ;;  %v6423_v15 = vld [vmem:[#allocation3 + $0x48] sm:$0xf0] }
 0x77e   : > { %v4782_v17 = vsel %vm1291_vm12, %v9295_v39, %v4781_v46  ;;  %5382 = vmatpush.bf16.msra.mxu2 %v5270_v4  ;;  %v4670_v53 = vsel %vm1291_vm12, %v9269_v48, %v4669_v24  ;;  %v4672_v49 = vsel %vm1291_vm12, %v4654_v33, %v4671_v55  ;;  %5357 = vmatpush.bf16.msra.mxu0 %v6534_v31  ;;  %v6788_v48 = vld [vmem:[#allocation3 + $0xdc] sm:$0xf0]  ;;  %v6495_v41 = vld [vmem:[#allocation3 + $0xe0] sm:$0xf0] }
 0x77f   : > { %5395 = vmatpush.bf16.msra.mxu3 %v5273_v30  ;;  %4792 = vst [vmem:[#allocation3 + $0x98] sm:$0xff] %v4782_v17  ;;  %v6542_v39 = vor.u32 %v6799_v44, %v6541_v47  ;;  %5370 = vmatpush.bf16.msra.mxu1 %v6538_v62  ;;  %v6494_v1 = vor.u32 %v6788_v48, %v6493_v12  ;;  %v6789_v40 = vld [vmem:[#allocation3 + $0xe4] sm:$0xf0]  ;;  %v6503_v42 = vld [vmem:[#allocation3 + $0xe8] sm:$0xf0] }
 0x780   : > { %4681 = vst [vmem:[#allocation3 + $0x18] sm:$0xff] %v4670_v53  ;;  %6552 = vmatmul.msk.bf16.vlgmr.msrb.gmra.mxu3 %vm1014_vm9, %v9303_v10  ;;  %v6498_v0 = vor.u32 %v6783_v20, %v6495_v41  ;;  %v6502_v21 = vor.u32 %v6789_v40, %v6501_v57  ;;  %v6506_v22 = vor.u32 %v6784_v23, %v6503_v42 }
 0x781   : > { %4682 = vst [vmem:[#allocation3 + $0x20] sm:$0xff] %v4672_v49 }
 0x782   : > { %5383 = vmatpush.bf16.msra.mxu2 %v6542_v39  ;;  %5358 = vmatpush.bf16.msra.mxu0 %v6494_v1  ;;  %v5015_v50 = vpop.permute.xlu0 %5014 }
 0x783   : > { %5396 = vmatpush.bf16.msra.mxu3 %v6546_v63  ;;  %5371 = vmatpush.bf16.msra.mxu1 %v6498_v0 }
 0x786   : > { %5384 = vmatpush.bf16.msra.mxu2 %v6502_v21  ;;  %v6779_v59 = vld [vmem:[#allocation3 + $0x94] sm:$0xf0]  ;;  %v6463_v54 = vld [vmem:[#allocation3 + $0x98] sm:$0xf0]  ;;  %5359 = vmatpush.bf16.msra.mxu0 %v6454_v7 }
 0x787   : > { %5397 = vmatpush.bf16.msra.mxu3 %v6506_v22  ;;  %v6462_v38 = vor.u32 %v6779_v59, %v6461_v45  ;;  %v6466_v16 = vor.u32 %v6774_v60, %v6463_v54  ;;  %v6413_v52 = vld [vmem:[#allocation3 + $0x18] sm:$0xf]  ;;  %v6763_v2 = vld [vmem:[#allocation3 + $0x1c] sm:$0xf]  ;;  %5372 = vmatpush.bf16.msra.mxu1 %v6458_v28 }
 0x788   : > { %v6414_v14 = vor.u32 %v6768_v43, %v6413_v52  ;;  %v6418_v4 = vor.u32 %v6763_v2, %v6415_v25  ;;  %v6421_v30 = vld [vmem:[#allocation3 + $0x20] sm:$0xf]  ;;  %v6764_v33 = vld [vmem:[#allocation3 + $0x24] sm:$0xf] }
 0x789   : > { %v6422_v51 = vor.u32 %v6769_v37, %v6421_v30  ;;  %v6426_v6 = vor.u32 %v6764_v33, %v6423_v15 }
 0x78a   : > { %5385 = vmatpush.bf16.msra.mxu2 %v6462_v38  ;;  %5360 = vmatpush.bf16.msra.mxu0 %v6414_v14 }
 0x78b   : > { %5398 = vmatpush.bf16.msra.mxu3 %v6466_v16  ;;  %5373 = vmatpush.bf16.msra.mxu1 %v6418_v4 }
 0x78d   : > { %6553 = vmatmul.msk.bf16.vlgmr.msra.gmra.mxu0 %vm1014_vm9, %v9303_v10 }
 0x78e   : > { %5386 = vmatpush.bf16.msra.mxu2 %v6422_v51  ;;  %6554 = vmatmul.msk.bf16.vlgmr.msra.gmra.mxu1 %vm1014_vm9, %v9303_v10 }
 0x78f   : > { %5399 = vmatpush.bf16.msra.mxu3 %v6426_v6 }
 0x791   : > { %6555 = vmatmul.msk.bf16.vlgmr.msra.gmra.mxu2 %vm1014_vm9, %v9303_v10 }
 0x792   : > { %6556 = vmatmul.msk.bf16.vlgmr.msra.gmra.mxu3 %vm1014_vm9, %v9303_v10 }
 0x7eb   : > { %v5284_v31 = vpop.f32.mrf.mxu2  ;;  %v5297_v8 = vpop.f32.mrf.mxu3 }
 0x7ec   : > { %v5285_v61 = vadd.f32 %v5284_v31, %v5015_v50  ;;  %v5298_v44 = vadd.f32 %v5297_v8, %v5015_v50 }
 0x7ee   : > { %v5405_v46 = vmax.f32 %v5285_v61, 0.0  ;;  %v5406_v24 = vmax.f32 %v5298_v44, 0.0 }
 0x7f0   : > { %v5415_v55 = vadd.f32 %v5405_v46, %v9121_v58  ;;  %v5416_v47 = vadd.f32 %v5406_v24, %v9125_v35 }
 0x7f2   : > { %5425 = vst [vmem:[%s7121_s12] sm:$0xff] %v5415_v55 }
 0x7f3   : > { %5426 = vst [vmem:[%s7121_s12 + $0x8] sm:$0xff] %v5416_v47  ;;  %v5286_v18 = vpop.f32.mrf.mxu2  ;;  %v5299_v17 = vpop.f32.mrf.mxu3 }
 0x7f6   : > { %v5310_v11 = vpop.f32.mrf.mxu0 }
 0x7f7   : > { %v5311_v53 = vadd.f32 %v5310_v11, %v5015_v50 }
 0x7f9   : > { %v5407_v10 = vmax.f32 %v5311_v53, 0.0  ;;  %v5323_v49 = vpop.f32.mrf.mxu1 }
 0x7fa   : > { %v5324_v12 = vadd.f32 %v5323_v49, %v5015_v50 }
 0x7fb   : > { %v5417_v62 = vadd.f32 %v5407_v10, %v9109_v9 }
 0x7fc   : > { %v5408_v20 = vmax.f32 %v5324_v12, 0.0 }
 0x7fd   : > { %5427 = vst [vmem:[%s7121_s12 + $0x10] sm:$0xff] %v5417_v62 }
 0x7fe   : > { %v5312_v39 = vpop.f32.mrf.mxu0  ;;  %v5418_v58 = vadd.f32 %v5408_v20, %v9113_v5 }
 0x800   : > { %5428 = vst [vmem:[%s7121_s12 + $0x18] sm:$0xff] %v5418_v58  ;;  %v5336_v35 = vpop.f32.mrf.mxu2 }
 0x801   : > { %v5337_v48 = vadd.f32 %v5336_v35, %v5015_v50  ;;  %v5325_v1 = vpop.f32.mrf.mxu1 }
 0x803   : > { %v5349_v63 = vpop.f32.mrf.mxu3  ;;  %v5409_v0 = vmax.f32 %v5337_v48, 0.0 }
 0x804   : > { %v5350_v41 = vadd.f32 %v5349_v63, %v5015_v50 }
 0x805   : > { %v5419_v9 = vadd.f32 %v5409_v0, %v9148_v32 }
 0x806   : > { %v5410_v40 = vmax.f32 %v5350_v41, 0.0 }
 0x807   : > { %5429 = vst [vmem:[%s7121_s12 + $0x20] sm:$0xff] %v5419_v9 }
 0x808   : > { %v5420_v42 = vadd.f32 %v5410_v40, %v9152_v34  ;;  %v5338_v36 = vpop.f32.mrf.mxu2 }
 0x80a   : > { %5430 = vst [vmem:[%s7121_s12 + $0x28] sm:$0xff] %v5420_v42  ;;  %v5362_v5 = vpop.f32.mrf.mxu0 }
 0x80b   : > { %v5351_v57 = vpop.f32.mrf.mxu3  ;;  %v5363_v23 = vadd.f32 %v5362_v5, %v5015_v50  ;;  %v5375_v21 = vpop.f32.mrf.mxu1 }
 0x80c   : > { %v5376_v22 = vadd.f32 %v5375_v21, %v5015_v50 }
 0x80d   : > { %v5411_v13 = vmax.f32 %v5363_v23, 0.0 }
 0x80e   : > { %v5412_v29 = vmax.f32 %v5376_v22, 0.0 }
 0x80f   : > { %v5421_v43 = vadd.f32 %v5411_v13, %v9156_v19 }
 0x810   : > { %v5422_v7 = vadd.f32 %v5412_v29, %v9160_v27 }
 0x811   : > { %5431 = vst [vmem:[%s7121_s12 + $0x30] sm:$0xff] %v5421_v43 }
 0x812   : > { %5432 = vst [vmem:[%s7121_s12 + $0x38] sm:$0xff] %v5422_v7  ;;  %v5364_v25 = vpop.f32.mrf.mxu0 }
 0x813   : > { %v5377_v59 = vpop.f32.mrf.mxu1 }
 0x814   : > { %v5388_v32 = vpop.f32.mrf.mxu2 }
 0x815   : > { %v5401_v34 = vpop.f32.mrf.mxu3  ;;  %v5389_v3 = vadd.f32 %v5388_v32, %v5015_v50 }
 0x816   : > { %v5402_v45 = vadd.f32 %v5401_v34, %v5015_v50 }
 0x817   : > { %v5413_v60 = vmax.f32 %v5389_v3, 0.0 }
 0x818   : > { %v5414_v54 = vmax.f32 %v5402_v45, 0.0 }
 0x819   : > { %v5423_v19 = vadd.f32 %v5413_v60, %v9206_v26 }
 0x81a   : > { %v5424_v27 = vadd.f32 %v5414_v54, %v9210_v56 }
 0x81b   : > { %5433 = vst [vmem:[%s7121_s12 + $0x40] sm:$0xff] %v5423_v19 }
 0x81c   : > { %5434 = vst [vmem:[%s7121_s12 + $0x48] sm:$0xff] %v5424_v27  ;;  %v5390_v28 = vpop.f32.mrf.mxu2 }
 0x81d   : > { %v5403_v38 = vpop.f32.mrf.mxu3 }
 0x81e   : > { %6937 = shalt.err (!%p6934_p8)
}
 0x81f   : > { %6806 = dma.vmem_to_hbm [thread:$0]  (%p7081_p11), %s5450_s22, 1280, %s5452_s17, %s5436_s25  }
 0x820 PF: > { %s5463_s6 = sand.u32 1, %s6964_s18   ;;  %p6813_p10 = pnand %p5524_p9, %p7085_p12 }
 0x821   : > { %s5464_s12 = scalar_lea.sflag [#allocation6], %s5463_s6 }
 0x822   : > { %p6814_p0 = pneg %p6813_p10 }
 0x824   : > { %6959 = dma.done.wait (%p6814_p0), %s5464_s12, 1280  }
 0x825   : > { %6961 = vsyncadd (%p6814_p0), %s5464_s12, 4294966016  ;;  %p18_p1 = scmp.ge.s32.totalorder %s7060_s24, 4   ;;  %s9580_s18 = smov %s6968_s19 }
 0x826   : > { %s9581_s19 = smov %s6972_s20  ;;  %s9582_s20 = smov %s7072_s27 }
 0x827   : > { %s9583_s21 = smov %s7060_s24  ;;  %20 = sbr.rel (!%p18_p1) target bundleno = 5 (0x5), region = 98 }
 0x82c   :  { %5470 = vsyncpa [#allocation5], 1 }
 0x82d   :  { %5472 = vsyncpa [#allocation5 + $0x1], 1 }
 0x82e   :  { %5473 = vsyncpa [#allocation6], 1 }
 0x82f   :  { %5475 = vsyncpa [#allocation6 + $0x1], 1 }

</bundles_post_ra>
